<compile_context>
chip_gen: v6e
topology: v6e:2x2x1
jax: 0.10.0
libtpu: 0.0.40
codegen_flags: <defaults>
</compile_context>

<pallas_src>
import functools

import numpy as np

import jax
import jax.numpy as jnp
from jax.experimental import pallas as pl
from jax.experimental.pallas import tpu as pltpu


# ----------------------------- configuration --------------------------------
NUM_XYZ_FREQ = 10
NUM_DIR_FREQ = 4
D_XYZ = 3 + 6 * NUM_XYZ_FREQ      # 63
D_VIEWDIR = 3 + 6 * NUM_DIR_FREQ  # 27
ENC_XYZ = 128                     # enc_xyz_size (small demo config)
W_DIM = 128                       # W
NUM_EXPERTS = 4
RGB_HID = 64
HEAD1 = RGB_HID + 1               # fused [rgb-hidden | sigma] head width

XD_W = 8                          # packed input: [xyz(3) | viewdir(3) | pad(2)]
NX = 3 * NUM_XYZ_FREQ             # 30 xyz phases
ND = 3 * NUM_DIR_FREQ             # 12 viewdir phases
TRIG_W = 2 * NX + 2 * ND          # 84: [sin_x(30) | cos_x(30) | sin_d(12) | cos_d(12)]
DIR_BASE = 2 * NX                 # 60
EXPG_W = NUM_EXPERTS * W_DIM + NUM_EXPERTS   # 516: [4 experts | gate logits]
PACK = 1 + 3 + NUM_EXPERTS        # 8 packed output columns: [sigma | rgb | gates]


# ---------------------- static phase-construction matrices -------------------
def _phase_consts():
    """ph = xd @ S + OFF;  sin(ph) = [sin(y_x) | cos(y_x) | sin(y_d) | cos(y_d)]."""
    s = np.zeros((XD_W, TRIG_W), np.float32)
    off = np.zeros((1, TRIG_W), np.float32)
    half_pi = np.float32(np.pi / 2.0)
    for i in range(NUM_XYZ_FREQ):
        for k in range(3):
            s[k, i * 3 + k] = 2.0 ** i            # sin(2^i * xyz_k)
            s[k, NX + i * 3 + k] = 2.0 ** i       # cos via sin(phase + pi/2)
    off[0, NX:2 * NX] = half_pi
    for i in range(NUM_DIR_FREQ):
        for k in range(3):
            s[3 + k, DIR_BASE + i * 3 + k] = 2.0 ** i
            s[3 + k, DIR_BASE + ND + i * 3 + k] = 2.0 ** i
    off[0, DIR_BASE + ND:DIR_BASE + 2 * ND] = half_pi
    return s, off


_S_ALL_NP, _OFF_ALL_NP = _phase_consts()


# ------------------------------ Pallas kernel --------------------------------
def switchnerf_kernel(
    xd_ref,                                  # (TM, 8)  f32  [xyz | viewdir | pad]
    s_all_ref, off_ref,                      # (8, 84) / (1, 84) f32 phase consts
    w_enc_raw_ref, w_enc_trig_ref, b_enc_ref,
    w_expg_ref, b_expg_ref,                  # fused experts + gate
    w_h1_ref, w_dir_raw_ref, w_dir_trig_ref, b_h1_ref,
    w_r2_ref, b_r2_ref,
    out_ref,                                 # (TM, 8)  f32  [sigma | rgb | gates]
):
    f32, bf16 = jnp.float32, jnp.bfloat16

    xd = xd_ref[...]                                              # (TM, 8)
    xd16 = xd.astype(bf16)

    # ---- positional-encoding phases: one tiny f32 matmul, no lane concats ----
    ph = jnp.dot(xd, s_all_ref[...], preferred_element_type=f32) + off_ref[...]
    trig = jnp.sin(ph)                                            # (TM, 84) EUP
    trig16 = trig.astype(bf16)

    # ---- encoding_xyz: Linear(63 -> 128) as raw + trig branches ----
    y = (jnp.dot(xd16, w_enc_raw_ref[...], preferred_element_type=f32)
         + jnp.dot(trig16, w_enc_trig_ref[...], preferred_element_type=f32)
         + b_enc_ref[...])                                        # (TM, 128) f32
    y16 = y.astype(bf16)

    # ---- fused experts + gate logits: (TM,128)@(128, 4*128+4) ----
    hg = jnp.dot(y16, w_expg_ref[...], preferred_element_type=f32) + b_expg_ref[...]
    logits = hg[:, NUM_EXPERTS * W_DIM:]                          # (TM, 4), aligned start
    hcat16 = jnp.maximum(hg[:, :NUM_EXPERTS * W_DIM], 0.0).astype(bf16)

    # softmax gate (1/temperature pre-folded into w/b); exact division, f32
    m = jnp.max(logits, axis=-1, keepdims=True)
    ez = jnp.exp(logits - m)
    gates = ez / jnp.sum(ez, axis=-1, keepdims=True)              # (TM, 4) f32

    # dense soft mixture; bf16 accumulate (feeds a bf16 matmul next anyway)
    g16 = gates.astype(bf16)
    shape_out = g16[:, 0:1] * hcat16[:, :W_DIM]
    for e in range(1, NUM_EXPERTS):                               # static unroll
        shape_out = shape_out + g16[:, e:e + 1] * hcat16[:, e * W_DIM:(e + 1) * W_DIM]

    # ---- fused [rgb-hidden | sigma] head: shape_out + viewdir (raw + trig) ----
    head = (jnp.dot(shape_out, w_h1_ref[...], preferred_element_type=f32)
            + jnp.dot(xd16, w_dir_raw_ref[...], preferred_element_type=f32)
            + jnp.dot(trig16, w_dir_trig_ref[...], preferred_element_type=f32)
            + b_h1_ref[...])                                      # (TM, 65)
    s = head[:, RGB_HID:HEAD1]
    sigma = jnp.log1p(jnp.exp(-jnp.abs(s))) + jnp.maximum(s, 0.0)  # softplus

    h1 = jnp.maximum(head[:, :RGB_HID], 0.0).astype(bf16)
    z = jnp.dot(h1, w_r2_ref[...], preferred_element_type=f32) + b_r2_ref[...]
    rgb = pl.reciprocal(1.0 + jnp.exp(-z), approx=True)            # sigmoid

    # single packed (contiguous-in-HBM) store: [sigma | rgb | gates_soft]
    out_ref[...] = jnp.concatenate([sigma, rgb, gates], axis=-1)


# ------------------------------ wrapper --------------------------------------
def make_params(key):
    ks = jax.random.split(key, 8)
    sc = 0.05
    return {
        "w_enc":  sc * jax.random.normal(ks[0], (D_XYZ, ENC_XYZ), jnp.float32),
        "b_enc":  jnp.zeros((1, ENC_XYZ), jnp.float32),
        "w_gate": sc * jax.random.normal(ks[1], (ENC_XYZ, NUM_EXPERTS), jnp.float32),
        "b_gate": jnp.zeros((1, NUM_EXPERTS), jnp.float32),
        "w_exp":  sc * jax.random.normal(ks[2], (NUM_EXPERTS, ENC_XYZ, W_DIM), jnp.float32),
        "b_exp":  jnp.zeros((NUM_EXPERTS, W_DIM), jnp.float32),
        "w_sig":  sc * jax.random.normal(ks[3], (W_DIM, 1), jnp.float32),
        "b_sig":  jnp.zeros((1, 1), jnp.float32),
        "w_r1a":  sc * jax.random.normal(ks[4], (W_DIM, RGB_HID), jnp.float32),
        "w_r1b":  sc * jax.random.normal(ks[5], (D_VIEWDIR, RGB_HID), jnp.float32),
        "b_r1":   jnp.zeros((1, RGB_HID), jnp.float32),
        "w_r2":   sc * jax.random.normal(ks[6], (RGB_HID, 3), jnp.float32),
        "b_r2":   jnp.zeros((1, 3), jnp.float32),
    }


def _round_up(x, m):
    return ((x + m - 1) // m) * m


def _tpu_caps():
    """(vmem_capacity_bytes or None, tensorcores-per-chip best guess)."""
    vmem, cores = None, None
    try:
        info = pltpu.get_tpu_info()
        vmem = int(getattr(info, "vmem_capacity_bytes", 0)) or None
        cores = int(getattr(info, "num_cores", 0)) or None
    except Exception:
        pass
    if cores is None:
        # 64 MiB-VMEM chips (v7x-class) are the dual-TensorCore ones.
        cores = 2 if (vmem is not None and vmem < 96 * 1024 * 1024) else 1
    return vmem, cores


def switchnerf_forward(params, xyz, viewdir, shape_latent, texture_latent, temperature):
    # latent_dim == 0 in this configuration -> shape/texture latents are unused.
    nrays, nsamples, xyz_dim = xyz.shape
    n = nrays * nsamples
    f32, bf16 = jnp.float32, jnp.bfloat16

    # ---- generation-aware tile size / VMEM limit ----
    vmem_cap, cores = _tpu_caps()
    if vmem_cap is None:                       # unknown chip: conservative
        tm_max, vmem_limit = 2048, 32 * 1024 * 1024
    elif vmem_cap >= 96 * 1024 * 1024:         # v5e / v6e: 128 MiB VMEM, 1 TC
        tm_max, vmem_limit = 4096, 64 * 1024 * 1024
    else:                                      # v7x-class: 64 MiB VMEM, 2 TC
        tm_max, vmem_limit = 2048, 48 * 1024 * 1024

    n128 = _round_up(n, 128)
    if cores > 1:
        # keep >=2 grid steps so the dual-TensorCore megacore has work to shard
        tm = min(tm_max, _round_up(max(n128 // cores, 128), 128))
    else:
        tm = min(tm_max, n128)
    n_pad = _round_up(n128, tm)

    # ---- single packed (N, 8) f32 input: [xyz | viewdir | pad] ----
    xyz_flat = xyz.reshape(-1, xyz_dim)
    dir_flat = viewdir.reshape(-1, viewdir.shape[-1])
    xd = jnp.concatenate(
        [xyz_flat, dir_flat, jnp.zeros((n, XD_W - 6), f32)], axis=1)
    if n_pad != n:
        xd = jnp.pad(xd, ((0, n_pad - n), (0, 0)))

    inv_t = 1.0 / jnp.asarray(temperature, f32)

    # ---- split encoder weights into raw / trig branches (PE via phase matmul) ----
    w_enc = params["w_enc"]                                       # (63, 128)
    w_enc_raw = jnp.zeros((XD_W, ENC_XYZ), f32).at[0:3].set(w_enc[0:3]).astype(bf16)
    w_enc_trig = (jnp.zeros((TRIG_W, ENC_XYZ), f32)
                  .at[0:NX].set(w_enc[3:3 + NX])                  # sin(y_x)
                  .at[NX:2 * NX].set(w_enc[3 + NX:3 + 2 * NX])    # cos(y_x)
                  .astype(bf16))

    # ---- fuse experts + temperature-folded gate into one (128, 516) weight ----
    w_exp = jnp.transpose(params["w_exp"], (1, 0, 2)).reshape(ENC_XYZ, NUM_EXPERTS * W_DIM)
    w_expg = jnp.concatenate([w_exp, params["w_gate"] * inv_t], axis=1).astype(bf16)
    b_expg = jnp.concatenate(
        [params["b_exp"].reshape(1, -1), params["b_gate"] * inv_t], axis=1)

    # ---- fused [rgb-hidden | sigma] head weights ----
    w_h1 = jnp.concatenate([params["w_r1a"], params["w_sig"]], axis=1).astype(bf16)
    b_h1 = jnp.concatenate([params["b_r1"], params["b_sig"]], axis=1)

    w_r1b = params["w_r1b"]                                       # (27, 64)
    w_dir_raw = (jnp.zeros((XD_W, HEAD1), f32)
                 .at[3:6, 0:RGB_HID].set(w_r1b[0:3]).astype(bf16))
    w_dir_trig = (jnp.zeros((TRIG_W, HEAD1), f32)
                  .at[DIR_BASE:DIR_BASE + ND, 0:RGB_HID].set(w_r1b[3:3 + ND])
                  .at[DIR_BASE + ND:DIR_BASE + 2 * ND, 0:RGB_HID].set(w_r1b[3 + ND:3 + 2 * ND])
                  .astype(bf16))

    w_r2 = params["w_r2"].astype(bf16)

    s_all = jnp.asarray(_S_ALL_NP)
    off_all = jnp.asarray(_OFF_ALL_NP)

    row_spec = lambda w: pl.BlockSpec((tm, w), lambda i: (i, 0))
    full2d = lambda shp: pl.BlockSpec(shp, lambda i: (0, 0))

    grid_spec = pltpu.PrefetchScalarGridSpec(
        num_scalar_prefetch=0,
        grid=(n_pad // tm,),
        in_specs=[
            row_spec(XD_W),
            full2d((XD_W, TRIG_W)), full2d((1, TRIG_W)),
            full2d((XD_W, ENC_XYZ)), full2d((TRIG_W, ENC_XYZ)), full2d((1, ENC_XYZ)),
            full2d((ENC_XYZ, EXPG_W)), full2d((1, EXPG_W)),
            full2d((W_DIM, HEAD1)), full2d((XD_W, HEAD1)), full2d((TRIG_W, HEAD1)),
            full2d((1, HEAD1)),
            full2d((RGB_HID, 3)), full2d((1, 3)),
        ],
        out_specs=row_spec(PACK),
    )

    packed = pl.pallas_call(
        switchnerf_kernel,
        out_shape=jax.ShapeDtypeStruct((n_pad, PACK), f32),
        grid_spec=grid_spec,
        compiler_params=pltpu.CompilerParams(
            dimension_semantics=("parallel",),
            vmem_limit_bytes=vmem_limit),
    )(
        xd,
        s_all, off_all,
        w_enc_raw, w_enc_trig, params["b_enc"],
        w_expg, b_expg,
        w_h1, w_dir_raw, w_dir_trig, b_h1,
        w_r2, params["b_r2"],
    )

    packed = packed[:n]
    sigmas = packed[:, 0:1]
    rgbs = packed[:, 1:4]
    gates_soft = packed[:, 4:4 + NUM_EXPERTS]

    # hard gates (straight-through forward value) computed in the wrapper (XLA):
    # torch.max returns the first max index on ties; jnp.argmax matches.
    idx = jnp.argmax(gates_soft, axis=-1)
    gates_hard = jax.nn.one_hot(idx, NUM_EXPERTS, dtype=f32)

    # cheap reductions / extras (glue)
    mean_sigma = sigmas.mean(0)                                   # (1,)
    num_pts = jnp.sum(gates_hard, axis=0).astype(jnp.int32)       # (NUM_EXPERTS,)
    frac = gates_hard.mean(0)
    prob = gates_soft.mean(0)
    aux_loss = NUM_EXPERTS * jnp.sum(frac * prob)                 # Switch-style

    sigmas = sigmas.reshape(nrays, nsamples, -1)
    rgbs = rgbs.reshape(nrays, nsamples, -1)
    gates_soft = gates_soft.reshape(nrays, nsamples, -1)
    gates_hard = gates_hard.reshape(nrays, nsamples, -1)
    extras = {"mean_sigma": mean_sigma, "num_pts": num_pts, "aux_loss": aux_loss}
    return sigmas, rgbs, gates_soft, gates_hard, extras


# --------------------------------- main ---------------------------------------
if __name__ == "__main__":
    key = jax.random.PRNGKey(0)
    kp, kx, kd = jax.random.split(key, 3)
    params = make_params(kp)

    nrays, nsamples = 32, 8                                        # N = 256
    xyz = jax.random.uniform(kx, (nrays, nsamples, 3), jnp.float32, -1.0, 1.0)
    viewdir = jax.random.normal(kd, (nrays, nsamples, 3), jnp.float32)
    viewdir = viewdir / jnp.linalg.norm(viewdir, axis=-1, keepdims=True)
    temperature = 1.0

    fwd = jax.jit(functools.partial(switchnerf_forward, params))
    sigmas, rgbs, gsoft, ghard, extras = fwd(xyz, viewdir, None, None, temperature)
    jax.block_until_ready((sigmas, rgbs, gsoft, ghard, extras))

    assert sigmas.shape == (nrays, nsamples, 1)
    assert rgbs.shape == (nrays, nsamples, 3)
    assert gsoft.shape == (nrays, nsamples, NUM_EXPERTS)
    assert ghard.shape == (nrays, nsamples, NUM_EXPERTS)
    assert bool(jnp.all(jnp.isfinite(sigmas))) and bool(jnp.all(jnp.isfinite(rgbs)))
    assert bool(jnp.all(jnp.sum(ghard, -1) == 1.0))
    print("KERNEL_OK")
</pallas_src>

<mosaic_0001>
module attributes {stable_mosaic.version = 11 : i64} {
  func.func @switchnerf_kernel(%arg0: i32, %arg1: memref<256x8xf32, #tpu.memory_space<vmem>>, %arg2: memref<8x84xf32, #tpu.memory_space<vmem>>, %arg3: memref<1x84xf32, #tpu.memory_space<vmem>>, %arg4: memref<8x128xbf16, #tpu.memory_space<vmem>>, %arg5: memref<84x128xbf16, #tpu.memory_space<vmem>>, %arg6: memref<1x128xf32, #tpu.memory_space<vmem>>, %arg7: memref<128x516xbf16, #tpu.memory_space<vmem>>, %arg8: memref<1x516xf32, #tpu.memory_space<vmem>>, %arg9: memref<128x65xbf16, #tpu.memory_space<vmem>>, %arg10: memref<8x65xbf16, #tpu.memory_space<vmem>>, %arg11: memref<84x65xbf16, #tpu.memory_space<vmem>>, %arg12: memref<1x65xf32, #tpu.memory_space<vmem>>, %arg13: memref<64x3xbf16, #tpu.memory_space<vmem>>, %arg14: memref<1x3xf32, #tpu.memory_space<vmem>>, %arg15: memref<256x8xf32, #tpu.memory_space<vmem>>) attributes {dimension_semantics = [#tpu.dimension_semantics<parallel>], iteration_bounds = array<i64: 1>, scalar_prefetch = 0 : i64, scratch_operands = 0 : i64, tpu.core_type = #tpu.core_type<tc>, window_params = [{transform_indices = @transform_0, window_bounds = array<i64: 256, 8>}, {pipeline_mode = #tpu.pipeline_mode<synchronous>, transform_indices = @transform_1, window_bounds = array<i64: 8, 84>}, {pipeline_mode = #tpu.pipeline_mode<synchronous>, transform_indices = @transform_2, window_bounds = array<i64: 1, 84>}, {pipeline_mode = #tpu.pipeline_mode<synchronous>, transform_indices = @transform_3, window_bounds = array<i64: 8, 128>}, {pipeline_mode = #tpu.pipeline_mode<synchronous>, transform_indices = @transform_4, window_bounds = array<i64: 84, 128>}, {pipeline_mode = #tpu.pipeline_mode<synchronous>, transform_indices = @transform_5, window_bounds = array<i64: 1, 128>}, {pipeline_mode = #tpu.pipeline_mode<synchronous>, transform_indices = @transform_6, window_bounds = array<i64: 128, 516>}, {pipeline_mode = #tpu.pipeline_mode<synchronous>, transform_indices = @transform_7, window_bounds = array<i64: 1, 516>}, {pipeline_mode = #tpu.pipeline_mode<synchronous>, transform_indices = @transform_8, window_bounds = array<i64: 128, 65>}, {pipeline_mode = #tpu.pipeline_mode<synchronous>, transform_indices = @transform_9, window_bounds = array<i64: 8, 65>}, {pipeline_mode = #tpu.pipeline_mode<synchronous>, transform_indices = @transform_10, window_bounds = array<i64: 84, 65>}, {pipeline_mode = #tpu.pipeline_mode<synchronous>, transform_indices = @transform_11, window_bounds = array<i64: 1, 65>}, {pipeline_mode = #tpu.pipeline_mode<synchronous>, transform_indices = @transform_12, window_bounds = array<i64: 64, 3>}, {pipeline_mode = #tpu.pipeline_mode<synchronous>, transform_indices = @transform_13, window_bounds = array<i64: 1, 3>}, {transform_indices = @transform_14, window_bounds = array<i64: 256, 8>}]} {
    %c0 = arith.constant 0 : index
    %c0_0 = arith.constant 0 : index
    %0 = vector.load %arg1[%c0, %c0_0] : memref<256x8xf32, #tpu.memory_space<vmem>>, vector<256x8xf32>
    %1 = arith.truncf %0 : vector<256x8xf32> to vector<256x8xbf16>
    %c0_1 = arith.constant 0 : index
    %c0_2 = arith.constant 0 : index
    %2 = vector.load %arg2[%c0_1, %c0_2] : memref<8x84xf32, #tpu.memory_space<vmem>>, vector<8x84xf32>
    %cst = arith.constant dense<0.000000e+00> : vector<256x84xf32>
    %3 = tpu.matmul %0, %2, %cst {dimension_numbers = #tpu.dot_dimension_numbers<[1], [0], [0], [1], [0, 0, 1, 1], [], []>} : vector<256x8xf32>, vector<8x84xf32>, vector<256x84xf32> -> vector<256x84xf32>
    %c0_3 = arith.constant 0 : index
    %c0_4 = arith.constant 0 : index
    %4 = vector.load %arg3[%c0_3, %c0_4] : memref<1x84xf32, #tpu.memory_space<vmem>>, vector<1x84xf32>
    %5 = vector.broadcast %4 : vector<1x84xf32> to vector<256x84xf32>
    %6 = arith.addf %3, %5 : vector<256x84xf32>
    %7 = math.sin %6 : vector<256x84xf32>
    %8 = arith.truncf %7 : vector<256x84xf32> to vector<256x84xbf16>
    %c0_5 = arith.constant 0 : index
    %c0_6 = arith.constant 0 : index
    %9 = vector.load %arg4[%c0_5, %c0_6] : memref<8x128xbf16, #tpu.memory_space<vmem>>, vector<8x128xbf16>
    %cst_7 = arith.constant dense<0.000000e+00> : vector<256x128xf32>
    %10 = tpu.matmul %1, %9, %cst_7 {dimension_numbers = #tpu.dot_dimension_numbers<[1], [0], [0], [1], [0, 0, 1, 1], [], []>} : vector<256x8xbf16>, vector<8x128xbf16>, vector<256x128xf32> -> vector<256x128xf32>
    %c0_8 = arith.constant 0 : index
    %c0_9 = arith.constant 0 : index
    %11 = vector.load %arg5[%c0_8, %c0_9] : memref<84x128xbf16, #tpu.memory_space<vmem>>, vector<84x128xbf16>
    %cst_10 = arith.constant dense<0.000000e+00> : vector<256x128xf32>
    %12 = tpu.matmul %8, %11, %cst_10 {dimension_numbers = #tpu.dot_dimension_numbers<[1], [0], [0], [1], [0, 0, 1, 1], [], []>} : vector<256x84xbf16>, vector<84x128xbf16>, vector<256x128xf32> -> vector<256x128xf32>
    %13 = arith.addf %10, %12 : vector<256x128xf32>
    %c0_11 = arith.constant 0 : index
    %c0_12 = arith.constant 0 : index
    %14 = vector.load %arg6[%c0_11, %c0_12] : memref<1x128xf32, #tpu.memory_space<vmem>>, vector<1x128xf32>
    %15 = vector.broadcast %14 : vector<1x128xf32> to vector<256x128xf32>
    %16 = arith.addf %13, %15 : vector<256x128xf32>
    %17 = arith.truncf %16 : vector<256x128xf32> to vector<256x128xbf16>
    %c0_13 = arith.constant 0 : index
    %c0_14 = arith.constant 0 : index
    %18 = vector.load %arg7[%c0_13, %c0_14] : memref<128x516xbf16, #tpu.memory_space<vmem>>, vector<128x516xbf16>
    %cst_15 = arith.constant dense<0.000000e+00> : vector<256x516xf32>
    %19 = tpu.matmul %17, %18, %cst_15 {dimension_numbers = #tpu.dot_dimension_numbers<[1], [0], [0], [1], [0, 0, 1, 1], [], []>} : vector<256x128xbf16>, vector<128x516xbf16>, vector<256x516xf32> -> vector<256x516xf32>
    %c0_16 = arith.constant 0 : index
    %c0_17 = arith.constant 0 : index
    %20 = vector.load %arg8[%c0_16, %c0_17] : memref<1x516xf32, #tpu.memory_space<vmem>>, vector<1x516xf32>
    %21 = vector.broadcast %20 : vector<1x516xf32> to vector<256x516xf32>
    %22 = arith.addf %19, %21 : vector<256x516xf32>
    %23 = vector.extract_strided_slice %22 {offsets = [0, 512], sizes = [256, 4], strides = [1, 1]} : vector<256x516xf32> to vector<256x4xf32>
    %24 = vector.extract_strided_slice %22 {offsets = [0, 0], sizes = [256, 512], strides = [1, 1]} : vector<256x516xf32> to vector<256x512xf32>
    %cst_18 = arith.constant 0.000000e+00 : f32
    %25 = vector.broadcast %cst_18 : f32 to vector<256x512xf32>
    %26 = arith.maximumf %24, %25 : vector<256x512xf32>
    %27 = arith.truncf %26 : vector<256x512xf32> to vector<256x512xbf16>
    %cst_19 = arith.constant dense<0xFF800000> : vector<256xf32>
    %28 = vector.multi_reduction <maximumf>, %23, %cst_19 [1] : vector<256x4xf32> to vector<256xf32>
    %29 = vector.shape_cast %28 : vector<256xf32> to vector<256x1xf32>
    %30 = vector.broadcast %29 : vector<256x1xf32> to vector<256x4xf32>
    %31 = arith.subf %23, %30 : vector<256x4xf32>
    %32 = math.exp %31 : vector<256x4xf32>
    %cst_20 = arith.constant dense<0.000000e+00> : vector<256xf32>
    %33 = vector.multi_reduction <add>, %32, %cst_20 [1] : vector<256x4xf32> to vector<256xf32>
    %34 = vector.shape_cast %33 : vector<256xf32> to vector<256x1xf32>
    %35 = vector.broadcast %34 : vector<256x1xf32> to vector<256x4xf32>
    %36 = arith.divf %32, %35 : vector<256x4xf32>
    %37 = arith.truncf %36 : vector<256x4xf32> to vector<256x4xbf16>
    %38 = vector.extract_strided_slice %37 {offsets = [0, 0], sizes = [256, 1], strides = [1, 1]} : vector<256x4xbf16> to vector<256x1xbf16>
    %39 = vector.extract_strided_slice %27 {offsets = [0, 0], sizes = [256, 128], strides = [1, 1]} : vector<256x512xbf16> to vector<256x128xbf16>
    %40 = vector.broadcast %38 : vector<256x1xbf16> to vector<256x128xbf16>
    %41 = arith.mulf %40, %39 : vector<256x128xbf16>
    %42 = vector.extract_strided_slice %37 {offsets = [0, 1], sizes = [256, 1], strides = [1, 1]} : vector<256x4xbf16> to vector<256x1xbf16>
    %43 = vector.extract_strided_slice %27 {offsets = [0, 128], sizes = [256, 128], strides = [1, 1]} : vector<256x512xbf16> to vector<256x128xbf16>
    %44 = vector.broadcast %42 : vector<256x1xbf16> to vector<256x128xbf16>
    %45 = arith.mulf %44, %43 : vector<256x128xbf16>
    %46 = arith.addf %41, %45 : vector<256x128xbf16>
    %47 = vector.extract_strided_slice %37 {offsets = [0, 2], sizes = [256, 1], strides = [1, 1]} : vector<256x4xbf16> to vector<256x1xbf16>
    %48 = vector.extract_strided_slice %27 {offsets = [0, 256], sizes = [256, 128], strides = [1, 1]} : vector<256x512xbf16> to vector<256x128xbf16>
    %49 = vector.broadcast %47 : vector<256x1xbf16> to vector<256x128xbf16>
    %50 = arith.mulf %49, %48 : vector<256x128xbf16>
    %51 = arith.addf %46, %50 : vector<256x128xbf16>
    %52 = vector.extract_strided_slice %37 {offsets = [0, 3], sizes = [256, 1], strides = [1, 1]} : vector<256x4xbf16> to vector<256x1xbf16>
    %53 = vector.extract_strided_slice %27 {offsets = [0, 384], sizes = [256, 128], strides = [1, 1]} : vector<256x512xbf16> to vector<256x128xbf16>
    %54 = vector.broadcast %52 : vector<256x1xbf16> to vector<256x128xbf16>
    %55 = arith.mulf %54, %53 : vector<256x128xbf16>
    %56 = arith.addf %51, %55 : vector<256x128xbf16>
    %c0_21 = arith.constant 0 : index
    %c0_22 = arith.constant 0 : index
    %57 = vector.load %arg9[%c0_21, %c0_22] : memref<128x65xbf16, #tpu.memory_space<vmem>>, vector<128x65xbf16>
    %cst_23 = arith.constant dense<0.000000e+00> : vector<256x65xf32>
    %58 = tpu.matmul %56, %57, %cst_23 {dimension_numbers = #tpu.dot_dimension_numbers<[1], [0], [0], [1], [0, 0, 1, 1], [], []>} : vector<256x128xbf16>, vector<128x65xbf16>, vector<256x65xf32> -> vector<256x65xf32>
    %c0_24 = arith.constant 0 : index
    %c0_25 = arith.constant 0 : index
    %59 = vector.load %arg10[%c0_24, %c0_25] : memref<8x65xbf16, #tpu.memory_space<vmem>>, vector<8x65xbf16>
    %cst_26 = arith.constant dense<0.000000e+00> : vector<256x65xf32>
    %60 = tpu.matmul %1, %59, %cst_26 {dimension_numbers = #tpu.dot_dimension_numbers<[1], [0], [0], [1], [0, 0, 1, 1], [], []>} : vector<256x8xbf16>, vector<8x65xbf16>, vector<256x65xf32> -> vector<256x65xf32>
    %61 = arith.addf %58, %60 : vector<256x65xf32>
    %c0_27 = arith.constant 0 : index
    %c0_28 = arith.constant 0 : index
    %62 = vector.load %arg11[%c0_27, %c0_28] : memref<84x65xbf16, #tpu.memory_space<vmem>>, vector<84x65xbf16>
    %cst_29 = arith.constant dense<0.000000e+00> : vector<256x65xf32>
    %63 = tpu.matmul %8, %62, %cst_29 {dimension_numbers = #tpu.dot_dimension_numbers<[1], [0], [0], [1], [0, 0, 1, 1], [], []>} : vector<256x84xbf16>, vector<84x65xbf16>, vector<256x65xf32> -> vector<256x65xf32>
    %64 = arith.addf %61, %63 : vector<256x65xf32>
    %c0_30 = arith.constant 0 : index
    %c0_31 = arith.constant 0 : index
    %65 = vector.load %arg12[%c0_30, %c0_31] : memref<1x65xf32, #tpu.memory_space<vmem>>, vector<1x65xf32>
    %66 = vector.broadcast %65 : vector<1x65xf32> to vector<256x65xf32>
    %67 = arith.addf %64, %66 : vector<256x65xf32>
    %68 = vector.extract_strided_slice %67 {offsets = [0, 64], sizes = [256, 1], strides = [1, 1]} : vector<256x65xf32> to vector<256x1xf32>
    %69 = math.absf %68 : vector<256x1xf32>
    %cst_32 = arith.constant 0.000000e+00 : f32
    %70 = vector.broadcast %cst_32 : f32 to vector<256x1xf32>
    %71 = arith.subf %70, %69 : vector<256x1xf32>
    %72 = math.exp %71 : vector<256x1xf32>
    %73 = math.log1p %72 : vector<256x1xf32>
    %cst_33 = arith.constant 0.000000e+00 : f32
    %74 = vector.broadcast %cst_33 : f32 to vector<256x1xf32>
    %75 = arith.maximumf %68, %74 : vector<256x1xf32>
    %76 = arith.addf %73, %75 : vector<256x1xf32>
    %77 = vector.extract_strided_slice %67 {offsets = [0, 0], sizes = [256, 64], strides = [1, 1]} : vector<256x65xf32> to vector<256x64xf32>
    %cst_34 = arith.constant 0.000000e+00 : f32
    %78 = vector.broadcast %cst_34 : f32 to vector<256x64xf32>
    %79 = arith.maximumf %77, %78 : vector<256x64xf32>
    %80 = arith.truncf %79 : vector<256x64xf32> to vector<256x64xbf16>
    %c0_35 = arith.constant 0 : index
    %c0_36 = arith.constant 0 : index
    %81 = vector.load %arg13[%c0_35, %c0_36] : memref<64x3xbf16, #tpu.memory_space<vmem>>, vector<64x3xbf16>
    %cst_37 = arith.constant dense<0.000000e+00> : vector<256x3xf32>
    %82 = tpu.matmul %80, %81, %cst_37 {dimension_numbers = #tpu.dot_dimension_numbers<[1], [0], [0], [1], [0, 0, 1, 1], [], []>} : vector<256x64xbf16>, vector<64x3xbf16>, vector<256x3xf32> -> vector<256x3xf32>
    %c0_38 = arith.constant 0 : index
    %c0_39 = arith.constant 0 : index
    %83 = vector.load %arg14[%c0_38, %c0_39] : memref<1x3xf32, #tpu.memory_space<vmem>>, vector<1x3xf32>
    %84 = vector.broadcast %83 : vector<1x3xf32> to vector<256x3xf32>
    %85 = arith.addf %82, %84 : vector<256x3xf32>
    %cst_40 = arith.constant 0.000000e+00 : f32
    %86 = vector.broadcast %cst_40 : f32 to vector<256x3xf32>
    %87 = arith.subf %86, %85 : vector<256x3xf32>
    %88 = math.exp %87 : vector<256x3xf32>
    %cst_41 = arith.constant 1.000000e+00 : f32
    %89 = vector.broadcast %cst_41 : f32 to vector<256x3xf32>
    %90 = arith.addf %89, %88 : vector<256x3xf32>
    %91 = tpu.reciprocal %90 {approx = true} : vector<256x3xf32> -> vector<256x3xf32>
    %92 = tpu.concatenate %76, %91, %36 in 1 : vector<256x1xf32>, vector<256x3xf32>, vector<256x4xf32> -> vector<256x8xf32>
    %c0_42 = arith.constant 0 : index
    %c0_43 = arith.constant 0 : index
    %93 = vector.load %arg15[%c0_42, %c0_43] : memref<256x8xf32, #tpu.memory_space<vmem>>, vector<256x8xf32>
    tpu.vector_store %arg15[%c0_42, %c0_43], %92 {strides = array<i32>} : memref<256x8xf32, #tpu.memory_space<vmem>>, vector<256x8xf32>,
    return
  }
  func.func @transform_0(%arg0: i32) -> (i32, i32) {
    %c0_i32 = arith.constant 0 : i32
    %c0_i32_0 = arith.constant 0 : i32
    return %arg0, %c0_i32 : i32, i32
  }
  func.func @transform_1(%arg0: i32) -> (i32, i32) {
    %c0_i32 = arith.constant 0 : i32
    %c0_i32_0 = arith.constant 0 : i32
    %c0_i32_1 = arith.constant 0 : i32
    return %c0_i32, %c0_i32_0 : i32, i32
  }
  func.func @transform_2(%arg0: i32) -> (i32, i32) {
    %c0_i32 = arith.constant 0 : i32
    %c0_i32_0 = arith.constant 0 : i32
    %c0_i32_1 = arith.constant 0 : i32
    return %c0_i32, %c0_i32_0 : i32, i32
  }
  func.func @transform_3(%arg0: i32) -> (i32, i32) {
    %c0_i32 = arith.constant 0 : i32
    %c0_i32_0 = arith.constant 0 : i32
    %c0_i32_1 = arith.constant 0 : i32
    return %c0_i32, %c0_i32_0 : i32, i32
  }
  func.func @transform_4(%arg0: i32) -> (i32, i32) {
    %c0_i32 = arith.constant 0 : i32
    %c0_i32_0 = arith.constant 0 : i32
    %c0_i32_1 = arith.constant 0 : i32
    return %c0_i32, %c0_i32_0 : i32, i32
  }
  func.func @transform_5(%arg0: i32) -> (i32, i32) {
    %c0_i32 = arith.constant 0 : i32
    %c0_i32_0 = arith.constant 0 : i32
    %c0_i32_1 = arith.constant 0 : i32
    return %c0_i32, %c0_i32_0 : i32, i32
  }
  func.func @transform_6(%arg0: i32) -> (i32, i32) {
    %c0_i32 = arith.constant 0 : i32
    %c0_i32_0 = arith.constant 0 : i32
    %c0_i32_1 = arith.constant 0 : i32
    return %c0_i32, %c0_i32_0 : i32, i32
  }
  func.func @transform_7(%arg0: i32) -> (i32, i32) {
    %c0_i32 = arith.constant 0 : i32
    %c0_i32_0 = arith.constant 0 : i32
    %c0_i32_1 = arith.constant 0 : i32
    return %c0_i32, %c0_i32_0 : i32, i32
  }
  func.func @transform_8(%arg0: i32) -> (i32, i32) {
    %c0_i32 = arith.constant 0 : i32
    %c0_i32_0 = arith.constant 0 : i32
    %c0_i32_1 = arith.constant 0 : i32
    return %c0_i32, %c0_i32_0 : i32, i32
  }
  func.func @transform_9(%arg0: i32) -> (i32, i32) {
    %c0_i32 = arith.constant 0 : i32
    %c0_i32_0 = arith.constant 0 : i32
    %c0_i32_1 = arith.constant 0 : i32
    return %c0_i32, %c0_i32_0 : i32, i32
  }
  func.func @transform_10(%arg0: i32) -> (i32, i32) {
    %c0_i32 = arith.constant 0 : i32
    %c0_i32_0 = arith.constant 0 : i32
    %c0_i32_1 = arith.constant 0 : i32
    return %c0_i32, %c0_i32_0 : i32, i32
  }
  func.func @transform_11(%arg0: i32) -> (i32, i32) {
    %c0_i32 = arith.constant 0 : i32
    %c0_i32_0 = arith.constant 0 : i32
    %c0_i32_1 = arith.constant 0 : i32
    return %c0_i32, %c0_i32_0 : i32, i32
  }
  func.func @transform_12(%arg0: i32) -> (i32, i32) {
    %c0_i32 = arith.constant 0 : i32
    %c0_i32_0 = arith.constant 0 : i32
    %c0_i32_1 = arith.constant 0 : i32
    return %c0_i32, %c0_i32_0 : i32, i32
  }
  func.func @transform_13(%arg0: i32) -> (i32, i32) {
    %c0_i32 = arith.constant 0 : i32
    %c0_i32_0 = arith.constant 0 : i32
    %c0_i32_1 = arith.constant 0 : i32
    return %c0_i32, %c0_i32_0 : i32, i32
  }
  func.func @transform_14(%arg0: i32) -> (i32, i32) {
    %c0_i32 = arith.constant 0 : i32
    %c0_i32_0 = arith.constant 0 : i32
    return %arg0, %c0_i32 : i32, i32
  }
}

</mosaic_0001>

<bundles_post_ra>
// kernel: switchnerf_forward.1
= control target key start
LH: loop header
LB: loop body
LE: loop exit
PB: predicated region body
PF: predicated region fallthrough
CT: control target
= control target key end

     0   :  { %vm16120_vm0 = vcmask 64512   ;;  %s15982_s1 = inlined_call_operand.vmem [shape: f32[8,84], index: 1, kind: input, shape index: {}]   ;;  %s15983_s0 = inlined_call_operand.vmem [shape: f32[256,8], index: 0, kind: input, shape index: {}]   ;;  %s15984_s2 = inlined_call_operand.vmem [shape: f32[1,84], index: 2, kind: input, shape index: {}]   ;;  %s15985_s4 = inlined_call_operand.vmem [shape: bf16[84,128], index: 4, kind: input, shape index: {}]   ;;  %s15986_s6 = inlined_call_operand.vmem [shape: bf16[128,516], index: 6, kind: input, shape index: {}]   ;;  %s15987_s3 = inlined_call_operand.vmem [shape: bf16[8,128], index: 3, kind: input, shape index: {}]   ;;  %s15988_s5 = inlined_call_operand.vmem [shape: f32[1,128], index: 5, kind: input, shape index: {}]   ;;  %s15989_s9 = inlined_call_operand.vmem [shape: bf16[8,65], index: 9, kind: input, shape index: {}]   ;;  %s15990_s10 = inlined_call_operand.vmem [shape: bf16[84,65], index: 10, kind: input, shape index: {}]   ;;  %s15991_s7 = inlined_call_operand.vmem [shape: f32[1,516], index: 7, kind: input, shape index: {}]   ;;  %s15992_s8 = inlined_call_operand.vmem [shape: bf16[128,65], index: 8, kind: input, shape index: {}]   ;;  %s15993_s12 = inlined_call_operand.vmem [shape: bf16[64,3], index: 12, kind: input, shape index: {}]   ;;  %s15994_s11 = inlined_call_operand.vmem [shape: f32[1,65], index: 11, kind: input, shape index: {}]   ;;  %s15995_s13 = inlined_call_operand.vmem [shape: f32[1,3], index: 13, kind: input, shape index: {}]   ;;  %s15996_s14 = inlined_call_operand.vmem [shape: f32[256,8], index: 14, kind: output, shape index: {}]  }
   0x1   :  { %v96_v0 = vld [vmem:[%s15982_s1] sm:$0xff]  ;;  %v49_v2 = vld [vmem:[%s15983_s0 + $0x8] sm:$0xff]  ;;  %v50_v4 = vld [vmem:[%s15983_s0 + $0x10] sm:$0xff] }
   0x2   :  { %v48_v1 = vld [vmem:[%s15983_s0] sm:$0xff]  ;;  %8618 = vmatprep.subr.mxu0 %v96_v0  ;;  %v51_v5 = vld [vmem:[%s15983_s0 + $0x18] sm:$0xff]  ;;  %v53_v8 = vld [vmem:[%s15983_s0 + $0x28] sm:$0xff] }
   0x3   :  { %v9875_v3 = vpack.c.bf16 %v49_v2, %v48_v1  ;;  %8620 = vmatprep.mubr.msk.f32.mxu0 %vm16120_vm0, %v48_v1  ;;  %v52_v6 = vld [vmem:[%s15983_s0 + $0x20] sm:$0xff]  ;;  %8619 = vmatpush3.msra.mxu0 %v96_v0  ;;  %v9887_v7 = vpack.c.bf16 %v51_v5, %v50_v4  ;;  %v54_v9 = vld [vmem:[%s15983_s0 + $0x30] sm:$0xff]  ;;  %v55_v10 = vld [vmem:[%s15983_s0 + $0x38] sm:$0xff] }
   0x4   :  { %8621 = vmatmul.mubr.msk.f32.vlgmr.msra.gmra.mxu0 %vm16120_vm0, %v49_v2  ;;  %v9899_v11 = vpack.c.bf16 %v53_v8, %v52_v6  ;;  %v9901_v12 = vpack.c.bf16 %v55_v10, %v54_v9  ;;  %v56_v13 = vld [vmem:[%s15983_s0 + $0x40] sm:$0xff]  ;;  %v57_v14 = vld [vmem:[%s15983_s0 + $0x48] sm:$0xff]  ;;  %v58_v15 = vld [vmem:[%s15983_s0 + $0x50] sm:$0xff] }
   0x5   :  { %16177 = vst [vmem:[#allocation2_spill] sm:$0xff] %v9875_v3  ;;  %16178 = vst [vmem:[#allocation3_spill] sm:$0xff] %v9887_v7  ;;  %8623 = vmatprep.mubr.msk.f32.mxu0 %vm16120_vm0, %v50_v4  ;;  %v9913_v16 = vpack.c.bf16 %v57_v14, %v56_v13  ;;  %v59_v17 = vld [vmem:[%s15983_s0 + $0x58] sm:$0xff]  ;;  %v60_v18 = vld [vmem:[%s15983_s0 + $0x60] sm:$0xff] }
   0x6   :  { %16179 = vst [vmem:[#allocation4_spill] sm:$0xff] %v9899_v11  ;;  %16180 = vst [vmem:[#allocation5_spill] sm:$0xff] %v9901_v12  ;;  %v61_v19 = vld [vmem:[%s15983_s0 + $0x68] sm:$0xff]  ;;  %v9924_v20 = vpack.c.bf16 %v59_v17, %v58_v15  ;;  %v62_v22 = vld [vmem:[%s15983_s0 + $0x70] sm:$0xff] }
   0x7   :  { %16181 = vst [vmem:[#allocation6_spill] sm:$0xff] %v9913_v16  ;;  %v9926_v21 = vpack.c.bf16 %v61_v19, %v60_v18  ;;  %v63_v23 = vld [vmem:[%s15983_s0 + $0x78] sm:$0xff]  ;;  %v64_v24 = vld [vmem:[%s15983_s0 + $0x80] sm:$0xff]  ;;  %v65_v26 = vld [vmem:[%s15983_s0 + $0x88] sm:$0xff] }
   0x8   :  { %16182 = vst [vmem:[#allocation7_spill] sm:$0xff] %v9924_v20  ;;  %v9937_v25 = vpack.c.bf16 %v63_v23, %v62_v22  ;;  %v66_v27 = vld [vmem:[%s15983_s0 + $0x90] sm:$0xff]  ;;  %v67_v28 = vld [vmem:[%s15983_s0 + $0x98] sm:$0xff]  ;;  %8624 = vmatmul.mubr.msk.f32.gmra.mxu0 %vm16120_vm0, %v51_v5  ;;  %v9949_v29 = vpack.c.bf16 %v65_v26, %v64_v24  ;;  %v68_v31 = vld [vmem:[%s15983_s0 + $0xa0] sm:$0xff] }
   0x9   :  { %16183 = vst [vmem:[#allocation8_spill] sm:$0xff] %v9926_v21  ;;  %v9951_v30 = vpack.c.bf16 %v67_v28, %v66_v27  ;;  %v69_v32 = vld [vmem:[%s15983_s0 + $0xa8] sm:$0xff]  ;;  %v70_v33 = vld [vmem:[%s15983_s0 + $0xb0] sm:$0xff]  ;;  %8626 = vmatprep.mubr.msk.f32.mxu0 %vm16120_vm0, %v52_v6  ;;  %v71_v35 = vld [vmem:[%s15983_s0 + $0xb8] sm:$0xff] }
   0xa   :  { %16184 = vst [vmem:[#allocation9_spill] sm:$0xff] %v9937_v25  ;;  %16185 = vst [vmem:[#allocation10_spill] sm:$0xff] %v9949_v29  ;;  %v9963_v34 = vpack.c.bf16 %v69_v32, %v68_v31  ;;  %v72_v36 = vld [vmem:[%s15983_s0 + $0xc0] sm:$0xff]  ;;  %v73_v37 = vld [vmem:[%s15983_s0 + $0xc8] sm:$0xff]  ;;  %v9974_v38 = vpack.c.bf16 %v71_v35, %v70_v33 }
   0xb   :  { %16186 = vst [vmem:[#allocation11_spill] sm:$0xff] %v9951_v30  ;;  %v9976_v39 = vpack.c.bf16 %v73_v37, %v72_v36  ;;  %v74_v40 = vld [vmem:[%s15983_s0 + $0xd0] sm:$0xff]  ;;  %v75_v41 = vld [vmem:[%s15983_s0 + $0xd8] sm:$0xff]  ;;  %v76_v42 = vld [vmem:[%s15983_s0 + $0xe0] sm:$0xff] }
   0xc   :  { %16187 = vst [vmem:[#allocation12_spill] sm:$0xff] %v9963_v34  ;;  %16188 = vst [vmem:[#allocation13_spill] sm:$0xff] %v9974_v38  ;;  %v9987_v43 = vpack.c.bf16 %v75_v41, %v74_v40  ;;  %v77_v44 = vld [vmem:[%s15983_s0 + $0xe8] sm:$0xff]  ;;  %v78_v45 = vld [vmem:[%s15983_s0 + $0xf0] sm:$0xff]  ;;  %8627 = vmatmul.mubr.msk.f32.gmra.mxu0 %vm16120_vm0, %v53_v8 }
   0xd   :  { %16189 = vst [vmem:[#allocation14_spill] sm:$0xff] %v9976_v39  ;;  %v79_v46 = vld [vmem:[%s15983_s0 + $0xf8] sm:$0xff]  ;;  %v9999_v47 = vpack.c.bf16 %v77_v44, %v76_v42  ;;  %8629 = vmatprep.mubr.msk.f32.mxu0 %vm16120_vm0, %v54_v9  ;;  %v10032_v49 = vld [vmem:[%s15984_s2] ss:$0 sm:$0xff] }
   0xe   :  { %16190 = vst [vmem:[#allocation15_spill] sm:$0xff] %v9987_v43  ;;  %v10001_v48 = vpack.c.bf16 %v79_v46, %v78_v45 }
   0xf   :  { %16191 = vst [vmem:[#allocation16_spill] sm:$0xff] %v9999_v47 }
  0x10   :  { %16192 = vst [vmem:[#allocation17_spill] sm:$0xff] %v10001_v48  ;;  %8630 = vmatmul.mubr.msk.f32.gmra.mxu0 %vm16120_vm0, %v55_v10 }
  0x11   :  { %8632 = vmatprep.mubr.msk.f32.mxu0 %vm16120_vm0, %v56_v13 }
  0x14   :  { %8633 = vmatmul.mubr.msk.f32.gmra.mxu0 %vm16120_vm0, %v57_v14 }
  0x15   :  { %8635 = vmatprep.mubr.msk.f32.mxu0 %vm16120_vm0, %v58_v15  ;;  %v16015_v15 = vmov 683565275  }
  0x18   :  { %8636 = vmatmul.mubr.msk.f32.gmra.mxu0 %vm16120_vm0, %v59_v17 }
  0x19   :  { %8638 = vmatprep.mubr.msk.f32.mxu0 %vm16120_vm0, %v60_v18 }
  0x1c   :  { %8639 = vmatmul.mubr.msk.f32.gmra.mxu0 %vm16120_vm0, %v61_v19  ;;  %v16009_v19 = vmov 2475754826  }
  0x1d   :  { %8641 = vmatprep.mubr.msk.f32.mxu0 %vm16120_vm0, %v62_v22 }
  0x20   :  { %8642 = vmatmul.mubr.msk.f32.gmra.mxu0 %vm16120_vm0, %v63_v23  ;;  %v16003_v23 = vmov 2131351028  }
  0x21   :  { %8644 = vmatprep.mubr.msk.f32.mxu0 %vm16120_vm0, %v64_v24 }
  0x24   :  { %8645 = vmatmul.mubr.msk.f32.gmra.mxu0 %vm16120_vm0, %v65_v26  ;;  %v16005_v26 = vmov 2102212464  }
  0x25   :  { %8647 = vmatprep.mubr.msk.f32.mxu0 %vm16120_vm0, %v66_v27 }
  0x28   :  { %8648 = vmatmul.mubr.msk.f32.gmra.mxu0 %vm16120_vm0, %v67_v28  ;;  %v16007_v28 = vmov 920167782  }
  0x29   :  { %8650 = vmatprep.mubr.msk.f32.mxu0 %vm16120_vm0, %v68_v31 }
  0x2c   :  { %8651 = vmatmul.mubr.msk.f32.gmra.mxu0 %vm16120_vm0, %v69_v32 }
  0x2d   :  { %8653 = vmatprep.mubr.msk.f32.mxu0 %vm16120_vm0, %v70_v33 }
  0x30   :  { %8654 = vmatmul.mubr.msk.f32.gmra.mxu0 %vm16120_vm0, %v71_v35 }
  0x31   :  { %8656 = vmatprep.mubr.msk.f32.mxu0 %vm16120_vm0, %v72_v36 }
  0x34   :  { %8657 = vmatmul.mubr.msk.f32.gmra.mxu0 %vm16120_vm0, %v73_v37 }
  0x35   :  { %8659 = vmatprep.mubr.msk.f32.mxu0 %vm16120_vm0, %v74_v40  ;;  %v16000_v40 = vmov 1326507024  }
  0x38   :  { %8660 = vmatmul.mubr.msk.f32.gmra.mxu0 %vm16120_vm0, %v75_v41 }
  0x39   :  { %8662 = vmatprep.mubr.msk.f32.mxu0 %vm16120_vm0, %v76_v42 }
  0x3c   :  { %8663 = vmatmul.mubr.msk.f32.gmra.mxu0 %vm16120_vm0, %v77_v44 }
  0x3d   :  { %8665 = vmatprep.mubr.msk.f32.mxu0 %vm16120_vm0, %v78_v45 }
  0x40   :  { %8666 = vmatmul.mubr.msk.f32.gmra.mxu0 %vm16120_vm0, %v79_v46 }
  0xc4   :  { %v8622_v50 = vpop.f32.mrf.mxu0 }
  0xc5   :  { %v10035_v51 = vadd.f32 %v8622_v50, %v10032_v49 }
  0xc6   :  { %v267_v52 = vpop.f32.mrf.mxu0 }
  0xc7   :  { %16193 = vst [vmem:[#allocation18_spill] sm:$0xff] %v10035_v51  ;;  %v15999_v53 = vand.u32 2147483647, %v10035_v51  ;;  %v533_v54 = vand.u32 2139095040, %v10035_v51  ;;  %v10040_v55 = vadd.f32 %v10032_v49, %v267_v52 }
  0xc8   :  { %v8625_v61 = vpop.f32.mrf.mxu0 }
  0xc9   :  { %v534_v56 = vshrl.u32 %v533_v54, 23  ;;  %v537_v57 = vand.u32 8388607, %v15999_v53  ;;  %v429_v58 = vand.u32 2139095040, %v10040_v55  ;;  %v15998_v60 = vand.u32 2147483647, %v10040_v55 }
  0xca   :  { %v10047_v2 = vadd.f32 %v8625_v61, %v10032_v49 }
  0xcb   :  { %v8168_v59 = vadd.s32 4294967169, %v534_v56  ;;  %v430_v62 = vshrl.u32 %v429_v58, 23  ;;  %v538_v0 = vor.u32 8388608, %v537_v57  ;;  %v10051_v4 = vand.u32 8388607, %v15998_v60 }
  0xcc   :  { %v741_v13 = vand.u32 2139095040, %v10047_v2 }
  0xcd   :  { %v540_v63 = vadd.s32 1, %v8168_v59  ;;  %v8164_v1 = vadd.s32 4294967169, %v430_v62  ;;  %v10053_v10 = vshll.u32 %v538_v0, 8  ;;  %v434_v18 = vor.u32 8388608, %v10051_v4 }
  0xcf   :  { %vm541_vm1 = vcmp.gt.s32.totalorder %v540_v63, 0  ;;  %v436_v6 = vadd.s32 1, %v8164_v1 }
  0xd0   :  { %v542_v5 = vsel %vm541_vm1, %v540_v63, 0 }
  0xd1   :  { %v543_v8 = vshrl.u32 %v542_v5, 5  ;;  %v544_v9 = vand.u32 31, %v542_v5  ;;  %vm437_vm2 = vcmp.gt.s32.totalorder %v436_v6, 0 }
  0xd2   :  { %v438_v46 = vsel %vm437_vm2, %v436_v6, 0  ;;  %v742_v6 = vshrl.u32 %v741_v13, 23 }
  0xd3   :  { %v545_v14 = vsub.s32 32, %v544_v9  ;;  %v547_v17 = vshll.u32 %v16015_v15, %v544_v9  ;;  %v550_v22 = vshll.u32 %v16009_v19, %v544_v9  ;;  %v553_v24 = vshll.u32 %v16003_v23, %v544_v9 }
  0xd4   :  { %v556_v27 = vshll.u32 %v16005_v26, %v544_v9  ;;  %v559_v31 = vshll.u32 %v16007_v28, %v544_v9  ;;  %vm562_vm3 = vcmp.lt.s32.totalorder %v543_v8, 1  ;;  %vm564_vm4 = vcmp.lt.s32.totalorder %v543_v8, 3 }
  0xd5   :  { %v548_v32 = vshrl.u32 %v16009_v19, %v545_v14  ;;  %v551_v33 = vshrl.u32 %v16003_v23, %v545_v14  ;;  %v554_v35 = vshrl.u32 %v16005_v26, %v545_v14  ;;  %v546_v36 = vshrl.u32 %v16015_v15, %v545_v14 }
  0xd6   :  { %v557_v37 = vshrl.u32 %v16007_v28, %v545_v14  ;;  %v560_v41 = vshrl.u32 %v16000_v40, %v545_v14  ;;  %vm565_vm5 = vcmp.lt.s32.totalorder %v543_v8, 4  ;;  %v440_v54 = vand.u32 31, %v438_v46 }
  0xd7   :  { %v549_v42 = vor.u32 %v548_v32, %v547_v17  ;;  %v552_v44 = vor.u32 %v551_v33, %v550_v22  ;;  %v555_v45 = vor.u32 %v554_v35, %v553_v24  ;;  %vm563_vm6 = vcmp.lt.s32.totalorder %v543_v8, 2 }
  0xd8   :  { %v558_v50 = vor.u32 %v557_v37, %v556_v27  ;;  %v561_v52 = vor.u32 %v560_v41, %v559_v31  ;;  %v441_v0 = vsub.s32 32, %v440_v54  ;;  %v10075_v22 = vshrl.u32 %v438_v46, 5 }
  0xd9   :  { %v566_v56 = vsel %vm562_vm3, %v546_v36, %v549_v42  ;;  %v567_v57 = vsel %vm565_vm5, %v555_v45, 2102212464  ;;  %v570_v58 = vsel %vm562_vm3, %v549_v42, %v552_v44  ;;  %v574_v59 = vsel %vm562_vm3, %v552_v44, %v555_v45 }
  0xda   :  { %v568_v61 = vsel %vm564_vm4, %v552_v44, %v567_v57  ;;  %v571_v62 = vsel %vm565_vm5, %v558_v50, 920167782  ;;  %v575_v63 = vsel %vm565_vm5, %v561_v52, 1326507024  ;;  %v443_v33 = vshll.u32 %v16015_v15, %v440_v54 }
  0xdb   :  { %v572_v1 = vsel %vm564_vm4, %v555_v45, %v571_v62  ;;  %v576_v5 = vsel %vm564_vm4, %v558_v50, %v575_v63  ;;  %v569_v9 = vsel %vm563_vm6, %v566_v56, %v568_v61  ;;  %v444_v8 = vshrl.u32 %v16009_v19, %v441_v0 }
  0xdc   :  { %v573_v14 = vsel %vm563_vm6, %v570_v58, %v572_v1  ;;  %v577_v17 = vsel %vm563_vm6, %v574_v59, %v576_v5  ;;  %v446_v13 = vshll.u32 %v16009_v19, %v440_v54  ;;  %v447_v35 = vshrl.u32 %v16003_v23, %v441_v0 }
  0xdd   :  { %v10078_v24 = vmul.u32.u64.low %v10053_v10, %v577_v17  ;;  %v10079_v27 = vmul.u32.u64.high %v10053_v10, %v577_v17, %v10078_v24  ;;  %v10082_v31 = vmul.u32.u64.low %v10053_v10, %v573_v14  ;;  %v10083_v32 = vmul.u32.u64.high %v10053_v10, %v573_v14, %v10082_v31 }
  0xde   :  { %v449_v36 = vshll.u32 %v16003_v23, %v440_v54  ;;  %v450_v37 = vshrl.u32 %v16005_v26, %v441_v0  ;;  %v452_v41 = vshll.u32 %v16005_v26, %v440_v54  ;;  %v453_v42 = vshrl.u32 %v16007_v28, %v441_v0 }
  0xdf   :  { %v445_v44 = vor.u32 %v444_v8, %v443_v33  ;;  %v448_v45 = vor.u32 %v447_v35, %v446_v13  ;;  %v455_v46 = vshll.u32 %v16007_v28, %v440_v54  ;;  %v456_v50 = vshrl.u32 %v16000_v40, %v441_v0 }
  0xe0   :  { %vm587_vm7 = vc.u32 %v10079_v27, %v10082_v31  ;;  %v588_v52 = vadd.s32 1, %v10083_v32  ;;  %v451_v56 = vor.u32 %v450_v37, %v449_v36  ;;  %v8176_v57 = vadd.s32 4294967169, %v742_v6  ;;  %v277_v36 = vpop.f32.mrf.mxu0 }
  0xe1   :  { %v585_v58 = vmul.u32 %v10053_v10, %v569_v9  ;;  %v454_v59 = vor.u32 %v453_v42, %v452_v41  ;;  %v457_v61 = vor.u32 %v456_v50, %v455_v46  ;;  %vm458_vm8 = vcmp.lt.s32.totalorder %v10075_v22, 1 }
  0xe2   :  { %v589_v62 = vsel %vm587_vm7, %v588_v52, %v10083_v32  ;;  %vm461_vm9 = vcmp.lt.s32.totalorder %v10075_v22, 4  ;;  %v466_v54 = vsel %vm458_vm8, %v445_v44, %v448_v45  ;;  %vm460_vm10 = vcmp.lt.s32.totalorder %v10075_v22, 3 }
  0xe3   :  { %v590_v63 = vadd.s32 %v589_v62, %v585_v58  ;;  %v467_v1 = vsel %vm461_vm9, %v454_v59, 920167782  ;;  %v470_v10 = vsel %vm458_vm8, %v448_v45, %v451_v56  ;;  %vm459_vm11 = vcmp.lt.s32.totalorder %v10075_v22, 2 }
  0xe4   :  { %v468_v5 = vsel %vm460_vm10, %v451_v56, %v467_v1  ;;  %v471_v6 = vsel %vm461_vm9, %v457_v61, 1326507024  ;;  %v748_v9 = vadd.s32 1, %v8176_v57  ;;  %v474_v32 = vshll.u32 %v434_v18, 8 }
  0xe5   :  { %v591_v14 = vadd.s32 536870912, %v590_v63  ;;  %v469_v17 = vsel %vm459_vm11, %v466_v54, %v468_v5  ;;  %v472_v24 = vsel %vm460_vm10, %v454_v59, %v471_v6  ;;  %v15997_v8 = vand.u32 2147483647, %v10047_v2 }
  0xe6   :  { %v473_v33 = vsel %vm459_vm11, %v470_v10, %v472_v24  ;;  %v10124_v13 = vmul.u32.u64.low %v474_v32, %v469_v17  ;;  %v10125_v35 = vmul.u32.u64.high %v474_v32, %v469_v17, %v10124_v13  ;;  %vm749_vm12 = vcmp.gt.s32.totalorder %v748_v9, 0 }
  0xe7   :  { %v463_v37 = vsel %vm461_vm9, %v451_v56, 2102212464  ;;  %v750_v41 = vsel %vm749_vm12, %v748_v9, 0  ;;  %v10130_v42 = vshrl.u32 %v591_v14, 30  ;;  %v442_v50 = vshrl.u32 %v16015_v15, %v441_v0 }
  0xe8   :  { %v10132_v46 = vmul.u32.u64.low %v474_v32, %v473_v33  ;;  %v10133_v4 = vmul.u32.u64.high %v474_v32, %v473_v33, %v10132_v46  ;;  %v752_v18 = vand.u32 31, %v750_v41  ;;  %v745_v52 = vand.u32 8388607, %v15997_v8 }
  0xe9   :  { %v10139_v57 = vadd.f32 %v10032_v49, %v277_v36  ;;  %v462_v58 = vsel %vm458_vm8, %v442_v50, %v445_v44  ;;  %v464_v56 = vsel %vm460_vm10, %v448_v45, %v463_v37  ;;  %v593_v61 = vshll.u32 %v10130_v42, 30 }
  0xea   :  { %v753_v59 = vsub.s32 32, %v752_v18  ;;  %v746_v62 = vor.u32 8388608, %v745_v52  ;;  %v465_v10 = vsel %vm459_vm11, %v462_v58, %v464_v56  ;;  %v484_v5 = vadd.s32 1, %v10125_v35 }
  0xeb   :  { %v637_v1 = vand.u32 2139095040, %v10139_v57  ;;  %v751_v6 = vshrl.u32 %v750_v41, 5  ;;  %v755_v44 = vshll.u32 %v16015_v15, %v752_v18  ;;  %v758_v45 = vshll.u32 %v16009_v19, %v752_v18 }
  0xec   :  { %v756_v54 = vshrl.u32 %v16009_v19, %v753_v59  ;;  %v759_v0 = vshrl.u32 %v16003_v23, %v753_v59  ;;  %v762_v9 = vshrl.u32 %v16005_v26, %v753_v59  ;;  %v764_v14 = vshll.u32 %v16005_v26, %v752_v18 }
  0xed   :  { %v765_v17 = vshrl.u32 %v16007_v28, %v753_v59  ;;  %v10157_v24 = vsub.s32 %v590_v63, %v593_v61  ;;  %vm483_vm13 = vc.u32 %v10133_v4, %v10124_v13  ;;  %v761_v22 = vshll.u32 %v16003_v23, %v752_v18 }
  0xee   :  { %v768_v33 = vshrl.u32 %v16000_v40, %v753_v59  ;;  %v757_v36 = vor.u32 %v756_v54, %v755_v44  ;;  %v760_v37 = vor.u32 %v759_v0, %v758_v45  ;;  %v767_v46 = vshll.u32 %v16007_v28, %v752_v18 }
  0xef   :  { %v766_v41 = vor.u32 %v765_v17, %v764_v14  ;;  %v638_v50 = vshrl.u32 %v637_v1, 23  ;;  %v485_v52 = vsel %vm483_vm13, %v484_v5, %v10125_v35  ;;  %v763_v58 = vor.u32 %v762_v9, %v761_v22 }
  0xf0   :  { %v769_v56 = vor.u32 %v768_v33, %v767_v46  ;;  %v596_v63 = vsub.s32 0, %v10157_v24  ;;  %v481_v61 = vmul.u32 %v474_v32, %v465_v10  ;;  %vm770_vm14 = vcmp.lt.s32.totalorder %v751_v6, 1 }
  0xf1   :  { %vm773_vm15 = vcmp.lt.s32.totalorder %v751_v6, 4  ;;  %v778_v8 = vsel %vm770_vm14, %v757_v36, %v760_v37  ;;  %v786_v53 = vshll.u32 %v746_v62, 8  ;;  %vm771_vm1 = vcmp.lt.s32.totalorder %v751_v6, 2 }
  0xf2   :  { %v779_v60 = vsel %vm773_vm15, %v766_v41, 920167782  ;;  %v486_v40 = vadd.s32 %v485_v52, %v481_v61  ;;  %vm772_vm2 = vcmp.lt.s32.totalorder %v751_v6, 3  ;;  %v8172_v54 = vadd.s32 4294967169, %v638_v50 }
  0xf3   :  { %v775_v0 = vsel %vm773_vm15, %v763_v58, 2102212464  ;;  %v780_v18 = vsel %vm772_vm2, %v763_v58, %v779_v60  ;;  %v782_v1 = vsel %vm770_vm14, %v760_v37, %v763_v58  ;;  %v783_v35 = vsel %vm773_vm15, %v769_v56, 1326507024 }
  0xf4   :  { %v8169_v5 = vmin.u32 %v596_v63, %v10157_v24  ;;  %v754_v44 = vshrl.u32 %v16015_v15, %v753_v59  ;;  %v781_v32 = vsel %vm771_vm1, %v778_v8, %v780_v18  ;;  %v784_v10 = vsel %vm772_vm2, %v766_v41, %v783_v35 }
  0xf5   :  { %v10171_v45 = vmul.u32.u64.low %v786_v53, %v781_v32  ;;  %v10172_v9 = vmul.u32.u64.high %v786_v53, %v781_v32, %v10171_v45  ;;  %v776_v14 = vsel %vm772_vm2, %v760_v37, %v775_v0  ;;  %v785_v17 = vsel %vm771_vm1, %v782_v1, %v784_v10 }
  0xf6   :  { %v774_v62 = vsel %vm770_vm14, %v754_v44, %v757_v36  ;;  %v487_v60 = vadd.s32 536870912, %v486_v40  ;;  %v10177_v22 = vmul.u32.u64.low %v786_v53, %v785_v17  ;;  %v10178_v33 = vmul.u32.u64.high %v786_v53, %v785_v17, %v10177_v22 }
  0xf7   :  { %v644_v46 = vadd.s32 1, %v8172_v54  ;;  %v598_v50 = vclz %v8169_v5  ;;  %v777_v59 = vsel %vm771_vm1, %v774_v62, %v776_v14  ;;  %v796_v8 = vadd.s32 1, %v10172_v9  ;;  %v8628_v62 = vpop.f32.mrf.mxu0 }
  0xf8   :  { %v16002_v41 = vand.u32 2147483647, %v10139_v57  ;;  %v10183_v58 = vshrl.u32 %v487_v60, 30  ;;  %vm795_vm4 = vc.u32 %v10178_v33, %v10171_v45  ;;  %v793_v37 = vmul.u32 %v786_v53, %v777_v59 }
  0xf9   :  { %vm645_vm3 = vcmp.gt.s32.totalorder %v644_v46, 0  ;;  %v8170_v36 = vadd.s32 4294967294, %v598_v50  ;;  %v797_v56 = vsel %vm795_vm4, %v796_v8, %v10172_v9  ;;  %vm532_vm12 = vcmp.lt.s32.totalorder %v10035_v51, 0 }
  0xfa   :  { %v646_v52 = vsel %vm645_vm3, %v644_v46, 0  ;;  %v798_v61 = vadd.s32 %v797_v56, %v793_v37  ;;  %v641_v6 = vand.u32 8388607, %v16002_v41  ;;  %v489_v54 = vshll.u32 %v10183_v58, 30 }
  0xfb   :  { %v648_v63 = vand.u32 31, %v646_v52  ;;  %vm8171_vm5 = vcmp.lt.s32.totalorder %v8170_v36, 0  ;;  %v647_v10 = vshrl.u32 %v646_v52, 5  ;;  %v10209_v56 = vadd.f32 %v8628_v62, %v10032_v49 }
  0xfc   :  { %v799_v18 = vadd.s32 536870912, %v798_v61  ;;  %v642_v35 = vor.u32 8388608, %v641_v6  ;;  %v10195_v53 = vsel %vm8171_vm5, 0, %v8170_v36  ;;  %v10197_v32 = vsub.s32 %v486_v40, %v489_v54 }
  0xfd   :  { %v649_v0 = vsub.s32 32, %v648_v63  ;;  %v651_v17 = vshll.u32 %v16015_v15, %v648_v63  ;;  %v654_v60 = vshll.u32 %v16009_v19, %v648_v63  ;;  %v657_v22 = vshll.u32 %v16003_v23, %v648_v63 }
  0xfe   :  { %v10191_v1 = vshrl.u32 %v799_v18, 30  ;;  %v660_v46 = vshll.u32 %v16005_v26, %v648_v63  ;;  %v663_v59 = vshll.u32 %v16007_v28, %v648_v63  ;;  %v16194_v40 = vmov 1326507024  }
  0xff   :  { %v652_v5 = vshrl.u32 %v16009_v19, %v649_v0  ;;  %v655_v44 = vshrl.u32 %v16003_v23, %v649_v0  ;;  %v658_v9 = vshrl.u32 %v16005_v26, %v649_v0  ;;  %v661_v50 = vshrl.u32 %v16007_v28, %v649_v0 }
 0x100   :  { %v801_v14 = vshll.u32 %v10191_v1, 30  ;;  %v664_v8 = vshrl.u32 %v16194_v40, %v649_v0  ;;  %v606_v18 = vsub.s32 4294967266, %v10195_v53  ;;  %v492_v41 = vsub.s32 0, %v10197_v32 }
 0x101   :  { %v653_v52 = vor.u32 %v652_v5, %v651_v17  ;;  %v656_v36 = vor.u32 %v655_v44, %v654_v60  ;;  %v659_v37 = vor.u32 %v658_v9, %v657_v22  ;;  %v662_v6 = vor.u32 %v661_v50, %v660_v46 }
 0x102   :  { %v665_v54 = vor.u32 %v664_v8, %v663_v59  ;;  %v10213_v23 = vsub.s32 %v798_v61, %v801_v14  ;;  %vm669_vm6 = vcmp.lt.s32.totalorder %v647_v10, 4  ;;  %v602_v26 = vsub.s32 32, %v10195_v53 }
 0x103   :  { %vm666_vm7 = vcmp.lt.s32.totalorder %v647_v10, 1  ;;  %v675_v63 = vsel %vm669_vm6, %v662_v6, 920167782  ;;  %v682_v28 = vshll.u32 %v642_v35, 8  ;;  %vm668_vm8 = vcmp.lt.s32.totalorder %v647_v10, 3 }
 0x104   :  { %v671_v5 = vsel %vm669_vm6, %v659_v37, 2102212464  ;;  %v674_v44 = vsel %vm666_vm7, %v653_v52, %v656_v36  ;;  %v949_v9 = vand.u32 2139095040, %v10209_v56  ;;  %v650_v62 = vshrl.u32 %v16015_v15, %v649_v0 }
 0x105   :  { %v676_v17 = vsel %vm668_vm8, %v659_v37, %v675_v63  ;;  %v678_v60 = vsel %vm666_vm7, %v656_v36, %v659_v37  ;;  %v679_v22 = vsel %vm669_vm6, %v665_v54, 1326507024  ;;  %v607_v46 = vadd.s32 127, %v606_v18 }
 0x106   :  { %v8165_v61 = vmin.u32 %v492_v41, %v10197_v32  ;;  %v804_v14 = vsub.s32 0, %v10213_v23  ;;  %vm667_vm9 = vcmp.lt.s32.totalorder %v647_v10, 2  ;;  %v670_v50 = vsel %vm666_vm7, %v650_v62, %v653_v52  ;;  %v287_v41 = vpop.f32.mrf.mxu0 }
 0x107   :  { %v672_v59 = vsel %vm668_vm8, %v656_v36, %v671_v5  ;;  %v677_v8 = vsel %vm667_vm9, %v674_v44, %v676_v17  ;;  %v680_v35 = vsel %vm668_vm8, %v662_v6, %v679_v22  ;;  %v586_v19 = vadd.s32 %v10082_v31, %v10079_v27 }
 0x108   :  { %v681_v48 = vsel %vm667_vm9, %v678_v60, %v680_v35  ;;  %v10222_v47 = vmul.u32.u64.low %v682_v28, %v677_v8  ;;  %v10223_v43 = vmul.u32.u64.high %v682_v28, %v677_v8, %v10222_v47  ;;  %v950_v54 = vshrl.u32 %v949_v9, 23 }
 0x109   :  { %v10226_v0 = vmul.u32.u64.low %v682_v28, %v681_v48  ;;  %v10227_v37 = vmul.u32.u64.high %v682_v28, %v681_v48, %v10226_v0  ;;  %v604_v18 = vshrl.u32 %v586_v19, %v602_v26  ;;  %v608_v63 = vshll.u32 %v607_v46, 23 }
 0x10a   :  { %v673_v10 = vsel %vm667_vm9, %v670_v50, %v672_v59  ;;  %v494_v52 = vclz %v8165_v61  ;;  %v8177_v36 = vmin.u32 %v804_v14, %v10213_v23  ;;  %v8184_v6 = vadd.s32 4294967169, %v950_v54 }
 0x10b   :  { %v603_v27 = vshll.u32 %v10157_v24, %v10195_v53  ;;  %v692_v31 = vadd.s32 1, %v10223_v43  ;;  %v10234_v5 = vadd.f32 %v10032_v49, %v287_v41  ;;  %v616_v48 = vsub.s32 4, %v10130_v42 }
 0x10c   :  { %v689_v44 = vmul.u32 %v682_v28, %v673_v10  ;;  %vm691_vm10 = vc.u32 %v10227_v37, %v10222_v47  ;;  %v956_v19 = vadd.s32 1, %v8184_v6  ;;  %v609_v9 = vor.u32 4788187, %v608_v63 }
 0x10d   :  { %v605_v26 = vor.u32 %v604_v18, %v603_v27  ;;  %v693_v62 = vsel %vm691_vm10, %v692_v31, %v10223_v43  ;;  %v8166_v17 = vadd.s32 4294967294, %v494_v52  ;;  %v806_v60 = vclz %v8177_v36 }
 0x10e   :  { %v694_v22 = vadd.s32 %v693_v62, %v689_v44  ;;  %vm957_vm11 = vcmp.gt.s32.totalorder %v956_v19, 0  ;;  %v16014_v24 = vand.u32 2147483647, %v10209_v56  ;;  %v845_v46 = vand.u32 2139095040, %v10234_v5 }
 0x10f   :  { %v958_v53 = vsel %vm957_vm11, %v956_v19, 0  ;;  %v10246_v28 = vsel %vm532_vm12, %v616_v48, %v10130_v42  ;;  %vm428_vm13 = vcmp.lt.s32.totalorder %v10040_v55, 0  ;;  %v610_v14 = vand.u32 2147483647, %v609_v9 }
 0x110   :  { %v695_v61 = vadd.s32 536870912, %v694_v22  ;;  %v960_v43 = vand.u32 31, %v958_v53  ;;  %v612_v50 = vcvt.s32.f32 %v605_v26  ;;  %v482_v59 = vadd.s32 %v10124_v13, %v10133_v4 }
 0x111   :  { %v512_v8 = vsub.s32 4, %v10183_v58  ;;  %vm8167_vm14 = vcmp.lt.s32.totalorder %v8166_v17, 0  ;;  %v8178_v35 = vadd.s32 4294967294, %v806_v60  ;;  %v953_v42 = vand.u32 8388607, %v16014_v24 }
 0x112   :  { %v10252_v0 = vshrl.u32 %v695_v61, 30  ;;  %v961_v54 = vsub.s32 32, %v960_v43  ;;  %v10256_v41 = vshrl.u32 %v958_v53, 5  ;;  %v963_v18 = vshll.u32 %v16015_v15, %v960_v43 }
 0x113   :  { %v846_v63 = vshrl.u32 %v845_v46, 23  ;;  %v16195_v52 = vmov 2475754826   ;;  %v16196_v4 = vmov 2131351028   ;;  %v497_v9 = vsel %vm8167_vm14, 0, %v8166_v17 }
 0x114   :  { %v697_v10 = vshll.u32 %v10252_v0, 30  ;;  %v964_v36 = vshrl.u32 %v16195_v52, %v961_v54  ;;  %v966_v13 = vshll.u32 %v16195_v52, %v960_v43  ;;  %v969_v6 = vshll.u32 %v16196_v4, %v960_v43 }
 0x115   :  { %v967_v27 = vshrl.u32 %v16196_v4, %v961_v54  ;;  %v16197_v31 = vmov 2102212464   ;;  %v16198_v19 = vmov 920167782   ;;  %v976_v53 = vshrl.u32 %v16194_v40, %v961_v54 }
 0x116   :  { %v970_v48 = vshrl.u32 %v16197_v31, %v961_v54  ;;  %v972_v44 = vshll.u32 %v16197_v31, %v960_v43  ;;  %v973_v26 = vshrl.u32 %v16198_v19, %v961_v54  ;;  %v10268_v62 = vsub.s32 %v694_v22, %v697_v10 }
 0x117   :  { %v975_v60 = vshll.u32 %v16198_v19, %v960_v43  ;;  %v613_v46 = vmul.f32 %v612_v50, %v610_v14  ;;  %v10275_v61 = vsel %vm428_vm13, %v512_v8, %v10183_v58  ;;  %vm8179_vm15 = vcmp.lt.s32.totalorder %v8178_v35, 0 }
 0x118   :  { %v8180_v24 = vadd.s32 4294967169, %v846_v63  ;;  %v700_v15 = vsub.s32 0, %v10268_v62  ;;  %v954_v39 = vor.u32 8388608, %v953_v42  ;;  %v965_v38 = vor.u32 %v964_v36, %v963_v18 }
 0x119   :  { %v968_v34 = vor.u32 %v967_v27, %v966_v13  ;;  %v498_v17 = vsub.s32 32, %v497_v9  ;;  %v971_v22 = vor.u32 %v970_v48, %v969_v6  ;;  %v974_v10 = vor.u32 %v973_v26, %v972_v44 }
 0x11a   :  { %vm978_vm1 = vcmp.lt.s32.totalorder %v10256_v41, 1  ;;  %v16199_v43 = vand.u32 2147483647, %v10035_v51  ;;  %v16202_v58 = vand.u32 2147483647, %v10040_v55  ;;  %v10291_v8 = vsel %vm8179_vm15, 0, %v8178_v35 }
 0x11b   :  { %v8173_v42 = vmin.u32 %v700_v15, %v10268_v62  ;;  %v977_v18 = vor.u32 %v976_v53, %v975_v60  ;;  %vm981_vm4 = vcmp.lt.s32.totalorder %v10256_v41, 4  ;;  %v499_v63 = vshll.u32 %v10197_v32, %v497_v9 }
 0x11c   :  { %vm10281_vm2 = vcmp.le.f32.partialorder %v16199_v43, 0.7853982  ;;  %vm10287_vm3 = vcmp.le.f32.partialorder %v16202_v58, 0.7853982  ;;  %v502_v36 = vsub.s32 4294967266, %v497_v9  ;;  %vm980_vm5 = vcmp.lt.s32.totalorder %v10256_v41, 3 }
 0x11d   :  { %v852_v13 = vadd.s32 1, %v8180_v24  ;;  %v614_v6 = vxor.u32 2147483648, %v613_v46  ;;  %vm979_vm6 = vcmp.lt.s32.totalorder %v10256_v41, 2  ;;  %v986_v27 = vsel %vm978_vm1, %v965_v38, %v968_v34 }
 0x11e   :  { %v994_v48 = vshll.u32 %v954_v39, 8  ;;  %v500_v35 = vshrl.u32 %v482_v59, %v498_v17  ;;  %v814_v44 = vsub.s32 4294967266, %v10291_v8  ;;  %v987_v15 = vsel %vm981_vm4, %v974_v10, 920167782 }
 0x11f   :  { %v990_v32 = vsel %vm978_vm1, %v968_v34, %v971_v22  ;;  %v702_v26 = vclz %v8173_v42  ;;  %v16205_v9 = vmov 683565275   ;;  %v988_v24 = vsel %vm980_vm5, %v971_v22, %v987_v15 }
 0x120   :  { %v962_v60 = vshrl.u32 %v16205_v9, %v961_v54  ;;  %v991_v53 = vsel %vm981_vm4, %v977_v18, 1326507024  ;;  %v983_v39 = vsel %vm981_vm4, %v971_v22, 2102212464  ;;  %v989_v59 = vsel %vm979_vm6, %v986_v27, %v988_v24 }
 0x121   :  { %v992_v17 = vsel %vm980_vm5, %v974_v10, %v991_v53  ;;  %vm853_vm7 = vcmp.gt.s32.totalorder %v852_v13, 0  ;;  %v503_v43 = vadd.s32 127, %v502_v36  ;;  %v810_v18 = vsub.s32 32, %v10291_v8 }
 0x122   :  { %v993_v54 = vsel %vm979_vm6, %v990_v32, %v992_v17  ;;  %v10318_v58 = vmul.u32.u64.low %v994_v48, %v989_v59  ;;  %v10319_v42 = vmul.u32.u64.high %v994_v48, %v989_v59, %v10318_v58  ;;  %v854_v22 = vsel %vm853_vm7, %v852_v13, 0 }
 0x123   :  { %v10323_v15 = vmul.u32.u64.low %v994_v48, %v993_v54  ;;  %v10324_v30 = vmul.u32.u64.high %v994_v48, %v993_v54, %v10323_v15  ;;  %v815_v29 = vadd.s32 127, %v814_v44  ;;  %v8174_v27 = vadd.s32 4294967294, %v702_v26 }
 0x124   :  { %v982_v10 = vsel %vm978_vm1, %v962_v60, %v965_v38  ;;  %v984_v36 = vsel %vm980_vm5, %v968_v34, %v983_v39  ;;  %v619_v32 = vsel %vm10281_vm2, 0, %v10246_v28  ;;  %v515_v24 = vsel %vm10287_vm3, 0, %v10275_v61 }
 0x125   :  { %v794_v53 = vadd.s32 %v10171_v45, %v10178_v33  ;;  %v856_v13 = vand.u32 31, %v854_v22  ;;  %v615_v44 = vsel %vm532_vm12, %v614_v6, %v613_v46  ;;  %v501_v26 = vor.u32 %v500_v35, %v499_v63 }
 0x126   :  { %v1004_v38 = vadd.s32 1, %v10319_v42  ;;  %v16022_v34 = vand.u32 2147483647, %v10234_v5  ;;  %v504_v60 = vshll.u32 %v503_v43, 23  ;;  %v985_v39 = vsel %vm979_vm6, %v982_v10, %v984_v36 }
 0x127   :  { %vm1003_vm8 = vc.u32 %v10324_v30, %v10318_v58  ;;  %v10346_v59 = vsub.s32 32, %v856_v13  ;;  %v812_v17 = vshrl.u32 %v794_v53, %v810_v18  ;;  %v816_v45 = vshll.u32 %v815_v29, 23 }
 0x128   :  { %vm8175_vm9 = vcmp.lt.s32.totalorder %v8174_v27, 0  ;;  %v859_v33 = vshll.u32 %v16205_v9, %v856_v13  ;;  %v1005_v46 = vsel %vm1003_vm8, %v1004_v38, %v10319_v42  ;;  %v862_v6 = vshll.u32 %v16195_v52, %v856_v13 }
 0x129   :  { %v860_v63 = vshrl.u32 %v16195_v52, %v10346_v59  ;;  %v863_v41 = vshrl.u32 %v16196_v4, %v10346_v59  ;;  %v811_v35 = vshll.u32 %v10213_v23, %v10291_v8  ;;  %v1001_v43 = vmul.u32 %v994_v48, %v985_v39 }
 0x12a   :  { %v849_v29 = vand.u32 8388607, %v16022_v34  ;;  %v10359_v54 = vshrl.u32 %v854_v22, 5  ;;  %v505_v18 = vor.u32 4788187, %v504_v60  ;;  %v10361_v15 = vsel %vm8175_vm9, 0, %v8174_v27 }
 0x12b   :  { %v865_v42 = vshll.u32 %v16196_v4, %v856_v13  ;;  %v866_v10 = vshrl.u32 %v16197_v31, %v10346_v59  ;;  %v813_v36 = vor.u32 %v812_v17, %v811_v35  ;;  %v817_v53 = vor.u32 4788187, %v816_v45  ;;  %v8631_v45 = vpop.f32.mrf.mxu0 }
 0x12c   :  { %v10366_v38 = vadd.s32 %v1005_v46, %v1001_v43  ;;  %v868_v23 = vshll.u32 %v16197_v31, %v856_v13  ;;  %v10369_v8 = vor.u32 %v860_v63, %v859_v33  ;;  %v10371_v48 = vor.u32 %v863_v41, %v862_v6 }
 0x12d   :  { %v869_v22 = vshrl.u32 %v16198_v19, %v10346_v59  ;;  %v871_v27 = vshll.u32 %v16198_v19, %v856_v13  ;;  %v710_v60 = vsub.s32 4294967266, %v10361_v15  ;;  %v850_v39 = vor.u32 8388608, %v849_v29 }
 0x12e   :  { %v872_v17 = vshrl.u32 %v16194_v40, %v10346_v59  ;;  %vm874_vm10 = vcmp.lt.s32.totalorder %v10359_v54, 1  ;;  %v506_v46 = vand.u32 2147483647, %v505_v18  ;;  %v508_v35 = vcvt.s32.f32 %v501_v26 }
 0x12f   :  { %v867_v33 = vor.u32 %v866_v10, %v865_v42  ;;  %v870_v63 = vor.u32 %v869_v22, %v868_v23  ;;  %v818_v6 = vand.u32 2147483647, %v817_v53  ;;  %vm876_vm11 = vcmp.lt.s32.totalorder %v10359_v54, 3 }
 0x130   :  { %v873_v41 = vor.u32 %v872_v17, %v871_v27  ;;  %vm877_vm12 = vcmp.lt.s32.totalorder %v10359_v54, 4  ;;  %v1007_v13 = vadd.s32 536870912, %v10366_v38  ;;  %vm875_vm14 = vcmp.lt.s32.totalorder %v10359_v54, 2 }
 0x131   :  { %v882_v43 = vsel %vm874_vm10, %v10369_v8, %v10371_v48  ;;  %v10389_v29 = vadd.f32 %v8631_v45, %v10032_v49  ;;  %v820_v26 = vcvt.s32.f32 %v813_v36  ;;  %v711_v18 = vadd.s32 127, %v710_v60 }
 0x132   :  { %v883_v42 = vsel %vm877_vm12, %v870_v63, 920167782  ;;  %v10393_v10 = vshll.u32 %v850_v39, 8  ;;  %v618_v53 = vsel %vm10281_vm2, %v10035_v51, %v615_v44  ;;  %v509_v23 = vmul.f32 %v508_v35, %v506_v46 }
 0x133   :  { %16206 = vst [vmem:[#allocation19_spill] sm:$0xff] %v10389_v29  ;;  %vm740_vm15 = vcmp.lt.s32.totalorder %v10047_v2, 0  ;;  %v884_v22 = vsel %vm876_vm11, %v867_v33, %v883_v42  ;;  %v886_v36 = vsel %vm874_vm10, %v10371_v48, %v867_v33  ;;  %v821_v27 = vmul.f32 %v820_v26, %v818_v6 }
 0x134   :  { %vm636_vm1 = vcmp.lt.s32.totalorder %v10139_v57, 0  ;;  %v706_v60 = vsub.s32 32, %v10361_v15  ;;  %v885_v39 = vsel %vm875_vm14, %v882_v43, %v884_v22  ;;  %v887_v44 = vsel %vm877_vm12, %v873_v41, 1326507024 }
 0x135   :  { %v690_v17 = vadd.s32 %v10222_v47, %v10227_v37  ;;  %v10412_v45 = vshrl.u32 %v1007_v13, 30  ;;  %v888_v46 = vsel %vm876_vm11, %v870_v63, %v887_v44  ;;  %v1157_v35 = vand.u32 2139095040, %v10389_v29 }
 0x136   :  { %v16208_v6 = vand.u32 2147483647, %v10047_v2  ;;  %v712_v43 = vshll.u32 %v711_v18, 23  ;;  %v889_v41 = vsel %vm875_vm14, %v886_v36, %v888_v46  ;;  %v858_v37 = vshrl.u32 %v16205_v9, %v10346_v59 }
 0x137   :  { %16207 = vst [vmem:[#allocation20_spill] sm:$0xff] %v10412_v45  ;;  %v10426_v42 = vmul.u32.u64.low %v10393_v10, %v885_v39  ;;  %v10427_v47 = vmul.u32.u64.high %v10393_v10, %v885_v39, %v10426_v42  ;;  %v10433_v63 = vmul.u32.u64.low %v10393_v10, %v889_v41  ;;  %v10434_v13 = vmul.u32.u64.high %v10393_v10, %v889_v41, %v10433_v63 }
 0x138   :  { %vm10419_vm4 = vcmp.le.f32.partialorder %v16208_v6, 0.7853982  ;;  %v1158_v22 = vshrl.u32 %v1157_v35, 23  ;;  %v822_v44 = vxor.u32 2147483648, %v821_v27  ;;  %v824_v6 = vsub.s32 4, %v10191_v1 }
 0x139   :  { %v16211_v18 = vand.u32 2147483647, %v10139_v57  ;;  %v708_v39 = vshrl.u32 %v690_v17, %v706_v60  ;;  %v879_v46 = vsel %vm877_vm12, %v867_v33, 2102212464  ;;  %v510_v34 = vxor.u32 2147483648, %v509_v23 }
 0x13a   :  { %v720_v59 = vsub.s32 4, %v10252_v0  ;;  %v1009_v41 = vshll.u32 %v10412_v45, 30  ;;  %v8192_v63 = vadd.s32 4294967169, %v1158_v22  ;;  %v10451_v35 = vadd.s32 3, %v619_v32  ;;  %v297_v32 = vpop.f32.mrf.mxu0 }
 0x13b   :  { %vm10439_vm5 = vcmp.le.f32.partialorder %v16211_v18, 0.7853982  ;;  %v10457_v60 = vadd.s32 3, %v515_v24  ;;  %v707_v33 = vshll.u32 %v10268_v62, %v10361_v15  ;;  %v713_v17 = vor.u32 4788187, %v712_v43 }
 0x13c   :  { %16214 = vst [vmem:[#allocation21_spill] sm:$0xff] %v10451_v35  ;;  %9261 = vcosq.f32 %v618_v53  ;;  %v878_v22 = vsel %vm874_vm10, %v858_v37, %v10369_v8  ;;  %v880_v28 = vsel %vm876_vm11, %v10371_v48, %v879_v46  ;;  %v1164_v14 = vadd.s32 1, %v8192_v63 }
 0x13d   :  { %v823_v61 = vsel %vm740_vm15, %v822_v44, %v821_v27  ;;  %v825_v24 = vsel %vm740_vm15, %v824_v6, %v10191_v1  ;;  %v709_v62 = vor.u32 %v708_v39, %v707_v33  ;;  %v900_v15 = vadd.s32 1, %v10427_v47 }
 0x13e   :  { %v511_v43 = vsel %vm428_vm13, %v510_v34, %v509_v23  ;;  %v721_v8 = vsel %vm636_vm1, %v720_v59, %v10252_v0  ;;  %v10479_v48 = vsub.s32 %v10366_v38, %v1009_v41  ;;  %vm899_vm2 = vc.u32 %v10434_v13, %v10426_v42 }
 0x13f   :  { %v714_v27 = vand.u32 2147483647, %v713_v17  ;;  %v881_v1 = vsel %vm875_vm14, %v878_v22, %v880_v28  ;;  %vm1165_vm6 = vcmp.gt.s32.totalorder %v1164_v14, 0  ;;  %v10486_v37 = vadd.f32 %v10032_v49, %v297_v32 }
 0x140   :  { %9263 = vsinq.f32 %v618_v53  ;;  %v826_v34 = vsel %vm10419_vm4, %v10047_v2, %v823_v61  ;;  %v16023_v0 = vand.u32 2147483647, %v10389_v29  ;;  %v1166_v38 = vsel %vm1165_vm6, %v1164_v14, 0 }
 0x141   :  { %16215 = vst [vmem:[#allocation22_spill] sm:$0xff] %v10486_v37  ;;  %v827_v23 = vsel %vm10419_vm4, 0, %v825_v24  ;;  %v716_v44 = vcvt.s32.f32 %v709_v62  ;;  %v901_v6 = vsel %vm899_vm2, %v900_v15, %v10427_v47  ;;  %v1168_v54 = vand.u32 31, %v1166_v38 }
 0x142   :  { %v514_v49 = vsel %vm10287_vm3, %v10040_v55, %v511_v43  ;;  %v723_v53 = vsel %vm10439_vm5, 0, %v721_v8  ;;  %v1012_v18 = vsub.s32 0, %v10479_v48  ;;  %v897_v39 = vmul.u32 %v10393_v10, %v881_v1 }
 0x143   :  { %9265 = vcosq.f32 %v826_v34  ;;  %v10502_v46 = vmul.f32 %v716_v44, %v714_v27  ;;  %v1169_v26 = vsub.s32 32, %v1168_v54  ;;  %v1053_v59 = vand.u32 2139095040, %v10486_v37 }
 0x144   :  { %9267 = vsinq.f32 %v826_v34  ;;  %v10505_v47 = vadd.s32 %v901_v6, %v897_v39  ;;  %v1161_v50 = vand.u32 8388607, %v16023_v0  ;;  %v1171_v41 = vshll.u32 %v16205_v9, %v1168_v54 }
 0x145   :  { %v831_v63 = vadd.s32 3, %v827_v23  ;;  %v1172_v33 = vshrl.u32 %v16195_v52, %v1169_v26  ;;  %v1174_v17 = vshll.u32 %v16195_v52, %v1168_v54  ;;  %v1175_v10 = vshrl.u32 %v16196_v4, %v1169_v26 }
 0x146   :  { %9269 = vcosq.f32 %v514_v49  ;;  %v8185_v22 = vmin.u32 %v1012_v18, %v10479_v48  ;;  %v1167_v28 = vshrl.u32 %v1166_v38, 5  ;;  %v1177_v14 = vshll.u32 %v16196_v4, %v1168_v54 }
 0x147   :  { %v718_v32 = vxor.u32 2147483648, %v10502_v46  ;;  %v727_v61 = vadd.s32 3, %v723_v53  ;;  %v1178_v24 = vshrl.u32 %v16197_v31, %v1169_v26  ;;  %v1054_v62 = vshrl.u32 %v1053_v59, 23 }
 0x148   :  { %v903_v15 = vadd.s32 536870912, %v10505_v47  ;;  %v1162_v43 = vor.u32 8388608, %v1161_v50  ;;  %v1173_v8 = vor.u32 %v1172_v33, %v1171_v41  ;;  %v1180_v27 = vshll.u32 %v16197_v31, %v1168_v54 }
 0x149   :  { %v10519_v1 = vpop.eup %9261  ;;  %v1176_v34 = vor.u32 %v1175_v10, %v1174_v17  ;;  %v1179_v23 = vor.u32 %v1178_v24, %v1177_v14  ;;  %v1181_v38 = vshrl.u32 %v16198_v19, %v1169_v26  ;;  %v1183_v44 = vshll.u32 %v16198_v19, %v1168_v54 }
 0x14a   :  { %16216 = vst [vmem:[#allocation23_spill] sm:$0xff] %v10519_v1  ;;  %v1014_v6 = vclz %v8185_v22  ;;  %v1170_v53 = vshrl.u32 %v16205_v9, %v1169_v26  ;;  %v1184_v18 = vshrl.u32 %v16194_v40, %v1169_v26  ;;  %vm1186_vm13 = vcmp.lt.s32.totalorder %v1167_v28, 1 }
 0x14b   :  { %v1182_v39 = vor.u32 %v1181_v38, %v1180_v27  ;;  %vm1188_vm3 = vcmp.lt.s32.totalorder %v1167_v28, 3  ;;  %vm1189_vm7 = vcmp.lt.s32.totalorder %v1167_v28, 4  ;;  %v8188_v59 = vadd.s32 4294967169, %v1054_v62 }
 0x14c   :  { %v10525_v50 = vshrl.u32 %v903_v15, 30  ;;  %v1185_v41 = vor.u32 %v1184_v18, %v1183_v44  ;;  %vm1187_vm8 = vcmp.lt.s32.totalorder %v1167_v28, 2  ;;  %v1202_v33 = vshll.u32 %v1162_v43, 8 }
 0x14d   :  { %v10527_v17 = vpop.eup %9263  ;;  %v1191_v10 = vsel %vm1189_vm7, %v1179_v23, 2102212464  ;;  %v1194_v14 = vsel %vm1186_vm13, %v1173_v8, %v1176_v34  ;;  %v1195_v54 = vsel %vm1189_vm7, %v1182_v39, 920167782  ;;  %v1198_v22 = vsel %vm1186_vm13, %v1176_v34, %v1179_v23 }
 0x14e   :  { %16217 = vst [vmem:[#allocation24_spill] sm:$0xff] %v10525_v50  ;;  %16218 = vst [vmem:[#allocation25_spill] sm:$0xff] %v10527_v17  ;;  %v1190_v24 = vsel %vm1186_vm13, %v1170_v53, %v1173_v8  ;;  %v1196_v0 = vsel %vm1188_vm3, %v1179_v23, %v1195_v54  ;;  %v1199_v26 = vsel %vm1189_vm7, %v1185_v41, 1326507024  ;;  %v16026_v27 = vand.u32 2147483647, %v10486_v37 }
 0x14f   :  { %v1192_v38 = vsel %vm1188_vm3, %v1176_v34, %v1191_v10  ;;  %v1197_v62 = vsel %vm1187_vm8, %v1194_v14, %v1196_v0  ;;  %v1200_v15 = vsel %vm1188_vm3, %v1182_v39, %v1199_v26  ;;  %v1060_v44 = vadd.s32 1, %v8188_v59  ;;  %v8634_v10 = vpop.f32.mrf.mxu0 }
 0x150   :  { %v10534_v43 = vpop.eup %9265  ;;  %v905_v18 = vshll.u32 %v10525_v50, 30  ;;  %v1201_v25 = vsel %vm1187_vm8, %v1198_v22, %v1200_v15  ;;  %v10538_v21 = vmul.u32.u64.low %v1202_v33, %v1197_v62  ;;  %v10539_v8 = vmul.u32.u64.high %v1202_v33, %v1197_v62, %v10538_v21 }
 0x151   :  { %v10542_v23 = vpop.eup %9267  ;;  %9271 = vsinq.f32 %v514_v49  ;;  %v10544_v53 = vand.u32 3, %v831_v63  ;;  %v10546_v34 = vmul.u32.u64.low %v1202_v33, %v1201_v25  ;;  %v10547_v0 = vmul.u32.u64.high %v1202_v33, %v1201_v25, %v10546_v34 }
 0x152   :  { %v10549_v39 = vand.u32 3, %v727_v61  ;;  %v8186_v59 = vadd.s32 4294967294, %v1014_v6  ;;  %v1193_v41 = vsel %vm1187_vm8, %v1190_v24, %v1192_v38  ;;  %vm1061_vm9 = vcmp.gt.s32.totalorder %v1060_v44, 0 }
 0x153   :  { %v10552_v14 = vpop.eup %9269  ;;  %v719_v49 = vsel %vm636_vm1, %v718_v32, %v10502_v46  ;;  %v10560_v63 = vadd.s32 %v10318_v58, %v10324_v30  ;;  %v1062_v25 = vsel %vm1061_vm9, %v1060_v44, 0  ;;  %v10564_v28 = vsub.s32 %v10505_v47, %v905_v18  ;;  %v10574_v30 = vld [vmem:[%s15984_s2] ss:$0 sm:$0xff] }
 0x154   :  { %v1212_v6 = vadd.s32 1, %v10539_v8  ;;  %v1057_v22 = vand.u32 8388607, %v16026_v27  ;;  %v1209_v24 = vmul.u32 %v1202_v33, %v1193_v41  ;;  %vm1211_vm10 = vc.u32 %v10547_v0, %v10538_v21 }
 0x155   :  { %v1064_v46 = vand.u32 31, %v1062_v25  ;;  %v10577_v58 = vadd.f32 %v10574_v30, %v8634_v10  ;;  %v10582_v47 = vsel %vm10439_vm5, %v10139_v57, %v719_v49  ;;  %vm8187_vm11 = vcmp.lt.s32.totalorder %v8186_v59, 0 }
 0x156   :  { %v1213_v32 = vsel %vm1211_vm10, %v1212_v6, %v10539_v8  ;;  %v10585_v33 = vshrl.u32 %v1062_v25, 5  ;;  %v908_v44 = vsub.s32 0, %v10564_v28  ;;  %v1058_v18 = vor.u32 8388608, %v1057_v22 }
 0x157   :  { %16219 = vst [vmem:[#allocation26_spill] sm:$0xff] %v10577_v58  ;;  %v1214_v26 = vadd.s32 %v1213_v32, %v1209_v24  ;;  %v1065_v38 = vsub.s32 32, %v1064_v46  ;;  %v1067_v62 = vshll.u32 %v16205_v9, %v1064_v46  ;;  %v1070_v15 = vshll.u32 %v16195_v52, %v1064_v46 }
 0x158   :  { %v1073_v34 = vshll.u32 %v16196_v4, %v1064_v46  ;;  %v1076_v36 = vshll.u32 %v16197_v31, %v1064_v46  ;;  %v1365_v49 = vand.u32 2139095040, %v10577_v58  ;;  %v1079_v24 = vshll.u32 %v16198_v19, %v1064_v46 }
 0x159   :  { %v1215_v41 = vadd.s32 536870912, %v1214_v26  ;;  %v1068_v10 = vshrl.u32 %v16195_v52, %v1065_v38  ;;  %v1071_v8 = vshrl.u32 %v16196_v4, %v1065_v38  ;;  %v1074_v25 = vshrl.u32 %v16197_v31, %v1065_v38 }
 0x15a   :  { %v1077_v6 = vshrl.u32 %v16198_v19, %v1065_v38  ;;  %vm1082_vm12 = vcmp.lt.s32.totalorder %v10585_v33, 1  ;;  %vm837_vm14 = vcmp.eq.s32.totalorder %v10544_v53, 2  ;;  %v1080_v61 = vshrl.u32 %v16194_v40, %v1065_v38 }
 0x15b   :  { %v10600_v22 = vshrl.u32 %v1215_v41, 30  ;;  %v1069_v32 = vor.u32 %v1068_v10, %v1067_v62  ;;  %v1072_v27 = vor.u32 %v1071_v8, %v1070_v15  ;;  %v1017_v54 = vsel %vm8187_vm11, 0, %v8186_v59 }
 0x15c   :  { %v8181_v20 = vmin.u32 %v908_v44, %v10564_v28  ;;  %v1075_v16 = vor.u32 %v1074_v25, %v1073_v34  ;;  %v1078_v12 = vor.u32 %v1077_v6, %v1076_v36  ;;  %vm834_vm15 = vcmp.eq.s32.totalorder %v10544_v53, 0 }
 0x15d   :  { %v1217_v46 = vshll.u32 %v10600_v22, 30  ;;  %v1066_v11 = vshrl.u32 %v16205_v9, %v1065_v38  ;;  %vm1084_vm1 = vcmp.lt.s32.totalorder %v10585_v33, 3  ;;  %v1098_v41 = vshll.u32 %v1058_v18, 8 }
 0x15e   :  { %v10609_v7 = vpop.eup %9271  ;;  %v1081_v62 = vor.u32 %v1080_v61, %v1079_v24  ;;  %vm1083_vm4 = vcmp.lt.s32.totalorder %v10585_v33, 2  ;;  %vm1085_vm5 = vcmp.lt.s32.totalorder %v10585_v33, 4  ;;  %v1090_v59 = vsel %vm1082_vm12, %v1069_v32, %v1072_v27 }
 0x15f   :  { %9273 = vcosq.f32 %v10582_v47  ;;  %v10616_v15 = vsub.s32 %v1214_v26, %v1217_v46  ;;  %v1091_v38 = vsel %vm1085_vm5, %v1078_v12, 920167782  ;;  %v1366_v44 = vshrl.u32 %v1365_v49, 23 }
 0x160   :  { %vm833_vm2 = vcmp.lt.s32.totalorder %v10544_v53, 2  ;;  %v1018_v18 = vsub.s32 32, %v1017_v54  ;;  %v910_v34 = vclz %v8181_v20  ;;  %v1087_v61 = vsel %vm1085_vm5, %v1075_v16, 2102212464 }
 0x161   :  { %v1092_v36 = vsel %vm1084_vm1, %v1075_v16, %v1091_v38  ;;  %v1022_v10 = vsub.s32 4294967266, %v1017_v54  ;;  %v1220_v8 = vsub.s32 0, %v10616_v15  ;;  %v1086_v26 = vsel %vm1082_vm12, %v1066_v11, %v1069_v32 }
 0x162   :  { %v1093_v25 = vsel %vm1083_vm4, %v1090_v59, %v1092_v36  ;;  %v1094_v49 = vsel %vm1082_vm12, %v1072_v27, %v1075_v16  ;;  %v1095_v20 = vsel %vm1085_vm5, %v1081_v62, 1326507024  ;;  %v1088_v38 = vsel %vm1084_vm1, %v1072_v27, %v1087_v61 }
 0x163   :  { %v10634_v6 = vmul.u32.u64.low %v1098_v41, %v1093_v25  ;;  %v10635_v24 = vmul.u32.u64.high %v1098_v41, %v1093_v25, %v10634_v6  ;;  %v8193_v46 = vmin.u32 %v1220_v8, %v10616_v15  ;;  %v1096_v11 = vsel %vm1084_vm1, %v1078_v12, %v1095_v20  ;;  %v307_v8 = vpop.f32.mrf.mxu0 }
 0x164   :  { %v8200_v32 = vadd.s32 4294967169, %v1366_v44  ;;  %v16220_v59 = vxor.u32 2147483648, %v10534_v43  ;;  %v8182_v62 = vadd.s32 4294967294, %v910_v34  ;;  %v1097_v36 = vsel %vm1083_vm4, %v1094_v49, %v1096_v11 }
 0x165   :  { %v16035_v25 = vand.u32 2147483647, %v10577_v58  ;;  %v1222_v3 = vclz %v8193_v46  ;;  %v10651_v45 = vmul.u32.u64.low %v1098_v41, %v1097_v36  ;;  %v10652_v27 = vmul.u32.u64.high %v1098_v41, %v1097_v36, %v10651_v45 }
 0x166   :  { %v839_v16 = vsel %vm837_vm14, %v16220_v59, %v10542_v23  ;;  %v1372_v61 = vadd.s32 1, %v8200_v32  ;;  %v16221_v12 = vxor.u32 2147483648, %v10542_v23  ;;  %v1020_v20 = vshrl.u32 %v10560_v63, %v1018_v18 }
 0x167   :  { %v1089_v34 = vsel %vm1083_vm4, %v1086_v26, %v1088_v38  ;;  %v1108_v49 = vadd.s32 1, %v10635_v24  ;;  %9275 = vsinq.f32 %v10582_v47  ;;  %v10664_v46 = vadd.s32 127, %v1022_v10 }
 0x168   :  { %v836_v44 = vsel %vm834_vm15, %v10534_v43, %v16221_v12  ;;  %vm1373_vm6 = vcmp.gt.s32.totalorder %v1372_v61, 0  ;;  %v10667_v45 = vadd.f32 %v10574_v30, %v307_v8  ;;  %v1019_v23 = vshll.u32 %v10479_v48, %v1017_v54 }
 0x169   :  { %vm8183_vm13 = vcmp.lt.s32.totalorder %v8182_v62, 0  ;;  %v1369_v43 = vand.u32 8388607, %v16035_v25  ;;  %v1374_v63 = vsel %vm1373_vm6, %v1372_v61, 0  ;;  %v10674_v33 = vsel %vm833_vm2, %v836_v44, %v839_v16 }
 0x16a   :  { %16222 = vst [vmem:[#allocation27_spill] sm:$0xff] %v10667_v45  ;;  %v8194_v18 = vadd.s32 4294967294, %v1222_v3  ;;  %v1105_v26 = vmul.u32 %v1098_v41, %v1089_v34  ;;  %vm1107_vm3 = vc.u32 %v10652_v27, %v10634_v6  ;;  %v10678_v47 = vor.u32 %v1020_v20, %v1019_v23 }
 0x16b   :  { %v10682_v10 = vadd.s32 %v10426_v42, %v10434_v13  ;;  %v1109_v48 = vsel %vm1107_vm3, %v1108_v49, %v10635_v24  ;;  %v1376_v54 = vand.u32 31, %v1374_v63  ;;  %v1024_v38 = vshll.u32 %v10664_v46, 23 }
 0x16c   :  { %v10686_v11 = vsel %vm8183_vm13, 0, %v8182_v62  ;;  %v1110_v53 = vadd.s32 %v1109_v48, %v1105_v26  ;;  %v1261_v3 = vand.u32 2139095040, %v10667_v45  ;;  %v10689_v41 = vpop.eup %9273  ;;  %v1370_v32 = vor.u32 8388608, %v1369_v43 }
 0x16d   :  { %v1377_v59 = vsub.s32 32, %v1376_v54  ;;  %v1379_v16 = vshll.u32 %v16205_v9, %v1376_v54  ;;  %v1382_v36 = vshll.u32 %v16195_v52, %v1376_v54  ;;  %vm8195_vm7 = vcmp.lt.s32.totalorder %v8194_v18, 0 }
 0x16e   :  { %v1111_v42 = vadd.s32 536870912, %v1110_v53  ;;  %v1375_v13 = vshrl.u32 %v1374_v63, 5  ;;  %v1385_v24 = vshll.u32 %v16196_v4, %v1376_v54  ;;  %v1388_v12 = vshll.u32 %v16197_v31, %v1376_v54 }
 0x16f   :  { %v1380_v8 = vshrl.u32 %v16195_v52, %v1377_v59  ;;  %v1383_v62 = vshrl.u32 %v16196_v4, %v1377_v59  ;;  %v1386_v61 = vshrl.u32 %v16197_v31, %v1377_v59  ;;  %v734_v44 = vxor.u32 2147483648, %v10689_v41 }
 0x170   :  { %v10699_v20 = vshrl.u32 %v1111_v42, 30  ;;  %v1389_v34 = vshrl.u32 %v16198_v19, %v1377_v59  ;;  %v1262_v49 = vshrl.u32 %v1261_v3, 23  ;;  %v10702_v46 = vsel %vm8195_vm7, 0, %v8194_v18 }
 0x171   :  { %v1381_v23 = vor.u32 %v1380_v8, %v1379_v16  ;;  %v1384_v43 = vor.u32 %v1383_v62, %v1382_v36  ;;  %v1391_v63 = vshll.u32 %v16198_v19, %v1376_v54  ;;  %vm733_vm8 = vcmp.eq.s32.totalorder %v10549_v39, 2 }
 0x172   :  { %v918_v26 = vsub.s32 4294967266, %v10686_v11  ;;  %v1113_v48 = vshll.u32 %v10699_v20, 30  ;;  %v1378_v25 = vshrl.u32 %v16205_v9, %v1377_v59  ;;  %v10709_v50 = vshll.u32 %v1370_v32, 8 }
 0x173   :  { %vm730_vm9 = vcmp.eq.s32.totalorder %v10549_v39, 0  ;;  %v1387_v42 = vor.u32 %v1386_v61, %v1385_v24  ;;  %v1390_v3 = vor.u32 %v1389_v34, %v1388_v12  ;;  %v1392_v18 = vshrl.u32 %v16194_v40, %v1377_v59 }
 0x174   :  { %vm1394_vm10 = vcmp.lt.s32.totalorder %v1375_v13, 1  ;;  %v1230_v16 = vsub.s32 4294967266, %v10702_v46  ;;  %v10714_v54 = vsub.s32 %v1110_v53, %v1113_v48  ;;  %vm1396_vm11 = vcmp.lt.s32.totalorder %v1375_v13, 3  ;;  %v9276_v8 = vpop.eup %9275 }
 0x175   :  { %v8196_v36 = vadd.s32 4294967169, %v1262_v49  ;;  %v1393_v62 = vor.u32 %v1392_v18, %v1391_v63  ;;  %vm1395_vm12 = vcmp.lt.s32.totalorder %v1375_v13, 2  ;;  %vm1397_vm14 = vcmp.lt.s32.totalorder %v1375_v13, 4 }
 0x176   :  { %v1402_v32 = vsel %vm1394_vm10, %v1381_v23, %v1384_v43  ;;  %vm729_vm15 = vcmp.lt.s32.totalorder %v10549_v39, 2  ;;  %v1116_v24 = vsub.s32 0, %v10714_v54  ;;  %v1398_v61 = vsel %vm1394_vm10, %v1378_v25, %v1381_v23 }
 0x177   :  { %v1399_v59 = vsel %vm1397_vm14, %v1387_v42, 2102212464  ;;  %v1403_v12 = vsel %vm1397_vm14, %v1390_v3, 920167782  ;;  %v1406_v49 = vsel %vm1394_vm10, %v1384_v43, %v1387_v42  ;;  %v1407_v48 = vsel %vm1397_vm14, %v1393_v62, 1326507024 }
 0x178   :  { %v1400_v34 = vsel %vm1396_vm11, %v1384_v43, %v1399_v59  ;;  %v1404_v53 = vsel %vm1396_vm11, %v1387_v42, %v1403_v12  ;;  %v731_v63 = vxor.u32 2147483648, %v9276_v8  ;;  %v1025_v18 = vor.u32 4788187, %v1024_v38 }
 0x179   :  { %v919_v1 = vadd.s32 127, %v918_v26  ;;  %v1405_v17 = vsel %vm1395_vm12, %v1402_v32, %v1404_v53  ;;  %v1028_v51 = vcvt.s32.f32 %v10678_v47  ;;  %v1408_v35 = vsel %vm1396_vm11, %v1390_v3, %v1407_v48 }
 0x17a   :  { %v10727_v25 = vmul.u32.u64.low %v10709_v50, %v1405_v17  ;;  %v10728_v23 = vmul.u32.u64.high %v10709_v50, %v1405_v17, %v10727_v25  ;;  %v1231_v59 = vadd.s32 127, %v1230_v16  ;;  %v8189_v12 = vmin.u32 %v1116_v24, %v10714_v54  ;;  %v8637_v24 = vpop.f32.mrf.mxu0 }
 0x17b   :  { %v1401_v43 = vsel %vm1395_vm12, %v1398_v61, %v1400_v34  ;;  %v1409_v42 = vsel %vm1395_vm12, %v1406_v49, %v1408_v35  ;;  %v735_v38 = vsel %vm733_vm8, %v734_v44, %v9276_v8  ;;  %v1268_v3 = vadd.s32 1, %v8196_v36 }
 0x17c   :  { %v10737_v26 = vmul.u32.u64.low %v10709_v50, %v1409_v42  ;;  %v10738_v47 = vmul.u32.u64.high %v10709_v50, %v1409_v42, %v10737_v26  ;;  %v732_v17 = vsel %vm730_vm9, %v10689_v41, %v731_v63  ;;  %v1026_v62 = vand.u32 2147483647, %v1025_v18 }
 0x17d   :  { %v914_v16 = vsub.s32 32, %v10686_v11  ;;  %v920_v32 = vshll.u32 %v919_v1, 23  ;;  %v1226_v13 = vsub.s32 32, %v10702_v46  ;;  %v1417_v35 = vmul.u32 %v10709_v50, %v1401_v43 }
 0x17e   :  { %v1420_v44 = vadd.s32 1, %v10728_v23  ;;  %vm1269_vm1 = vcmp.gt.s32.totalorder %v1268_v3, 0  ;;  %v1232_v8 = vshll.u32 %v1231_v59, 23  ;;  %v1118_v61 = vclz %v8189_v12 }
 0x17f   :  { %v16043_v36 = vand.u32 2147483647, %v10667_v45  ;;  %v1270_v34 = vsel %vm1269_vm1, %v1268_v3, 0  ;;  %v10750_v41 = vsel %vm729_vm15, %v732_v17, %v735_v38  ;;  %v1210_v1 = vadd.s32 %v10538_v21, %v10547_v0 }
 0x180   :  { %vm1419_vm4 = vc.u32 %v10738_v47, %v10727_v25  ;;  %v10757_v50 = vadd.f32 %v10574_v30, %v8637_v24  ;;  %v10759_v53 = vmul.f32 %v1028_v51, %v1026_v62  ;;  %v915_v49 = vshll.u32 %v10564_v28, %v10686_v11 }
 0x181   :  { %v916_v48 = vshrl.u32 %v10682_v10, %v914_v16  ;;  %v1421_v39 = vsel %vm1419_vm4, %v1420_v44, %v10728_v23  ;;  %v10765_v63 = vor.u32 4788187, %v920_v32  ;;  %v1228_v18 = vshrl.u32 %v1210_v1, %v1226_v13 }
 0x182   :  { %16223 = vst [vmem:[#allocation28_spill] sm:$0xff] %v10757_v50  ;;  %v1422_v59 = vadd.s32 %v1421_v39, %v1417_v35  ;;  %v1272_v21 = vand.u32 31, %v1270_v34  ;;  %v1227_v0 = vshll.u32 %v10616_v15, %v10702_v46  ;;  %v1233_v12 = vor.u32 4788187, %v1232_v8 }
 0x183   :  { %v8190_v43 = vadd.s32 4294967294, %v1118_v61  ;;  %v1265_v51 = vand.u32 8388607, %v16043_v36  ;;  %v917_v11 = vor.u32 %v916_v48, %v915_v49  ;;  %v1271_v23 = vshrl.u32 %v1270_v34, 5 }
 0x184   :  { %v1423_v42 = vadd.s32 536870912, %v1422_v59  ;;  %v1273_v38 = vsub.s32 32, %v1272_v21  ;;  %v1275_v28 = vshll.u32 %v16205_v9, %v1272_v21  ;;  %v1278_v10 = vshll.u32 %v16195_v52, %v1272_v21 }
 0x185   :  { %v1281_v26 = vshll.u32 %v16196_v4, %v1272_v21  ;;  %v1284_v3 = vshll.u32 %v16197_v31, %v1272_v21  ;;  %v922_v17 = vand.u32 2147483647, %v10765_v63  ;;  %v1229_v15 = vor.u32 %v1228_v18, %v1227_v0 }
 0x186   :  { %v1276_v46 = vshrl.u32 %v16195_v52, %v1273_v38  ;;  %v1279_v62 = vshrl.u32 %v16196_v4, %v1273_v38  ;;  %vm726_vm5 = vweird.f32 %v10139_v57  ;;  %v1234_v16 = vand.u32 2147483647, %v1233_v12 }
 0x187   :  { %v1266_v32 = vor.u32 8388608, %v1265_v51  ;;  %v1282_v24 = vshrl.u32 %v16197_v31, %v1273_v38  ;;  %v1285_v13 = vshrl.u32 %v16198_v19, %v1273_v38  ;;  %vm8191_vm2 = vcmp.lt.s32.totalorder %v8190_v43, 0 }
 0x188   :  { %v10781_v35 = vshrl.u32 %v1423_v42, 30  ;;  %v1277_v44 = vor.u32 %v1276_v46, %v1275_v28  ;;  %v1280_v8 = vor.u32 %v1279_v62, %v1278_v10  ;;  %v1287_v1 = vshll.u32 %v16198_v19, %v1272_v21 }
 0x189   :  { %v1283_v61 = vor.u32 %v1282_v24, %v1281_v26  ;;  %v1286_v34 = vor.u32 %v1285_v13, %v1284_v3  ;;  %vm1290_vm6 = vcmp.lt.s32.totalorder %v1271_v23, 1  ;;  %v1236_v49 = vcvt.s32.f32 %v1229_v15 }
 0x18a   :  { %v1274_v48 = vshrl.u32 %v16205_v9, %v1273_v38  ;;  %v1288_v39 = vshrl.u32 %v16194_v40, %v1273_v38  ;;  %vm1293_vm13 = vcmp.lt.s32.totalorder %v1271_v23, 4  ;;  %vm830_vm3 = vweird.f32 %v10047_v2 }
 0x18b   :  { %vm1156_vm7 = vcmp.lt.s32.totalorder %v10389_v29, 0  ;;  %v10788_v63 = vsel %vm8191_vm2, 0, %v8190_v43  ;;  %vm1291_vm8 = vcmp.lt.s32.totalorder %v1271_v23, 2  ;;  %vm1292_vm9 = vcmp.lt.s32.totalorder %v1271_v23, 3 }
 0x18c   :  { %v1573_v18 = vand.u32 2139095040, %v10757_v50  ;;  %v1425_v0 = vshll.u32 %v10781_v35, 30  ;;  %v1289_v21 = vor.u32 %v1288_v39, %v1287_v1  ;;  %v1295_v12 = vsel %vm1293_vm13, %v1283_v61, 2102212464 }
 0x18d   :  { %v1298_v51 = vsel %vm1290_vm6, %v1277_v44, %v1280_v8  ;;  %v1237_v42 = vmul.f32 %v1236_v49, %v1234_v16  ;;  %v1299_v38 = vsel %vm1293_vm13, %v1286_v34, 920167782  ;;  %v1302_v28 = vsel %vm1290_vm6, %v1280_v8, %v1283_v61 }
 0x18e   :  { %v1306_v10 = vshll.u32 %v1266_v32, 8  ;;  %vm16121_vm10 = vcmp.lt.s32.totalorder %v10209_v56, 0  ;;  %v1126_v43 = vsub.s32 4294967266, %v10788_v63  ;;  %v1294_v26 = vsel %vm1290_vm6, %v1274_v48, %v1277_v44 }
 0x18f   :  { %v1300_v3 = vsel %vm1292_vm9, %v1283_v61, %v1299_v38  ;;  %v1303_v15 = vsel %vm1293_vm13, %v1289_v21, 1326507024  ;;  %v1296_v46 = vsel %vm1292_vm9, %v1280_v8, %v1295_v12  ;;  %v1574_v24 = vshrl.u32 %v1573_v18, 23  ;;  %v317_v12 = vpop.f32.mrf.mxu0 }
 0x190   :  { %v1301_v62 = vsel %vm1291_vm8, %v1298_v51, %v1300_v3  ;;  %v1304_v16 = vsel %vm1292_vm9, %v1286_v34, %v1303_v15  ;;  %v737_v32 = vsel %vm726_vm5, nan, %v10750_v41  ;;  %v1240_v13 = vsub.s32 4, %v10600_v22 }
 0x191   :  { %v10808_v1 = vsub.s32 %v1422_v59, %v1425_v0  ;;  %v1305_v44 = vsel %vm1291_vm8, %v1302_v28, %v1304_v16  ;;  %v924_v61 = vcvt.s32.f32 %v917_v11  ;;  %v8208_v8 = vadd.s32 4294967169, %v1574_v24 }
 0x192   :  { %v10811_v49 = vmul.u32.u64.low %v1306_v10, %v1305_v44  ;;  %v10812_v48 = vmul.u32.u64.high %v1306_v10, %v1305_v44, %v10811_v49  ;;  %v1127_v39 = vadd.s32 127, %v1126_v43  ;;  %v1297_v21 = vsel %vm1291_vm8, %v1294_v26, %v1296_v46 }
 0x193   :  { %v10815_v34 = vmul.u32.u64.low %v1306_v10, %v1301_v62  ;;  %v10816_v18 = vmul.u32.u64.high %v1306_v10, %v1301_v62, %v10815_v34  ;;  %v1030_v57 = vxor.u32 2147483648, %v10759_v53  ;;  %v10820_v41 = vmul.f32 %v924_v61, %v922_v17 }
 0x194   :  { %v1238_v59 = vxor.u32 2147483648, %v1237_v42  ;;  %v1580_v0 = vadd.s32 1, %v8208_v8  ;;  %v841_v11 = vsel %vm830_vm3, nan, %v10674_v33  ;;  %v16224_v51 = vand.u32 2147483647, %v10389_v29 }
 0x195   :  { %v10834_v38 = vsel %vm1156_vm7, %v1240_v13, %v10600_v22  ;;  %v1428_v17 = vsub.s32 0, %v10808_v1  ;;  %v1313_v28 = vmul.u32 %v1306_v10, %v1297_v21  ;;  %vm1315_vm12 = vc.u32 %v10812_v48, %v10815_v34 }
 0x196   :  { %vm10827_vm11 = vcmp.le.f32.partialorder %v16224_v51, 0.7853982  ;;  %v16042_v2 = vand.u32 2147483647, %v10757_v50  ;;  %vm1581_vm14 = vcmp.gt.s32.totalorder %v1580_v0, 0  ;;  %v10840_v33 = vpack.c.bf16 %v841_v11, %v737_v32 }
 0x197   :  { %v1128_v43 = vshll.u32 %v1127_v39, 23  ;;  %v1316_v26 = vadd.s32 1, %v10816_v18  ;;  %v10844_v3 = vadd.f32 %v10574_v30, %v317_v12  ;;  %v10849_v22 = vsel %vm16121_vm10, %v1030_v57, %v10759_v53 }
 0x198   :  { %v1239_v15 = vsel %vm1156_vm7, %v1238_v59, %v1237_v42  ;;  %v1582_v46 = vsel %vm1581_vm14, %v1580_v0, 0  ;;  %v1122_v16 = vsub.s32 32, %v10788_v63  ;;  %v8201_v24 = vmin.u32 %v1428_v17, %v10808_v1 }
 0x199   :  { %16227 = vst [vmem:[#allocation29_spill] sm:$0xff] %v10844_v3  ;;  %v1317_v32 = vsel %vm1315_vm12, %v1316_v26, %v10816_v18  ;;  %v1106_v53 = vadd.s32 %v10634_v6, %v10652_v27  ;;  %v1577_v44 = vand.u32 8388607, %v16042_v2  ;;  %v1584_v61 = vand.u32 31, %v1582_v46 }
 0x19a   :  { %v1318_v13 = vadd.s32 %v1317_v32, %v1313_v28  ;;  %v10867_v42 = vsel %vm10827_vm11, %v10389_v29, %v1239_v15  ;;  %v1123_v49 = vshll.u32 %v10714_v54, %v10788_v63  ;;  %v1129_v8 = vor.u32 4788187, %v1128_v43 }
 0x19b   :  { %v1469_v39 = vand.u32 2139095040, %v10844_v3  ;;  %v1585_v18 = vsub.s32 32, %v1584_v61  ;;  %v1587_v6 = vshll.u32 %v16205_v9, %v1584_v61  ;;  %v1590_v27 = vshll.u32 %v16195_v52, %v1584_v61 }
 0x19c   :  { %v1319_v21 = vadd.s32 536870912, %v1318_v13  ;;  %v1124_v57 = vshrl.u32 %v1106_v53, %v1122_v16  ;;  %v1430_v59 = vclz %v8201_v24  ;;  %v1583_v0 = vshrl.u32 %v1582_v46, 5 }
 0x19d   :  { %v1596_v12 = vshll.u32 %v16197_v31, %v1584_v61  ;;  %v1588_v51 = vshrl.u32 %v16195_v52, %v1585_v18  ;;  %v1591_v54 = vshrl.u32 %v16196_v4, %v1585_v18  ;;  %v1593_v63 = vshll.u32 %v16196_v4, %v1584_v61 }
 0x19e   :  { %v10875_v11 = vshrl.u32 %v1319_v21, 30  ;;  %v1578_v17 = vor.u32 8388608, %v1577_v44  ;;  %v1594_v28 = vshrl.u32 %v16197_v31, %v1585_v18  ;;  %v1597_v43 = vshrl.u32 %v16198_v19, %v1585_v18 }
 0x19f   :  { %v1599_v26 = vshll.u32 %v16198_v19, %v1584_v61  ;;  %v1589_v46 = vor.u32 %v1588_v51, %v1587_v6  ;;  %v1592_v16 = vor.u32 %v1591_v54, %v1590_v27  ;;  %v1470_v24 = vshrl.u32 %v1469_v39, 23 }
 0x1a0   :  { %v1321_v15 = vshll.u32 %v10875_v11, 30  ;;  %v8202_v32 = vadd.s32 4294967294, %v1430_v59  ;;  %v1598_v53 = vor.u32 %v1597_v43, %v1596_v12  ;;  %v1600_v21 = vshrl.u32 %v16194_v40, %v1585_v18 }
 0x1a1   :  { %vm1602_vm15 = vcmp.lt.s32.totalorder %v1583_v0, 1  ;;  %vm844_vm1 = vcmp.lt.s32.totalorder %v10234_v5, 0  ;;  %v1125_v2 = vor.u32 %v1124_v57, %v1123_v49  ;;  %v1595_v36 = vor.u32 %v1594_v28, %v1593_v63 }
 0x1a2   :  { %v10886_v44 = vsub.s32 %v1318_v13, %v1321_v15  ;;  %vm1605_vm4 = vcmp.lt.s32.totalorder %v1583_v0, 4  ;;  %v1130_v62 = vand.u32 2147483647, %v1129_v8  ;;  %v1586_v61 = vshrl.u32 %v16205_v9, %v1585_v18 }
 0x1a3   :  { %v1601_v10 = vor.u32 %v1600_v21, %v1599_v26  ;;  %vm1604_vm5 = vcmp.lt.s32.totalorder %v1583_v0, 3  ;;  %vm1603_vm2 = vcmp.lt.s32.totalorder %v1583_v0, 2  ;;  %v1607_v39 = vsel %vm1605_vm4, %v1595_v36, 2102212464 }
 0x1a4   :  { %v1610_v6 = vsel %vm1602_vm15, %v1589_v46, %v1592_v16  ;;  %v8204_v27 = vadd.s32 4294967169, %v1470_v24  ;;  %vm8203_vm6 = vcmp.lt.s32.totalorder %v8202_v32, 0  ;;  %v1324_v59 = vsub.s32 0, %v10886_v44 }
 0x1a5   :  { %v1611_v49 = vsel %vm1605_vm4, %v1598_v53, 920167782  ;;  %v1618_v13 = vshll.u32 %v1578_v17, 8  ;;  %v1132_v57 = vcvt.s32.f32 %v1125_v2  ;;  %v1614_v8 = vsel %vm1602_vm15, %v1592_v16, %v1595_v36 }
 0x1a6   :  { %v1612_v12 = vsel %vm1604_vm5, %v1595_v36, %v1611_v49  ;;  %v16044_v18 = vand.u32 2147483647, %v10844_v3  ;;  %v1606_v51 = vsel %vm1602_vm15, %v1586_v61, %v1589_v46  ;;  %v1608_v54 = vsel %vm1604_vm5, %v1592_v16, %v1607_v39 }
 0x1a7   :  { %v1613_v63 = vsel %vm1603_vm2, %v1610_v6, %v1612_v12  ;;  %v1615_v28 = vsel %vm1605_vm4, %v1601_v10, 1326507024  ;;  %v10900_v43 = vmul.f32 %v1132_v57, %v1130_v62  ;;  %v10902_v26 = vsel %vm8203_vm6, 0, %v8202_v32  ;;  %v8640_v6 = vpop.f32.mrf.mxu0 }
 0x1a8   :  { %v1616_v2 = vsel %vm1604_vm5, %v1598_v53, %v1615_v28  ;;  %v1476_v17 = vadd.s32 1, %v8204_v27  ;;  %v8197_v15 = vmin.u32 %v1324_v59, %v10886_v44  ;;  %v1609_v46 = vsel %vm1603_vm2, %v1606_v51, %v1608_v54 }
 0x1a9   :  { %v1617_v36 = vsel %vm1603_vm2, %v1614_v8, %v1616_v2  ;;  %v10907_v24 = vmul.u32.u64.low %v1618_v13, %v1613_v63  ;;  %v10908_v21 = vmul.u32.u64.high %v1618_v13, %v1613_v63, %v10907_v24  ;;  %v16228_v10 = vxor.u32 2147483648, %v10820_v41 }
 0x1aa   :  { %v10912_v16 = vmul.u32.u64.low %v1618_v13, %v1617_v36  ;;  %v10913_v61 = vmul.u32.u64.high %v1618_v13, %v1617_v36, %v10912_v16  ;;  %vm1477_vm13 = vcmp.gt.s32.totalorder %v1476_v17, 0  ;;  %v1438_v32 = vsub.s32 4294967266, %v10902_v26 }
 0x1ab   :  { %v10920_v62 = vsel %vm844_vm1, %v16228_v10, %v10820_v41  ;;  %v1473_v53 = vand.u32 8388607, %v16044_v18  ;;  %v1478_v39 = vsel %vm1477_vm13, %v1476_v17, 0  ;;  %9277 = vcosq.f32 %v10867_v42 }
 0x1ac   :  { %v16229_v0 = vsel %vm10827_vm11, 0, %v10834_v38  ;;  %v1480_v49 = vand.u32 31, %v1478_v39  ;;  %v1418_v41 = vadd.s32 %v10727_v25, %v10738_v47  ;;  %v1625_v12 = vmul.u32 %v1618_v13, %v1609_v46 }
 0x1ad   :  { %v10930_v27 = vadd.s32 3, %v16229_v0  ;;  %v1628_v8 = vadd.s32 1, %v10908_v21  ;;  %v1434_v54 = vsub.s32 32, %v10902_v26  ;;  %v1326_v23 = vclz %v8197_v15 }
 0x1ae   :  { %v10940_v38 = vadd.f32 %v10574_v30, %v8640_v6  ;;  %v1439_v63 = vadd.s32 127, %v1438_v32  ;;  %vm1627_vm3 = vc.u32 %v10913_v61, %v10907_v24  ;;  %v1474_v28 = vor.u32 8388608, %v1473_v53 }
 0x1af   :  { %16230 = vst [vmem:[#allocation30_spill] sm:$0xff] %v10930_v27  ;;  %v1481_v2 = vsub.s32 32, %v1480_v49  ;;  %v1629_v25 = vsel %vm1627_vm3, %v1628_v8, %v10908_v21  ;;  %v1483_v47 = vshll.u32 %v16205_v9, %v1480_v49  ;;  %v1486_v13 = vshll.u32 %v16195_v52, %v1480_v49 }
 0x1b0   :  { %16231 = vst [vmem:[#allocation31_spill] sm:$0xff] %v10940_v38  ;;  %v1489_v17 = vshll.u32 %v16196_v4, %v1480_v49  ;;  %v1630_v36 = vadd.s32 %v1629_v25, %v1625_v12  ;;  %v1479_v46 = vshrl.u32 %v1478_v39, 5  ;;  %v1436_v10 = vshrl.u32 %v1418_v41, %v1434_v54 }
 0x1b1   :  { %v1484_v15 = vshrl.u32 %v16195_v52, %v1481_v2  ;;  %v1487_v16 = vshrl.u32 %v16196_v4, %v1481_v2  ;;  %v8198_v32 = vadd.s32 4294967294, %v1326_v23  ;;  %v1490_v6 = vshrl.u32 %v16197_v31, %v1481_v2 }
 0x1b2   :  { %v1492_v53 = vshll.u32 %v16197_v31, %v1480_v49  ;;  %v1440_v0 = vshll.u32 %v1439_v63, 23  ;;  %v1631_v21 = vadd.s32 536870912, %v1630_v36  ;;  %v1493_v8 = vshrl.u32 %v16198_v19, %v1481_v2 }
 0x1b3   :  { %v1781_v18 = vand.u32 2139095040, %v10940_v38  ;;  %v1485_v51 = vor.u32 %v1484_v15, %v1483_v47  ;;  %v1488_v57 = vor.u32 %v1487_v16, %v1486_v13  ;;  %v1491_v12 = vor.u32 %v1490_v6, %v1489_v17 }
 0x1b4   :  { %v1495_v39 = vshll.u32 %v16198_v19, %v1480_v49  ;;  %v10955_v25 = vshrl.u32 %v1631_v21, 30  ;;  %v1494_v59 = vor.u32 %v1493_v8, %v1492_v53  ;;  %v1496_v41 = vshrl.u32 %v16194_v40, %v1481_v2 }
 0x1b5   :  { %vm1498_vm7 = vcmp.lt.s32.totalorder %v1479_v46, 1  ;;  %vm1052_vm8 = vcmp.lt.s32.totalorder %v10486_v37, 0  ;;  %vm1364_vm9 = vcmp.lt.s32.totalorder %v10577_v58, 0  ;;  %vm8199_vm11 = vcmp.lt.s32.totalorder %v8198_v32, 0 }
 0x1b6   :  { %v1482_v54 = vshrl.u32 %v16205_v9, %v1481_v2  ;;  %vm1500_vm12 = vcmp.lt.s32.totalorder %v1479_v46, 3  ;;  %vm1501_vm14 = vcmp.lt.s32.totalorder %v1479_v46, 4  ;;  %v1633_v23 = vshll.u32 %v10955_v25, 30 }
 0x1b7   :  { %v1497_v63 = vor.u32 %v1496_v41, %v1495_v39  ;;  %vm1499_vm15 = vcmp.lt.s32.totalorder %v1479_v46, 2  ;;  %v1514_v49 = vshll.u32 %v1474_v28, 8  ;;  %v1441_v47 = vor.u32 4788187, %v1440_v0 }
 0x1b8   :  { %v1503_v13 = vsel %vm1501_vm14, %v1491_v12, 2102212464  ;;  %v1506_v17 = vsel %vm1498_vm7, %v1485_v51, %v1488_v57  ;;  %v1507_v15 = vsel %vm1501_vm14, %v1494_v59, 920167782  ;;  %v10965_v16 = vpop.eup %9277  ;;  %v1435_v6 = vshll.u32 %v10808_v1, %v10902_v26 }
 0x1b9   :  { %16232 = vst [vmem:[#allocation32_spill] sm:$0xff] %v10965_v16  ;;  %v1329_v2 = vsel %vm8199_vm11, 0, %v8198_v32  ;;  %v10969_v53 = vsub.s32 %v1630_v36, %v1633_v23  ;;  %v1508_v21 = vsel %vm1500_vm12, %v1491_v12, %v1507_v15  ;;  %v16233_v8 = vand.u32 2147483647, %v10577_v58 }
 0x1ba   :  { %v1502_v0 = vsel %vm1498_vm7, %v1482_v54, %v1485_v51  ;;  %v1504_v39 = vsel %vm1500_vm12, %v1488_v57, %v1503_v13  ;;  %v1509_v41 = vsel %vm1499_vm15, %v1506_v17, %v1508_v21  ;;  %v1782_v16 = vshrl.u32 %v1781_v18, 23 }
 0x1bb   :  { %vm10974_vm4 = vcmp.le.f32.partialorder %v16233_v8, 0.7853982  ;;  %v16236_v1 = vand.u32 2147483647, %v10486_v37  ;;  %v16237_v26 = vmov 0  ;;  %v1437_v36 = vor.u32 %v1436_v10, %v1435_v6 }
 0x1bc   :  { %v1510_v32 = vsel %vm1498_vm7, %v1488_v57, %v1491_v12  ;;  %v1511_v23 = vsel %vm1501_vm14, %v1497_v63, 1326507024  ;;  %v16046_v15 = vand.u32 2147483647, %v10940_v38  ;;  %v1442_v8 = vand.u32 2147483647, %v1441_v47 }
 0x1bd   :  { %vm10983_vm5 = vcmp.le.f32.partialorder %v16236_v1, 0.7853982  ;;  %v1512_v51 = vsel %vm1500_vm12, %v1494_v59, %v1511_v23  ;;  %v10991_v54 = vmul.u32.u64.low %v1514_v49, %v1509_v41  ;;  %v10992_v13 = vmul.u32.u64.high %v1514_v49, %v1509_v41, %v10991_v54 }
 0x1be   :  { %v16238_v26 = vsel %vm10983_vm5, 4294967295, %v16237_v26  ;;  %v1330_v18 = vsub.s32 32, %v1329_v2  ;;  %v1636_v17 = vsub.s32 0, %v10969_v53  ;;  %v1505_v21 = vsel %vm1499_vm15, %v1502_v0, %v1504_v39 }
 0x1bf   :  { %16239 = vst [vmem:[#allocation33_spill] sm:$0xff] %v16238_v26  ;;  %v1513_v10 = vsel %vm1499_vm15, %v1510_v32, %v1512_v51  ;;  %v1334_v6 = vsub.s32 4294967266, %v1329_v2  ;;  %v8216_v63 = vadd.s32 4294967169, %v1782_v16  ;;  %9279 = vsinq.f32 %v10867_v42  ;;  %v327_v32 = vpop.f32.mrf.mxu0 }
 0x1c0   :  { %v10998_v57 = vmul.u32.u64.low %v1514_v49, %v1513_v10  ;;  %v10999_v12 = vmul.u32.u64.high %v1514_v49, %v1513_v10, %v10998_v57  ;;  %v16240_v59 = vsub.s32 4, %v10699_v20  ;;  %v1444_v41 = vcvt.s32.f32 %v1437_v36 }
 0x1c1   :  { %v16242_v0 = vsub.s32 4, %v10781_v35  ;;  %v1314_v16 = vadd.s32 %v10815_v34, %v10812_v48  ;;  %v1521_v39 = vmul.u32 %v1514_v49, %v1505_v21  ;;  %v1524_v42 = vadd.s32 1, %v10992_v13 }
 0x1c2   :  { %v11007_v47 = vsel %vm1052_vm8, %v16240_v59, %v10699_v20  ;;  %v1788_v1 = vadd.s32 1, %v8216_v63  ;;  %v16243_v20 = vxor.u32 2147483648, %v10900_v43  ;;  %v11024_v23 = vmul.f32 %v1444_v41, %v1442_v8 }
 0x1c3   :  { %16241 = vst [vmem:[#allocation34_spill] sm:$0xff] %v11007_v47  ;;  %v11014_v46 = vsel %vm1364_vm9, %v16242_v0, %v10781_v35  ;;  %v8209_v51 = vmin.u32 %v1636_v17, %v10969_v53  ;;  %v1785_v35 = vand.u32 8388607, %v16046_v15  ;;  %v1332_v10 = vshrl.u32 %v1314_v16, %v1330_v18 }
 0x1c4   :  { %v1135_v36 = vsel %vm1052_vm8, %v16243_v20, %v10900_v43  ;;  %v1335_v48 = vadd.s32 127, %v1334_v6  ;;  %vm1523_vm2 = vc.u32 %v10999_v12, %v10991_v54  ;;  %vm1789_vm6 = vcmp.gt.s32.totalorder %v1788_v1, 0 }
 0x1c5   :  { %v1525_v49 = vsel %vm1523_vm2, %v1524_v42, %v10992_v13  ;;  %v1790_v43 = vsel %vm1789_vm6, %v1788_v1, 0  ;;  %v11036_v8 = vadd.f32 %v10574_v30, %v327_v32  ;;  %v11041_v17 = vsel %vm10983_vm5, %v10486_v37, %v1135_v36 }
 0x1c6   :  { %v1331_v18 = vshll.u32 %v10886_v44, %v1329_v2  ;;  %v1526_v21 = vadd.s32 %v1525_v49, %v1521_v39  ;;  %v1792_v6 = vand.u32 31, %v1790_v43  ;;  %v1638_v59 = vclz %v8209_v51 }
 0x1c7   :  { %16244 = vst [vmem:[#allocation35_spill] sm:$0xff] %v11036_v8  ;;  %v1786_v41 = vor.u32 8388608, %v1785_v35  ;;  %v1336_v0 = vshll.u32 %v1335_v48, 23  ;;  %v1677_v44 = vand.u32 2139095040, %v11036_v8  ;;  %v1791_v35 = vshrl.u32 %v1790_v43, 5 }
 0x1c8   :  { %v11046_v13 = vor.u32 %v1332_v10, %v1331_v18  ;;  %v1527_v30 = vadd.s32 536870912, %v1526_v21  ;;  %v1793_v16 = vsub.s32 32, %v1792_v6  ;;  %v1795_v42 = vshll.u32 %v16205_v9, %v1792_v6 }
 0x1c9   :  { %v1798_v1 = vshll.u32 %v16195_v52, %v1792_v6  ;;  %v1804_v32 = vshll.u32 %v16197_v31, %v1792_v6  ;;  %v1801_v36 = vshll.u32 %v16196_v4, %v1792_v6  ;;  %v8210_v51 = vadd.s32 4294967294, %v1638_v59 }
 0x1ca   :  { %v11052_v2 = vshrl.u32 %v1527_v30, 30  ;;  %v1796_v39 = vshrl.u32 %v16195_v52, %v1793_v16  ;;  %v1799_v20 = vshrl.u32 %v16196_v4, %v1793_v16  ;;  %v1802_v10 = vshrl.u32 %v16197_v31, %v1793_v16 }
 0x1cb   :  { %v1805_v48 = vshrl.u32 %v16198_v19, %v1793_v16  ;;  %v1337_v49 = vor.u32 4788187, %v1336_v0  ;;  %v11060_v15 = vshll.u32 %v1786_v41, 8  ;;  %v1678_v29 = vshrl.u32 %v1677_v44, 23 }
 0x1cc   :  { %v1529_v18 = vshll.u32 %v11052_v2, 30  ;;  %v1797_v63 = vor.u32 %v1796_v39, %v1795_v42  ;;  %v1800_v57 = vor.u32 %v1799_v20, %v1798_v1  ;;  %v11063_v37 = vpop.eup %9279  ;;  %v1803_v43 = vor.u32 %v1802_v10, %v1801_v36 }
 0x1cd   :  { %v1806_v34 = vor.u32 %v1805_v48, %v1804_v32  ;;  %16245 = vst [vmem:[#allocation36_spill] sm:$0xff] %v11063_v37  ;;  %v1807_v59 = vshll.u32 %v16198_v19, %v1792_v6  ;;  %v1808_v26 = vshrl.u32 %v16194_v40, %v1793_v16  ;;  %vm8211_vm13 = vcmp.lt.s32.totalorder %v8210_v51, 0 }
 0x1ce   :  { %v11065_v27 = vsub.s32 %v1526_v21, %v1529_v18  ;;  %v1794_v0 = vshrl.u32 %v16205_v9, %v1793_v16  ;;  %vm1810_vm3 = vcmp.lt.s32.totalorder %v1791_v35, 1  ;;  %vm1812_vm7 = vcmp.lt.s32.totalorder %v1791_v35, 3 }
 0x1cf   :  { %vm1260_vm8 = vcmp.lt.s32.totalorder %v10667_v45, 0  ;;  %v1809_v42 = vor.u32 %v1808_v26, %v1807_v59  ;;  %vm1811_vm11 = vcmp.lt.s32.totalorder %v1791_v35, 2  ;;  %vm1813_vm12 = vcmp.lt.s32.totalorder %v1791_v35, 4 }
 0x1d0   :  { %v1532_v41 = vsub.s32 0, %v11065_v27  ;;  %v1815_v1 = vsel %vm1813_vm12, %v1803_v43, 2102212464  ;;  %v1818_v21 = vsel %vm1810_vm3, %v1797_v63, %v1800_v57  ;;  %v1819_v32 = vsel %vm1813_vm12, %v1806_v34, 920167782 }
 0x1d1   :  { %v8212_v44 = vadd.s32 4294967169, %v1678_v29  ;;  %v11072_v39 = vsel %vm8211_vm13, 0, %v8210_v51  ;;  %v1820_v20 = vsel %vm1812_vm7, %v1803_v43, %v1819_v32  ;;  %v1822_v16 = vsel %vm1810_vm3, %v1800_v57, %v1803_v43 }
 0x1d2   :  { %v8205_v6 = vmin.u32 %v1532_v41, %v11065_v27  ;;  %v1814_v36 = vsel %vm1810_vm3, %v1794_v0, %v1797_v63  ;;  %v1816_v10 = vsel %vm1812_vm7, %v1800_v57, %v1815_v1  ;;  %v1821_v48 = vsel %vm1811_vm11, %v1818_v21, %v1820_v20 }
 0x1d3   :  { %v1823_v18 = vsel %vm1813_vm12, %v1809_v42, 1326507024  ;;  %v11080_v30 = vmul.u32.u64.low %v11060_v15, %v1821_v48  ;;  %v11081_v37 = vmul.u32.u64.high %v11060_v15, %v1821_v48, %v11080_v30  ;;  %v1338_v29 = vand.u32 2147483647, %v1337_v49 }
 0x1d4   :  { %v1534_v26 = vclz %v8205_v6  ;;  %v1824_v59 = vsel %vm1812_vm7, %v1806_v34, %v1823_v18  ;;  %v16246_v41 = vand.u32 2147483647, %v11036_v8  ;;  %v1684_v63 = vadd.s32 1, %v8212_v44 }
 0x1d5   :  { %v1825_v51 = vsel %vm1811_vm11, %v1822_v16, %v1824_v59  ;;  %v1646_v57 = vsub.s32 4294967266, %v11072_v39  ;;  %v1817_v0 = vsel %vm1811_vm11, %v1814_v36, %v1816_v10  ;;  %9281 = vcosq.f32 %v11041_v17 }
 0x1d6   :  { %v1681_v43 = vand.u32 8388607, %v16246_v41  ;;  %v11090_v42 = vmul.u32.u64.low %v11060_v15, %v1825_v51  ;;  %v11091_v1 = vmul.u32.u64.high %v11060_v15, %v1825_v51, %v11090_v42  ;;  %v16247_v34 = vsel %vm10974_vm4, 0, %v11014_v46 }
 0x1d7   :  { %v11098_v49 = vadd.s32 3, %v16247_v34  ;;  %v8206_v21 = vadd.s32 4294967294, %v1534_v26  ;;  %vm1685_vm14 = vcmp.gt.s32.totalorder %v1684_v63, 0  ;;  %9283 = vsinq.f32 %v11041_v17 }
 0x1d8   :  { %v1340_v32 = vcvt.s32.f32 %v11046_v13  ;;  %v1836_v35 = vadd.s32 1, %v11081_v37  ;;  %v1686_v44 = vsel %vm1685_vm14, %v1684_v63, 0  ;;  %v16249_v6 = vxor.u32 2147483648, %v11024_v23 }
 0x1d9   :  { %16248 = vst [vmem:[#allocation37_spill] sm:$0xff] %v11098_v49  ;;  %v16250_v46 = vsub.s32 4, %v10875_v11  ;;  %v1833_v17 = vmul.u32 %v11060_v15, %v1817_v0  ;;  %v1688_v13 = vand.u32 31, %v1686_v44  ;;  %v1626_v10 = vadd.s32 %v10907_v24, %v10913_v61 }
 0x1da   :  { %v11108_v20 = vsel %vm1364_vm9, %v16249_v6, %v11024_v23  ;;  %v11118_v36 = vmul.f32 %v1340_v32, %v1338_v29  ;;  %v1647_v48 = vadd.s32 127, %v1646_v57  ;;  %v1682_v18 = vor.u32 8388608, %v1681_v43 }
 0x1db   :  { %v11115_v16 = vsel %vm1260_vm8, %v16250_v46, %v10875_v11  ;;  %v1642_v23 = vsub.s32 32, %v11072_v39  ;;  %vm8207_vm9 = vcmp.lt.s32.totalorder %v8206_v21, 0  ;;  %vm1835_vm15 = vc.u32 %v11091_v1, %v11080_v30 }
 0x1dc   :  { %v1689_v26 = vsub.s32 32, %v1688_v13  ;;  %v1837_v11 = vsel %vm1835_vm15, %v1836_v35, %v11081_v37  ;;  %v1691_v59 = vshll.u32 %v16205_v9, %v1688_v13  ;;  %v1694_v15 = vshll.u32 %v16195_v52, %v1688_v13 }
 0x1dd   :  { %v1697_v29 = vshll.u32 %v16196_v4, %v1688_v13  ;;  %v1838_v51 = vadd.s32 %v1837_v11, %v1833_v17  ;;  %v1687_v41 = vshrl.u32 %v1686_v44, 5  ;;  %v1643_v43 = vshll.u32 %v10969_v53, %v11072_v39 }
 0x1de   :  { %v1692_v24 = vshrl.u32 %v16195_v52, %v1689_v26  ;;  %v1695_v61 = vshrl.u32 %v16196_v4, %v1689_v26  ;;  %v1648_v63 = vshll.u32 %v1647_v48, 23  ;;  %v1698_v57 = vshrl.u32 %v16197_v31, %v1689_v26 }
 0x1df   :  { %v1700_v37 = vshll.u32 %v16197_v31, %v1688_v13  ;;  %v1644_v0 = vshrl.u32 %v1626_v10, %v1642_v23  ;;  %v11136_v42 = vsel %vm8207_vm9, 0, %v8206_v21  ;;  %v1839_v34 = vadd.s32 536870912, %v1838_v51 }
 0x1e0   :  { %v1701_v32 = vshrl.u32 %v16198_v19, %v1689_v26  ;;  %v1693_v35 = vor.u32 %v1692_v24, %v1691_v59  ;;  %v1696_v44 = vor.u32 %v1695_v61, %v1694_v15  ;;  %v1699_v6 = vor.u32 %v1698_v57, %v1697_v29  ;;  %v8643_v59 = vpop.f32.mrf.mxu0 }
 0x1e1   :  { %v1703_v46 = vshll.u32 %v16198_v19, %v1688_v13  ;;  %v11140_v17 = vshrl.u32 %v1839_v34, 30  ;;  %v1704_v39 = vshrl.u32 %v16194_v40, %v1689_v26  ;;  %vm1706_vm2 = vcmp.lt.s32.totalorder %v1687_v41, 1 }
 0x1e2   :  { %v1702_v53 = vor.u32 %v1701_v32, %v1700_v37  ;;  %v1649_v48 = vor.u32 4788187, %v1648_v63  ;;  %v1690_v10 = vshrl.u32 %v16205_v9, %v1689_v26  ;;  %vm1708_vm6 = vcmp.lt.s32.totalorder %v1687_v41, 3  ;;  %v11147_v15 = vpop.eup %9281 }
 0x1e3   :  { %vm1709_vm13 = vcmp.lt.s32.totalorder %v1687_v41, 4  ;;  %v1841_v21 = vshll.u32 %v11140_v17, 30  ;;  %v1705_v23 = vor.u32 %v1704_v39, %v1703_v46  ;;  %vm1707_vm3 = vcmp.lt.s32.totalorder %v1687_v41, 2  ;;  %16251 = vst [vmem:[#allocation38_spill] sm:$0xff] %v11147_v15 }
 0x1e4   :  { %v11145_v11 = vshll.u32 %v1682_v18, 8  ;;  %v1542_v13 = vsub.s32 4294967266, %v11136_v42  ;;  %v1711_v29 = vsel %vm1709_vm13, %v1699_v6, 2102212464  ;;  %v1714_v24 = vsel %vm1706_vm2, %v1693_v35, %v1696_v44  ;;  %v11153_v26 = vpop.eup %9283 }
 0x1e5   :  { %v1715_v61 = vsel %vm1709_vm13, %v1702_v53, 920167782  ;;  %16252 = vst [vmem:[#allocation39_spill] sm:$0xff] %v11153_v26  ;;  %v16253_v63 = vand.u32 2147483647, %v10667_v45  ;;  %v1342_v18 = vxor.u32 2147483648, %v11118_v36  ;;  %v1645_v37 = vor.u32 %v1644_v0, %v1643_v43 }
 0x1e6   :  { %v11162_v34 = vsub.s32 %v1838_v51, %v1841_v21  ;;  %v1716_v32 = vsel %vm1708_vm6, %v1699_v6, %v1715_v61  ;;  %v1710_v46 = vsel %vm1706_vm2, %v1690_v10, %v1693_v35  ;;  %v1712_v39 = vsel %vm1708_vm6, %v1696_v44, %v1711_v29 }
 0x1e7   :  { %vm11157_vm7 = vcmp.le.f32.partialorder %v16253_v63, 0.7853982  ;;  %v1717_v49 = vsel %vm1707_vm3, %v1714_v24, %v1716_v32  ;;  %v11171_v63 = vld [vmem:[%s15984_s2] ss:$0 sm:$0xff]  ;;  %v1650_v26 = vand.u32 2147483647, %v1649_v48  ;;  %v1718_v43 = vsel %vm1706_vm2, %v1696_v44, %v1699_v6 }
 0x1e8   :  { %v11174_v15 = vadd.f32 %v11171_v63, %v8643_v59  ;;  %v1844_v51 = vsub.s32 0, %v11162_v34  ;;  %v1719_v0 = vsel %vm1709_vm13, %v1705_v23, 1326507024  ;;  %v1543_v35 = vadd.s32 127, %v1542_v13 }
 0x1e9   :  { %v1720_v10 = vsel %vm1708_vm6, %v1702_v53, %v1719_v0  ;;  %v11181_v21 = vmul.u32.u64.low %v11145_v11, %v1717_v49  ;;  %v11182_v29 = vmul.u32.u64.high %v11145_v11, %v1717_v49, %v11181_v21  ;;  %vm1572_vm11 = vcmp.lt.s32.totalorder %v10757_v50, 0  ;;  %v9181_v44 = vld [vmem:[%s15985_s4 + $0x28] ss:$0 sps:$4 sm:$0x33]  }
 0x1ea   :  { %16256 = vst [vmem:[#allocation40_spill] sm:$0xff] %v11174_v15  ;;  %v1652_v24 = vcvt.s32.f32 %v1645_v37  ;;  %v8217_v59 = vmin.u32 %v1844_v51, %v11162_v34  ;;  %v1713_v48 = vsel %vm1707_vm3, %v1710_v46, %v1712_v39  ;;  %v1721_v61 = vsel %vm1707_vm3, %v1718_v43, %v1720_v10 }
 0x1eb   :  { %v1450_v49 = vsel %vm10974_vm4, %v10577_v58, %v11108_v20  ;;  %v1538_v6 = vsub.s32 32, %v11136_v42  ;;  %v11198_v53 = vmul.u32.u64.low %v11145_v11, %v1721_v61  ;;  %v11199_v23 = vmul.u32.u64.high %v11145_v11, %v1721_v61, %v11198_v53 }
 0x1ec   :  { %v1653_v13 = vmul.f32 %v1652_v24, %v1650_v26  ;;  %v1522_v41 = vadd.s32 %v10991_v54, %v10999_v12  ;;  %v1846_v37 = vclz %v8217_v59  ;;  %v1989_v32 = vand.u32 2139095040, %v11174_v15  ;;  %v337_v24 = vpop.f32.mrf.mxu0 }
 0x1ed   :  { %v16257_v46 = vand.u32 2147483647, %v10757_v50  ;;  %v1544_v28 = vshll.u32 %v1543_v35, 23  ;;  %v1729_v20 = vmul.u32 %v11145_v11, %v1713_v48  ;;  %v1732_v51 = vadd.s32 1, %v11182_v29 }
 0x1ee   :  { %vm16093_vm4 = vcmask 1041408   ;;  %v1343_v26 = vsel %vm1260_vm8, %v1342_v18, %v11118_v36  ;;  %v8218_v54 = vadd.s32 4294967294, %v1846_v37  ;;  %v1990_v12 = vshrl.u32 %v1989_v32, 23 }
 0x1ef   :  { %vm11206_vm12 = vcmp.le.f32.partialorder %v16257_v46, 0.7853982  ;;  %8972 = vmatprep.subr.msk.bf16.mxu0 %vm16093_vm4, %v9181_v44  ;;  %v3866_v43 = vsel %vm16093_vm4, %v9181_v44, 0  ;;  %8973 = vmatprep.subr.msk.bf16.mxu1 %vm16093_vm4, %v9181_v44  ;;  %v1347_v0 = vsel %vm11157_vm7, 0, %v11115_v16  ;;  %v1656_v11 = vsub.s32 4, %v10955_v25 }
 0x1f0   :  { %v1540_v35 = vshrl.u32 %v1522_v41, %v1538_v6  ;;  %vm1731_vm14 = vc.u32 %v11199_v23, %v11181_v21  ;;  %8669 = vmatpush3.bf16.msra.mxu0 %v3866_v43  ;;  %8966 = vmatpush3.bf16.msra.mxu1 %v3866_v43  ;;  %9285 = vcosq.f32 %v1450_v49  ;;  %v1654_v36 = vxor.u32 2147483648, %v1653_v13 }
 0x1f1   :  { %v1733_v18 = vsel %vm1731_vm14, %v1732_v51, %v11182_v29  ;;  %v8224_v10 = vadd.s32 4294967169, %v1990_v12  ;;  %v1346_v59 = vsel %vm11157_vm7, %v10667_v45, %v1343_v26  ;;  %v1539_v16 = vshll.u32 %v11065_v27, %v11136_v42 }
 0x1f2   :  { %v1545_v48 = vor.u32 4788187, %v1544_v28  ;;  %v1734_v61 = vadd.s32 %v1733_v18, %v1729_v20  ;;  %9287 = vsinq.f32 %v1450_v49  ;;  %vm8219_vm8 = vcmp.lt.s32.totalorder %v8218_v54, 0 }
 0x1f3   :  { %v16055_v44 = vand.u32 2147483647, %v11174_v15  ;;  %v1996_v6 = vadd.s32 1, %v8224_v10  ;;  %v11234_v29 = vsel %vm1572_vm11, %v1656_v11, %v10955_v25  ;;  %v1541_v53 = vor.u32 %v1540_v35, %v1539_v16 }
 0x1f4   :  { %v1735_v41 = vadd.s32 536870912, %v1734_v61  ;;  %v11237_v57 = vadd.f32 %v11171_v63, %v337_v24  ;;  %9289 = vcosq.f32 %v1346_v59  ;;  %v11239_v37 = vadd.s32 3, %v1347_v0 }
 0x1f5   :  { %v1655_v27 = vsel %vm1572_vm11, %v1654_v36, %v1653_v13  ;;  %vm1997_vm9 = vcmp.gt.s32.totalorder %v1996_v6, 0  ;;  %v1546_v42 = vand.u32 2147483647, %v1545_v48  ;;  %v11243_v49 = vsel %vm8219_vm8, 0, %v8218_v54 }
 0x1f6   :  { %16260 = vst [vmem:[#allocation41_spill] sm:$0xff] %v11237_v57  ;;  %16261 = vst [vmem:[#allocation42_spill] sm:$0xff] %v11239_v37  ;;  %v11245_v32 = vshrl.u32 %v1735_v41, 30  ;;  %v1998_v46 = vsel %vm1997_vm9, %v1996_v6, 0  ;;  %9291 = vsinq.f32 %v1346_v59  ;;  %v1993_v28 = vand.u32 8388607, %v16055_v44 }
 0x1f7   :  { %v2000_v20 = vand.u32 31, %v1998_v46  ;;  %v1548_v51 = vcvt.s32.f32 %v1541_v53  ;;  %v1885_v54 = vand.u32 2139095040, %v11237_v57  ;;  %v11258_v12 = vsel %vm11206_vm12, %v10757_v50, %v1655_v27 }
 0x1f8   :  { %v1737_v13 = vshll.u32 %v11245_v32, 30  ;;  %v1834_v43 = vadd.s32 %v11080_v30, %v11091_v1  ;;  %v1854_v0 = vsub.s32 4294967266, %v11243_v49  ;;  %v1994_v24 = vor.u32 8388608, %v1993_v28 }
 0x1f9   :  { %v2001_v11 = vsub.s32 32, %v2000_v20  ;;  %v11263_v35 = vmul.f32 %v1548_v51, %v1546_v42  ;;  %v2003_v18 = vshll.u32 %v16205_v9, %v2000_v20  ;;  %v2006_v10 = vshll.u32 %v16195_v52, %v2000_v20 }
 0x1fa   :  { %v11265_v36 = vsub.s32 %v1734_v61, %v1737_v13  ;;  %v1999_v59 = vshrl.u32 %v1998_v46, 5  ;;  %v2009_v48 = vshll.u32 %v16196_v4, %v2000_v20  ;;  %v1886_v53 = vshrl.u32 %v1885_v54, 23 }
 0x1fb   :  { %v2004_v16 = vshrl.u32 %v16195_v52, %v2001_v11  ;;  %v2007_v30 = vshrl.u32 %v16196_v4, %v2001_v11  ;;  %v2010_v1 = vshrl.u32 %v16197_v31, %v2001_v11  ;;  %v1850_v61 = vsub.s32 32, %v11243_v49 }
 0x1fc   :  { %v1740_v6 = vsub.s32 0, %v11265_v36  ;;  %v1855_v41 = vadd.s32 127, %v1854_v0  ;;  %v2012_v27 = vshll.u32 %v16197_v31, %v2000_v20  ;;  %v2013_v42 = vshrl.u32 %v16198_v19, %v2001_v11 }
 0x1fd   :  { %v11277_v28 = vpop.eup %9285  ;;  %v2002_v46 = vshrl.u32 %v16205_v9, %v2001_v11  ;;  %v2005_v51 = vor.u32 %v2004_v16, %v2003_v18  ;;  %v2008_v13 = vor.u32 %v2007_v30, %v2006_v10  ;;  %v2015_v44 = vshll.u32 %v16198_v19, %v2000_v20 }
 0x1fe   :  { %16262 = vst [vmem:[#allocation43_spill] sm:$0xff] %v11277_v28  ;;  %v2011_v26 = vor.u32 %v2010_v1, %v2009_v48  ;;  %v2014_v25 = vor.u32 %v2013_v42, %v2012_v27  ;;  %v2016_v50 = vshrl.u32 %v16194_v40, %v2001_v11  ;;  %vm2018_vm15 = vcmp.lt.s32.totalorder %v1999_v59, 1 }
 0x1ff   :  { %v11282_v54 = vpop.eup %9287  ;;  %vm1468_vm2 = vcmp.lt.s32.totalorder %v10844_v3, 0  ;;  %v8213_v0 = vmin.u32 %v1740_v6, %v11265_v36  ;;  %vm2021_vm6 = vcmp.lt.s32.totalorder %v1999_v59, 4  ;;  %v16061_v28 = vand.u32 2147483647, %v11237_v57 }
 0x200   :  { %16263 = vst [vmem:[#allocation44_spill] sm:$0xff] %v11282_v54  ;;  %v8220_v58 = vadd.s32 4294967169, %v1886_v53  ;;  %vm1780_vm13 = vcmp.lt.s32.totalorder %v10940_v38, 0  ;;  %v2017_v18 = vor.u32 %v2016_v50, %v2015_v44  ;;  %vm2020_vm3 = vcmp.lt.s32.totalorder %v1999_v59, 3 }
 0x201   :  { %v2023_v20 = vsel %vm2021_vm6, %v2011_v26, 2102212464  ;;  %v2034_v10 = vshll.u32 %v1994_v24, 8  ;;  %v11289_v16 = vpop.eup %9289  ;;  %v1852_v11 = vshrl.u32 %v1834_v43, %v1850_v61  ;;  %v1856_v48 = vshll.u32 %v1855_v41, 23 }
 0x202   :  { %16264 = vst [vmem:[#allocation45_spill] sm:$0xff] %v11289_v16  ;;  %vm2019_vm7 = vcmp.lt.s32.totalorder %v1999_v59, 2  ;;  %v2026_v30 = vsel %vm2018_vm15, %v2005_v51, %v2008_v13  ;;  %v2022_v6 = vsel %vm2018_vm15, %v2002_v46, %v2005_v51  ;;  %v2024_v1 = vsel %vm2020_vm3, %v2008_v13, %v2023_v20 }
 0x203   :  { %v2027_v53 = vsel %vm2021_vm6, %v2014_v25, 920167782  ;;  %v2030_v27 = vsel %vm2018_vm15, %v2008_v13, %v2011_v26  ;;  %v11296_v50 = vpop.eup %9291  ;;  %v1742_v44 = vclz %v8213_v0  ;;  %v2031_v42 = vsel %vm2021_vm6, %v2017_v18, 1326507024 }
 0x204   :  { %16265 = vst [vmem:[#allocation46_spill] sm:$0xff] %v11296_v50  ;;  %v2028_v24 = vsel %vm2020_vm3, %v2011_v26, %v2027_v53  ;;  %v1892_v43 = vadd.s32 1, %v8220_v58  ;;  %v1550_v61 = vxor.u32 2147483648, %v11263_v35  ;;  %v1864_v41 = vsub.s32 4, %v11140_v17 }
 0x205   :  { %v2029_v46 = vsel %vm2019_vm7, %v2026_v30, %v2028_v24  ;;  %v2032_v51 = vsel %vm2020_vm3, %v2014_v25, %v2031_v42  ;;  %v1851_v20 = vshll.u32 %v11162_v34, %v11243_v49  ;;  %v2025_v13 = vsel %vm2019_vm7, %v2022_v6, %v2024_v1  ;;  %v8646_v42 = vpop.f32.mrf.mxu0 }
 0x206   :  { %v2033_v0 = vsel %vm2019_vm7, %v2030_v27, %v2032_v51  ;;  %v1889_v26 = vand.u32 8388607, %v16061_v28  ;;  %v11313_v53 = vmul.u32.u64.low %v2034_v10, %v2029_v46  ;;  %v11314_v54 = vmul.u32.u64.high %v2034_v10, %v2029_v46, %v11313_v53  ;;  %v9182_v28 = vld [vmem:[%s15985_s4 + $0x20] sm:$0xff]  }
 0x207   :  { %v11310_v18 = vmul.u32.u64.low %v2034_v10, %v2033_v0  ;;  %v11311_v58 = vmul.u32.u64.high %v2034_v10, %v2033_v0, %v11310_v18  ;;  %v1853_v30 = vor.u32 %v1852_v11, %v1851_v20  ;;  %v1857_v24 = vor.u32 4788187, %v1856_v48  ;;  %8670 = vmatprep.subr.bf16.mxu0 %v9182_v28  ;;  %8961 = vmatprep.subr.bf16.mxu1 %v9182_v28 }
 0x208   :  { %v8214_v25 = vadd.s32 4294967294, %v1742_v44  ;;  %vm1893_vm11 = vcmp.gt.s32.totalorder %v1892_v43, 0  ;;  %9293 = vcosq.f32 %v11258_v12  ;;  %v16266_v34 = vsel %vm11206_vm12, 0, %v11234_v29  ;;  %8671 = vmatpush3.bf16.msra.mxu0 %v9182_v28  ;;  %8967 = vmatpush3.bf16.msra.mxu1 %v9182_v28 }
 0x209   :  { %v11322_v49 = vadd.s32 3, %v16266_v34  ;;  %v16268_v59 = vsub.s32 4, %v11052_v2  ;;  %v1894_v11 = vsel %vm1893_vm11, %v1892_v43, 0  ;;  %v11334_v48 = vsel %vm1468_vm2, %v1550_v61, %v11263_v35 }
 0x20a   :  { %v11339_v39 = vsel %vm1780_vm13, %v1864_v41, %v11140_v17  ;;  %v2041_v29 = vmul.u32 %v2034_v10, %v2025_v13  ;;  %v1896_v1 = vand.u32 31, %v1894_v11  ;;  %vm2043_vm12 = vc.u32 %v11311_v58, %v11313_v53 }
 0x20b   :  { %16267 = vst [vmem:[#allocation47_spill] sm:$0xff] %v11322_v49  ;;  %v11329_v6 = vsel %vm1468_vm2, %v16268_v59, %v11052_v2  ;;  %v2044_v27 = vadd.s32 1, %v11314_v54  ;;  %v1890_v2 = vor.u32 8388608, %v1889_v26  ;;  %v11345_v44 = vadd.f32 %v11171_v63, %v8646_v42 }
 0x20c   :  { %16269 = vst [vmem:[#allocation48_spill] sm:$0xff] %v11329_v6  ;;  %v1858_v43 = vand.u32 2147483647, %v1857_v24  ;;  %v1860_v46 = vcvt.s32.f32 %v1853_v30  ;;  %vm8215_vm14 = vcmp.lt.s32.totalorder %v8214_v25, 0  ;;  %v1897_v35 = vsub.s32 32, %v1896_v1 }
 0x20d   :  { %16270 = vst [vmem:[#allocation49_spill] sm:$0xff] %v11345_v44  ;;  %v2045_v61 = vsel %vm2043_vm12, %v2044_v27, %v11314_v54  ;;  %v1899_v17 = vshll.u32 %v16205_v9, %v1896_v1  ;;  %v1902_v10 = vshll.u32 %v16195_v52, %v1896_v1  ;;  %v1908_v41 = vshll.u32 %v16197_v31, %v1896_v1 }
 0x20e   :  { %v2046_v51 = vadd.s32 %v2045_v61, %v2041_v29  ;;  %v1895_v20 = vshrl.u32 %v1894_v11, 5  ;;  %v1900_v13 = vshrl.u32 %v16195_v52, %v1897_v35  ;;  %v1905_v0 = vshll.u32 %v16196_v4, %v1896_v1 }
 0x20f   :  { %v1903_v26 = vshrl.u32 %v16196_v4, %v1897_v35  ;;  %v1906_v18 = vshrl.u32 %v16197_v31, %v1897_v35  ;;  %v1909_v30 = vshrl.u32 %v16198_v19, %v1897_v35  ;;  %v1911_v54 = vshll.u32 %v16198_v19, %v1896_v1 }
 0x210   :  { %v1861_v24 = vmul.f32 %v1860_v46, %v1858_v43  ;;  %v11357_v42 = vsel %vm8215_vm14, 0, %v8214_v25  ;;  %v2047_v34 = vadd.s32 536870912, %v2046_v51  ;;  %v1912_v59 = vshrl.u32 %v16194_v40, %v1897_v35 }
 0x211   :  { %v1901_v29 = vor.u32 %v1900_v13, %v1899_v17  ;;  %v1904_v11 = vor.u32 %v1903_v26, %v1902_v10  ;;  %v1910_v27 = vor.u32 %v1909_v30, %v1908_v41  ;;  %v2197_v61 = vand.u32 2139095040, %v11345_v44 }
 0x212   :  { %v16271_v49 = vand.u32 2147483647, %v10844_v3  ;;  %v16272_v6 = vmov 0  ;;  %v16275_v25 = vand.u32 2147483647, %v10940_v38  ;;  %v11376_v43 = vshrl.u32 %v2047_v34, 30  ;;  %v347_v34 = vpop.f32.mrf.mxu0 }
 0x213   :  { %v1898_v46 = vshrl.u32 %v16205_v9, %v1897_v35  ;;  %v1907_v17 = vor.u32 %v1906_v18, %v1905_v0  ;;  %vm1914_vm15 = vcmp.lt.s32.totalorder %v1895_v20, 1  ;;  %v1750_v10 = vsub.s32 4294967266, %v11357_v42 }
 0x214   :  { %vm11366_vm8 = vcmp.le.f32.partialorder %v16271_v49, 0.7853982  ;;  %vm11372_vm9 = vcmp.le.f32.partialorder %v16275_v25, 0.7853982  ;;  %v1913_v41 = vor.u32 %v1912_v59, %v1911_v54  ;;  %vm1917_vm2 = vcmp.lt.s32.totalorder %v1895_v20, 4 }
 0x215   :  { %v16273_v6 = vsel %vm11366_vm8, 4294967295, %v16272_v6  ;;  %v1930_v49 = vshll.u32 %v1890_v2, 8  ;;  %v1862_v13 = vxor.u32 2147483648, %v1861_v24  ;;  %v2049_v26 = vshll.u32 %v11376_v43, 30  ;;  %v11384_v54 = vpop.eup %9293 }
 0x216   :  { %16274 = vst [vmem:[#allocation50_spill] sm:$0xff] %v16273_v6  ;;  %vm1916_vm6 = vcmp.lt.s32.totalorder %v1895_v20, 3  ;;  %v1919_v30 = vsel %vm1917_vm2, %v1907_v17, 2102212464  ;;  %vm1915_vm3 = vcmp.lt.s32.totalorder %v1895_v20, 2  ;;  %v1922_v35 = vsel %vm1914_vm15, %v1901_v29, %v1904_v11  ;;  %16278 = vst [vmem:[#allocation51_spill] sm:$0xff] %v11384_v54 }
 0x217   :  { %v1923_v0 = vsel %vm1917_vm2, %v1910_v27, 920167782  ;;  %v2198_v18 = vshrl.u32 %v2197_v61, 23  ;;  %v11386_v2 = vsub.s32 %v2046_v51, %v2049_v26  ;;  %v1918_v59 = vsel %vm1914_vm15, %v1898_v46, %v1901_v29 }
 0x218   :  { %v1920_v25 = vsel %vm1916_vm6, %v1904_v11, %v1919_v30  ;;  %v1926_v16 = vsel %vm1914_vm15, %v1904_v11, %v1907_v17  ;;  %v1746_v50 = vsub.s32 32, %v11357_v42  ;;  %v1751_v28 = vadd.s32 127, %v1750_v10 }
 0x219   :  { %v1924_v37 = vsel %vm1916_vm6, %v1907_v17, %v1923_v0  ;;  %v1927_v45 = vsel %vm1917_vm2, %v1913_v41, 1326507024  ;;  %v2052_v61 = vsub.s32 0, %v11386_v2  ;;  %v11398_v26 = vadd.f32 %v11171_v63, %v347_v34 }
 0x21a   :  { %v1925_v47 = vsel %vm1915_vm3, %v1922_v35, %v1924_v37  ;;  %v1928_v51 = vsel %vm1916_vm6, %v1910_v27, %v1927_v45  ;;  %v1921_v29 = vsel %vm1915_vm3, %v1918_v59, %v1920_v25  ;;  %v8232_v0 = vadd.s32 4294967169, %v2198_v18 }
 0x21b   :  { %16279 = vst [vmem:[#allocation52_spill] sm:$0xff] %v11398_v26  ;;  %v1929_v11 = vsel %vm1915_vm3, %v1926_v16, %v1928_v51  ;;  %v11402_v46 = vmul.u32.u64.low %v1930_v49, %v1925_v47  ;;  %v11403_v30 = vmul.u32.u64.high %v1930_v49, %v1925_v47, %v11402_v46  ;;  %v8225_v17 = vmin.u32 %v2052_v61, %v11386_v2 }
 0x21c   :  { %v11407_v10 = vmul.u32.u64.low %v1930_v49, %v1929_v11  ;;  %v11408_v41 = vmul.u32.u64.high %v1930_v49, %v1929_v11, %v11407_v10  ;;  %9295 = vsinq.f32 %v11258_v12  ;;  %v1554_v45 = vsel %vm11366_vm8, %v10844_v3, %v11334_v48 }
 0x21d   :  { %v1867_v37 = vsel %vm11372_vm9, 0, %v11339_v39  ;;  %v1730_v47 = vadd.s32 %v11181_v21, %v11199_v23  ;;  %v2054_v16 = vclz %v8225_v17  ;;  %v1937_v20 = vmul.u32 %v1930_v49, %v1921_v29 }
 0x21e   :  { %v16066_v27 = vand.u32 2147483647, %v11345_v44  ;;  %v2204_v35 = vadd.s32 1, %v8232_v0  ;;  %v1863_v12 = vsel %vm1780_vm13, %v1862_v13, %v1861_v24  ;;  %v1752_v34 = vshll.u32 %v1751_v28, 23 }
 0x21f   :  { %v1748_v18 = vshrl.u32 %v1730_v47, %v1746_v50  ;;  %v1940_v59 = vadd.s32 1, %v11403_v30  ;;  %v8226_v48 = vadd.s32 4294967294, %v2054_v16  ;;  %vm1939_vm7 = vc.u32 %v11408_v41, %v11402_v46 }
 0x220   :  { %vm2205_vm11 = vcmp.gt.s32.totalorder %v2204_v35, 0  ;;  %v2093_v39 = vand.u32 2139095040, %v11398_v26  ;;  %9297 = vcosq.f32 %v1554_v45  ;;  %v1747_v21 = vshll.u32 %v11265_v36, %v11357_v42 }
 0x221   :  { %v1941_v23 = vsel %vm1939_vm7, %v1940_v59, %v11403_v30  ;;  %v2206_v49 = vsel %vm2205_vm11, %v2204_v35, 0  ;;  %vm8227_vm12 = vcmp.lt.s32.totalorder %v8226_v48, 0  ;;  %v2201_v50 = vand.u32 8388607, %v16066_v27 }
 0x222   :  { %v1942_v24 = vadd.s32 %v1941_v23, %v1937_v20  ;;  %v2208_v13 = vand.u32 31, %v2206_v49  ;;  %9299 = vsinq.f32 %v1554_v45  ;;  %v11435_v25 = vsel %vm11372_vm9, %v10940_v38, %v1863_v12 }
 0x223   :  { %v11437_v28 = vadd.s32 3, %v1867_v37  ;;  %v1749_v36 = vor.u32 %v1748_v18, %v1747_v21  ;;  %v1753_v42 = vor.u32 4788187, %v1752_v34  ;;  %v2094_v29 = vshrl.u32 %v2093_v39, 23 }
 0x224   :  { %v1943_v51 = vadd.s32 536870912, %v1942_v24  ;;  %v11440_v11 = vsel %vm8227_vm12, 0, %v8226_v48  ;;  %v2209_v30 = vsub.s32 32, %v2208_v13  ;;  %v2211_v17 = vshll.u32 %v16205_v9, %v2208_v13 }
 0x225   :  { %16280 = vst [vmem:[#allocation53_spill] sm:$0xff] %v11437_v28  ;;  %v2214_v10 = vshll.u32 %v16195_v52, %v2208_v13  ;;  %v2202_v1 = vor.u32 8388608, %v2201_v50  ;;  %v2207_v45 = vshrl.u32 %v2206_v49, 5  ;;  %v2217_v37 = vshll.u32 %v16196_v4, %v2208_v13 }
 0x226   :  { %v11444_v0 = vshrl.u32 %v1943_v51, 30  ;;  %v2212_v47 = vshrl.u32 %v16195_v52, %v2209_v30  ;;  %v2215_v16 = vshrl.u32 %v16196_v4, %v2209_v30  ;;  %v2218_v20 = vshrl.u32 %v16197_v31, %v2209_v30 }
 0x227   :  { %v2220_v35 = vshll.u32 %v16197_v31, %v2208_v13  ;;  %v1756_v12 = vcvt.s32.f32 %v1749_v36  ;;  %v2062_v18 = vsub.s32 4294967266, %v11440_v11  ;;  %v8228_v59 = vadd.s32 4294967169, %v2094_v29 }
 0x228   :  { %v1945_v34 = vshll.u32 %v11444_v0, 30  ;;  %v1754_v48 = vand.u32 2147483647, %v1753_v42  ;;  %v2213_v39 = vor.u32 %v2212_v47, %v2211_v17  ;;  %v2216_v21 = vor.u32 %v2215_v16, %v2214_v10 }
 0x229   :  { %v2221_v23 = vshrl.u32 %v16198_v19, %v2209_v30  ;;  %v11454_v49 = vpop.eup %9295  ;;  %v2210_v51 = vshrl.u32 %v16205_v9, %v2209_v30  ;;  %v2219_v27 = vor.u32 %v2218_v20, %v2217_v37  ;;  %v2242_v61 = vshll.u32 %v2202_v1, 8 }
 0x22a   :  { %16281 = vst [vmem:[#allocation54_spill] sm:$0xff] %v11454_v49  ;;  %v11456_v50 = vsub.s32 %v1942_v24, %v1945_v34  ;;  %vm1676_vm13 = vcmp.lt.s32.totalorder %v11036_v8, 0  ;;  %v2223_v38 = vshll.u32 %v16198_v19, %v2208_v13  ;;  %v2224_v29 = vshrl.u32 %v16194_v40, %v2209_v30 }
 0x22b   :  { %v2222_v36 = vor.u32 %v2221_v23, %v2220_v35  ;;  %vm2226_vm14 = vcmp.lt.s32.totalorder %v2207_v45, 1  ;;  %v2063_v42 = vadd.s32 127, %v2062_v18  ;;  %vm2228_vm9 = vcmp.lt.s32.totalorder %v2207_v45, 3 }
 0x22c   :  { %v1948_v17 = vsub.s32 0, %v11456_v50  ;;  %v2100_v10 = vadd.s32 1, %v8228_v59  ;;  %v2225_v47 = vor.u32 %v2224_v29, %v2223_v38  ;;  %vm2227_vm15 = vcmp.lt.s32.totalorder %v2207_v45, 2 }
 0x22d   :  { %vm2229_vm2 = vcmp.lt.s32.totalorder %v2207_v45, 4  ;;  %v2234_v24 = vsel %vm2226_vm14, %v2213_v39, %v2216_v21  ;;  %v11464_v37 = vpop.eup %9297  ;;  %v2230_v16 = vsel %vm2226_vm14, %v2210_v51, %v2213_v39  ;;  %v2238_v18 = vsel %vm2226_vm14, %v2216_v21, %v2219_v27 }
 0x22e   :  { %16282 = vst [vmem:[#allocation55_spill] sm:$0xff] %v11464_v37  ;;  %v8221_v1 = vmin.u32 %v1948_v17, %v11456_v50  ;;  %v2231_v13 = vsel %vm2229_vm2, %v2219_v27, 2102212464  ;;  %v2235_v20 = vsel %vm2229_vm2, %v2222_v36, 920167782  ;;  %v11473_v59 = vmul.f32 %v1756_v12, %v1754_v48 }
 0x22f   :  { %v2232_v30 = vsel %vm2228_vm9, %v2216_v21, %v2231_v13  ;;  %v2236_v35 = vsel %vm2228_vm9, %v2219_v27, %v2235_v20  ;;  %v2239_v34 = vsel %vm2229_vm2, %v2225_v47, 1326507024  ;;  %v11471_v38 = vpop.eup %9299  ;;  %v16069_v17 = vand.u32 2147483647, %v11398_v26 }
 0x230   :  { %16283 = vst [vmem:[#allocation56_spill] sm:$0xff] %v11471_v38  ;;  %v1950_v23 = vclz %v8221_v1  ;;  %v2237_v29 = vsel %vm2227_vm15, %v2234_v24, %v2236_v35  ;;  %v2058_v39 = vsub.s32 32, %v11440_v11  ;;  %v2240_v51 = vsel %vm2228_vm9, %v2222_v36, %v2239_v34  ;;  %v8649_v1 = vpop.f32.mrf.mxu0 }
 0x231   :  { %v11479_v28 = vmul.u32.u64.low %v2242_v61, %v2237_v29  ;;  %v11480_v13 = vmul.u32.u64.high %v2242_v61, %v2237_v29, %v11479_v28  ;;  %v2233_v27 = vsel %vm2227_vm15, %v2230_v16, %v2232_v30  ;;  %v2241_v21 = vsel %vm2227_vm15, %v2238_v18, %v2240_v51 }
 0x232   :  { %v8222_v20 = vadd.s32 4294967294, %v1950_v23  ;;  %vm2101_vm6 = vcmp.gt.s32.totalorder %v2100_v10, 0  ;;  %v2064_v12 = vshll.u32 %v2063_v42, 23  ;;  %9301 = vcosq.f32 %v11435_v25 }
 0x233   :  { %v11485_v48 = vmul.u32.u64.low %v2242_v61, %v2241_v21  ;;  %v11486_v47 = vmul.u32.u64.high %v2242_v61, %v2241_v21, %v11485_v48  ;;  %v2102_v24 = vsel %vm2101_vm6, %v2100_v10, 0  ;;  %v16284_v36 = vsub.s32 4, %v11245_v32 }
 0x234   :  { %vm8223_vm3 = vcmp.lt.s32.totalorder %v8222_v20, 0  ;;  %v2104_v16 = vand.u32 31, %v2102_v24  ;;  %v2042_v42 = vadd.s32 %v11313_v53, %v11311_v58  ;;  %v2249_v30 = vmul.u32 %v2242_v61, %v2233_v27 }
 0x235   :  { %v11494_v35 = vsel %vm1676_vm13, %v16284_v36, %v11245_v32  ;;  %v2252_v10 = vadd.s32 1, %v11480_v13  ;;  %v2059_v18 = vshll.u32 %v11386_v2, %v11440_v11  ;;  %v2097_v34 = vand.u32 8388607, %v16069_v17 }
 0x236   :  { %v2105_v23 = vsub.s32 32, %v2104_v16  ;;  %v11505_v32 = vadd.f32 %v11171_v63, %v8649_v1  ;;  %v2060_v29 = vshrl.u32 %v2042_v42, %v2058_v39  ;;  %v2065_v51 = vor.u32 4788187, %v2064_v12 }
 0x237   :  { %v11507_v21 = vsel %vm8223_vm3, 0, %v8222_v20  ;;  %vm2251_vm7 = vc.u32 %v11486_v47, %v11479_v28  ;;  %v2103_v53 = vshrl.u32 %v2102_v24, 5  ;;  %v2107_v61 = vshll.u32 %v16205_v9, %v2104_v16 }
 0x238   :  { %16285 = vst [vmem:[#allocation57_spill] sm:$0xff] %v11505_v32  ;;  %v2253_v58 = vsel %vm2251_vm7, %v2252_v10, %v11480_v13  ;;  %v2110_v2 = vshll.u32 %v16195_v52, %v2104_v16  ;;  %v2108_v27 = vshrl.u32 %v16195_v52, %v2105_v23  ;;  %v2111_v48 = vshrl.u32 %v16196_v4, %v2105_v23 }
 0x239   :  { %v2254_v11 = vadd.s32 %v2253_v58, %v2249_v30  ;;  %v2113_v39 = vshll.u32 %v16196_v4, %v2104_v16  ;;  %v1958_v20 = vsub.s32 4294967266, %v11507_v21  ;;  %v2098_v12 = vor.u32 8388608, %v2097_v34 }
 0x23a   :  { %v2114_v1 = vshrl.u32 %v16197_v31, %v2105_v23  ;;  %v2116_v36 = vshll.u32 %v16197_v31, %v2104_v16  ;;  %v2061_v13 = vor.u32 %v2060_v29, %v2059_v18  ;;  %v2066_v24 = vand.u32 2147483647, %v2065_v51 }
 0x23b   :  { %v2255_v42 = vadd.s32 536870912, %v2254_v11  ;;  %v2117_v10 = vshrl.u32 %v16198_v19, %v2105_v23  ;;  %v2109_v17 = vor.u32 %v2108_v27, %v2107_v61  ;;  %v2112_v30 = vor.u32 %v2111_v48, %v2110_v2 }
 0x23c   :  { %v2115_v58 = vor.u32 %v2114_v1, %v2113_v39  ;;  %v2119_v45 = vshll.u32 %v16198_v19, %v2104_v16  ;;  %v2120_v3 = vshrl.u32 %v16194_v40, %v2105_v23  ;;  %vm2122_vm11 = vcmp.lt.s32.totalorder %v2103_v53, 1 }
 0x23d   :  { %v11522_v54 = vshrl.u32 %v2255_v42, 30  ;;  %v2118_v49 = vor.u32 %v2117_v10, %v2116_v36  ;;  %v1959_v34 = vadd.s32 127, %v1958_v20  ;;  %v2106_v37 = vshrl.u32 %v16205_v9, %v2105_v23 }
 0x23e   :  { %vm2124_vm12 = vcmp.lt.s32.totalorder %v2103_v53, 3  ;;  %vm2125_vm14 = vcmp.lt.s32.totalorder %v2103_v53, 4  ;;  %v2121_v29 = vor.u32 %v2120_v3, %v2119_v45  ;;  %vm2123_vm9 = vcmp.lt.s32.totalorder %v2103_v53, 2 }
 0x23f   :  { %v2257_v18 = vshll.u32 %v11522_v54, 30  ;;  %v2138_v51 = vshll.u32 %v2098_v12, 8  ;;  %v16286_v61 = vand.u32 2147483647, %v11036_v8  ;;  %v1954_v2 = vsub.s32 32, %v11507_v21  ;;  %v11537_v39 = vpop.eup %9301 }
 0x240   :  { %v2127_v27 = vsel %vm2125_vm14, %v2115_v58, 2102212464  ;;  %v2130_v48 = vsel %vm2122_vm11, %v2109_v17, %v2112_v30  ;;  %v2131_v23 = vsel %vm2125_vm14, %v2118_v49, 920167782  ;;  %16289 = vst [vmem:[#allocation58_spill] sm:$0xff] %v11537_v39  ;;  %v2068_v20 = vcvt.s32.f32 %v2061_v13 }
 0x241   :  { %vm11529_vm15 = vcmp.le.f32.partialorder %v16286_v61, 0.7853982  ;;  %v1938_v3 = vadd.s32 %v11402_v46, %v11408_v41  ;;  %v11541_v45 = vsub.s32 %v2254_v11, %v2257_v18  ;;  %v2132_v12 = vsel %vm2124_vm12, %v2115_v58, %v2131_v23 }
 0x242   :  { %v1960_v1 = vshll.u32 %v1959_v34, 23  ;;  %v2126_v36 = vsel %vm2122_vm11, %v2106_v37, %v2109_v17  ;;  %v2128_v42 = vsel %vm2124_vm12, %v2112_v30, %v2127_v27  ;;  %v2133_v10 = vsel %vm2123_vm9, %v2130_v48, %v2132_v12 }
 0x243   :  { %v2069_v61 = vmul.f32 %v2068_v20, %v2066_v24  ;;  %v2260_v38 = vsub.s32 0, %v11541_v45  ;;  %v2134_v39 = vsel %vm2122_vm11, %v2112_v30, %v2115_v58  ;;  %v2135_v13 = vsel %vm2125_vm14, %v2121_v29, 1326507024 }
 0x244   :  { %v1956_v6 = vshrl.u32 %v1938_v3, %v1954_v2  ;;  %v2136_v46 = vsel %vm2124_vm12, %v2118_v49, %v2135_v13  ;;  %v11551_v41 = vmul.u32.u64.low %v2138_v51, %v2133_v10  ;;  %v11552_v11 = vmul.u32.u64.high %v2138_v51, %v2133_v10, %v11551_v41 }
 0x245   :  { %v16290_v37 = vand.u32 2147483647, %v11174_v15  ;;  %v2072_v24 = vsub.s32 4, %v11376_v43  ;;  %v8233_v34 = vmin.u32 %v2260_v38, %v11541_v45  ;;  %v2129_v30 = vsel %vm2123_vm9, %v2126_v36, %v2128_v42 }
 0x246   :  { %v2137_v58 = vsel %vm2123_vm9, %v2134_v39, %v2136_v46  ;;  %v1955_v49 = vshll.u32 %v11456_v50, %v11507_v21  ;;  %v1961_v18 = vor.u32 4788187, %v1960_v1  ;;  %v16293_v27 = vxor.u32 2147483648, %v11473_v59  ;;  %v357_v21 = vpop.f32.mrf.mxu0 }
 0x247   :  { %vm11557_vm2 = vcmp.le.f32.partialorder %v16290_v37, 0.7853982  ;;  %v11567_v29 = vmul.u32.u64.low %v2138_v51, %v2137_v58  ;;  %v11568_v2 = vmul.u32.u64.high %v2138_v51, %v2137_v58, %v11567_v29  ;;  %v2070_v23 = vxor.u32 2147483648, %v2069_v61 }
 0x248   :  { %v1759_v48 = vsel %vm1676_vm13, %v16293_v27, %v11473_v59  ;;  %v16078_v38 = vand.u32 2147483647, %v11505_v32  ;;  %v2405_v20 = vand.u32 2139095040, %v11505_v32  ;;  %v1957_v53 = vor.u32 %v1956_v6, %v1955_v49 }
 0x249   :  { %v2262_v39 = vclz %v8233_v34  ;;  %v2145_v3 = vmul.u32 %v2138_v51, %v2129_v30  ;;  %v2148_v50 = vadd.s32 1, %v11552_v11  ;;  %9303 = vsinq.f32 %v11435_v25 }
 0x24a   :  { %v1763_v12 = vsel %vm11529_vm15, 0, %v11494_v35  ;;  %vm1988_vm6 = vcmp.lt.s32.totalorder %v11174_v15, 0  ;;  %v2406_v59 = vshrl.u32 %v2405_v20, 23  ;;  %v1762_v1 = vsel %vm11529_vm15, %v11036_v8, %v1759_v48 }
 0x24b   :  { %v2073_v6 = vsel %vm1988_vm6, %v2072_v24, %v11376_v43  ;;  %v1962_v36 = vand.u32 2147483647, %v1961_v18  ;;  %vm2147_vm13 = vc.u32 %v11568_v2, %v11551_v41  ;;  %v2071_v51 = vsel %vm1988_vm6, %v2070_v23, %v2069_v61 }
 0x24c   :  { %v2149_v25 = vsel %vm2147_vm13, %v2148_v50, %v11552_v11  ;;  %v8240_v42 = vadd.s32 4294967169, %v2406_v59  ;;  %v11591_v10 = vadd.f32 %v11171_v63, %v357_v21  ;;  %v1964_v35 = vcvt.s32.f32 %v1957_v53 }
 0x24d   :  { %v8234_v13 = vadd.s32 4294967294, %v2262_v39  ;;  %v2150_v46 = vadd.s32 %v2149_v25, %v2145_v3  ;;  %v2409_v16 = vand.u32 8388607, %v16078_v38  ;;  %9305 = vcosq.f32 %v1762_v1 }
 0x24e   :  { %16294 = vst [vmem:[#allocation59_spill] sm:$0xff] %v11591_v10  ;;  %vm1884_vm3 = vcmp.lt.s32.totalorder %v11237_v57, 0  ;;  %v1968_v43 = vsub.s32 4, %v11444_v0  ;;  %v2412_v37 = vadd.s32 1, %v8240_v42  ;;  %v11600_v61 = vsel %vm11557_vm2, %v11174_v15, %v2071_v51 }
 0x24f   :  { %v2075_v63 = vsel %vm11557_vm2, 0, %v2073_v6  ;;  %v11604_v11 = vmul.f32 %v1964_v35, %v1962_v36  ;;  %v2151_v24 = vadd.s32 536870912, %v2150_v46  ;;  %9307 = vsinq.f32 %v1762_v1 }
 0x250   :  { %v11606_v34 = vadd.s32 3, %v1763_v12  ;;  %vm2413_vm7 = vcmp.gt.s32.totalorder %v2412_v37, 0  ;;  %v2301_v30 = vand.u32 2139095040, %v11591_v10  ;;  %vm8235_vm11 = vcmp.lt.s32.totalorder %v8234_v13, 0 }
 0x251   :  { %v11609_v58 = vshrl.u32 %v2151_v24, 30  ;;  %v2410_v49 = vor.u32 8388608, %v2409_v16  ;;  %v2414_v18 = vsel %vm2413_vm7, %v2412_v37, 0  ;;  %9309 = vcosq.f32 %v11600_v61 }
 0x252   :  { %16295 = vst [vmem:[#allocation60_spill] sm:$0xff] %v11606_v34  ;;  %v11612_v29 = vadd.s32 3, %v2075_v63  ;;  %v11617_v17 = vsel %vm1884_vm3, %v1968_v43, %v11444_v0  ;;  %v2416_v27 = vand.u32 31, %v2414_v18  ;;  %v1966_v48 = vxor.u32 2147483648, %v11604_v11 }
 0x253   :  { %16297 = vst [vmem:[#allocation62_spill] sm:$0xff] %v11617_v17  ;;  %v2250_v23 = vadd.s32 %v11479_v28, %v11486_v47  ;;  %v2153_v53 = vshll.u32 %v11609_v58, 30  ;;  %v11624_v39 = vsel %vm8235_vm11, 0, %v8234_v13  ;;  %v2302_v21 = vshrl.u32 %v2301_v30, 23 }
 0x254   :  { %16296 = vst [vmem:[#allocation61_spill] sm:$0xff] %v11612_v29  ;;  %v2417_v3 = vsub.s32 32, %v2416_v27  ;;  %v2419_v0 = vshll.u32 %v16205_v9, %v2416_v27  ;;  %v2422_v59 = vshll.u32 %v16195_v52, %v2416_v27  ;;  %v11631_v1 = vshll.u32 %v2410_v49, 8 }
 0x255   :  { %v11627_v12 = vsub.s32 %v2150_v46, %v2153_v53  ;;  %v2266_v28 = vsub.s32 32, %v11624_v39  ;;  %v2415_v47 = vshrl.u32 %v2414_v18, 5  ;;  %v2425_v36 = vshll.u32 %v16196_v4, %v2416_v27 }
 0x256   :  { %v2420_v6 = vshrl.u32 %v16195_v52, %v2417_v3  ;;  %v11636_v51 = vpop.eup %9303  ;;  %v2270_v25 = vsub.s32 4294967266, %v11624_v39  ;;  %v2423_v35 = vshrl.u32 %v16196_v4, %v2417_v3  ;;  %v2426_v13 = vshrl.u32 %v16197_v31, %v2417_v3 }
 0x257   :  { %16298 = vst [vmem:[#allocation63_spill] sm:$0xff] %v11636_v51  ;;  %v2156_v42 = vsub.s32 0, %v11627_v12  ;;  %v2418_v46 = vshrl.u32 %v16205_v9, %v2417_v3  ;;  %v2428_v16 = vshll.u32 %v16197_v31, %v2416_v27  ;;  %v2429_v43 = vshrl.u32 %v16198_v19, %v2417_v3 }
 0x258   :  { %v8236_v37 = vadd.s32 4294967169, %v2302_v21  ;;  %vm2196_vm12 = vcmp.lt.s32.totalorder %v11345_v44, 0  ;;  %v2421_v24 = vor.u32 %v2420_v6, %v2419_v0  ;;  %v2424_v30 = vor.u32 %v2423_v35, %v2422_v59 }
 0x259   :  { %v8229_v63 = vmin.u32 %v2156_v42, %v11627_v12  ;;  %v2431_v49 = vshll.u32 %v16198_v19, %v2416_v27  ;;  %v2427_v18 = vor.u32 %v2426_v13, %v2425_v36  ;;  %v2430_v53 = vor.u32 %v2429_v43, %v2428_v16  ;;  %v8652_v43 = vpop.f32.mrf.mxu0 }
 0x25a   :  { %v2432_v38 = vshrl.u32 %v16194_v40, %v2417_v3  ;;  %vm2434_vm14 = vcmp.lt.s32.totalorder %v2415_v47, 1  ;;  %v11649_v20 = vpop.eup %9305  ;;  %v16300_v50 = vand.u32 2147483647, %v11237_v57  ;;  %v16301_v15 = vmov 0 }
 0x25b   :  { %16299 = vst [vmem:[#allocation64_spill] sm:$0xff] %v11649_v20  ;;  %v2271_v21 = vadd.s32 127, %v2270_v25  ;;  %v2158_v29 = vclz %v8229_v63  ;;  %vm2437_vm15 = vcmp.lt.s32.totalorder %v2415_v47, 4  ;;  %v16304_v0 = vand.u32 2147483647, %v11591_v10 }
 0x25c   :  { %vm11653_vm9 = vcmp.le.f32.partialorder %v16300_v50, 0.7853982  ;;  %v2433_v27 = vor.u32 %v2432_v38, %v2431_v49  ;;  %vm2436_vm2 = vcmp.lt.s32.totalorder %v2415_v47, 3  ;;  %v2439_v6 = vsel %vm2437_vm15, %v2427_v18, 2102212464  ;;  %v11660_v36 = vpop.eup %9307 }
 0x25d   :  { %v16302_v15 = vsel %vm11653_vm9, 4294967295, %v16301_v15  ;;  %v2305_v59 = vand.u32 8388607, %v16304_v0  ;;  %v2308_v3 = vadd.s32 1, %v8236_v37  ;;  %16305 = vst [vmem:[#allocation66_spill] sm:$0xff] %v11660_v36  ;;  %v2267_v42 = vshll.u32 %v11541_v45, %v11624_v39 }
 0x25e   :  { %16303 = vst [vmem:[#allocation65_spill] sm:$0xff] %v16302_v15  ;;  %v2268_v50 = vshrl.u32 %v2250_v23, %v2266_v28  ;;  %vm2435_vm6 = vcmp.lt.s32.totalorder %v2415_v47, 2  ;;  %v2442_v35 = vsel %vm2434_vm14, %v2421_v24, %v2424_v30  ;;  %v2438_v25 = vsel %vm2434_vm14, %v2418_v46, %v2421_v24  ;;  %v11669_v63 = vpop.eup %9309 }
 0x25f   :  { %v2440_v13 = vsel %vm2436_vm2, %v2424_v30, %v2439_v6  ;;  %v2443_v16 = vsel %vm2437_vm15, %v2430_v53, 920167782  ;;  %v2446_v38 = vsel %vm2434_vm14, %v2424_v30, %v2427_v18  ;;  %16306 = vst [vmem:[#allocation67_spill] sm:$0xff] %v11669_v63  ;;  %v2272_v37 = vshll.u32 %v2271_v21, 23 }
 0x260   :  { %v8230_v49 = vadd.s32 4294967294, %v2158_v29  ;;  %v2444_v0 = vsel %vm2436_vm2, %v2427_v18, %v2443_v16  ;;  %v2447_v45 = vsel %vm2437_vm15, %v2433_v27, 1326507024  ;;  %v1967_v23 = vsel %vm1884_vm3, %v1966_v48, %v11604_v11  ;;  %v11683_v29 = vld [vmem:[%s15984_s2] ss:$0 sm:$0xff] }
 0x261   :  { %v2445_v39 = vsel %vm2435_vm6, %v2442_v35, %v2444_v0  ;;  %v2448_v28 = vsel %vm2436_vm2, %v2430_v53, %v2447_v45  ;;  %vm2309_vm13 = vcmp.gt.s32.totalorder %v2308_v3, 0  ;;  %v2441_v46 = vsel %vm2435_vm6, %v2438_v25, %v2440_v13 }
 0x262   :  { %v2449_v24 = vsel %vm2435_vm6, %v2446_v38, %v2448_v28  ;;  %v2306_v30 = vor.u32 8388608, %v2305_v59  ;;  %v11686_v18 = vadd.f32 %v11683_v29, %v8652_v43  ;;  %v2269_v47 = vor.u32 %v2268_v50, %v2267_v42 }
 0x263   :  { %v11689_v11 = vmul.u32.u64.low %v11631_v1, %v2449_v24  ;;  %v11690_v48 = vmul.u32.u64.high %v11631_v1, %v2449_v24, %v11689_v11  ;;  %v11693_v53 = vmul.u32.u64.low %v11631_v1, %v2445_v39  ;;  %v11694_v21 = vmul.u32.u64.high %v11631_v1, %v2445_v39, %v11693_v53 }
 0x264   :  { %16307 = vst [vmem:[#allocation68_spill] sm:$0xff] %v11686_v18  ;;  %v2273_v27 = vor.u32 4788187, %v2272_v37  ;;  %vm8231_vm3 = vcmp.lt.s32.totalorder %v8230_v49, 0  ;;  %v2310_v59 = vsel %vm2309_vm13, %v2308_v3, 0  ;;  %9311 = vsinq.f32 %v11600_v61 }
 0x265   :  { %v11701_v6 = vsel %vm11653_vm9, %v11237_v57, %v1967_v23  ;;  %v16308_v35 = vsub.s32 4, %v11522_v54  ;;  %v2312_v13 = vand.u32 31, %v2310_v59  ;;  %v2146_v42 = vadd.s32 %v11551_v41, %v11568_v2 }
 0x266   :  { %v2457_v3 = vmul.u32 %v11631_v1, %v2441_v46  ;;  %v11713_v50 = vshll.u32 %v2306_v30, 8  ;;  %v11716_v16 = vsel %vm8231_vm3, 0, %v8230_v49  ;;  %vm2459_vm7 = vc.u32 %v11690_v48, %v11693_v53 }
 0x267   :  { %v11708_v25 = vsel %vm2196_vm12, %v16308_v35, %v11522_v54  ;;  %v2460_v38 = vadd.s32 1, %v11694_v21  ;;  %v2313_v43 = vsub.s32 32, %v2312_v13  ;;  %v2274_v54 = vand.u32 2147483647, %v2273_v27 }
 0x268   :  { %v2276_v37 = vcvt.s32.f32 %v2269_v47  ;;  %v2315_v0 = vshll.u32 %v16205_v9, %v2312_v13  ;;  %v2318_v41 = vshll.u32 %v16195_v52, %v2312_v13  ;;  %v2311_v1 = vshrl.u32 %v2310_v59, 5 }
 0x269   :  { %v2461_v2 = vsel %vm2459_vm7, %v2460_v38, %v11694_v21  ;;  %v2316_v45 = vshrl.u32 %v16195_v52, %v2313_v43  ;;  %v2319_v49 = vshrl.u32 %v16196_v4, %v2313_v43  ;;  %v2166_v23 = vsub.s32 4294967266, %v11716_v16 }
 0x26a   :  { %v2462_v39 = vadd.s32 %v2461_v2, %v2457_v3  ;;  %v2321_v28 = vshll.u32 %v16196_v4, %v2312_v13  ;;  %v2322_v46 = vshrl.u32 %v16197_v31, %v2313_v43  ;;  %v2314_v24 = vshrl.u32 %v16205_v9, %v2313_v43 }
 0x26b   :  { %v2324_v30 = vshll.u32 %v16197_v31, %v2312_v13  ;;  %v2325_v11 = vshrl.u32 %v16198_v19, %v2313_v43  ;;  %v2613_v21 = vand.u32 2139095040, %v11686_v18  ;;  %v16309_v47 = vand.u32 2147483647, %v11345_v44 }
 0x26c   :  { %v2463_v59 = vadd.s32 536870912, %v2462_v39  ;;  %v2317_v35 = vor.u32 %v2316_v45, %v2315_v0  ;;  %v2320_v3 = vor.u32 %v2319_v49, %v2318_v41  ;;  %v2327_v38 = vshll.u32 %v16198_v19, %v2312_v13 }
 0x26d   :  { %vm11735_vm11 = vcmp.le.f32.partialorder %v16309_v47, 0.7853982  ;;  %vm2092_vm14 = vcmp.lt.s32.totalorder %v11398_v26, 0  ;;  %v2323_v2 = vor.u32 %v2322_v46, %v2321_v28  ;;  %v2326_v61 = vor.u32 %v2325_v11, %v2324_v30 }
 0x26e   :  { %v2328_v63 = vshrl.u32 %v16194_v40, %v2313_v43  ;;  %vm2330_vm15 = vcmp.lt.s32.totalorder %v2311_v1, 1  ;;  %v2277_v57 = vmul.f32 %v2276_v37, %v2274_v54  ;;  %v2176_v15 = vsub.s32 4, %v11609_v58 }
 0x26f   :  { %v11743_v17 = vshrl.u32 %v2463_v59, 30  ;;  %vm2333_vm2 = vcmp.lt.s32.totalorder %v2311_v1, 4  ;;  %v2167_v47 = vadd.s32 127, %v2166_v23  ;;  %vm2332_vm6 = vcmp.lt.s32.totalorder %v2311_v1, 3 }
 0x270   :  { %v2329_v51 = vor.u32 %v2328_v63, %v2327_v38  ;;  %v2335_v0 = vsel %vm2333_vm2, %v2323_v2, 2102212464  ;;  %v16312_v13 = vand.u32 2147483647, %v11398_v26  ;;  %v2162_v43 = vsub.s32 32, %v11716_v16 }
 0x271   :  { %v2465_v54 = vshll.u32 %v11743_v17, 30  ;;  %vm2331_vm3 = vcmp.lt.s32.totalorder %v2311_v1, 2  ;;  %v2338_v37 = vsel %vm2330_vm15, %v2317_v35, %v2320_v3  ;;  %v2334_v45 = vsel %vm2330_vm15, %v2314_v24, %v2317_v35  ;;  %v11758_v28 = vpop.eup %9311 }
 0x272   :  { %vm11748_vm13 = vcmp.le.f32.partialorder %v16312_v13, 0.7853982  ;;  %v2336_v63 = vsel %vm2332_vm6, %v2320_v3, %v2335_v0  ;;  %v2339_v49 = vsel %vm2333_vm2, %v2326_v61, 920167782  ;;  %v2614_v23 = vshrl.u32 %v2613_v21, 23  ;;  %16315 = vst [vmem:[#allocation69_spill] sm:$0xff] %v11758_v28 }
 0x273   :  { %v2278_v46 = vxor.u32 2147483648, %v2277_v57  ;;  %v11760_v30 = vsub.s32 %v2462_v39, %v2465_v54  ;;  %v2340_v11 = vsel %vm2332_vm6, %v2323_v2, %v2339_v49  ;;  %v2342_v59 = vsel %vm2330_vm15, %v2320_v3, %v2323_v2 }
 0x274   :  { %v2163_v38 = vshll.u32 %v11627_v12, %v11716_v16  ;;  %v2168_v13 = vshll.u32 %v2167_v47, 23  ;;  %v2341_v24 = vsel %vm2331_vm3, %v2338_v37, %v2340_v11  ;;  %v2343_v35 = vsel %vm2333_vm2, %v2329_v51, 1326507024  ;;  %v367_v47 = vpop.f32.mrf.mxu0 }
 0x275   :  { %v2164_v0 = vshrl.u32 %v2146_v42, %v2162_v43  ;;  %v2468_v21 = vsub.s32 0, %v11760_v30  ;;  %v2337_v28 = vsel %vm2331_vm3, %v2334_v45, %v2336_v63  ;;  %v2344_v39 = vsel %vm2332_vm6, %v2326_v61, %v2343_v35 }
 0x276   :  { %v2345_v54 = vsel %vm2331_vm3, %v2342_v59, %v2344_v39  ;;  %v11773_v49 = vmul.u32.u64.low %v11713_v50, %v2341_v24  ;;  %v11774_v3 = vmul.u32.u64.high %v11713_v50, %v2341_v24, %v11773_v49  ;;  %v8248_v12 = vadd.s32 4294967169, %v2614_v23 }
 0x277   :  { %9313 = vcosq.f32 %v11701_v6  ;;  %v8241_v16 = vmin.u32 %v2468_v21, %v11760_v30  ;;  %v11780_v51 = vmul.u32.u64.low %v11713_v50, %v2345_v54  ;;  %v11781_v42 = vmul.u32.u64.high %v11713_v50, %v2345_v54, %v11780_v51 }
 0x278   :  { %9315 = vsinq.f32 %v11701_v6  ;;  %v2169_v1 = vor.u32 4788187, %v2168_v13  ;;  %v2620_v2 = vadd.s32 1, %v8248_v12  ;;  %v11790_v43 = vsel %vm2092_vm14, %v2176_v15, %v11609_v58 }
 0x279   :  { %v2470_v37 = vclz %v8241_v16  ;;  %v2353_v45 = vmul.u32 %v11713_v50, %v2337_v28  ;;  %v16316_v63 = vand.u32 2147483647, %v11686_v18  ;;  %v2279_v6 = vsel %vm2196_vm12, %v2278_v46, %v2277_v57 }
 0x27a   :  { %v2165_v11 = vor.u32 %v2164_v0, %v2163_v38  ;;  %v2356_v59 = vadd.s32 1, %v11774_v3  ;;  %vm2621_vm7 = vcmp.gt.s32.totalorder %v2620_v2, 0  ;;  %vm2355_vm15 = vc.u32 %v11781_v42, %v11773_v49  ;;  %v9183_v0 = vld [vmem:[%s15985_s4 + $0x18] sm:$0xff]  }
 0x27b   :  { %v2617_v23 = vand.u32 8388607, %v16316_v63  ;;  %v8242_v13 = vadd.s32 4294967294, %v2470_v37  ;;  %v2622_v24 = vsel %vm2621_vm7, %v2620_v2, 0  ;;  %v11801_v15 = vadd.f32 %v11683_v29, %v367_v47  ;;  %8672 = vmatprep.subr.bf16.mxu0 %v9183_v0  ;;  %8962 = vmatprep.subr.bf16.mxu1 %v9183_v0 }
 0x27c   :  { %v2170_v58 = vand.u32 2147483647, %v2169_v1  ;;  %v2357_v28 = vsel %vm2355_vm15, %v2356_v59, %v11774_v3  ;;  %v2624_v57 = vand.u32 31, %v2622_v24  ;;  %v11810_v46 = vsel %vm11735_vm11, %v11345_v44, %v2279_v6  ;;  %8673 = vmatpush3.bf16.msra.mxu0 %v9183_v0  ;;  %8968 = vmatpush3.bf16.msra.mxu1 %v9183_v0 }
 0x27d   :  { %16317 = vst [vmem:[#allocation70_spill] sm:$0xff] %v11801_v15  ;;  %vm8243_vm12 = vcmp.lt.s32.totalorder %v8242_v13, 0  ;;  %v2358_v38 = vadd.s32 %v2357_v28, %v2353_v45  ;;  %v2618_v35 = vor.u32 8388608, %v2617_v23  ;;  %v2172_v21 = vcvt.s32.f32 %v2165_v11 }
 0x27e   :  { %v2458_v39 = vadd.s32 %v11693_v53, %v11690_v48  ;;  %v2473_v54 = vsel %vm8243_vm12, 0, %v8242_v13  ;;  %v2625_v12 = vsub.s32 32, %v2624_v57  ;;  %v2627_v51 = vshll.u32 %v16205_v9, %v2624_v57 }
 0x27f   :  { %v2478_v3 = vsub.s32 4294967266, %v2473_v54  ;;  %v2359_v16 = vadd.s32 536870912, %v2358_v38  ;;  %v2509_v1 = vand.u32 2139095040, %v11801_v15  ;;  %v11819_v2 = vmul.f32 %v2172_v21, %v2170_v58 }
 0x280   :  { %v2628_v47 = vshrl.u32 %v16195_v52, %v2625_v12  ;;  %v2630_v37 = vshll.u32 %v16195_v52, %v2624_v57  ;;  %v2631_v45 = vshrl.u32 %v16196_v4, %v2625_v12  ;;  %v2633_v53 = vshll.u32 %v16196_v4, %v2624_v57 }
 0x281   :  { %v11824_v48 = vshrl.u32 %v2359_v16, 30  ;;  %v2634_v63 = vshrl.u32 %v16197_v31, %v2625_v12  ;;  %v11828_v23 = vshll.u32 %v2618_v35, 8  ;;  %v2474_v6 = vsub.s32 32, %v2473_v54 }
 0x282   :  { %v2623_v11 = vshrl.u32 %v2622_v24, 5  ;;  %v2636_v59 = vshll.u32 %v16197_v31, %v2624_v57  ;;  %v2637_v13 = vshrl.u32 %v16198_v19, %v2625_v12  ;;  %v2479_v58 = vadd.s32 127, %v2478_v3 }
 0x283   :  { %v2361_v28 = vshll.u32 %v11824_v48, 30  ;;  %v2629_v21 = vor.u32 %v2628_v47, %v2627_v51  ;;  %v2510_v50 = vshrl.u32 %v2509_v1, 23  ;;  %v2632_v61 = vor.u32 %v2631_v45, %v2630_v37 }
 0x284   :  { %v11833_v16 = vpop.eup %9313  ;;  %v2638_v44 = vor.u32 %v2637_v13, %v2636_v59  ;;  %v2639_v20 = vshll.u32 %v16198_v19, %v2624_v57  ;;  %v2640_v35 = vshrl.u32 %v16194_v40, %v2625_v12  ;;  %v2475_v24 = vshll.u32 %v11760_v30, %v2473_v54 }
 0x285   :  { %v11837_v0 = vpop.eup %9315  ;;  %v11840_v36 = vsub.s32 %v2358_v38, %v2361_v28  ;;  %v2626_v3 = vshrl.u32 %v16205_v9, %v2625_v12  ;;  %v2635_v8 = vor.u32 %v2634_v63, %v2633_v53  ;;  %v2476_v34 = vshrl.u32 %v2458_v39, %v2474_v6 }
 0x286   :  { %v2641_v51 = vor.u32 %v2640_v35, %v2639_v20  ;;  %vm2642_vm2 = vcmp.lt.s32.totalorder %v2623_v11, 1  ;;  %vm2644_vm6 = vcmp.lt.s32.totalorder %v2623_v11, 3  ;;  %v2480_v1 = vshll.u32 %v2479_v58, 23 }
 0x287   :  { %v2364_v47 = vsub.s32 0, %v11840_v36  ;;  %vm2643_vm3 = vcmp.lt.s32.totalorder %v2623_v11, 2  ;;  %vm2645_vm7 = vcmp.lt.s32.totalorder %v2623_v11, 4  ;;  %v2650_v37 = vsel %vm2642_vm2, %v2629_v21, %v2632_v61 }
 0x288   :  { %v2647_v57 = vsel %vm2645_vm7, %v2635_v8, 2102212464  ;;  %v2651_v45 = vsel %vm2645_vm7, %v2638_v44, 920167782  ;;  %v8244_v59 = vadd.s32 4294967169, %v2510_v50  ;;  %v2654_v54 = vsel %vm2642_vm2, %v2632_v61, %v2635_v8 }
 0x289   :  { %v8237_v30 = vmin.u32 %v2364_v47, %v11840_v36  ;;  %v2652_v38 = vsel %vm2644_vm6, %v2635_v8, %v2651_v45  ;;  %v16092_v12 = vand.u32 2147483647, %v11801_v15  ;;  %v2646_v39 = vsel %vm2642_vm2, %v2626_v3, %v2629_v21 }
 0x28a   :  { %v2648_v20 = vsel %vm2644_vm6, %v2632_v61, %v2647_v57  ;;  %v2653_v53 = vsel %vm2643_vm3, %v2650_v37, %v2652_v38  ;;  %v2655_v63 = vsel %vm2645_vm7, %v2641_v51, 1326507024  ;;  %v2477_v6 = vor.u32 %v2476_v34, %v2475_v24  ;;  %v8655_v34 = vpop.f32.mrf.mxu0 }
 0x28b   :  { %v2481_v13 = vor.u32 4788187, %v2480_v1  ;;  %v2366_v58 = vclz %v8237_v30  ;;  %v2656_v28 = vsel %vm2644_vm6, %v2638_v44, %v2655_v63  ;;  %v2516_v8 = vadd.s32 1, %v8244_v59 }
 0x28c   :  { %v2657_v50 = vsel %vm2643_vm3, %v2654_v54, %v2656_v28  ;;  %v11852_v35 = vmul.u32.u64.low %v11828_v23, %v2653_v53  ;;  %v11853_v47 = vmul.u32.u64.high %v11828_v23, %v2653_v53, %v11852_v35  ;;  %v2649_v21 = vsel %vm2643_vm3, %v2646_v39, %v2648_v20 }
 0x28d   :  { %v8238_v45 = vadd.s32 4294967294, %v2366_v58  ;;  %v11858_v61 = vmul.u32.u64.low %v11828_v23, %v2657_v50  ;;  %v11859_v3 = vmul.u32.u64.high %v11828_v23, %v2657_v50, %v11858_v61  ;;  %9317 = vcosq.f32 %v11810_v46 }
 0x28e   :  { %v16318_v44 = vsel %vm11735_vm11, 0, %v11708_v25  ;;  %v2174_v51 = vxor.u32 2147483648, %v11819_v2  ;;  %vm2517_vm15 = vcmp.gt.s32.totalorder %v2516_v8, 0  ;;  %9319 = vsinq.f32 %v11810_v46 }
 0x28f   :  { %v11866_v24 = vadd.s32 3, %v16318_v44  ;;  %v16320_v11 = vsel %vm11748_vm13, 0, %v11790_v43  ;;  %vm8239_vm12 = vcmp.lt.s32.totalorder %v8238_v45, 0  ;;  %v2518_v57 = vsel %vm2517_vm15, %v2516_v8, 0 }
 0x290   :  { %v11874_v1 = vadd.s32 3, %v16320_v11  ;;  %v11876_v37 = vsel %vm8239_vm12, 0, %v8238_v45  ;;  %v2665_v27 = vmul.u32 %v11828_v23, %v2649_v21  ;;  %v2668_v25 = vadd.s32 1, %v11853_v47 }
 0x291   :  { %16319 = vst [vmem:[#allocation71_spill] sm:$0xff] %v11866_v24  ;;  %v11881_v59 = vadd.f32 %v11683_v29, %v8655_v34  ;;  %v2482_v30 = vand.u32 2147483647, %v2481_v13  ;;  %v2484_v38 = vcvt.s32.f32 %v2477_v6  ;;  %v2374_v46 = vsub.s32 4294967266, %v11876_v37 }
 0x292   :  { %v2513_v43 = vand.u32 8388607, %v16092_v12  ;;  %v2175_v54 = vsel %vm2092_vm14, %v2174_v51, %v11819_v2  ;;  %v2488_v39 = vsub.s32 4, %v11743_v17  ;;  %vm2667_vm11 = vc.u32 %v11859_v3, %v11852_v35 }
 0x293   :  { %16321 = vst [vmem:[#allocation72_spill] sm:$0xff] %v11881_v59  ;;  %v2520_v23 = vand.u32 31, %v2518_v57  ;;  %v2354_v20 = vadd.s32 %v11773_v49, %v11781_v42  ;;  %v2375_v53 = vadd.s32 127, %v2374_v46  ;;  %v2669_v63 = vsel %vm2667_vm11, %v2668_v25, %v11853_v47 }
 0x294   :  { %v11895_v6 = vshrl.u32 %v2518_v57, 5  ;;  %v2670_v13 = vadd.s32 %v2669_v63, %v2665_v27  ;;  %v11899_v50 = vmul.f32 %v2484_v38, %v2482_v30  ;;  %v2514_v8 = vor.u32 8388608, %v2513_v43 }
 0x295   :  { %v2521_v58 = vsub.s32 32, %v2520_v23  ;;  %v2523_v28 = vshll.u32 %v16205_v9, %v2520_v23  ;;  %v2526_v2 = vshll.u32 %v16195_v52, %v2520_v23  ;;  %v2529_v45 = vshll.u32 %v16196_v4, %v2520_v23 }
 0x296   :  { %v2532_v21 = vshll.u32 %v16197_v31, %v2520_v23  ;;  %vm2404_vm14 = vcmp.lt.s32.totalorder %v11505_v32, 0  ;;  %v2370_v49 = vsub.s32 32, %v11876_v37  ;;  %v2671_v42 = vadd.s32 536870912, %v2670_v13 }
 0x297   :  { %v2524_v47 = vshrl.u32 %v16195_v52, %v2521_v58  ;;  %v2527_v61 = vshrl.u32 %v16196_v4, %v2521_v58  ;;  %v2376_v34 = vshll.u32 %v2375_v53, 23  ;;  %v2530_v44 = vshrl.u32 %v16197_v31, %v2521_v58 }
 0x298   :  { %v2533_v51 = vshrl.u32 %v16198_v19, %v2521_v58  ;;  %vm2538_vm2 = vcmp.lt.s32.totalorder %v11895_v6, 1  ;;  %v11910_v11 = vshrl.u32 %v2671_v42, 30  ;;  %v2535_v25 = vshll.u32 %v16198_v19, %v2520_v23 }
 0x299   :  { %v2525_v57 = vor.u32 %v2524_v47, %v2523_v28  ;;  %v2528_v27 = vor.u32 %v2527_v61, %v2526_v2  ;;  %v2522_v30 = vshrl.u32 %v16205_v9, %v2521_v58  ;;  %v2531_v38 = vor.u32 %v2530_v44, %v2529_v45 }
 0x29a   :  { %v2534_v46 = vor.u32 %v2533_v51, %v2532_v21  ;;  %v2536_v43 = vshrl.u32 %v16194_v40, %v2521_v58  ;;  %v16322_v53 = vand.u32 2147483647, %v11505_v32  ;;  %v2673_v12 = vshll.u32 %v11910_v11, 30  ;;  %v11924_v23 = vpop.eup %9317 }
 0x29b   :  { %vm2540_vm3 = vcmp.lt.s32.totalorder %v11895_v6, 3  ;;  %vm2541_vm7 = vcmp.lt.s32.totalorder %v11895_v6, 4  ;;  %v2554_v28 = vshll.u32 %v2514_v8, 8  ;;  %16325 = vst [vmem:[#allocation73_spill] sm:$0xff] %v11924_v23  ;;  %vm2539_vm15 = vcmp.lt.s32.totalorder %v11895_v6, 2  ;;  %v11931_v21 = vpop.eup %9319 }
 0x29c   :  { %vm11917_vm6 = vcmp.le.f32.partialorder %v16322_v53, 0.7853982  ;;  %v2537_v2 = vor.u32 %v2536_v43, %v2535_v25  ;;  %v2543_v58 = vsel %vm2541_vm7, %v2531_v38, 2102212464  ;;  %v2546_v45 = vsel %vm2538_vm2, %v2525_v57, %v2528_v27  ;;  %16326 = vst [vmem:[#allocation74_spill] sm:$0xff] %v11931_v21 }
 0x29d   :  { %v2371_v42 = vshll.u32 %v11840_v36, %v11876_v37  ;;  %v2372_v47 = vshrl.u32 %v2354_v20, %v2370_v49  ;;  %v11935_v61 = vsub.s32 %v2670_v13, %v2673_v12  ;;  %v2547_v8 = vsel %vm2541_vm7, %v2534_v46, 920167782 }
 0x29e   :  { %v2377_v44 = vor.u32 4788187, %v2376_v34  ;;  %vm2612_vm12 = vcmp.lt.s32.totalorder %v11686_v18, 0  ;;  %v2542_v51 = vsel %vm2538_vm2, %v2522_v30, %v2525_v57  ;;  %v2548_v25 = vsel %vm2540_vm3, %v2531_v38, %v2547_v8 }
 0x29f   :  { %v2821_v43 = vand.u32 2139095040, %v11881_v59  ;;  %v2676_v53 = vsub.s32 0, %v11935_v61  ;;  %v2544_v36 = vsel %vm2540_vm3, %v2528_v27, %v2543_v58  ;;  %v2549_v12 = vsel %vm2539_vm15, %v2546_v45, %v2548_v25 }
 0x2a0   :  { %v2550_v37 = vsel %vm2538_vm2, %v2528_v27, %v2531_v38  ;;  %v2486_v20 = vxor.u32 2147483648, %v11899_v50  ;;  %v2551_v13 = vsel %vm2541_vm7, %v2537_v2, 1326507024  ;;  %v2178_v57 = vsel %vm11748_vm13, %v11398_v26, %v2175_v54 }
 0x2a1   :  { %v11955_v49 = vmul.u32.u64.low %v2554_v28, %v2549_v12  ;;  %v11956_v34 = vmul.u32.u64.high %v2554_v28, %v2549_v12, %v11955_v49  ;;  %vm2300_vm11 = vcmp.lt.s32.totalorder %v11591_v10, 0  ;;  %v2373_v30 = vor.u32 %v2372_v47, %v2371_v42 }
 0x2a2   :  { %v16327_v58 = vand.u32 2147483647, %v11686_v18  ;;  %v8249_v38 = vmin.u32 %v2676_v53, %v11935_v61  ;;  %v2552_v2 = vsel %vm2540_vm3, %v2534_v46, %v2551_v13  ;;  %v2489_v41 = vsel %vm2404_vm14, %v2488_v39, %v11743_v17 }
 0x2a3   :  { %v2545_v54 = vsel %vm2539_vm15, %v2542_v51, %v2544_v36  ;;  %v2553_v45 = vsel %vm2539_vm15, %v2550_v37, %v2552_v2  ;;  %v2822_v42 = vshrl.u32 %v2821_v43, 23  ;;  %v2378_v47 = vand.u32 2147483647, %v2377_v44 }
 0x2a4   :  { %vm11965_vm4 = vcmp.le.f32.partialorder %v16327_v58, 0.7853982  ;;  %v2678_v8 = vclz %v8249_v38  ;;  %v11981_v25 = vmul.u32.u64.low %v2554_v28, %v2553_v45  ;;  %v11982_v53 = vmul.u32.u64.high %v2554_v28, %v2553_v45, %v11981_v25  ;;  %v377_v58 = vpop.f32.mrf.mxu0 }
 0x2a5   :  { %v2487_v46 = vsel %vm2404_vm14, %v2486_v20, %v11899_v50  ;;  %v2564_v12 = vadd.s32 1, %v11956_v34  ;;  %v16094_v17 = vand.u32 2147483647, %v11881_v59  ;;  %v8256_v39 = vadd.s32 4294967169, %v2822_v42 }
 0x2a6   :  { %v2380_v13 = vcvt.s32.f32 %v2373_v30  ;;  %v8250_v51 = vadd.s32 4294967294, %v2678_v8  ;;  %v2696_v6 = vsub.s32 4, %v11910_v11  ;;  %v2561_v36 = vmul.u32 %v2554_v28, %v2545_v54 }
 0x2a7   :  { %9321 = vcosq.f32 %v2178_v57  ;;  %v2491_v44 = vsel %vm11917_vm6, 0, %v2489_v41  ;;  %v2384_v43 = vsub.s32 4, %v11824_v48  ;;  %v2828_v37 = vadd.s32 1, %v8256_v39 }
 0x2a8   :  { %v11996_v50 = vsel %vm11917_vm6, %v11505_v32, %v2487_v46  ;;  %v2381_v20 = vmul.f32 %v2380_v13, %v2378_v47  ;;  %vm8251_vm13 = vcmp.lt.s32.totalorder %v8250_v51, 0  ;;  %vm2563_vm14 = vc.u32 %v11982_v53, %v11955_v49 }
 0x2a9   :  { %v2681_v30 = vsel %vm8251_vm13, 0, %v8250_v51  ;;  %v2565_v28 = vsel %vm2563_vm14, %v2564_v12, %v11956_v34  ;;  %v2825_v38 = vand.u32 8388607, %v16094_v17  ;;  %vm2829_vm2 = vcmp.gt.s32.totalorder %v2828_v37, 0 }
 0x2aa   :  { %v2686_v2 = vsub.s32 4294967266, %v2681_v30  ;;  %v12006_v41 = vsel %vm2612_vm12, %v2696_v6, %v11910_v11  ;;  %v2566_v63 = vadd.s32 %v2565_v28, %v2561_v36  ;;  %v12009_v54 = vadd.f32 %v11683_v29, %v377_v58 }
 0x2ab   :  { %9323 = vsinq.f32 %v2178_v57  ;;  %v2666_v45 = vadd.s32 %v11852_v35, %v11859_v3  ;;  %v2682_v42 = vsub.s32 32, %v2681_v30  ;;  %v2830_v34 = vsel %vm2829_vm2, %v2828_v37, 0 }
 0x2ac   :  { %16330 = vst [vmem:[#allocation75_spill] sm:$0xff] %v12009_v54  ;;  %v12013_v47 = vadd.s32 3, %v2491_v44  ;;  %v2382_v8 = vxor.u32 2147483648, %v2381_v20  ;;  %v2687_v25 = vadd.s32 127, %v2686_v2  ;;  %v2567_v46 = vadd.s32 536870912, %v2566_v63 }
 0x2ad   :  { %9325 = vcosq.f32 %v11996_v50  ;;  %v12019_v11 = vsel %vm2300_vm11, %v2384_v43, %v11824_v48  ;;  %v2832_v12 = vand.u32 31, %v2830_v34  ;;  %v2683_v35 = vshll.u32 %v11935_v61, %v2681_v30 }
 0x2ae   :  { %16331 = vst [vmem:[#allocation76_spill] sm:$0xff] %v12013_v47  ;;  %16332 = vst [vmem:[#allocation77_spill] sm:$0xff] %v12019_v11  ;;  %v12025_v3 = vshrl.u32 %v2567_v46, 30  ;;  %v2826_v39 = vor.u32 8388608, %v2825_v38  ;;  %v2717_v13 = vand.u32 2139095040, %v12009_v54  ;;  %v2684_v51 = vshrl.u32 %v2666_v45, %v2682_v42 }
 0x2af   :  { %v2833_v6 = vsub.s32 32, %v2832_v12  ;;  %v2835_v36 = vshll.u32 %v16205_v9, %v2832_v12  ;;  %v2838_v44 = vshll.u32 %v16195_v52, %v2832_v12  ;;  %v2383_v48 = vsel %vm2300_vm11, %v2382_v8, %v2381_v20 }
 0x2b0   :  { %v2688_v43 = vshll.u32 %v2687_v25, 23  ;;  %v2569_v37 = vshll.u32 %v12025_v3, 30  ;;  %v2831_v58 = vshrl.u32 %v2830_v34, 5  ;;  %v2841_v28 = vshll.u32 %v16196_v4, %v2832_v12 }
 0x2b1   :  { %v2836_v61 = vshrl.u32 %v16195_v52, %v2833_v6  ;;  %v2839_v30 = vshrl.u32 %v16196_v4, %v2833_v6  ;;  %v2842_v38 = vshrl.u32 %v16197_v31, %v2833_v6  ;;  %v16333_v2 = vand.u32 2147483647, %v11591_v10 }
 0x2b2   :  { %v16334_v45 = vmov 0  ;;  %v12043_v42 = vsub.s32 %v2566_v63, %v2569_v37  ;;  %v2844_v20 = vshll.u32 %v16197_v31, %v2832_v12  ;;  %v12046_v8 = vshll.u32 %v2826_v39, 8 }
 0x2b3   :  { %vm12039_vm6 = vcmp.le.f32.partialorder %v16333_v2, 0.7853982  ;;  %v2685_v25 = vor.u32 %v2684_v51, %v2683_v35  ;;  %v2837_v46 = vor.u32 %v2836_v61, %v2835_v36  ;;  %v2840_v17 = vor.u32 %v2839_v30, %v2838_v44 }
 0x2b4   :  { %v16335_v45 = vsel %vm12039_vm6, 4294967295, %v16334_v45  ;;  %v2718_v57 = vshrl.u32 %v2717_v13, 23  ;;  %v12049_v32 = vpop.eup %9321  ;;  %v2689_v47 = vor.u32 4788187, %v2688_v43  ;;  %v2572_v2 = vsub.s32 0, %v12043_v42 }
 0x2b5   :  { %16336 = vst [vmem:[#allocation78_spill] sm:$0xff] %v16335_v45  ;;  %16337 = vst [vmem:[#allocation79_spill] sm:$0xff] %v12049_v32  ;;  %v2845_v26 = vshrl.u32 %v16198_v19, %v2833_v6  ;;  %vm2850_vm3 = vcmp.lt.s32.totalorder %v2831_v58, 1  ;;  %v2834_v63 = vshrl.u32 %v16205_v9, %v2833_v6  ;;  %v2843_v37 = vor.u32 %v2842_v38, %v2841_v28 }
 0x2b6   :  { %v2847_v39 = vshll.u32 %v16198_v19, %v2832_v12  ;;  %v2848_v11 = vshrl.u32 %v16194_v40, %v2833_v6  ;;  %v8245_v35 = vmin.u32 %v2572_v2, %v12043_v42  ;;  %vm2852_vm7 = vcmp.lt.s32.totalorder %v2831_v58, 3 }
 0x2b7   :  { %v2846_v51 = vor.u32 %v2845_v26, %v2844_v20  ;;  %vm2853_vm15 = vcmp.lt.s32.totalorder %v2831_v58, 4  ;;  %vm2851_vm11 = vcmp.lt.s32.totalorder %v2831_v58, 2  ;;  %v2858_v44 = vsel %vm2850_vm3, %v2837_v46, %v2840_v17 }
 0x2b8   :  { %v2849_v13 = vor.u32 %v2848_v11, %v2847_v39  ;;  %v2855_v36 = vsel %vm2853_vm15, %v2843_v37, 2102212464  ;;  %v12059_v43 = vpop.eup %9323  ;;  %v2692_v61 = vcvt.s32.f32 %v2685_v25  ;;  %v2574_v30 = vclz %v8245_v35 }
 0x2b9   :  { %v2859_v28 = vsel %vm2853_vm15, %v2846_v51, 920167782  ;;  %v8252_v12 = vadd.s32 4294967169, %v2718_v57  ;;  %v2854_v6 = vsel %vm2850_vm3, %v2834_v63, %v2837_v46  ;;  %v2856_v38 = vsel %vm2852_vm7, %v2840_v17, %v2855_v36  ;;  %v8658_v36 = vpop.f32.mrf.mxu0 }
 0x2ba   :  { %v2860_v26 = vsel %vm2852_vm7, %v2843_v37, %v2859_v28  ;;  %v2862_v11 = vsel %vm2850_vm3, %v2840_v17, %v2843_v37  ;;  %v12066_v20 = vpop.eup %9325  ;;  %v2690_v2 = vand.u32 2147483647, %v2689_v47  ;;  %v8246_v39 = vadd.s32 4294967294, %v2574_v30 }
 0x2bb   :  { %16338 = vst [vmem:[#allocation80_spill] sm:$0xff] %v12066_v20  ;;  %v2861_v34 = vsel %vm2851_vm11, %v2858_v44, %v2860_v26  ;;  %v2863_v25 = vsel %vm2853_vm15, %v2849_v13, 1326507024  ;;  %v12073_v57 = vsel %vm12039_vm6, %v11591_v10, %v2383_v48  ;;  %v2857_v17 = vsel %vm2851_vm11, %v2854_v6, %v2856_v38 }
 0x2bc   :  { %v2864_v46 = vsel %vm2852_vm7, %v2846_v51, %v2863_v25  ;;  %v12077_v63 = vmul.u32.u64.low %v12046_v8, %v2861_v34  ;;  %v12078_v35 = vmul.u32.u64.high %v12046_v8, %v2861_v34, %v12077_v63  ;;  %vm8247_vm13 = vcmp.lt.s32.totalorder %v8246_v39, 0 }
 0x2bd   :  { %v2865_v47 = vsel %vm2851_vm11, %v2862_v11, %v2864_v46  ;;  %v2724_v37 = vadd.s32 1, %v8252_v12  ;;  %v2577_v13 = vsel %vm8247_vm13, 0, %v8246_v39  ;;  %v16339_v48 = vand.u32 2147483647, %v12009_v54 }
 0x2be   :  { %v12084_v44 = vmul.u32.u64.low %v12046_v8, %v2865_v47  ;;  %v12085_v30 = vmul.u32.u64.high %v12046_v8, %v2865_v47, %v12084_v44  ;;  %9327 = vsinq.f32 %v11996_v50  ;;  %v12090_v34 = vmul.f32 %v2692_v61, %v2690_v2 }
 0x2bf   :  { %v2721_v51 = vand.u32 8388607, %v16339_v48  ;;  %v16340_v28 = vsel %vm11965_vm4, 0, %v12006_v41  ;;  %vm2725_vm14 = vcmp.gt.s32.totalorder %v2724_v37, 0  ;;  %v2873_v12 = vmul.u32 %v12046_v8, %v2857_v17 }
 0x2c0   :  { %v12096_v58 = vadd.s32 3, %v16340_v28  ;;  %v2876_v6 = vadd.s32 1, %v12078_v35  ;;  %v2726_v38 = vsel %vm2725_vm14, %v2724_v37, 0  ;;  %v12101_v26 = vadd.f32 %v11683_v29, %v8658_v36 }
 0x2c1   :  { %9329 = vcosq.f32 %v12073_v57  ;;  %v2562_v50 = vadd.s32 %v11955_v49, %v11982_v53  ;;  %v2582_v61 = vsub.s32 4294967266, %v2577_v13  ;;  %v2728_v11 = vand.u32 31, %v2726_v38 }
 0x2c2   :  { %16341 = vst [vmem:[#allocation81_spill] sm:$0xff] %v12096_v58  ;;  %16342 = vst [vmem:[#allocation82_spill] sm:$0xff] %v12101_v26  ;;  %v2592_v41 = vsub.s32 4, %v12025_v3  ;;  %vm2875_vm2 = vc.u32 %v12085_v30, %v12077_v63  ;;  %v2722_v2 = vor.u32 8388608, %v2721_v51  ;;  %v2694_v39 = vxor.u32 2147483648, %v12090_v34 }
 0x2c3   :  { %vm2508_vm3 = vcmp.lt.s32.totalorder %v11801_v15, 0  ;;  %v2578_v25 = vsub.s32 32, %v2577_v13  ;;  %v2877_v46 = vsel %vm2875_vm2, %v2876_v6, %v12078_v35  ;;  %v2729_v17 = vsub.s32 32, %v2728_v11 }
 0x2c4   :  { %v2579_v49 = vshll.u32 %v12043_v42, %v2577_v13  ;;  %v2878_v53 = vadd.s32 %v2877_v46, %v2873_v12  ;;  %v2731_v47 = vshll.u32 %v16205_v9, %v2728_v11  ;;  %v2734_v37 = vshll.u32 %v16195_v52, %v2728_v11 }
 0x2c5   :  { %v2583_v36 = vadd.s32 127, %v2582_v61  ;;  %v2727_v44 = vshrl.u32 %v2726_v38, 5  ;;  %v2732_v48 = vshrl.u32 %v16195_v52, %v2729_v17  ;;  %v2737_v51 = vshll.u32 %v16196_v4, %v2728_v11 }
 0x2c6   :  { %v2879_v28 = vadd.s32 536870912, %v2878_v53  ;;  %v2735_v8 = vshrl.u32 %v16196_v4, %v2729_v17  ;;  %v2738_v58 = vshrl.u32 %v16197_v31, %v2729_v17  ;;  %v2740_v35 = vshll.u32 %v16197_v31, %v2728_v11 }
 0x2c7   :  { %v2580_v6 = vshrl.u32 %v2562_v50, %v2578_v25  ;;  %v2741_v42 = vshrl.u32 %v16198_v19, %v2729_v17  ;;  %v2743_v13 = vshll.u32 %v16198_v19, %v2728_v11  ;;  %v3029_v12 = vand.u32 2139095040, %v12101_v26 }
 0x2c8   :  { %v12124_v61 = vshrl.u32 %v2879_v28, 30  ;;  %v2733_v38 = vor.u32 %v2732_v48, %v2731_v47  ;;  %v2736_v46 = vor.u32 %v2735_v8, %v2734_v37  ;;  %v2744_v20 = vshrl.u32 %v16194_v40, %v2729_v17 }
 0x2c9   :  { %v16343_v10 = vand.u32 2147483647, %v11801_v15  ;;  %v2730_v50 = vshrl.u32 %v16205_v9, %v2729_v17  ;;  %v2739_v25 = vor.u32 %v2738_v58, %v2737_v51  ;;  %v2742_v23 = vor.u32 %v2741_v42, %v2740_v35  ;;  %v387_v51 = vpop.f32.mrf.mxu0 }
 0x2ca   :  { %vm2746_vm15 = vcmp.lt.s32.totalorder %v2727_v44, 1  ;;  %v2584_v11 = vshll.u32 %v2583_v36, 23  ;;  %v2881_v21 = vshll.u32 %v12124_v61, 30  ;;  %vm2748_vm11 = vcmp.lt.s32.totalorder %v2727_v44, 3 }
 0x2cb   :  { %vm12129_vm7 = vcmp.le.f32.partialorder %v16343_v10, 0.7853982  ;;  %v2762_v28 = vshll.u32 %v2722_v2, 8  ;;  %v2581_v47 = vor.u32 %v2580_v6, %v2579_v49  ;;  %v2745_v8 = vor.u32 %v2744_v20, %v2743_v13  ;;  %v12135_v37 = vpop.eup %9327 }
 0x2cc   :  { %vm2747_vm13 = vcmp.lt.s32.totalorder %v2727_v44, 2  ;;  %vm2749_vm14 = vcmp.lt.s32.totalorder %v2727_v44, 4  ;;  %16346 = vst [vmem:[#allocation83_spill] sm:$0xff] %v12135_v37  ;;  %v12137_v10 = vsub.s32 %v2878_v53, %v2881_v21  ;;  %v2754_v17 = vsel %vm2746_vm15, %v2733_v38, %v2736_v46 }
 0x2cd   :  { %v2751_v48 = vsel %vm2749_vm14, %v2739_v25, 2102212464  ;;  %v2755_v58 = vsel %vm2749_vm14, %v2742_v23, 920167782  ;;  %v2750_v36 = vsel %vm2746_vm15, %v2730_v50, %v2733_v38  ;;  %v3030_v20 = vshrl.u32 %v3029_v12, 23 }
 0x2ce   :  { %v2752_v35 = vsel %vm2748_vm11, %v2736_v46, %v2751_v48  ;;  %v2756_v2 = vsel %vm2748_vm11, %v2739_v25, %v2755_v58  ;;  %v12145_v49 = vpop.eup %9329  ;;  %v2695_v21 = vsel %vm2612_vm12, %v2694_v39, %v12090_v34  ;;  %v2585_v53 = vor.u32 4788187, %v2584_v11 }
 0x2cf   :  { %16347 = vst [vmem:[#allocation84_spill] sm:$0xff] %v12145_v49  ;;  %v12153_v6 = vsel %vm2508_vm3, %v2592_v41, %v12025_v3  ;;  %v2884_v42 = vsub.s32 0, %v12137_v10  ;;  %v2757_v13 = vsel %vm2747_vm13, %v2754_v17, %v2756_v2  ;;  %v2758_v38 = vsel %vm2746_vm15, %v2736_v46, %v2739_v25  ;;  %v8661_v3 = vpop.f32.mrf.mxu0 }
 0x2d0   :  { %v2759_v12 = vsel %vm2749_vm14, %v2745_v8, 1326507024  ;;  %v16348_v50 = vand.u32 2147483647, %v12101_v26  ;;  %v2588_v58 = vcvt.s32.f32 %v2581_v47  ;;  %v2753_v39 = vsel %vm2747_vm13, %v2750_v36, %v2752_v35 }
 0x2d1   :  { %v8257_v34 = vmin.u32 %v2884_v42, %v12137_v10  ;;  %v2760_v11 = vsel %vm2748_vm11, %v2742_v23, %v2759_v12  ;;  %v12165_v37 = vmul.u32.u64.low %v2762_v28, %v2757_v13  ;;  %v12166_v49 = vmul.u32.u64.high %v2762_v28, %v2757_v13, %v12165_v37 }
 0x2d2   :  { %v3033_v48 = vand.u32 8388607, %v16348_v50  ;;  %v2761_v41 = vsel %vm2747_vm13, %v2758_v38, %v2760_v11  ;;  %v8264_v46 = vadd.s32 4294967169, %v3030_v20  ;;  %v2586_v25 = vand.u32 2147483647, %v2585_v53 }
 0x2d3   :  { %v2886_v8 = vclz %v8257_v34  ;;  %v12169_v17 = vmul.u32.u64.low %v2762_v28, %v2761_v41  ;;  %v12170_v2 = vmul.u32.u64.high %v2762_v28, %v2761_v41, %v12169_v17  ;;  %9331 = vsinq.f32 %v12073_v57 }
 0x2d4   :  { %v3036_v47 = vadd.s32 1, %v8264_v46  ;;  %v12174_v36 = vadd.f32 %v11683_v29, %v387_v51  ;;  %v12177_v23 = vadd.f32 %v11683_v29, %v8661_v3  ;;  %v12182_v44 = vsel %vm11965_vm4, %v11686_v18, %v2695_v21 }
 0x2d5   :  { %v8258_v20 = vadd.s32 4294967294, %v2886_v8  ;;  %v2769_v53 = vmul.u32 %v2762_v28, %v2753_v39  ;;  %v2874_v57 = vadd.s32 %v12077_v63, %v12085_v30  ;;  %v2772_v51 = vadd.s32 1, %v12166_v49 }
 0x2d6   :  { %16349 = vst [vmem:[#allocation85_spill] sm:$0xff] %v12174_v36  ;;  %16350 = vst [vmem:[#allocation86_spill] sm:$0xff] %v12177_v23  ;;  %v3034_v42 = vor.u32 8388608, %v3033_v48  ;;  %vm3037_vm12 = vcmp.gt.s32.totalorder %v3036_v47, 0  ;;  %v12190_v29 = vmul.f32 %v2588_v58, %v2586_v25  ;;  %vm2771_vm4 = vc.u32 %v12170_v2, %v12165_v37 }
 0x2d7   :  { %vm8259_vm2 = vcmp.lt.s32.totalorder %v8258_v20, 0  ;;  %v3038_v27 = vsel %vm3037_vm12, %v3036_v47, 0  ;;  %v2904_v13 = vsub.s32 4, %v12124_v61  ;;  %v2773_v38 = vsel %vm2771_vm4, %v2772_v51, %v12166_v49 }
 0x2d8   :  { %v2889_v21 = vsel %vm8259_vm2, 0, %v8258_v20  ;;  %v3040_v28 = vand.u32 31, %v3038_v27  ;;  %v2774_v63 = vadd.s32 %v2773_v38, %v2769_v53  ;;  %v2925_v30 = vand.u32 2139095040, %v12174_v36 }
 0x2d9   :  { %v2890_v12 = vsub.s32 32, %v2889_v21  ;;  %v2894_v50 = vsub.s32 4294967266, %v2889_v21  ;;  %vm2820_vm15 = vcmp.lt.s32.totalorder %v11881_v59, 0  ;;  %v3039_v48 = vshrl.u32 %v3038_v27, 5 }
 0x2da   :  { %v3041_v58 = vsub.s32 32, %v3040_v28  ;;  %v3043_v34 = vshll.u32 %v16205_v9, %v3040_v28  ;;  %v3046_v39 = vshll.u32 %v16195_v52, %v3040_v28  ;;  %v2891_v11 = vshll.u32 %v12137_v10, %v2889_v21 }
 0x2db   :  { %v2895_v3 = vadd.s32 127, %v2894_v50  ;;  %v2775_v41 = vadd.s32 536870912, %v2774_v63  ;;  %v3049_v49 = vshll.u32 %v16196_v4, %v3040_v28  ;;  %v3052_v17 = vshll.u32 %v16197_v31, %v3040_v28 }
 0x2dc   :  { %v3044_v46 = vshrl.u32 %v16195_v52, %v3041_v58  ;;  %v3047_v25 = vshrl.u32 %v16196_v4, %v3041_v58  ;;  %v3050_v8 = vshrl.u32 %v16197_v31, %v3041_v58  ;;  %v2892_v47 = vshrl.u32 %v2874_v57, %v2890_v12 }
 0x2dd   :  { %v2896_v20 = vshll.u32 %v2895_v3, 23  ;;  %v12206_v53 = vshrl.u32 %v2775_v41, 30  ;;  %v3053_v51 = vshrl.u32 %v16198_v19, %v3041_v58  ;;  %v2590_v10 = vxor.u32 2147483648, %v12190_v29 }
 0x2de   :  { %v3045_v27 = vor.u32 %v3044_v46, %v3043_v34  ;;  %v3048_v21 = vor.u32 %v3047_v25, %v3046_v39  ;;  %v3055_v38 = vshll.u32 %v16198_v19, %v3040_v28  ;;  %v16351_v50 = vand.u32 2147483647, %v11881_v59 }
 0x2df   :  { %v2777_v18 = vshll.u32 %v12206_v53, 30  ;;  %v3042_v57 = vshrl.u32 %v16205_v9, %v3041_v58  ;;  %v12219_v12 = vshll.u32 %v3034_v42, 8  ;;  %v2926_v3 = vshrl.u32 %v2925_v30, 23 }
 0x2e0   :  { %vm12213_vm11 = vcmp.le.f32.partialorder %v16351_v50, 0.7853982  ;;  %v3051_v41 = vor.u32 %v3050_v8, %v3049_v49  ;;  %v3054_v24 = vor.u32 %v3053_v51, %v3052_v17  ;;  %v3056_v34 = vshrl.u32 %v16194_v40, %v3041_v58  ;;  %v12222_v39 = vpop.eup %9331 }
 0x2e1   :  { %vm3058_vm13 = vcmp.lt.s32.totalorder %v3039_v48, 1  ;;  %16354 = vst [vmem:[#allocation87_spill] sm:$0xff] %v12222_v39  ;;  %v2893_v28 = vor.u32 %v2892_v47, %v2891_v11  ;;  %v2897_v46 = vor.u32 4788187, %v2896_v20  ;;  %v12224_v25 = vsub.s32 %v2774_v63, %v2777_v18 }
 0x2e2   :  { %vm3060_vm14 = vcmp.lt.s32.totalorder %v3039_v48, 3  ;;  %v3057_v50 = vor.u32 %v3056_v34, %v3055_v38  ;;  %vm3059_vm12 = vcmp.lt.s32.totalorder %v3039_v48, 2  ;;  %vm3061_vm2 = vcmp.lt.s32.totalorder %v3039_v48, 4 }
 0x2e3   :  { %v3066_v32 = vsel %vm3058_vm13, %v3045_v27, %v3048_v21  ;;  %v2780_v42 = vsub.s32 0, %v12224_v25  ;;  %v3062_v30 = vsel %vm3058_vm13, %v3042_v57, %v3045_v27  ;;  %v3063_v49 = vsel %vm3061_vm2, %v3051_v41, 2102212464 }
 0x2e4   :  { %v3067_v8 = vsel %vm3061_vm2, %v3054_v24, 920167782  ;;  %v3064_v58 = vsel %vm3060_vm14, %v3048_v21, %v3063_v49  ;;  %v3070_v11 = vsel %vm3058_vm13, %v3048_v21, %v3051_v41  ;;  %v3071_v18 = vsel %vm3061_vm2, %v3057_v50, 1326507024 }
 0x2e5   :  { %v3068_v17 = vsel %vm3060_vm14, %v3051_v41, %v3067_v8  ;;  %9333 = vcosq.f32 %v12182_v44  ;;  %v2905_v63 = vsel %vm2820_vm15, %v2904_v13, %v12124_v61  ;;  %v8253_v47 = vmin.u32 %v2780_v42, %v12224_v25 }
 0x2e6   :  { %v3069_v20 = vsel %vm3059_vm12, %v3066_v32, %v3068_v17  ;;  %v2591_v51 = vsel %vm2508_vm3, %v2590_v10, %v12190_v29  ;;  %v3072_v27 = vsel %vm3060_vm14, %v3054_v24, %v3071_v18  ;;  %v3065_v41 = vsel %vm3059_vm12, %v3062_v30, %v3064_v58  ;;  %v9184_v32 = vld [vmem:[%s15985_s4 + $0x10] sm:$0xff]  }
 0x2e7   :  { %v12243_v38 = vmul.u32.u64.low %v12219_v12, %v3069_v20  ;;  %v12244_v21 = vmul.u32.u64.high %v12219_v12, %v3069_v20, %v12243_v38  ;;  %v2782_v57 = vclz %v8253_v47  ;;  %v3073_v61 = vsel %vm3059_vm12, %v3070_v11, %v3072_v27  ;;  %8674 = vmatprep.subr.bf16.mxu0 %v9184_v32  ;;  %8963 = vmatprep.subr.bf16.mxu1 %v9184_v32 }
 0x2e8   :  { %v8260_v13 = vadd.s32 4294967169, %v2926_v3  ;;  %v2898_v34 = vand.u32 2147483647, %v2897_v46  ;;  %v2900_v50 = vcvt.s32.f32 %v2893_v28  ;;  %9335 = vsinq.f32 %v12182_v44  ;;  %8675 = vmatpush3.bf16.msra.mxu0 %v9184_v32  ;;  %8969 = vmatpush3.bf16.msra.mxu1 %v9184_v32 }
 0x2e9   :  { %v12253_v29 = vmul.u32.u64.low %v12219_v12, %v3073_v61  ;;  %v12254_v24 = vmul.u32.u64.high %v12219_v12, %v3073_v61, %v12253_v29  ;;  %v16355_v10 = vsel %vm12129_vm7, 0, %v12153_v6  ;;  %v8254_v48 = vadd.s32 4294967294, %v2782_v57 }
 0x2ea   :  { %v12261_v42 = vadd.s32 3, %v16355_v10  ;;  %v2932_v3 = vadd.s32 1, %v8260_v13  ;;  %v12266_v28 = vsel %vm12129_vm7, %v11801_v15, %v2591_v51  ;;  %v2907_v46 = vsel %vm12213_vm11, 0, %v2905_v63 }
 0x2eb   :  { %v3081_v44 = vmul.u32 %v12219_v12, %v3065_v41  ;;  %v3084_v30 = vadd.s32 1, %v12244_v21  ;;  %v2770_v6 = vadd.s32 %v12165_v37, %v12170_v2  ;;  %vm8255_vm3 = vcmp.lt.s32.totalorder %v8254_v48, 0 }
 0x2ec   :  { %16356 = vst [vmem:[#allocation88_spill] sm:$0xff] %v12261_v42  ;;  %v16108_v49 = vand.u32 2147483647, %v12174_v36  ;;  %vm2933_vm4 = vcmp.gt.s32.totalorder %v2932_v3, 0  ;;  %v2901_v8 = vmul.f32 %v2900_v50, %v2898_v34  ;;  %v2785_v45 = vsel %vm8255_vm3, 0, %v8254_v48 }
 0x2ed   :  { %vm3083_vm7 = vc.u32 %v12254_v24, %v12243_v38  ;;  %v2934_v58 = vsel %vm2933_vm4, %v2932_v3, 0  ;;  %v12277_v17 = vadd.s32 3, %v2907_v46  ;;  %v2786_v12 = vsub.s32 32, %v2785_v45 }
 0x2ee   :  { %v2790_v11 = vsub.s32 4294967266, %v2785_v45  ;;  %v3085_v18 = vsel %vm3083_vm7, %v3084_v30, %v12244_v21  ;;  %9337 = vcosq.f32 %v12266_v28  ;;  %v2936_v37 = vand.u32 31, %v2934_v58 }
 0x2ef   :  { %16357 = vst [vmem:[#allocation89_spill] sm:$0xff] %v12277_v17  ;;  %v3086_v63 = vadd.s32 %v3085_v18, %v3081_v44  ;;  %v3237_v2 = vand.u32 2139095040, %v12177_v23  ;;  %v2787_v47 = vshll.u32 %v12224_v25, %v2785_v45  ;;  %v2788_v20 = vshrl.u32 %v2770_v6, %v2786_v12 }
 0x2f0   :  { %v2791_v51 = vadd.s32 127, %v2790_v11  ;;  %v2929_v27 = vand.u32 8388607, %v16108_v49  ;;  %v2902_v57 = vxor.u32 2147483648, %v2901_v8  ;;  %v12285_v61 = vshrl.u32 %v2934_v58, 5 }
 0x2f1   :  { %v3087_v41 = vadd.s32 536870912, %v3086_v63  ;;  %v2937_v13 = vsub.s32 32, %v2936_v37  ;;  %v2939_v21 = vshll.u32 %v16205_v9, %v2936_v37  ;;  %v2942_v34 = vshll.u32 %v16195_v52, %v2936_v37 }
 0x2f2   :  { %v2792_v32 = vshll.u32 %v2791_v51, 23  ;;  %v2945_v50 = vshll.u32 %v16196_v4, %v2936_v37  ;;  %v12290_v29 = vpop.eup %9333  ;;  %v2948_v3 = vshll.u32 %v16197_v31, %v2936_v37  ;;  %v2789_v46 = vor.u32 %v2788_v20, %v2787_v47 }
 0x2f3   :  { %16358 = vst [vmem:[#allocation90_spill] sm:$0xff] %v12290_v29  ;;  %v12292_v25 = vshrl.u32 %v3087_v41, 30  ;;  %v2940_v10 = vshrl.u32 %v16195_v52, %v2937_v13  ;;  %v2943_v48 = vshrl.u32 %v16196_v4, %v2937_v13  ;;  %v2930_v44 = vor.u32 8388608, %v2929_v27 }
 0x2f4   :  { %v2946_v30 = vshrl.u32 %v16197_v31, %v2937_v13  ;;  %v2949_v6 = vshrl.u32 %v16198_v19, %v2937_v13  ;;  %v2793_v45 = vor.u32 4788187, %v2792_v32  ;;  %v16110_v12 = vand.u32 2147483647, %v12177_v23 }
 0x2f5   :  { %v3089_v58 = vshll.u32 %v12292_v25, 30  ;;  %v3238_v11 = vshrl.u32 %v3237_v2, 23  ;;  %v2941_v18 = vor.u32 %v2940_v10, %v2939_v21  ;;  %v2944_v51 = vor.u32 %v2943_v48, %v2942_v34  ;;  %v12302_v17 = vpop.eup %9335 }
 0x2f6   :  { %v2947_v41 = vor.u32 %v2946_v30, %v2945_v50  ;;  %v2951_v49 = vshll.u32 %v16198_v19, %v2936_v37  ;;  %16359 = vst [vmem:[#allocation91_spill] sm:$0xff] %v12302_v17  ;;  %v2950_v47 = vor.u32 %v2949_v6, %v2948_v3  ;;  %v2952_v20 = vshrl.u32 %v16194_v40, %v2937_v13 }
 0x2f7   :  { %v12304_v15 = vsub.s32 %v3086_v63, %v3089_v58  ;;  %vm2954_vm13 = vcmp.lt.s32.totalorder %v12285_v61, 1  ;;  %v2903_v27 = vsel %vm2820_vm15, %v2902_v57, %v2901_v8  ;;  %v2796_v32 = vcvt.s32.f32 %v2789_v46 }
 0x2f8   :  { %vm3028_vm14 = vcmp.lt.s32.totalorder %v12101_v26, 0  ;;  %v2938_v2 = vshrl.u32 %v16205_v9, %v2937_v13  ;;  %v12312_v21 = vshll.u32 %v2930_v44, 8  ;;  %vm2716_vm12 = vcmp.lt.s32.totalorder %v12009_v54, 0 }
 0x2f9   :  { %v3092_v63 = vsub.s32 0, %v12304_v15  ;;  %v2953_v37 = vor.u32 %v2952_v20, %v2951_v49  ;;  %vm2956_vm2 = vcmp.lt.s32.totalorder %v12285_v61, 3  ;;  %vm2957_vm3 = vcmp.lt.s32.totalorder %v12285_v61, 4 }
 0x2fa   :  { %v2794_v34 = vand.u32 2147483647, %v2793_v45  ;;  %vm2955_vm4 = vcmp.lt.s32.totalorder %v12285_v61, 2  ;;  %v2959_v8 = vsel %vm2957_vm3, %v2947_v41, 2102212464  ;;  %v2962_v57 = vsel %vm2954_vm13, %v2941_v18, %v2944_v51 }
 0x2fb   :  { %v16360_v13 = vand.u32 2147483647, %v12101_v26  ;;  %v8265_v10 = vmin.u32 %v3092_v63, %v12304_v15  ;;  %v2963_v49 = vsel %vm2957_vm3, %v2950_v47, 920167782  ;;  %v2966_v48 = vsel %vm2954_vm13, %v2944_v51, %v2947_v41  ;;  %v12330_v46 = vpop.eup %9337 }
 0x2fc   :  { %v8272_v3 = vadd.s32 4294967169, %v3238_v11  ;;  %16363 = vst [vmem:[#allocation92_spill] sm:$0xff] %v12330_v46  ;;  %v2958_v44 = vsel %vm2954_vm13, %v2938_v2, %v2941_v18  ;;  %v2960_v30 = vsel %vm2956_vm2, %v2944_v51, %v2959_v8  ;;  %v2964_v6 = vsel %vm2956_vm2, %v2947_v41, %v2963_v49  ;;  %v397_v41 = vpop.f32.mrf.mxu0 }
 0x2fd   :  { %vm12323_vm15 = vcmp.le.f32.partialorder %v16360_v13, 0.7853982  ;;  %v2967_v45 = vsel %vm2957_vm3, %v2953_v37, 1326507024  ;;  %v3094_v58 = vclz %v8265_v10  ;;  %v3112_v20 = vsub.s32 4, %v12292_v25 }
 0x2fe   :  { %v2965_v63 = vsel %vm2955_vm4, %v2962_v57, %v2964_v6  ;;  %v2968_v11 = vsel %vm2956_vm2, %v2950_v47, %v2967_v45  ;;  %v2797_v13 = vmul.f32 %v2796_v32, %v2794_v34  ;;  %v2961_v8 = vsel %vm2955_vm4, %v2958_v44, %v2960_v30  ;;  %v9185_v6 = vld [vmem:[%s15985_s4 + $0x8] sm:$0xff]  }
 0x2ff   :  { %v2969_v18 = vsel %vm2955_vm4, %v2966_v48, %v2968_v11  ;;  %v12346_v2 = vmul.u32.u64.low %v12312_v21, %v2965_v63  ;;  %v12347_v51 = vmul.u32.u64.high %v12312_v21, %v2965_v63, %v12346_v2  ;;  %v8266_v37 = vadd.s32 4294967294, %v3094_v58  ;;  %v12370_v48 = vld [vmem:[%s15984_s2] ss:$0 sm:$0xff]  ;;  %8676 = vmatprep.subr.bf16.mxu0 %v9185_v6  ;;  %8964 = vmatprep.subr.bf16.mxu1 %v9185_v6 }
 0x300   :  { %v12353_v10 = vmul.u32.u64.low %v12312_v21, %v2969_v18  ;;  %v12354_v57 = vmul.u32.u64.high %v12312_v21, %v2969_v18, %v12353_v10  ;;  %9339 = vsinq.f32 %v12266_v28  ;;  %v2906_v47 = vsel %vm12213_vm11, %v11881_v59, %v2903_v27  ;;  %8677 = vmatpush3.bf16.msra.mxu0 %v9185_v6  ;;  %8970 = vmatpush3.bf16.msra.mxu1 %v9185_v6 }
 0x301   :  { %v2800_v32 = vsub.s32 4, %v12206_v53  ;;  %v3244_v34 = vadd.s32 1, %v8272_v3  ;;  %v3082_v49 = vadd.s32 %v12243_v38, %v12254_v24  ;;  %vm8267_vm7 = vcmp.lt.s32.totalorder %v8266_v37, 0  ;;  %v9186_v10 = vld [vmem:[%s15985_s4] sm:$0xff]  }
 0x302   :  { %v12365_v61 = vand.u32 8388607, %v16110_v12  ;;  %v12373_v28 = vadd.f32 %v12370_v48, %v397_v41  ;;  %v3097_v35 = vsel %vm8267_vm7, 0, %v8266_v37  ;;  %v2977_v27 = vmul.u32 %v12312_v21, %v2961_v8  ;;  %8678 = vmatprep.subr.bf16.mxu0 %v9186_v10  ;;  %8965 = vmatprep.subr.bf16.mxu1 %v9186_v10 }
 0x303   :  { %v2980_v3 = vadd.s32 1, %v12347_v51  ;;  %vm3245_vm11 = vcmp.gt.s32.totalorder %v3244_v34, 0  ;;  %v2798_v38 = vxor.u32 2147483648, %v2797_v13  ;;  %v3098_v24 = vsub.s32 32, %v3097_v35 }
 0x304   :  { %16364 = vst [vmem:[#allocation93_spill] sm:$0xff] %v12373_v28  ;;  %v3102_v44 = vsub.s32 4294967266, %v3097_v35  ;;  %v12380_v30 = vsel %vm3028_vm14, %v3112_v20, %v12292_v25  ;;  %9341 = vcosq.f32 %v2906_v47  ;;  %v12388_v21 = vsel %vm2716_vm12, %v2800_v32, %v12206_v53  ;;  %8679 = vmatpush3.bf16.msra.mxu0 %v9186_v10  ;;  %8971 = vmatpush3.bf16.msra.mxu1 %v9186_v10 }
 0x305   :  { %16365 = vst [vmem:[#allocation94_spill] sm:$0xff] %v12388_v21  ;;  %vm2979_vm13 = vc.u32 %v12354_v57, %v12346_v2  ;;  %v3246_v45 = vsel %vm3245_vm11, %v3244_v34, 0  ;;  %9343 = vsinq.f32 %v2906_v47  ;;  %v3133_v25 = vand.u32 2139095040, %v12373_v28 }
 0x306   :  { %v3103_v58 = vadd.s32 127, %v3102_v44  ;;  %v2981_v63 = vsel %vm2979_vm13, %v2980_v3, %v12347_v51  ;;  %v3242_v53 = vor.u32 8388608, %v12365_v61  ;;  %v3248_v18 = vand.u32 31, %v3246_v45 }
 0x307   :  { %v2982_v11 = vadd.s32 %v2981_v63, %v2977_v27  ;;  %v2799_v41 = vsel %vm2716_vm12, %v2798_v38, %v2797_v13  ;;  %v3099_v37 = vshll.u32 %v12304_v15, %v3097_v35  ;;  %v3100_v51 = vshrl.u32 %v3082_v49, %v3098_v24 }
 0x308   :  { %v3104_v8 = vshll.u32 %v3103_v58, 23  ;;  %v16366_v47 = vand.u32 2147483647, %v12009_v54  ;;  %v16367_v32 = vmov 0  ;;  %v3249_v61 = vsub.s32 32, %v3248_v18 }
 0x309   :  { %v2983_v34 = vadd.s32 536870912, %v2982_v11  ;;  %v3251_v27 = vshll.u32 %v16205_v9, %v3248_v18  ;;  %v3254_v13 = vshll.u32 %v16195_v52, %v3248_v18  ;;  %v3247_v3 = vshrl.u32 %v3246_v45, 5 }
 0x30a   :  { %vm12406_vm2 = vcmp.le.f32.partialorder %v16366_v47, 0.7853982  ;;  %v3260_v15 = vshll.u32 %v16197_v31, %v3248_v18  ;;  %v3134_v35 = vshrl.u32 %v3133_v25, 23  ;;  %v3252_v24 = vshrl.u32 %v16195_v52, %v3249_v61 }
 0x30b   :  { %v16368_v32 = vsel %vm12406_vm2, 4294967295, %v16367_v32  ;;  %v12414_v38 = vshrl.u32 %v2983_v34, 30  ;;  %v3255_v44 = vshrl.u32 %v16196_v4, %v3249_v61  ;;  %v3257_v6 = vshll.u32 %v16196_v4, %v3248_v18 }
 0x30c   :  { %16369 = vst [vmem:[#allocation95_spill] sm:$0xff] %v16368_v32  ;;  %v3101_v58 = vor.u32 %v3100_v51, %v3099_v37  ;;  %v3258_v45 = vshrl.u32 %v16197_v31, %v3249_v61  ;;  %v3261_v63 = vshrl.u32 %v16198_v19, %v3249_v61  ;;  %v3263_v47 = vshll.u32 %v16198_v19, %v3248_v18 }
 0x30d   :  { %v3105_v25 = vor.u32 4788187, %v3104_v8  ;;  %v2985_v12 = vshll.u32 %v12414_v38, 30  ;;  %v3253_v34 = vor.u32 %v3252_v24, %v3251_v27  ;;  %v3256_v20 = vor.u32 %v3255_v44, %v3254_v13  ;;  %v12423_v49 = vpop.eup %9339 }
 0x30e   :  { %16370 = vst [vmem:[#allocation96_spill] sm:$0xff] %v12423_v49  ;;  %v3250_v59 = vshrl.u32 %v16205_v9, %v3249_v61  ;;  %v3262_v21 = vor.u32 %v3261_v63, %v3260_v15  ;;  %v3264_v29 = vshrl.u32 %v16194_v40, %v3249_v61  ;;  %vm3266_vm12 = vcmp.lt.s32.totalorder %v3247_v3, 1 }
 0x30f   :  { %vm2924_vm3 = vcmp.lt.s32.totalorder %v12174_v36, 0  ;;  %v12428_v37 = vsub.s32 %v2982_v11, %v2985_v12  ;;  %v3259_v51 = vor.u32 %v3258_v45, %v3257_v6  ;;  %vm3269_vm4 = vcmp.lt.s32.totalorder %v3247_v3, 4 }
 0x310   :  { %v8268_v18 = vadd.s32 4294967169, %v3134_v35  ;;  %v3108_v8 = vcvt.s32.f32 %v3101_v58  ;;  %v3265_v10 = vor.u32 %v3264_v29, %v3263_v47  ;;  %vm3267_vm7 = vcmp.lt.s32.totalorder %v3247_v3, 2 }
 0x311   :  { %vm3268_vm11 = vcmp.lt.s32.totalorder %v3247_v3, 3  ;;  %v3106_v27 = vand.u32 2147483647, %v3105_v25  ;;  %v2988_v13 = vsub.s32 0, %v12428_v37  ;;  %v3271_v24 = vsel %vm3269_vm4, %v3259_v51, 2102212464  ;;  %v12433_v61 = vpop.eup %9341 }
 0x312   :  { %v3274_v15 = vsel %vm3266_vm12, %v3253_v34, %v3256_v20  ;;  %16371 = vst [vmem:[#allocation97_spill] sm:$0xff] %v12433_v61  ;;  %v12438_v12 = vsel %vm12406_vm2, %v12009_v54, %v2799_v41  ;;  %v3270_v11 = vsel %vm3266_vm12, %v3250_v59, %v3253_v34  ;;  %v3275_v29 = vsel %vm3269_vm4, %v3262_v21, 920167782  ;;  %v12442_v44 = vpop.eup %9343  ;;  %v8664_v54 = vpop.f32.mrf.mxu0 }
 0x313   :  { %v3282_v35 = vshll.u32 %v3242_v53, 8  ;;  %16372 = vst [vmem:[#allocation98_spill] sm:$0xff] %v12442_v44  ;;  %v8261_v6 = vmin.u32 %v2988_v13, %v12428_v37  ;;  %v3272_v58 = vsel %vm3268_vm11, %v3256_v20, %v3271_v24  ;;  %v3276_v45 = vsel %vm3268_vm11, %v3259_v51, %v3275_v29 }
 0x314   :  { %v3278_v63 = vsel %vm3266_vm12, %v3256_v20, %v3259_v51  ;;  %v3008_v47 = vsub.s32 4, %v12414_v38  ;;  %v3277_v41 = vsel %vm3267_vm7, %v3274_v15, %v3276_v45  ;;  %v3279_v25 = vsel %vm3269_vm4, %v3265_v10, 1326507024 }
 0x315   :  { %v16373_v59 = vand.u32 2147483647, %v12373_v28  ;;  %v12455_v53 = vmul.f32 %v3108_v8, %v3106_v27  ;;  %v2990_v61 = vclz %v8261_v6  ;;  %v3280_v13 = vsel %vm3268_vm11, %v3262_v21, %v3279_v25 }
 0x316   :  { %v3140_v24 = vadd.s32 1, %v8268_v18  ;;  %v3273_v29 = vsel %vm3267_vm7, %v3270_v11, %v3272_v58  ;;  %v3281_v20 = vsel %vm3267_vm7, %v3278_v63, %v3280_v13  ;;  %9345 = vcosq.f32 %v12438_v12 }
 0x317   :  { %v12453_v34 = vand.u32 8388607, %v16373_v59  ;;  %v12460_v51 = vmul.u32.u64.low %v3282_v35, %v3277_v41  ;;  %v12461_v44 = vmul.u32.u64.high %v3282_v35, %v3277_v41, %v12460_v51  ;;  %v8262_v10 = vadd.s32 4294967294, %v2990_v61 }
 0x318   :  { %v12464_v15 = vmul.u32.u64.low %v3282_v35, %v3281_v20  ;;  %v12465_v45 = vmul.u32.u64.high %v3282_v35, %v3281_v20, %v12464_v15  ;;  %vm3141_vm13 = vcmp.gt.s32.totalorder %v3140_v24, 0  ;;  %v16374_v21 = vsel %vm12323_vm15, 0, %v12380_v30 }
 0x319   :  { %v12472_v18 = vadd.s32 3, %v16374_v21  ;;  %v3142_v8 = vsel %vm3141_vm13, %v3140_v24, 0  ;;  %v12475_v3 = vadd.f32 %v12370_v48, %v8664_v54  ;;  %v2978_v27 = vadd.s32 %v12346_v2, %v12354_v57 }
 0x31a   :  { %vm8263_vm12 = vcmp.lt.s32.totalorder %v8262_v10, 0  ;;  %v3138_v61 = vor.u32 8388608, %v12453_v34  ;;  %v3144_v11 = vand.u32 31, %v3142_v8  ;;  %v12483_v58 = vsel %vm2924_vm3, %v3008_v47, %v12414_v38 }
 0x31b   :  { %16375 = vst [vmem:[#allocation99_spill] sm:$0xff] %v12472_v18  ;;  %v2993_v6 = vsel %vm8263_vm12, 0, %v8262_v10  ;;  %v3289_v30 = vmul.u32 %v3282_v35, %v3273_v29  ;;  %v3292_v63 = vadd.s32 1, %v12461_v44  ;;  %v3110_v41 = vxor.u32 2147483648, %v12455_v53 }
 0x31c   :  { %v2994_v54 = vsub.s32 32, %v2993_v6  ;;  %v2995_v25 = vshll.u32 %v12428_v37, %v2993_v6  ;;  %v2998_v59 = vsub.s32 4294967266, %v2993_v6  ;;  %vm3291_vm4 = vc.u32 %v12465_v45, %v12460_v51 }
 0x31d   :  { %v3145_v2 = vsub.s32 32, %v3144_v11  ;;  %v3147_v57 = vshll.u32 %v16205_v9, %v3144_v11  ;;  %v3150_v34 = vshll.u32 %v16195_v52, %v3144_v11  ;;  %v3293_v35 = vsel %vm3291_vm4, %v3292_v63, %v12461_v44 }
 0x31e   :  { %v2996_v13 = vshrl.u32 %v2978_v27, %v2994_v54  ;;  %v2999_v38 = vadd.s32 127, %v2998_v59  ;;  %v3153_v47 = vshll.u32 %v16196_v4, %v3144_v11  ;;  %v16376_v24 = vand.u32 2147483647, %v12174_v36 }
 0x31f   :  { %v3294_v37 = vadd.s32 %v3293_v35, %v3289_v30  ;;  %v3143_v20 = vshrl.u32 %v3142_v8, 5  ;;  %v3148_v10 = vshrl.u32 %v16195_v52, %v3145_v2  ;;  %v3151_v15 = vshrl.u32 %v16196_v4, %v3145_v2 }
 0x320   :  { %vm12496_vm7 = vcmp.le.f32.partialorder %v16376_v24, 0.7853982  ;;  %v2997_v21 = vor.u32 %v2996_v13, %v2995_v25  ;;  %v3000_v6 = vshll.u32 %v2999_v38, 23  ;;  %v3154_v27 = vshrl.u32 %v16197_v31, %v3145_v2 }
 0x321   :  { %v3156_v44 = vshll.u32 %v16197_v31, %v3144_v11  ;;  %v3295_v63 = vadd.s32 536870912, %v3294_v37  ;;  %v3149_v54 = vor.u32 %v3148_v10, %v3147_v57  ;;  %v3157_v59 = vshrl.u32 %v16198_v19, %v3145_v2 }
 0x322   :  { %v3445_v24 = vand.u32 2139095040, %v12475_v3  ;;  %v3001_v18 = vor.u32 4788187, %v3000_v6  ;;  %vm3236_vm11 = vcmp.lt.s32.totalorder %v12177_v23, 0  ;;  %v3152_v8 = vor.u32 %v3151_v15, %v3150_v34 }
 0x323   :  { %v3155_v30 = vor.u32 %v3154_v27, %v3153_v47  ;;  %v3159_v35 = vshll.u32 %v16198_v19, %v3144_v11  ;;  %v3296_v32 = vshrl.u32 %v3295_v63, 30  ;;  %v3158_v25 = vor.u32 %v3157_v59, %v3156_v44  ;;  %v12516_v11 = vpop.eup %9345 }
 0x324   :  { %v3160_v13 = vshrl.u32 %v16194_v40, %v3145_v2  ;;  %vm3162_vm13 = vcmp.lt.s32.totalorder %v3143_v20, 1  ;;  %v3004_v38 = vcvt.s32.f32 %v2997_v21  ;;  %v3146_v17 = vshrl.u32 %v16205_v9, %v3145_v2  ;;  %16382 = vst [vmem:[#allocation100_spill] sm:$0xff] %v12516_v11 }
 0x325   :  { %vm3164_vm12 = vcmp.lt.s32.totalorder %v3143_v20, 3  ;;  %vm3165_vm4 = vcmp.lt.s32.totalorder %v3143_v20, 4  ;;  %v3002_v57 = vand.u32 2147483647, %v3001_v18  ;;  %v16379_v10 = vand.u32 2147483647, %v12177_v23 }
 0x326   :  { %v3297_v34 = vshll.u32 %v3296_v32, 30  ;;  %v3161_v47 = vor.u32 %v3160_v13, %v3159_v35  ;;  %vm3163_vm10 = vcmp.lt.s32.totalorder %v3143_v20, 2  ;;  %v3167_v15 = vsel %vm3165_vm4, %v3155_v30, 2102212464 }
 0x327   :  { %vm12512_vm0 = vcmp.le.f32.partialorder %v16379_v10, 0.7853982  ;;  %v3170_v21 = vsel %vm3162_vm13, %v3149_v54, %v3152_v8  ;;  %v3171_v2 = vsel %vm3165_vm4, %v3158_v25, 920167782  ;;  %v3178_v27 = vshll.u32 %v3138_v61, 8 }
 0x328   :  { %v3111_v18 = vsel %vm3028_vm14, %v3110_v41, %v12455_v53  ;;  %v12524_v44 = vsub.s32 %v3294_v37, %v3297_v34  ;;  %v3172_v63 = vsel %vm3164_vm12, %v3155_v30, %v3171_v2  ;;  %v3446_v59 = vshrl.u32 %v3445_v24, 23 }
 0x329   :  { %v3320_v35 = vsub.s32 4, %v3296_v32  ;;  %v3166_v13 = vsel %vm3162_vm13, %v3146_v17, %v3149_v54  ;;  %v3168_v10 = vsel %vm3164_vm12, %v3152_v8, %v3167_v15  ;;  %v3173_v11 = vsel %vm3163_vm10, %v3170_v21, %v3172_v63 }
 0x32a   :  { %v3005_v46 = vmul.f32 %v3004_v38, %v3002_v57  ;;  %v3300_v49 = vsub.s32 0, %v12524_v44  ;;  %v3174_v61 = vsel %vm3162_vm13, %v3152_v8, %v3155_v30  ;;  %v3175_v42 = vsel %vm3165_vm4, %v3161_v47, 1326507024  ;;  %v407_v30 = vpop.f32.mrf.mxu0 }
 0x32b   :  { %v3011_v53 = vsel %vm12496_vm7, 0, %v12483_v58  ;;  %v3176_v41 = vsel %vm3164_vm12, %v3158_v25, %v3175_v42  ;;  %v12537_v37 = vmul.u32.u64.low %v3178_v27, %v3173_v11  ;;  %v12538_v24 = vmul.u32.u64.high %v3178_v27, %v3173_v11, %v12537_v37 }
 0x32c   :  { %v8273_v17 = vmin.u32 %v3300_v49, %v12524_v44  ;;  %v3169_v54 = vsel %vm3163_vm10, %v3166_v13, %v3168_v10  ;;  %v3177_v38 = vsel %vm3163_vm10, %v3174_v61, %v3176_v41  ;;  %v16125_v8 = vand.u32 2147483647, %v12475_v3 }
 0x32d   :  { %v12548_v57 = vsel %vm12323_vm15, %v12101_v26, %v3111_v18  ;;  %v12550_v58 = vmul.u32.u64.low %v3178_v27, %v3177_v38  ;;  %v12551_v42 = vmul.u32.u64.high %v3178_v27, %v3177_v38, %v12550_v58  ;;  %v8280_v25 = vadd.s32 4294967169, %v3446_v59 }
 0x32e   :  { %9347 = vsinq.f32 %v12438_v12  ;;  %v3006_v34 = vxor.u32 2147483648, %v3005_v46  ;;  %v3302_v49 = vclz %v8273_v17  ;;  %v12556_v20 = vsel %vm3236_vm11, %v3320_v35, %v3296_v32 }
 0x32f   :  { %v3185_v47 = vmul.u32 %v3178_v27, %v3169_v54  ;;  %v3188_v11 = vadd.s32 1, %v12538_v24  ;;  %v3452_v15 = vadd.s32 1, %v8280_v25  ;;  %v12560_v50 = vadd.f32 %v12370_v48, %v407_v30 }
 0x330   :  { %9349 = vcosq.f32 %v12548_v57  ;;  %v12563_v21 = vadd.s32 3, %v3011_v53  ;;  %v8274_v2 = vadd.s32 4294967294, %v3302_v49  ;;  %v3449_v12 = vand.u32 8388607, %v16125_v8 }
 0x331   :  { %v3290_v18 = vadd.s32 %v12460_v51, %v12465_v45  ;;  %vm3187_vm10 = vc.u32 %v12551_v42, %v12537_v37  ;;  %vm3453_vm14 = vcmp.gt.s32.totalorder %v3452_v15, 0  ;;  %v12576_v27 = vsel %vm2924_vm3, %v3006_v34, %v3005_v46 }
 0x332   :  { %16383 = vst [vmem:[#allocation101_spill] sm:$0xff] %v12563_v21  ;;  %vm8275_vm15 = vcmp.lt.s32.totalorder %v8274_v2, 0  ;;  %v3189_v63 = vsel %vm3187_vm10, %v3188_v11, %v12538_v24  ;;  %v3454_v59 = vsel %vm3453_vm14, %v3452_v15, 0  ;;  %v3341_v51 = vand.u32 2139095040, %v12560_v50 }
 0x333   :  { %v3305_v35 = vsel %vm8275_vm15, 0, %v8274_v2  ;;  %v3190_v13 = vadd.s32 %v3189_v63, %v3185_v47  ;;  %v3456_v10 = vand.u32 31, %v3454_v59  ;;  %v3450_v41 = vor.u32 8388608, %v3449_v12 }
 0x334   :  { %v3306_v45 = vsub.s32 32, %v3305_v35  ;;  %v3307_v61 = vshll.u32 %v12524_v44, %v3305_v35  ;;  %v3310_v53 = vsub.s32 4294967266, %v3305_v35  ;;  %v3455_v54 = vshrl.u32 %v3454_v59, 5 }
 0x335   :  { %v3191_v17 = vadd.s32 536870912, %v3190_v13  ;;  %v3457_v38 = vsub.s32 32, %v3456_v10  ;;  %v3459_v46 = vshll.u32 %v16205_v9, %v3456_v10  ;;  %v3462_v24 = vshll.u32 %v16195_v52, %v3456_v10 }
 0x336   :  { %v3308_v30 = vshrl.u32 %v3290_v18, %v3306_v45  ;;  %v3311_v58 = vadd.s32 127, %v3310_v53  ;;  %v3468_v25 = vshll.u32 %v16197_v31, %v3456_v10  ;;  %v3465_v44 = vshll.u32 %v16196_v4, %v3456_v10 }
 0x337   :  { %v12584_v34 = vshrl.u32 %v3191_v17, 30  ;;  %v3460_v49 = vshrl.u32 %v16195_v52, %v3457_v38  ;;  %v3463_v47 = vshrl.u32 %v16196_v4, %v3457_v38  ;;  %v3466_v2 = vshrl.u32 %v16197_v31, %v3457_v38 }
 0x338   :  { %v3309_v11 = vor.u32 %v3308_v30, %v3307_v61  ;;  %v3312_v15 = vshll.u32 %v3311_v58, 23  ;;  %v3469_v12 = vshrl.u32 %v16198_v19, %v3457_v38  ;;  %v12592_v59 = vshll.u32 %v3450_v41, 8 }
 0x339   :  { %v3193_v18 = vshll.u32 %v12584_v34, 30  ;;  %v3461_v63 = vor.u32 %v3460_v49, %v3459_v46  ;;  %v3342_v35 = vshrl.u32 %v3341_v51, 23  ;;  %v3464_v17 = vor.u32 %v3463_v47, %v3462_v24 }
 0x33a   :  { %v3313_v45 = vor.u32 4788187, %v3312_v15  ;;  %v3316_v53 = vcvt.s32.f32 %v3309_v11  ;;  %v3470_v8 = vor.u32 %v3469_v12, %v3468_v25  ;;  %v3467_v61 = vor.u32 %v3466_v2, %v3465_v44 }
 0x33b   :  { %v12594_v32 = vpop.eup %9347  ;;  %v12596_v26 = vsub.s32 %v3190_v13, %v3193_v18  ;;  %v3471_v30 = vshll.u32 %v16198_v19, %v3456_v10  ;;  %v3472_v58 = vshrl.u32 %v16194_v40, %v3457_v38  ;;  %v3458_v39 = vshrl.u32 %v16205_v9, %v3457_v38 }
 0x33c   :  { %v3314_v21 = vand.u32 2147483647, %v3313_v45  ;;  %vm3474_vm3 = vcmp.lt.s32.totalorder %v3455_v54, 1  ;;  %vm3476_vm13 = vcmp.lt.s32.totalorder %v3455_v54, 3  ;;  %vm3132_vm12 = vcmp.lt.s32.totalorder %v12373_v28, 0 }
 0x33d   :  { %v12601_v41 = vpop.eup %9349  ;;  %v3196_v51 = vsub.s32 0, %v12596_v26  ;;  %v3473_v46 = vor.u32 %v3472_v58, %v3471_v30  ;;  %vm3475_vm4 = vcmp.lt.s32.totalorder %v3455_v54, 2  ;;  %vm3477_vm10 = vcmp.lt.s32.totalorder %v3455_v54, 4 }
 0x33e   :  { %v3317_v13 = vmul.f32 %v3316_v53, %v3314_v21  ;;  %v3479_v24 = vsel %vm3477_vm10, %v3467_v61, 2102212464  ;;  %v3482_v10 = vsel %vm3474_vm3, %v3461_v63, %v3464_v17  ;;  %v3483_v25 = vsel %vm3477_vm10, %v3470_v8, 920167782 }
 0x33f   :  { %v8269_v49 = vmin.u32 %v3196_v51, %v12596_v26  ;;  %v3484_v38 = vsel %vm3476_vm13, %v3467_v61, %v3483_v25  ;;  %v3486_v47 = vsel %vm3474_vm3, %v3464_v17, %v3467_v61  ;;  %v8276_v44 = vadd.s32 4294967169, %v3342_v35 }
 0x340   :  { %v3478_v11 = vsel %vm3474_vm3, %v3458_v39, %v3461_v63  ;;  %v3480_v15 = vsel %vm3476_vm13, %v3464_v17, %v3479_v24  ;;  %v3485_v2 = vsel %vm3475_vm4, %v3482_v10, %v3484_v38  ;;  %v3487_v12 = vsel %vm3477_vm10, %v3473_v46, 1326507024 }
 0x341   :  { %v3198_v18 = vclz %v8269_v49  ;;  %v3488_v21 = vsel %vm3476_vm13, %v3470_v8, %v3487_v12  ;;  %v12614_v45 = vmul.u32.u64.low %v12592_v59, %v3485_v2  ;;  %v12615_v53 = vmul.u32.u64.high %v12592_v59, %v3485_v2, %v12614_v45 }
 0x342   :  { %v3010_v35 = vsel %vm12496_vm7, %v12174_v36, %v12576_v27  ;;  %v3318_v61 = vxor.u32 2147483648, %v3317_v13  ;;  %v3489_v39 = vsel %vm3475_vm4, %v3486_v47, %v3488_v21  ;;  %v16128_v63 = vand.u32 2147483647, %v12560_v50 }
 0x343   :  { %v8270_v17 = vadd.s32 4294967294, %v3198_v18  ;;  %v3481_v30 = vsel %vm3475_vm4, %v3478_v11, %v3480_v15  ;;  %v12626_v8 = vmul.u32.u64.low %v12592_v59, %v3489_v39  ;;  %v12627_v58 = vmul.u32.u64.high %v12592_v59, %v3489_v39, %v12626_v8 }
 0x344   :  { %9351 = vsinq.f32 %v12548_v57  ;;  %v16384_v51 = vsel %vm12512_vm0, 0, %v12556_v20  ;;  %v3216_v27 = vsub.s32 4, %v12584_v34  ;;  %v3348_v46 = vadd.s32 1, %v8276_v44  ;;  %v8667_v20 = vpop.f32.mrf.mxu0 }
 0x345   :  { %v12634_v29 = vadd.s32 3, %v16384_v51  ;;  %9353 = vcosq.f32 %v3010_v35  ;;  %v3186_v54 = vadd.s32 %v12537_v37, %v12551_v42  ;;  %vm8271_vm7 = vcmp.lt.s32.totalorder %v8270_v17, 0 }
 0x346   :  { %v3500_v24 = vadd.s32 1, %v12615_v53  ;;  %v3201_v10 = vsel %vm8271_vm7, 0, %v8270_v17  ;;  %v3497_v25 = vmul.u32 %v12592_v59, %v3481_v30  ;;  %v12643_v57 = vand.u32 8388607, %v16128_v63 }
 0x347   :  { %16385 = vst [vmem:[#allocation102_spill] sm:$0xff] %v12634_v29  ;;  %vm3349_vm14 = vcmp.gt.s32.totalorder %v3348_v46, 0  ;;  %v3319_v49 = vsel %vm3236_vm11, %v3318_v61, %v3317_v13  ;;  %v3202_v38 = vsub.s32 32, %v3201_v10  ;;  %v3203_v47 = vshll.u32 %v12596_v26, %v3201_v10 }
 0x348   :  { %v3206_v44 = vsub.s32 4294967266, %v3201_v10  ;;  %9355 = vsinq.f32 %v3010_v35  ;;  %v12651_v37 = vsel %vm3132_vm12, %v3216_v27, %v12584_v34  ;;  %vm3499_vm15 = vc.u32 %v12627_v58, %v12614_v45 }
 0x349   :  { %v3350_v42 = vsel %vm3349_vm14, %v3348_v46, 0  ;;  %v3204_v59 = vshrl.u32 %v3186_v54, %v3202_v38  ;;  %v3501_v15 = vsel %vm3499_vm15, %v3500_v24, %v12615_v53  ;;  %v12657_v13 = vadd.f32 %v12370_v48, %v8667_v20 }
 0x34a   :  { %v3207_v11 = vadd.s32 127, %v3206_v44  ;;  %v12662_v26 = vsel %vm12512_vm0, %v12177_v23, %v3319_v49  ;;  %v3502_v2 = vadd.s32 %v3501_v15, %v3497_v25  ;;  %v3346_v34 = vor.u32 8388608, %v12643_v57 }
 0x34b   :  { %v3352_v12 = vand.u32 31, %v3350_v42  ;;  %v3205_v18 = vor.u32 %v3204_v59, %v3203_v47  ;;  %v12665_v35 = vshrl.u32 %v3350_v42, 5  ;;  %v16129_v61 = vand.u32 2147483647, %v12657_v13 }
 0x34c   :  { %v3208_v21 = vshll.u32 %v3207_v11, 23  ;;  %v3503_v39 = vadd.s32 536870912, %v3502_v2  ;;  %v3653_v27 = vand.u32 2139095040, %v12657_v13  ;;  %vm3444_vm0 = vcmp.lt.s32.totalorder %v12475_v3, 0 }
 0x34d   :  { %v3353_v53 = vsub.s32 32, %v3352_v12  ;;  %v3355_v17 = vshll.u32 %v16205_v9, %v3352_v12  ;;  %v3358_v30 = vshll.u32 %v16195_v52, %v3352_v12  ;;  %v3212_v6 = vcvt.s32.f32 %v3205_v18 }
 0x34e   :  { %v3209_v8 = vor.u32 4788187, %v3208_v21  ;;  %v3364_v51 = vshll.u32 %v16197_v31, %v3352_v12  ;;  %v3504_v46 = vshrl.u32 %v3503_v39, 30  ;;  %v3361_v10 = vshll.u32 %v16196_v4, %v3352_v12 }
 0x34f   :  { %v3356_v54 = vshrl.u32 %v16195_v52, %v3353_v53  ;;  %v3359_v24 = vshrl.u32 %v16196_v4, %v3353_v53  ;;  %v3362_v57 = vshrl.u32 %v16197_v31, %v3353_v53  ;;  %v3365_v20 = vshrl.u32 %v16198_v19, %v3353_v53 }
 0x350   :  { %v3210_v25 = vand.u32 2147483647, %v3209_v8  ;;  %v3367_v49 = vshll.u32 %v16198_v19, %v3352_v12  ;;  %v3505_v38 = vshll.u32 %v3504_v46, 30  ;;  %vm3370_vm11 = vcmp.lt.s32.totalorder %v12665_v35, 1 }
 0x351   :  { %v3357_v47 = vor.u32 %v3356_v54, %v3355_v17  ;;  %v3360_v44 = vor.u32 %v3359_v24, %v3358_v30  ;;  %v12680_v42 = vpop.eup %9351  ;;  %v3354_v11 = vshrl.u32 %v16205_v9, %v3353_v53  ;;  %v3366_v15 = vor.u32 %v3365_v20, %v3364_v51  ;;  %v16547_v51 = vld [vmem:[#allocation82_spill] sm:$0xff] }
 0x352   :  { %v3213_v59 = vmul.f32 %v3212_v6, %v3210_v25  ;;  %v3368_v18 = vshrl.u32 %v16194_v40, %v3353_v53  ;;  %v12684_v21 = vpop.eup %9353  ;;  %v16386_v39 = vand.u32 2147483647, %v12475_v3  ;;  %v12692_v12 = vsub.s32 %v3502_v2, %v3505_v38 }
 0x353   :  { %v3363_v17 = vor.u32 %v3362_v57, %v3361_v10  ;;  %vm3373_vm13 = vcmp.lt.s32.totalorder %v12665_v35, 4  ;;  %v3654_v30 = vshrl.u32 %v3653_v27, 23  ;;  %v16389_v6 = vand.u32 2147483647, %v12373_v28 }
 0x354   :  { %vm12688_vm3 = vcmp.le.f32.partialorder %v16386_v39, 0.7853982  ;;  %v3528_v53 = vsub.s32 4, %v3504_v46  ;;  %v3369_v54 = vor.u32 %v3368_v18, %v3367_v49  ;;  %vm3371_vm10 = vcmp.lt.s32.totalorder %v12665_v35, 2 }
 0x355   :  { %vm12697_vm4 = vcmp.le.f32.partialorder %v16389_v6, 0.7853982  ;;  %vm3372_vm7 = vcmp.lt.s32.totalorder %v12665_v35, 3  ;;  %v3214_v24 = vxor.u32 2147483648, %v3213_v59  ;;  %v3508_v2 = vsub.s32 0, %v12692_v12  ;;  %v12708_v25 = vpop.eup %9355 }
 0x356   :  { %v3375_v10 = vsel %vm3373_vm13, %v3363_v17, 2102212464  ;;  %v3378_v27 = vsel %vm3370_vm11, %v3357_v47, %v3360_v44  ;;  %9357 = vcosq.f32 %v12662_v26  ;;  %v3374_v57 = vsel %vm3370_vm11, %v3354_v11, %v3357_v47 }
 0x357   :  { %v3379_v20 = vsel %vm3373_vm13, %v3366_v15, 920167782  ;;  %v3386_v49 = vshll.u32 %v3346_v34, 8  ;;  %v8281_v38 = vmin.u32 %v3508_v2, %v12692_v12  ;;  %v3376_v18 = vsel %vm3372_vm7, %v3360_v44, %v3375_v10 }
 0x358   :  { %v3380_v39 = vsel %vm3372_vm7, %v3363_v17, %v3379_v20  ;;  %v3382_v6 = vsel %vm3370_vm11, %v3360_v44, %v3363_v17  ;;  %v3529_v63 = vsel %vm3444_vm0, %v3528_v53, %v3504_v46  ;;  %v3383_v34 = vsel %vm3373_vm13, %v3369_v54, 1326507024  ;;  %v417_v17 = vpop.f32.mrf.mxu0 }
 0x359   :  { %v3381_v47 = vsel %vm3371_vm10, %v3378_v27, %v3380_v39  ;;  %v3657_v11 = vand.u32 8388607, %v16129_v61  ;;  %v3215_v2 = vsel %vm3132_vm12, %v3214_v24, %v3213_v59  ;;  %v3510_v10 = vclz %v8281_v38 }
 0x35a   :  { %v3384_v20 = vsel %vm3372_vm7, %v3366_v15, %v3383_v34  ;;  %v8288_v44 = vadd.s32 4294967169, %v3654_v30  ;;  %v3377_v46 = vsel %vm3371_vm10, %v3374_v57, %v3376_v18  ;;  %9359 = vsinq.f32 %v12662_v26 }
 0x35b   :  { %v3385_v53 = vsel %vm3371_vm10, %v3382_v6, %v3384_v20  ;;  %v12738_v27 = vmul.u32.u64.low %v3386_v49, %v3381_v47  ;;  %v12739_v54 = vmul.u32.u64.high %v3386_v49, %v3381_v47, %v12738_v27  ;;  %v8282_v39 = vadd.s32 4294967294, %v3510_v10 }
 0x35c   :  { %v12742_v61 = vmul.u32.u64.low %v3386_v49, %v3385_v53  ;;  %v12743_v23 = vmul.u32.u64.high %v3386_v49, %v3385_v53, %v12742_v61  ;;  %v3660_v59 = vadd.s32 1, %v8288_v44  ;;  %v3531_v15 = vsel %vm12688_vm3, 0, %v3529_v63 }
 0x35d   :  { %v3658_v30 = vor.u32 8388608, %v3657_v11  ;;  %v12749_v24 = vadd.f32 %v12370_v48, %v417_v17  ;;  %v12754_v35 = vsel %vm12697_vm4, %v12373_v28, %v3215_v2  ;;  %v3498_v57 = vadd.s32 %v12614_v45, %v12627_v58 }
 0x35e   :  { %vm8283_vm12 = vcmp.lt.s32.totalorder %v8282_v39, 0  ;;  %vm3661_vm14 = vcmp.gt.s32.totalorder %v3660_v59, 0  ;;  %v3393_v38 = vmul.u32 %v3386_v49, %v3377_v46  ;;  %v3396_v26 = vadd.s32 1, %v12739_v54 }
 0x35f   :  { %v3513_v61 = vsel %vm8283_vm12, 0, %v8282_v39  ;;  %v3662_v18 = vsel %vm3661_vm14, %v3660_v59, 0  ;;  %v12760_v47 = vadd.s32 3, %v3531_v15  ;;  %9361 = vcosq.f32 %v12754_v35 }
 0x360   :  { %v3514_v63 = vsub.s32 32, %v3513_v61  ;;  %v3515_v6 = vshll.u32 %v12692_v12, %v3513_v61  ;;  %v3518_v48 = vsub.s32 4294967266, %v3513_v61  ;;  %vm3395_vm15 = vc.u32 %v12743_v23, %v12738_v27 }
 0x361   :  { %16392 = vst [vmem:[#allocation103_spill] sm:$0xff] %v12760_v47  ;;  %v3664_v34 = vand.u32 31, %v3662_v18  ;;  %v12765_v45 = vshll.u32 %v3658_v30, 8  ;;  %v3397_v49 = vsel %vm3395_vm15, %v3396_v26, %v12739_v54  ;;  %v3663_v20 = vshrl.u32 %v3662_v18, 5 }
 0x362   :  { %v3516_v58 = vshrl.u32 %v3498_v57, %v3514_v63  ;;  %v3519_v11 = vadd.s32 127, %v3518_v48  ;;  %v3398_v10 = vadd.s32 %v3397_v49, %v3393_v38  ;;  %vm3340_vm11 = vcmp.lt.s32.totalorder %v12560_v50, 0 }
 0x363   :  { %v3665_v12 = vsub.s32 32, %v3664_v34  ;;  %v3667_v44 = vshll.u32 %v16205_v9, %v3664_v34  ;;  %v12770_v17 = vpop.eup %9357  ;;  %v3670_v39 = vshll.u32 %v16195_v52, %v3664_v34  ;;  %v3673_v59 = vshll.u32 %v16196_v4, %v3664_v34 }
 0x364   :  { %16393 = vst [vmem:[#allocation104_spill] sm:$0xff] %v12770_v17  ;;  %v3517_v46 = vor.u32 %v3516_v58, %v3515_v6  ;;  %v3520_v53 = vshll.u32 %v3519_v11, 23  ;;  %v3399_v15 = vadd.s32 536870912, %v3398_v10  ;;  %v3676_v57 = vshll.u32 %v16197_v31, %v3664_v34 }
 0x365   :  { %v3668_v30 = vshrl.u32 %v16195_v52, %v3665_v12  ;;  %v3671_v54 = vshrl.u32 %v16196_v4, %v3665_v12  ;;  %v3674_v26 = vshrl.u32 %v16197_v31, %v3665_v12  ;;  %v3677_v18 = vshrl.u32 %v16198_v19, %v3665_v12 }
 0x366   :  { %v3521_v61 = vor.u32 4788187, %v3520_v53  ;;  %v3524_v38 = vcvt.s32.f32 %v3517_v46  ;;  %v3400_v63 = vshrl.u32 %v3399_v15, 30  ;;  %v3666_v6 = vshrl.u32 %v16205_v9, %v3665_v12 }
 0x367   :  { %v3679_v48 = vshll.u32 %v16198_v19, %v3664_v34  ;;  %v3549_v58 = vand.u32 2139095040, %v12749_v24  ;;  %v3669_v49 = vor.u32 %v3668_v30, %v3667_v44  ;;  %v3672_v2 = vor.u32 %v3671_v54, %v3670_v39  ;;  %v12784_v28 = vpop.eup %9359 }
 0x368   :  { %v3522_v11 = vand.u32 2147483647, %v3521_v61  ;;  %v3680_v47 = vshrl.u32 %v16194_v40, %v3665_v12  ;;  %v3401_v53 = vshll.u32 %v3400_v63, 30  ;;  %v3675_v46 = vor.u32 %v3674_v26, %v3673_v59  ;;  %16394 = vst [vmem:[#allocation105_spill] sm:$0xff] %v12784_v28 }
 0x369   :  { %v3678_v17 = vor.u32 %v3677_v18, %v3676_v57  ;;  %vm3682_vm13 = vcmp.lt.s32.totalorder %v3663_v20, 1  ;;  %vm3685_vm10 = vcmp.lt.s32.totalorder %v3663_v20, 4  ;;  %v12787_v15 = vand.u32 3, %v10457_v60 }
 0x36a   :  { %v3525_v29 = vmul.f32 %v3524_v38, %v3522_v11  ;;  %v3681_v36 = vor.u32 %v3680_v47, %v3679_v48  ;;  %v12789_v34 = vsub.s32 %v3398_v10, %v3401_v53  ;;  %vm3684_vm7 = vcmp.lt.s32.totalorder %v3663_v20, 3 }
 0x36b   :  { %v3687_v44 = vsel %vm3685_vm10, %v3675_v46, 2102212464  ;;  %v3550_v39 = vshrl.u32 %v3549_v58, 23  ;;  %vm3683_vm12 = vcmp.lt.s32.totalorder %v3663_v20, 2  ;;  %v3690_v12 = vsel %vm3682_vm13, %v3669_v49, %v3672_v2 }
 0x36c   :  { %v3526_v30 = vxor.u32 2147483648, %v3525_v29  ;;  %v16395_v59 = vand.u32 2147483647, %v12749_v24  ;;  %v16396_v57 = vand.u32 2147483647, %v12560_v50  ;;  %v3404_v60 = vsub.s32 0, %v12789_v34  ;;  %v12805_v26 = vpop.eup %9361 }
 0x36d   :  { %v3686_v10 = vsel %vm3682_vm13, %v3666_v6, %v3669_v49  ;;  %v3688_v61 = vsel %vm3684_vm7, %v3672_v2, %v3687_v44  ;;  %v3691_v38 = vsel %vm3685_vm10, %v3678_v17, 920167782  ;;  %v3424_v18 = vsub.s32 4, %v3400_v63 }
 0x36e   :  { %v3553_v54 = vand.u32 8388607, %v16395_v59  ;;  %vm12797_vm14 = vcmp.le.f32.partialorder %v16396_v57, 0.7853982  ;;  %v3692_v48 = vsel %vm3684_vm7, %v3675_v46, %v3691_v38  ;;  %v3694_v58 = vsel %vm3682_vm13, %v3672_v2, %v3675_v46 }
 0x36f   :  { %v3695_v11 = vsel %vm3685_vm10, %v3681_v36, 1326507024  ;;  %v3527_v53 = vsel %vm3444_vm0, %v3526_v30, %v3525_v29  ;;  %v8277_v59 = vmin.u32 %v3404_v60, %v12789_v34  ;;  %v3693_v6 = vsel %vm3683_vm12, %v3690_v12, %v3692_v48 }
 0x370   :  { %v3696_v49 = vsel %vm3684_vm7, %v3678_v17, %v3695_v11  ;;  %v3689_v44 = vsel %vm3683_vm12, %v3686_v10, %v3688_v61  ;;  %v12818_v28 = vmul.u32.u64.low %v12765_v45, %v3693_v6  ;;  %v12819_v38 = vmul.u32.u64.high %v12765_v45, %v3693_v6, %v12818_v28  ;;  %v9189_v11 = vld [vmem:[%s15986_s6 + $0x11c] ss:$20 sps:$4 sm:$0xff]  }
 0x371   :  { %v3697_v57 = vsel %vm3683_vm12, %v3694_v58, %v3696_v49  ;;  %9363 = vsinq.f32 %v12754_v35  ;;  %v3406_v36 = vclz %v8277_v59  ;;  %v12829_v46 = vsel %vm12688_vm3, %v12475_v3, %v3527_v53  ;;  %4580 = vmatprep.subr.bf16.mxu1 %v9189_v11 }
 0x372   :  { %v12823_v2 = vmul.u32.u64.low %v12765_v45, %v3697_v57  ;;  %v12824_v29 = vmul.u32.u64.high %v12765_v45, %v3697_v57, %v12823_v2  ;;  %v3394_v20 = vadd.s32 %v12738_v27, %v12743_v23  ;;  %v12835_v17 = vsel %vm3340_vm11, %v3424_v18, %v3400_v63 }
 0x373   :  { %v8284_v30 = vadd.s32 4294967169, %v3550_v39  ;;  %v8278_v12 = vadd.s32 4294967294, %v3406_v36  ;;  %v3705_v35 = vmul.u32 %v12765_v45, %v3689_v44  ;;  %v3554_v60 = vor.u32 8388608, %v3553_v54 }
 0x374   :  { %v523_v10 = vxor.u32 2147483648, %v10609_v7  ;;  %v3708_v61 = vadd.s32 1, %v12819_v38  ;;  %vm522_vm0 = vcmp.eq.s32.totalorder %v12787_v15, 0  ;;  %v526_v8 = vxor.u32 2147483648, %v10552_v14 }
 0x375   :  { %v3556_v48 = vadd.s32 1, %v8284_v30  ;;  %vm8279_vm3 = vcmp.lt.s32.totalorder %v8278_v12, 0  ;;  %vm3707_vm15 = vc.u32 %v12824_v29, %v12818_v28  ;;  %vm525_vm13 = vcmp.eq.s32.totalorder %v12787_v15, 2  ;;  %v16399_v30 = vld [vmem:[#allocation21_spill] sm:$0xff] }
 0x376   :  { %v524_v23 = vsel %vm522_vm0, %v10552_v14, %v523_v10  ;;  %v3409_v27 = vsel %vm8279_vm3, 0, %v8278_v12  ;;  %v3709_v45 = vsel %vm3707_vm15, %v3708_v61, %v12819_v38  ;;  %v527_v63 = vsel %vm525_vm13, %v526_v8, %v10609_v7 }
 0x377   :  { %vm3557_vm10 = vcmp.gt.s32.totalorder %v3556_v48, 0  ;;  %v3410_v39 = vsub.s32 32, %v3409_v27  ;;  %v3411_v54 = vshll.u32 %v12789_v34, %v3409_v27  ;;  %v3414_v18 = vsub.s32 4294967266, %v3409_v27 }
 0x378   :  { %v3710_v58 = vadd.s32 %v3709_v45, %v3705_v35  ;;  %9365 = vcosq.f32 %v12829_v46  ;;  %v3427_v14 = vsel %vm12797_vm14, 0, %v12835_v17  ;;  %vm16137_vm7 = vcmp.lt.s32.totalorder %v12657_v13, 0  ;;  %v16417_v17 = vld [vmem:[#allocation34_spill] sm:$0xff] }
 0x379   :  { %v3558_v53 = vsel %vm3557_vm10, %v3556_v48, 0  ;;  %vm518_vm12 = vweird.f32 %v10040_v55  ;;  %v3412_v7 = vshrl.u32 %v3394_v20, %v3410_v39  ;;  %v3415_v59 = vadd.s32 127, %v3414_v18 }
 0x37a   :  { %v3711_v34 = vadd.s32 536870912, %v3710_v58  ;;  %vm521_vm0 = vcmp.lt.s32.totalorder %v12787_v15, 2  ;;  %v12859_v6 = vadd.s32 %v12818_v28, %v12824_v29  ;;  %v3560_v49 = vand.u32 31, %v3558_v53  ;;  %v16422_v29 = vld [vmem:[#allocation30_spill] sm:$0xff] }
 0x37b   :  { %v12861_v44 = vshll.u32 %v3554_v60, 8  ;;  %v528_v57 = vsel %vm521_vm0, %v524_v23, %v527_v63  ;;  %v3413_v38 = vor.u32 %v3412_v7, %v3411_v54  ;;  %v3416_v36 = vshll.u32 %v3415_v59, 23 }
 0x37c   :  { %v3712_v2 = vshrl.u32 %v3711_v34, 30  ;;  %v12864_v12 = vand.u32 3, %v16399_v30  ;;  %v3559_v35 = vshrl.u32 %v3558_v53, 5  ;;  %v3561_v20 = vsub.s32 32, %v3560_v49 }
 0x37d   :  { %v3563_v10 = vshll.u32 %v16205_v9, %v3560_v49  ;;  %v3566_v15 = vshll.u32 %v16195_v52, %v3560_v49  ;;  %v3417_v61 = vor.u32 4788187, %v3416_v36  ;;  %v3420_v48 = vcvt.s32.f32 %v3413_v38 }
 0x37e   :  { %v16400_v28 = vand.u32 2147483647, %v12657_v13  ;;  %v3713_v60 = vshll.u32 %v3712_v2, 30  ;;  %v3736_v8 = vsub.s32 4, %v3712_v2  ;;  %v12874_v23 = vpop.eup %9363  ;;  %v3564_v27 = vshrl.u32 %v16195_v52, %v3561_v20 }
 0x37f   :  { %v3567_v45 = vshrl.u32 %v16196_v4, %v3561_v20  ;;  %v3569_v63 = vshll.u32 %v16196_v4, %v3560_v49  ;;  %v3570_v39 = vshrl.u32 %v16197_v31, %v3561_v20  ;;  %v3418_v54 = vand.u32 2147483647, %v3417_v61 }
 0x380   :  { %vm12870_vm3 = vcmp.le.f32.partialorder %v16400_v28, 0.7853982  ;;  %v12880_v18 = vsub.s32 %v3710_v58, %v3713_v60  ;;  %v3572_v11 = vshll.u32 %v16197_v31, %v3560_v49  ;;  %v12885_v53 = vsel %vm518_vm12, nan, %v528_v57 }
 0x381   :  { %v3562_v7 = vshrl.u32 %v16205_v9, %v3561_v20  ;;  %v3565_v59 = vor.u32 %v3564_v27, %v3563_v10  ;;  %v3568_v34 = vor.u32 %v3567_v45, %v3566_v15  ;;  %vm3578_vm15 = vcmp.lt.s32.totalorder %v3559_v35, 1 }
 0x382   :  { %v3421_v52 = vmul.f32 %v3420_v48, %v3418_v54  ;;  %v3716_v38 = vsub.s32 0, %v12880_v18  ;;  %v12891_v4 = vsel %vm16137_vm7, %v3736_v8, %v3712_v2  ;;  %v3573_v58 = vshrl.u32 %v16198_v19, %v3561_v20 }
 0x383   :  { %v3571_v36 = vor.u32 %v3570_v39, %v3569_v63  ;;  %v3575_v31 = vshll.u32 %v16198_v19, %v3560_v49  ;;  %v3576_v55 = vshrl.u32 %v16194_v40, %v3561_v20  ;;  %vm3580_vm13 = vcmp.lt.s32.totalorder %v3559_v35, 3 }
 0x384   :  { %v3422_v57 = vxor.u32 2147483648, %v3421_v52  ;;  %v8289_v9 = vmin.u32 %v3716_v38, %v12880_v18  ;;  %v3574_v30 = vor.u32 %v3573_v58, %v3572_v11  ;;  %vm3581_vm10 = vcmp.lt.s32.totalorder %v3559_v35, 4  ;;  %v16404_v38 = vld [vmem:[#allocation25_spill] sm:$0xff] }
 0x385   :  { %v3577_v10 = vor.u32 %v3576_v55, %v3575_v31  ;;  %vm3579_vm12 = vcmp.lt.s32.totalorder %v3559_v35, 2  ;;  %v3583_v15 = vsel %vm3581_vm10, %v3571_v36, 2102212464  ;;  %v3586_v2 = vsel %vm3578_vm15, %v3565_v59, %v3568_v34  ;;  %v12899_v61 = vpop.eup %9365 }
 0x386   :  { %v3718_v48 = vclz %v8289_v9  ;;  %v3582_v28 = vsel %vm3578_vm15, %v3562_v7, %v3565_v59  ;;  %v3584_v19 = vsel %vm3580_vm13, %v3568_v34, %v3583_v15  ;;  %v3587_v40 = vsel %vm3581_vm10, %v3574_v30, 920167782  ;;  %v3770_v59 = vld [vmem:[%s15987_s3] sm:$0xf] }
 0x387   :  { %v3739_v49 = vsel %vm12870_vm3, 0, %v12891_v4  ;;  %v3588_v20 = vsel %vm3580_vm13, %v3571_v36, %v3587_v40  ;;  %v3590_v60 = vsel %vm3578_vm15, %v3568_v34, %v3571_v36  ;;  %vm625_vm0 = vcmp.lt.s32.totalorder %v12864_v12, 2 }
 0x388   :  { %vm626_vm7 = vcmp.eq.s32.totalorder %v12864_v12, 0  ;;  %v3423_v8 = vsel %vm3340_vm11, %v3422_v57, %v3421_v52  ;;  %v8290_v27 = vadd.s32 4294967294, %v3718_v48  ;;  %v3589_v45 = vsel %vm3579_vm12, %v3586_v2, %v3588_v20  ;;  %v16403_v52 = vld [vmem:[#allocation18_spill] sm:$0xff]  ;;  %v16405_v2 = vld [vmem:[#allocation23_spill] sm:$0xff] }
 0x389   :  { %v3591_v63 = vsel %vm3581_vm10, %v3577_v10, 1326507024  ;;  %v3585_v39 = vsel %vm3579_vm12, %v3582_v28, %v3584_v19  ;;  %v12918_v11 = vmul.u32.u64.low %v12861_v44, %v3589_v45  ;;  %v12919_v7 = vmul.u32.u64.high %v12861_v44, %v3589_v45, %v12918_v11 }
 0x38a   :  { %v3592_v54 = vsel %vm3580_vm13, %v3574_v30, %v3591_v63  ;;  %vm8291_vm15 = vcmp.lt.s32.totalorder %v8290_v27, 0  ;;  %vm622_vm11 = vweird.f32 %v16403_v52  ;;  %v627_v58 = vxor.u32 2147483648, %v16404_v38 }
 0x38b   :  { %v3593_v34 = vsel %vm3579_vm12, %v3590_v60, %v3592_v54  ;;  %v12931_v36 = vsel %vm12797_vm14, %v12560_v50, %v3423_v8  ;;  %v3721_v31 = vsel %vm8291_vm15, 0, %v8290_v27  ;;  %v3601_v35 = vmul.u32 %v12861_v44, %v3585_v39  ;;  %v16409_v60 = vld [vmem:[#allocation24_spill] sm:$0xff] }
 0x38c   :  { %v12934_v55 = vmul.u32.u64.low %v12861_v44, %v3593_v34  ;;  %v12935_v57 = vmul.u32.u64.high %v12861_v44, %v3593_v34, %v12934_v55  ;;  %v3722_v9 = vsub.s32 32, %v3721_v31  ;;  %v3723_v30 = vshll.u32 %v12880_v18, %v3721_v31 }
 0x38d   :  { %v3726_v10 = vsub.s32 4294967266, %v3721_v31  ;;  %v3604_v15 = vadd.s32 1, %v12919_v7  ;;  %v628_v48 = vsel %vm626_vm7, %v16405_v2, %v627_v58  ;;  %v630_v28 = vxor.u32 2147483648, %v16405_v2 }
 0x38e   :  { %vm16138_vm13 = vcmask 1043456   ;;  %v3724_v19 = vshrl.u32 %v12859_v6, %v3722_v9  ;;  %vm629_vm10 = vcmp.eq.s32.totalorder %v12864_v12, 2  ;;  %v16406_v18 = vand.u32 2147483647, %v10234_v5 }
 0x38f   :  { %v3727_v40 = vadd.s32 127, %v3726_v10  ;;  %8974 = vmatprep.subr.msk.bf16.mxu0 %vm16138_vm13, %v3770_v59  ;;  %vm3603_vm15 = vc.u32 %v12935_v57, %v12918_v11  ;;  %v631_v20 = vsel %vm629_vm10, %v630_v28, %v16404_v38  ;;  %vm16139_vm7 = vcmask 687104  }
 0x390   :  { %vm12949_vm12 = vcmp.le.f32.partialorder %v16406_v18, 0.7853982  ;;  %v928_v8 = vsub.s32 4, %v16409_v60  ;;  %v3725_v6 = vor.u32 %v3724_v19, %v3723_v30  ;;  %v3605_v45 = vsel %vm3603_vm15, %v3604_v15, %v12919_v7  ;;  %v9201_v7 = vld [vmem:[%s15986_s6 + $0x124] ss:$20 sps:$4 sm:$0xff]  }
 0x391   :  { %v3728_v27 = vshll.u32 %v3727_v40, 23  ;;  %v632_v63 = vsel %vm625_vm0, %v628_v48, %v631_v20  ;;  %v3606_v39 = vadd.s32 %v3605_v45, %v3601_v35  ;;  %v930_v38 = vsel %vm12949_vm12, %v10234_v5, %v10920_v62  ;;  %v16415_v19 = vld [vmem:[#allocation2_spill] sm:$0xff]  ;;  %v16420_v45 = vld [vmem:[#allocation39_spill] sm:$0xff]  ;;  %v16428_v35 = vld [vmem:[#allocation4_spill] sm:$0xff] }
 0x392   :  { %v633_v54 = vsel %vm622_vm11, nan, %v632_v63  ;;  %v929_v34 = vsel %vm844_vm1, %v928_v8, %v16409_v60  ;;  %v3732_v12 = vcvt.s32.f32 %v3725_v6  ;;  %v4079_v9 = vsel %vm16138_vm13, %v3770_v59, 0 }
 0x393   :  { %v3729_v58 = vor.u32 4788187, %v3728_v27  ;;  %v12973_v31 = vpack.c.bf16 %v633_v54, %v12885_v53  ;;  %v931_v52 = vsel %vm12949_vm12, 0, %v929_v34  ;;  %v3607_v55 = vadd.s32 536870912, %v3606_v39  ;;  %v16413_v53 = vld [vmem:[#allocation20_spill] sm:$0xff] }
 0x394   :  { %9367 = vcosq.f32 %v930_v38  ;;  %v935_v30 = vadd.s32 3, %v931_v52  ;;  %v16410_v62 = vand.u32 2147483647, %v10209_v56  ;;  %v1032_v15 = vsub.s32 4, %v16413_v53  ;;  %v9199_v54 = vld [vmem:[%s15986_s6 + $0x120] ss:$20 sps:$4 sm:$0xff]  }
 0x395   :  { %v3730_v10 = vand.u32 2147483647, %v3729_v58  ;;  %8680 = vmatprep.mubr.msk.bf16.mxu0 %vm16139_vm7, %v12973_v31  ;;  %9369 = vsinq.f32 %v930_v38  ;;  %vm16140_vm0 = vcmp.lt.s32.totalorder %v12749_v24, 0  ;;  %v3608_v59 = vshrl.u32 %v3607_v55, 30  ;;  %v16421_v38 = vld [vmem:[#allocation38_spill] sm:$0xff] }
 0x396   :  { %vm12982_vm1 = vcmp.le.f32.partialorder %v16410_v62, 0.7853982  ;;  %9371 = vsinq.f32 %v12829_v46  ;;  %8681 = vmatmul.mubr.msk.bf16.vlgmr.msra.gmra.mxu0 %vm16139_vm7, %v10840_v33  ;;  %v12999_v48 = vadd.s32 3, %v3427_v14  ;;  %vm16414_vm11 = vcmp.lt.s32.totalorder %v10209_v56, 0  ;;  %v16423_v55 = vld [vmem:[#allocation22_spill] sm:$0xff]  ;;  %v16427_v62 = vld [vmem:[#allocation19_spill] sm:$0xff] }
 0x397   :  { %v1034_v2 = vsel %vm12982_vm1, %v10209_v56, %v10849_v22  ;;  %v3733_v28 = vmul.f32 %v3732_v12, %v3730_v10  ;;  %8713 = vmatpush3.bf16.msra.mxu0 %v4079_v9  ;;  %v1033_v46 = vsel %vm16414_vm11, %v1032_v15, %v16413_v53  ;;  %vm16416_vm10 = vcmask 64512   ;;  %v16424_v9 = vld [vmem:[#allocation36_spill] sm:$0xff]  ;;  %v16425_v10 = vld [vmem:[#allocation3_spill] sm:$0xff] }
 0x398   :  { %9373 = vcosq.f32 %v1034_v2  ;;  %8714 = vmatprep.mubr.msk.bf16.mxu0 %vm16416_vm10, %v16415_v19  ;;  %v13011_v22 = vadd.s32 3, %v3739_v49  ;;  %v3609_v47 = vshll.u32 %v3608_v59, 30  ;;  %v1139_v40 = vsel %vm10983_vm5, 0, %v16417_v17  ;;  %4773 = vmatprep.subr.bf16.mxu0 %v9201_v7  ;;  %vm16426_vm11 = vmmov %vm16416_vm10  ;;  %v9205_v53 = vld [vmem:[%s15986_s6 + $0xf8] ss:$20 sps:$4 sm:$0xff]   ;;  %v16430_v17 = vld [vmem:[#allocation32_spill] sm:$0xff] }
 0x399   :  { %9375 = vcosq.f32 %v12931_v36  ;;  %v3734_v18 = vxor.u32 2147483648, %v3733_v28  ;;  %v13016_v44 = vand.u32 3, %v935_v30  ;;  %v1035_v20 = vsel %vm12982_vm1, 0, %v1033_v46  ;;  %vm16429_vm7 = vmmov %vm16426_vm11 }
 0x39a   :  { %9377 = vsinq.f32 %v1034_v2  ;;  %v13021_v60 = vsub.s32 %v3606_v39, %v3609_v47  ;;  %v3632_v4 = vsub.s32 4, %v3608_v59  ;;  %v1039_v49 = vadd.s32 3, %v1035_v20 }
 0x39b   :  { %9379 = vsinq.f32 %v12931_v36  ;;  %vm16419_vm14 = vcmp.lt.s32.totalorder %v12657_v13, 0  ;;  %v13027_v6 = vadd.s32 %v12918_v11, %v12935_v57  ;;  %v1143_v27 = vadd.s32 3, %v1139_v40  ;;  %v9207_v11 = vld [vmem:[%s15986_s6 + $0xfc] ss:$20 sps:$4 sm:$0xff]  }
 0x39c   :  { %v3735_v8 = vsel %vm16419_vm14, %v3734_v18, %v3733_v28  ;;  %v1147_v63 = vxor.u32 2147483648, %v16420_v45  ;;  %v3612_v39 = vsub.s32 0, %v13021_v60  ;;  %v13039_v34 = vand.u32 3, %v1039_v49  ;;  %v9210_v28 = vld [vmem:[%s15986_s6 + $0xd4] ss:$20 sps:$4 sm:$0xff]  }
 0x39d   :  { %v13036_v36 = vsel %vm12870_vm3, %v12657_v13, %v3735_v8  ;;  %v1150_v7 = vxor.u32 2147483648, %v16421_v38  ;;  %vm937_vm5 = vcmp.lt.s32.totalorder %v13016_v44, 2  ;;  %vm938_vm12 = vcmp.eq.s32.totalorder %v13016_v44, 0 }
 0x39e   :  { %vm941_vm15 = vcmp.eq.s32.totalorder %v13016_v44, 2  ;;  %v1144_v57 = vand.u32 3, %v1143_v27  ;;  %v1248_v58 = vand.u32 3, %v16422_v29  ;;  %v8285_v12 = vmin.u32 %v3612_v39, %v13021_v60  ;;  %8715 = vmatmul.mubr.msk.bf16.vlgmr.msra.gmra.mxu0 %vm16426_vm11, %v16425_v10 }
 0x39f   :  { %v13052_v52 = vsel %vm16140_vm0, %v3632_v4, %v3608_v59  ;;  %vm1142_vm1 = vweird.f32 %v16423_v55  ;;  %v1251_v30 = vxor.u32 2147483648, %v16424_v9  ;;  %9381 = vcosq.f32 %v13036_v36  ;;  %8718 = vmatprep.mubr.msk.bf16.mxu0 %vm16429_vm7, %v16428_v35  ;;  %4774 = vmatpush1.bf16.msra.mxu0 %v9199_v54 }
 0x3a0   :  { %vm1146_vm10 = vcmp.eq.s32.totalorder %v1144_v57, 0  ;;  %vm1149_vm14 = vcmp.eq.s32.totalorder %v1144_v57, 2  ;;  %v3614_v15 = vclz %v8285_v12  ;;  %vm1042_vm0 = vcmp.eq.s32.totalorder %v13039_v34, 0  ;;  %4775 = vmatprep.subr.bf16.mxu0 %v9207_v11  ;;  %v16432_v11 = vld [vmem:[#allocation42_spill] sm:$0xff] }
 0x3a1   :  { %vm1145_vm3 = vcmp.lt.s32.totalorder %v1144_v57, 2  ;;  %v1148_v59 = vsel %vm1146_vm10, %v16421_v38, %v1147_v63  ;;  %v1151_v2 = vsel %vm1149_vm14, %v1150_v7, %v16420_v45  ;;  %v9368_v46 = vpop.eup %9367  ;;  %vm1045_vm11 = vcmp.eq.s32.totalorder %v13039_v34, 2  ;;  %v9208_v63 = vld [vmem:[%s15986_s6 + $0xd0] ss:$20 sps:$4 sm:$0xff]   ;;  %v16431_v7 = vld [vmem:[#allocation27_spill] sm:$0xff] }
 0x3a2   :  { %v1152_v47 = vsel %vm1145_vm3, %v1148_v59, %v1151_v2  ;;  %vm1250_vm13 = vcmp.eq.s32.totalorder %v1248_v58, 0  ;;  %v1254_v14 = vxor.u32 2147483648, %v16430_v17  ;;  %v9370_v40 = vpop.eup %9369  ;;  %v8286_v18 = vadd.s32 4294967294, %v3614_v15 }
 0x3a3   :  { %v942_v20 = vxor.u32 2147483648, %v9368_v46  ;;  %vm1038_vm10 = vweird.f32 %v10209_v56  ;;  %v1252_v4 = vsel %vm1250_vm13, %v16430_v17, %v1251_v30  ;;  %vm1253_vm14 = vcmp.eq.s32.totalorder %v1248_v58, 2  ;;  %v13077_v49 = vpop.eup %9371  ;;  %4776 = vmatpush1.bf16.msra.mxu0 %v9205_v53  ;;  %v16434_v17 = vld [vmem:[#allocation5_spill] sm:$0xff] }
 0x3a4   :  { %v939_v8 = vxor.u32 2147483648, %v9370_v40  ;;  %v1153_v27 = vsel %vm1142_vm1, nan, %v1152_v47  ;;  %vm1249_vm7 = vcmp.lt.s32.totalorder %v1248_v58, 2  ;;  %v1255_v45 = vsel %vm1253_vm14, %v1254_v14, %v16424_v9  ;;  %4777 = vmatprep.subr.bf16.mxu0 %v9210_v28  ;;  %v16433_v9 = vld [vmem:[#allocation46_spill] sm:$0xff] }
 0x3a5   :  { %v9374_v54 = vpop.eup %9373  ;;  %vm8287_vm3 = vcmp.lt.s32.totalorder %v8286_v18, 0  ;;  %v943_v39 = vsel %vm941_vm15, %v942_v20, %v9370_v40  ;;  %v1256_v38 = vsel %vm1249_vm7, %v1252_v4, %v1255_v45  ;;  %vm1350_vm13 = vweird.f32 %v16431_v7 }
 0x3a6   :  { %v1352_v57 = vand.u32 3, %v16432_v11  ;;  %v13089_v29 = vpop.eup %9375  ;;  %v3617_v58 = vsel %vm8287_vm3, 0, %v8286_v18  ;;  %v940_v12 = vsel %vm938_vm12, %v9368_v46, %v939_v8  ;;  %v1046_v55 = vxor.u32 2147483648, %v9374_v54  ;;  %v16441_v8 = vld [vmem:[#allocation45_spill] sm:$0xff] }
 0x3a7   :  { %v1355_v30 = vxor.u32 2147483648, %v16433_v9  ;;  %v9378_v53 = vpop.eup %9377  ;;  %v3618_v15 = vsub.s32 32, %v3617_v58  ;;  %v3619_v59 = vshll.u32 %v13021_v60, %v3617_v58  ;;  %v3622_v2 = vsub.s32 4294967266, %v3617_v58  ;;  %v16438_v60 = vld [vmem:[#allocation6_spill] sm:$0xff]  ;;  %4778 = vmatpush1.bf16.msra.mxu0 %v9208_v63  ;;  %v16446_v58 = vld [vmem:[#allocation37_spill] sm:$0xff] }
 0x3a8   :  { %v944_v47 = vsel %vm937_vm5, %v940_v12, %v943_v39  ;;  %vm16435_vm15 = vcmask 64512   ;;  %v13099_v28 = vpop.eup %9379  ;;  %vm16436_vm1 = vweird.f32 %v10234_v5  ;;  %v1043_v46 = vxor.u32 2147483648, %v9378_v53 }
 0x3a9   :  { %8719 = vmatmul.mubr.msk.bf16.gmra.mxu0 %vm16435_vm15, %v16434_v17  ;;  %v945_v14 = vsel %vm16436_vm1, nan, %v944_v47  ;;  %v1047_v40 = vsel %vm1045_vm11, %v1046_v55, %v9378_v53  ;;  %vm16437_vm12 = vweird.f32 %v16427_v62  ;;  %vm16439_vm7 = vmmov %vm16435_vm15  ;;  %v3620_v44 = vshrl.u32 %v13027_v6, %v3618_v15  ;;  %v16447_v55 = vld [vmem:[#allocation44_spill] sm:$0xff] }
 0x3aa   :  { %v1257_v18 = vsel %vm16437_vm12, nan, %v1256_v38  ;;  %8722 = vmatprep.mubr.msk.bf16.mxu0 %vm16439_vm7, %v16438_v60  ;;  %v3623_v20 = vadd.s32 127, %v3622_v2  ;;  %vm1354_vm5 = vcmp.eq.s32.totalorder %v1352_v57, 0  ;;  %v1044_v5 = vsel %vm1042_vm0, %v9374_v54, %v1043_v46  ;;  %v9192_v46 = vld [vmem:[%s15986_s6 + $0xf4] ss:$20 sps:$4 sm:$0xff]  }
 0x3ab   :  { %v13110_v4 = vpack.c.bf16 %v1257_v18, %v1153_v27  ;;  %vm1353_vm14 = vcmp.lt.s32.totalorder %v1352_v57, 2  ;;  %v1356_v45 = vsel %vm1354_vm5, %v16441_v8, %v1355_v30  ;;  %v1358_v39 = vxor.u32 2147483648, %v16441_v8  ;;  %v16457_v8 = vld [vmem:[#allocation56_spill] sm:$0xff] }
 0x3ac   :  { %v16442_v62 = vand.u32 2147483647, %v12749_v24  ;;  %v3621_v63 = vor.u32 %v3620_v44, %v3619_v59  ;;  %v3624_v6 = vshll.u32 %v3623_v20, 23  ;;  %vm16445_vm3 = vcmp.lt.s32.totalorder %v13039_v34, 2  ;;  %v13129_v53 = vpop.eup %9381  ;;  %v9187_v34 = vld [vmem:[%s15986_s6 + $0x118] ss:$20 sps:$4 sm:$0xff]  }
 0x3ad   :  { %16440 = vst [vmem:[#allocation21_spill] sm:$0xff] %v13110_v4  ;;  %v1048_v27 = vsel %vm16445_vm3, %v1044_v5, %v1047_v40  ;;  %vm1357_vm15 = vcmp.eq.s32.totalorder %v1352_v57, 2  ;;  %v1456_v12 = vand.u32 3, %v16446_v58  ;;  %v1459_v30 = vxor.u32 2147483648, %v16447_v55  ;;  %v16451_v57 = vld [vmem:[#allocation43_spill] sm:$0xff]  ;;  %v16452_v44 = vld [vmem:[#allocation48_spill] sm:$0xff] }
 0x3ae   :  { %vm13118_vm11 = vcmp.le.f32.partialorder %v16442_v62, 0.7853982  ;;  %v1049_v54 = vsel %vm1038_vm10, nan, %v1048_v27  ;;  %v1359_v11 = vsel %vm1357_vm15, %v1358_v39, %v16433_v9  ;;  %v3625_v15 = vor.u32 4788187, %v3624_v6  ;;  %v16449_v9 = vld [vmem:[#allocation26_spill] sm:$0xff] }
 0x3af   :  { %v3628_v2 = vcvt.s32.f32 %v3621_v63  ;;  %v13131_v47 = vpack.c.bf16 %v1049_v54, %v945_v14  ;;  %v1360_v59 = vsel %vm1353_vm14, %v1356_v45, %v1359_v11  ;;  %9383 = vsinq.f32 %v13036_v36  ;;  %v16454_v20 = vld [vmem:[#allocation7_spill] sm:$0xff]  ;;  %v16458_v39 = vld [vmem:[#allocation8_spill] sm:$0xff] }
 0x3b0   :  { %v1361_v56 = vsel %vm1350_vm13, nan, %v1360_v59  ;;  %vm1454_vm0 = vweird.f32 %v16449_v9  ;;  %vm1458_vm10 = vcmp.eq.s32.totalorder %v1456_v12, 0  ;;  %v3626_v14 = vand.u32 2147483647, %v3625_v15  ;;  %vm16455_vm13 = vmmov %vm16439_vm7  ;;  %v16460_v6 = vld [vmem:[#allocation55_spill] sm:$0xff]  ;;  %v16463_v59 = vld [vmem:[#allocation54_spill] sm:$0xff] }
 0x3b1   :  { %16448 = vst [vmem:[#allocation18_spill] sm:$0xff] %v13131_v47  ;;  %vm16450_vm1 = vcmask 687104   ;;  %v1460_v40 = vsel %vm1458_vm10, %v16451_v57, %v1459_v30  ;;  %v1462_v18 = vxor.u32 2147483648, %v16451_v57  ;;  %v1555_v7 = vsel %vm11366_vm8, 0, %v16452_v44  ;;  %8723 = vmatmul.mubr.msk.bf16.gmra.mxu0 %vm16455_vm13, %v16454_v20  ;;  %vm16459_vm14 = vmmov %vm16455_vm13  ;;  %v16461_v54 = vld [vmem:[#allocation47_spill] sm:$0xff] }
 0x3b2   :  { %8684 = vmatprep.mubr.msk.bf16.mxu1 %vm16450_vm1, %v13131_v47  ;;  %vm16456_vm12 = vmmov %vm16450_vm1  ;;  %vm1457_vm7 = vcmp.lt.s32.totalorder %v1456_v12, 2  ;;  %vm1461_vm5 = vcmp.eq.s32.totalorder %v1456_v12, 2  ;;  %v1559_v5 = vadd.s32 3, %v1555_v7  ;;  %v1563_v45 = vxor.u32 2147483648, %v16457_v8  ;;  %8726 = vmatprep.mubr.msk.bf16.mxu0 %vm16459_vm14, %v16458_v39  ;;  %v9190_v58 = vld [vmem:[%s15986_s6 + $0xf0] ss:$20 sps:$4 sm:$0xff]  }
 0x3b3   :  { %8685 = vmatmul.mubr.msk.bf16.vlgmr.msra.gmra.mxu1 %vm16456_vm12, %v13110_v4  ;;  %v3629_v62 = vmul.f32 %v3628_v2, %v3626_v14  ;;  %v1463_v63 = vsel %vm1461_vm5, %v1462_v18, %v16447_v55  ;;  %v1566_v27 = vxor.u32 2147483648, %v16460_v6  ;;  %v1664_v11 = vand.u32 3, %v16461_v54  ;;  %v16462_v12 = vld [vmem:[#allocation29_spill] sm:$0xff]  ;;  %v9195_v55 = vld [vmem:[%s15986_s6 + $0xcc] ss:$20 sps:$4 sm:$0xff]  }
 0x3b4   :  { %4581 = vmatpush1.bf16.msra.mxu1 %v9187_v34  ;;  %v1464_v30 = vsel %vm1457_vm7, %v1460_v40, %v1463_v63  ;;  %vm1558_vm8 = vweird.f32 %v16462_v12  ;;  %v1560_v15 = vand.u32 3, %v1559_v5  ;;  %v1667_v57 = vxor.u32 2147483648, %v16463_v59  ;;  %v16464_v34 = vld [vmem:[#allocation51_spill] sm:$0xff]  ;;  %v16470_v54 = vld [vmem:[#allocation9_spill] sm:$0xff] }
 0x3b5   :  { %4582 = vmatprep.subr.bf16.mxu1 %v9192_v46  ;;  %v3630_v2 = vxor.u32 2147483648, %v3629_v62  ;;  %v1465_v14 = vsel %vm1454_vm0, nan, %v1464_v30  ;;  %vm1666_vm3 = vcmp.eq.s32.totalorder %v1664_v11, 0  ;;  %v1670_v18 = vxor.u32 2147483648, %v16464_v34  ;;  %v9193_v9 = vld [vmem:[%s15986_s6 + $0xc8] ss:$20 sps:$4 sm:$0xff]   ;;  %vm16467_vm0 = vmmov %vm16456_vm12 }
 0x3b6   :  { %v13172_v44 = vpack.c.bf16 %v1465_v14, %v1361_v56  ;;  %vm1561_vm15 = vcmp.lt.s32.totalorder %v1560_v15, 2  ;;  %vm1562_vm10 = vcmp.eq.s32.totalorder %v1560_v15, 0  ;;  %vm1565_vm1 = vcmp.eq.s32.totalorder %v1560_v15, 2  ;;  %v16471_v30 = vld [vmem:[#allocation35_spill] sm:$0xff]  ;;  %v16472_v15 = vld [vmem:[#allocation66_spill] sm:$0xff]  ;;  %v16536_v47 = vld [vmem:[#allocation17_spill] sm:$0xff] }
 0x3b7   :  { %vm16466_vm13 = vcmp.lt.s32.totalorder %v12749_v24, 0  ;;  %v1564_v46 = vsel %vm1562_vm10, %v16460_v6, %v1563_v45  ;;  %v1567_v36 = vsel %vm1565_vm1, %v1566_v27, %v16457_v8  ;;  %v1668_v7 = vsel %vm1666_vm3, %v16464_v34, %v1667_v57  ;;  %v9198_v8 = vld [vmem:[%s15986_s6 + $0xa4] ss:$20 sps:$4 sm:$0xff]   ;;  %v16469_v6 = vld [vmem:[#allocation60_spill] sm:$0xff] }
 0x3b8   :  { %16465 = vst [vmem:[#allocation25_spill] sm:$0xff] %v13172_v44  ;;  %v3631_v40 = vsel %vm16466_vm13, %v3630_v2, %v3629_v62  ;;  %4583 = vmatpush1.bf16.msra.mxu1 %v9190_v58  ;;  %8688 = vmatprep.mubr.msk.bf16.mxu1 %vm16467_vm0, %v13172_v44  ;;  %v1568_v5 = vsel %vm1561_vm15, %v1564_v46, %v1567_v36  ;;  %v16468_v62 = vld [vmem:[#allocation28_spill] sm:$0xff]  ;;  %vm1669_vm7 = vcmp.eq.s32.totalorder %v1664_v11, 2  ;;  %vm1665_vm5 = vcmp.lt.s32.totalorder %v1664_v11, 2  ;;  %v16474_v14 = vld [vmem:[#allocation10_spill] sm:$0xff]  ;;  %vm16475_vm15 = vmmov %vm16459_vm14 }
 0x3b9   :  { %v3634_v56 = vsel %vm13118_vm11, %v12749_v24, %v3631_v40  ;;  %vm1662_vm12 = vweird.f32 %v16468_v62  ;;  %4584 = vmatprep.subr.bf16.mxu1 %v9195_v55  ;;  %v1569_v45 = vsel %vm1558_vm8, nan, %v1568_v5  ;;  %v1671_v63 = vsel %vm1669_vm7, %v1670_v18, %v16463_v59  ;;  %8727 = vmatmul.mubr.msk.bf16.gmra.mxu0 %vm16459_vm14, %v16470_v54  ;;  %v16473_v55 = vld [vmem:[#allocation64_spill] sm:$0xff]  ;;  %v16478_v5 = vld [vmem:[#allocation63_spill] sm:$0xff]  ;;  %vm16480_vm13 = vmmov %vm16467_vm0 }
 0x3ba   :  { %v1768_v27 = vand.u32 3, %v16469_v6  ;;  %v1672_v58 = vsel %vm1665_vm5, %v1668_v7, %v1671_v63  ;;  %vm1766_vm3 = vweird.f32 %v16471_v30  ;;  %v1771_v57 = vxor.u32 2147483648, %v16472_v15  ;;  %8730 = vmatprep.mubr.msk.bf16.mxu0 %vm16475_vm15, %v16474_v14  ;;  %v9196_v11 = vld [vmem:[%s15986_s6 + $0xa0] ss:$20 sps:$4 sm:$0xff]   ;;  %v9204_v40 = vld [vmem:[%s15986_s6 + $0x7c] ss:$20 sps:$4 sm:$0xff]  }
 0x3bb   :  { %v1774_v2 = vxor.u32 2147483648, %v16473_v55  ;;  %9385 = vcosq.f32 %v3634_v56  ;;  %v1673_v12 = vsel %vm1662_vm12, nan, %v1672_v58  ;;  %v16477_v7 = vld [vmem:[#allocation53_spill] sm:$0xff]  ;;  %v1875_v62 = vxor.u32 2147483648, %v16478_v5  ;;  %v16479_v63 = vld [vmem:[#allocation58_spill] sm:$0xff]  ;;  %v16481_v6 = vld [vmem:[#allocation31_spill] sm:$0xff] }
 0x3bc   :  { %vm1770_vm8 = vcmp.eq.s32.totalorder %v1768_v27, 0  ;;  %vm1773_vm10 = vcmp.eq.s32.totalorder %v1768_v27, 2  ;;  %4585 = vmatpush1.bf16.msra.mxu1 %v9193_v9  ;;  %v13205_v59 = vpack.c.bf16 %v1673_v12, %v1569_v45  ;;  %vm1769_vm1 = vcmp.lt.s32.totalorder %v1768_v27, 2  ;;  %v13212_v46 = vpop.eup %9383  ;;  %v16482_v27 = vld [vmem:[#allocation62_spill] sm:$0xff]  ;;  %v16512_v44 = vld [vmem:[#allocation83_spill] sm:$0xff] }
 0x3bd   :  { %v1772_v34 = vsel %vm1770_vm8, %v16473_v55, %v1771_v57  ;;  %v1775_v18 = vsel %vm1773_vm10, %v1774_v2, %v16472_v15  ;;  %4586 = vmatprep.subr.bf16.mxu1 %v9198_v8  ;;  %v1872_v9 = vand.u32 3, %v16477_v7  ;;  %v1878_v45 = vxor.u32 2147483648, %v16479_v63  ;;  %v16484_v7 = vld [vmem:[#allocation61_spill] sm:$0xff] }
 0x3be   :  { %16476 = vst [vmem:[#allocation23_spill] sm:$0xff] %v13205_v59  ;;  %v1776_v36 = vsel %vm1769_vm1, %v1772_v34, %v1775_v18  ;;  %9387 = vsinq.f32 %v3634_v56  ;;  %8689 = vmatmul.mubr.msk.bf16.gmra.mxu1 %vm16480_vm13, %v13205_v59  ;;  %vm1870_vm0 = vweird.f32 %v16481_v6  ;;  %v1971_v15 = vsel %vm11653_vm9, 0, %v16482_v27  ;;  %v9202_v56 = vld [vmem:[%s15986_s6 + $0x78] ss:$20 sps:$4 sm:$0xff]   ;;  %v9213_v34 = vld [vmem:[%s15986_s6 + $0x54] ss:$20 sps:$4 sm:$0xff]   ;;  %vm16487_vm9 = vmmov %vm16459_vm14 }
 0x3bf   :  { %v1777_v8 = vsel %vm1766_vm3, nan, %v1776_v36  ;;  %vm1874_vm12 = vcmp.eq.s32.totalorder %v1872_v9, 0  ;;  %vm1877_vm7 = vcmp.eq.s32.totalorder %v1872_v9, 2  ;;  %v1975_v57 = vadd.s32 3, %v1971_v15  ;;  %v16485_v27 = vld [vmem:[#allocation69_spill] sm:$0xff]  ;;  %v16486_v15 = vld [vmem:[#allocation11_spill] sm:$0xff]  ;;  %vm16491_vm3 = vmmov %vm16487_vm9 }
 0x3c0   :  { %v1979_v55 = vxor.u32 2147483648, %v11837_v0  ;;  %4587 = vmatpush1.bf16.msra.mxu1 %v9196_v11  ;;  %vm1873_vm5 = vcmp.lt.s32.totalorder %v1872_v9, 2  ;;  %v1876_v30 = vsel %vm1874_vm12, %v16479_v63, %v1875_v62  ;;  %v1879_v2 = vsel %vm1877_vm7, %v1878_v45, %v16478_v5  ;;  %v16488_v5 = vld [vmem:[#allocation41_spill] sm:$0xff]  ;;  %v16489_v62 = vld [vmem:[#allocation67_spill] sm:$0xff]  ;;  %v16490_v45 = vld [vmem:[#allocation12_spill] sm:$0xff] }
 0x3c1   :  { %v1982_v12 = vxor.u32 2147483648, %v11833_v16  ;;  %4588 = vmatprep.subr.bf16.mxu1 %v9204_v40  ;;  %v1880_v18 = vsel %vm1873_vm5, %v1876_v30, %v1879_v2  ;;  %v1976_v36 = vand.u32 3, %v1975_v57  ;;  %v2080_v11 = vand.u32 3, %v16484_v7  ;;  %8731 = vmatmul.mubr.msk.bf16.gmra.mxu0 %vm16487_vm9, %v16486_v15  ;;  %v16493_v30 = vld [vmem:[#allocation40_spill] sm:$0xff] }
 0x3c2   :  { %v2083_v58 = vxor.u32 2147483648, %v16485_v27  ;;  %v1881_v9 = vsel %vm1870_vm0, nan, %v1880_v18  ;;  %vm1974_vm14 = vweird.f32 %v16488_v5  ;;  %v2086_v40 = vxor.u32 2147483648, %v16489_v62  ;;  %8734 = vmatprep.mubr.msk.bf16.mxu0 %vm16491_vm3, %v16490_v45  ;;  %v9211_v6 = vld [vmem:[%s15986_s6 + $0x50] ss:$20 sps:$4 sm:$0xff]  }
 0x3c3   :  { %v2184_v63 = vand.u32 3, %v11874_v1  ;;  %v13246_v57 = vpack.c.bf16 %v1881_v9, %v1777_v8  ;;  %vm1978_vm15 = vcmp.eq.s32.totalorder %v1976_v36, 0  ;;  %vm1981_vm8 = vcmp.eq.s32.totalorder %v1976_v36, 2  ;;  %v16497_v5 = vld [vmem:[#allocation74_spill] sm:$0xff] }
 0x3c4   :  { %vm2078_vm10 = vweird.f32 %v16493_v30  ;;  %4589 = vmatpush1.bf16.msra.mxu1 %v9202_v56  ;;  %vm1977_vm1 = vcmp.lt.s32.totalorder %v1976_v36, 2  ;;  %v1980_v2 = vsel %vm1978_vm15, %v11833_v16, %v1979_v55  ;;  %v1983_v18 = vsel %vm1981_vm8, %v1982_v12, %v11837_v0  ;;  %v16495_v0 = vld [vmem:[#allocation79_spill] sm:$0xff]  ;;  %v16504_v30 = vld [vmem:[#allocation52_spill] sm:$0xff] }
 0x3c5   :  { %16492 = vst [vmem:[#allocation24_spill] sm:$0xff] %v13246_v57  ;;  %vm2082_vm13 = vcmp.eq.s32.totalorder %v2080_v11, 0  ;;  %4590 = vmatprep.subr.bf16.mxu1 %v9213_v34  ;;  %vm16494_vm0 = vcmask 687104   ;;  %v1984_v1 = vsel %vm1977_vm1, %v1980_v2, %v1983_v18  ;;  %vm2081_vm12 = vcmp.lt.s32.totalorder %v2080_v11, 2  ;;  %v16499_v2 = vld [vmem:[#allocation73_spill] sm:$0xff] }
 0x3c6   :  { %8692 = vmatprep.mubr.msk.bf16.mxu1 %vm16494_vm0, %v13246_v57  ;;  %v2084_v8 = vsel %vm2082_vm13, %v16489_v62, %v2083_v58  ;;  %vm2085_vm7 = vcmp.eq.s32.totalorder %v2080_v11, 2  ;;  %v1985_v56 = vsel %vm1974_vm14, nan, %v1984_v1  ;;  %vm2185_vm5 = vcmp.lt.s32.totalorder %v2184_v63, 2  ;;  %v16496_v58 = vld [vmem:[#allocation71_spill] sm:$0xff]  ;;  %v16500_v1 = vld [vmem:[#allocation77_spill] sm:$0xff]  ;;  %vm16507_vm13 = vmmov %vm16494_vm0 }
 0x3c7   :  { %v2087_v7 = vsel %vm2085_vm7, %v2086_v40, %v16485_v27  ;;  %v2187_v16 = vxor.u32 2147483648, %v12059_v43  ;;  %vm2186_vm9 = vcmp.eq.s32.totalorder %v2184_v63, 0  ;;  %vm2189_vm3 = vcmp.eq.s32.totalorder %v2184_v63, 2  ;;  %v16511_v57 = vld [vmem:[#allocation76_spill] sm:$0xff] }
 0x3c8   :  { %v2088_v55 = vsel %vm2081_vm12, %v2084_v8, %v2087_v7  ;;  %v2190_v12 = vxor.u32 2147483648, %v16495_v0  ;;  %4591 = vmatpush1.bf16.msra.mxu1 %v9211_v6  ;;  %v13262_v34 = vpop.eup %9385  ;;  %v2288_v9 = vand.u32 3, %v16496_v58  ;;  %v2291_v27 = vxor.u32 2147483648, %v16497_v5  ;;  %v16502_v7 = vld [vmem:[#allocation13_spill] sm:$0xff]  ;;  %v16509_v58 = vld [vmem:[#allocation87_spill] sm:$0xff]  ;;  %v16510_v8 = vld [vmem:[#allocation84_spill] sm:$0xff] }
 0x3c9   :  { %v2089_v36 = vsel %vm2078_vm10, nan, %v2088_v55  ;;  %v2188_v11 = vsel %vm2186_vm9, %v16495_v0, %v2187_v16  ;;  %v2294_v18 = vxor.u32 2147483648, %v16499_v2  ;;  %v2387_v6 = vsel %vm12039_vm6, 0, %v16500_v1  ;;  %v16505_v55 = vld [vmem:[#allocation14_spill] sm:$0xff] }
 0x3ca   :  { %v13269_v62 = vpack.c.bf16 %v2089_v36, %v1985_v56  ;;  %v2191_v40 = vsel %vm2189_vm3, %v2190_v12, %v12059_v43  ;;  %vm16503_vm14 = vcmask 64512   ;;  %vm2182_vm15 = vweird.f32 %v16504_v30  ;;  %v16508_v36 = vld [vmem:[#allocation49_spill] sm:$0xff]  ;;  %vm16518_vm3 = vmmov %vm16507_vm13 }
 0x3cb   :  { %8735 = vmatmul.mubr.msk.bf16.gmra.mxu0 %vm16503_vm14, %v16502_v7  ;;  %v2192_v16 = vsel %vm2185_vm5, %v2188_v11, %v2191_v40  ;;  %vm2290_vm8 = vcmp.eq.s32.totalorder %v2288_v9, 0  ;;  %vm2293_vm10 = vcmp.eq.s32.totalorder %v2288_v9, 2  ;;  %vm16506_vm1 = vmmov %vm16503_vm14  ;;  %v13282_v56 = vpop.eup %9387  ;;  %vm2289_vm0 = vcmp.lt.s32.totalorder %v2288_v9, 2  ;;  %v16514_v9 = vld [vmem:[#allocation59_spill] sm:$0xff] }
 0x3cc   :  { %16498 = vst [vmem:[#allocation20_spill] sm:$0xff] %v13269_v62  ;;  %8738 = vmatprep.mubr.msk.bf16.mxu0 %vm16506_vm1, %v16505_v55  ;;  %8693 = vmatmul.mubr.msk.bf16.gmra.mxu1 %vm16507_vm13, %v13269_v62  ;;  %v2193_v43 = vsel %vm2182_vm15, nan, %v2192_v16  ;;  %v2292_v0 = vsel %vm2290_vm8, %v16499_v2, %v2291_v27  ;;  %v2295_v12 = vsel %vm2293_vm10, %v2294_v18, %v16497_v5  ;;  %vm2286_vm6 = vweird.f32 %v16508_v36  ;;  %v16515_v2 = vld [vmem:[#allocation80_spill] sm:$0xff]  ;;  %v16516_v18 = vld [vmem:[#allocation57_spill] sm:$0xff]  ;;  %v16519_v36 = vld [vmem:[#allocation15_spill] sm:$0xff] }
 0x3cd   :  { %v2296_v63 = vsel %vm2289_vm0, %v2292_v0, %v2295_v12  ;;  %v2391_v11 = vadd.s32 3, %v2387_v6  ;;  %v2395_v40 = vxor.u32 2147483648, %v16509_v58  ;;  %v2398_v30 = vxor.u32 2147483648, %v16510_v8  ;;  %v16517_v6 = vld [vmem:[#allocation88_spill] sm:$0xff]  ;;  %vm16522_vm0 = vmmov %vm16506_vm1 }
 0x3ce   :  { %v2297_v1 = vsel %vm2286_vm6, nan, %v2296_v63  ;;  %v2496_v59 = vand.u32 3, %v16511_v57  ;;  %v2499_v4 = vxor.u32 2147483648, %v16512_v44  ;;  %vm2390_vm12 = vweird.f32 %v16514_v9 }
 0x3cf   :  { %v13293_v62 = vpack.c.bf16 %v2297_v1, %v2193_v43  ;;  %v2392_v27 = vand.u32 3, %v2391_v11  ;;  %v2502_v5 = vxor.u32 2147483648, %v16515_v2  ;;  %vm2494_vm7 = vweird.f32 %v16516_v18  ;;  %v16520_v1 = vld [vmem:[#allocation96_spill] sm:$0xff] }
 0x3d0   :  { %vm2497_vm5 = vcmp.lt.s32.totalorder %v2496_v59, 2  ;;  %vm2498_vm9 = vcmp.eq.s32.totalorder %v2496_v59, 0  ;;  %v2600_v16 = vand.u32 3, %v16517_v6  ;;  %vm2501_vm8 = vcmp.eq.s32.totalorder %v2496_v59, 2 }
 0x3d1   :  { %16513 = vst [vmem:[#allocation2_spill] sm:$0xff] %v13293_v62  ;;  %8696 = vmatprep.mubr.msk.bf16.mxu1 %vm16518_vm3, %v13293_v62  ;;  %vm2394_vm14 = vcmp.eq.s32.totalorder %v2392_v27, 0  ;;  %vm2397_vm15 = vcmp.eq.s32.totalorder %v2392_v27, 2  ;;  %v2500_v57 = vsel %vm2498_vm9, %v16515_v2, %v2499_v4  ;;  %vm2393_vm10 = vcmp.lt.s32.totalorder %v2392_v27, 2  ;;  %v16521_v62 = vld [vmem:[#allocation16_spill] sm:$0xff] }
 0x3d2   :  { %v2396_v43 = vsel %vm2394_vm14, %v16510_v8, %v2395_v40  ;;  %v2399_v0 = vsel %vm2397_vm15, %v2398_v30, %v16509_v58  ;;  %v2503_v12 = vsel %vm2501_vm8, %v2502_v5, %v16512_v44  ;;  %vm2601_vm13 = vcmp.lt.s32.totalorder %v2600_v16, 2  ;;  %v16523_v58 = vld [vmem:[#allocation92_spill] sm:$0xff]  ;;  %v16525_v30 = vld [vmem:[#allocation81_spill] sm:$0xff]  ;;  %v16526_v5 = vld [vmem:[#allocation91_spill] sm:$0xff] }
 0x3d3   :  { %8739 = vmatmul.mubr.msk.bf16.gmra.mxu0 %vm16506_vm1, %v16519_v36  ;;  %v2400_v63 = vsel %vm2393_vm10, %v2396_v43, %v2399_v0  ;;  %v2504_v11 = vsel %vm2497_vm5, %v2500_v57, %v2503_v12  ;;  %v2603_v6 = vxor.u32 2147483648, %v16520_v1  ;;  %vm2602_vm6 = vcmp.eq.s32.totalorder %v2600_v16, 0  ;;  %v16527_v43 = vld [vmem:[#allocation90_spill] sm:$0xff]  ;;  %v16533_v12 = vld [vmem:[#allocation100_spill] sm:$0xff] }
 0x3d4   :  { %8742 = vmatprep.mubr.msk.bf16.mxu0 %vm16522_vm0, %v16521_v62  ;;  %v2401_v4 = vsel %vm2390_vm12, nan, %v2400_v63  ;;  %v2505_v59 = vsel %vm2494_vm7, nan, %v2504_v11  ;;  %v2606_v44 = vxor.u32 2147483648, %v16523_v58  ;;  %vm2605_vm5 = vcmp.eq.s32.totalorder %v2600_v16, 2  ;;  %v16528_v0 = vld [vmem:[#allocation94_spill] sm:$0xff]  ;;  %vm16530_vm12 = vmmov %vm16518_vm3 }
 0x3d5   :  { %v13315_v40 = vpack.c.bf16 %v2505_v59, %v2401_v4  ;;  %v2604_v8 = vsel %vm2602_vm6, %v16523_v58, %v2603_v6  ;;  %v2704_v27 = vand.u32 3, %v16525_v30  ;;  %v2707_v57 = vxor.u32 2147483648, %v16526_v5  ;;  %v16531_v63 = vld [vmem:[#allocation70_spill] sm:$0xff]  ;;  %v16532_v59 = vld [vmem:[#allocation68_spill] sm:$0xff] }
 0x3d6   :  { %v2607_v2 = vsel %vm2605_vm5, %v2606_v44, %v16520_v1  ;;  %v2710_v9 = vxor.u32 2147483648, %v16527_v43  ;;  %v2803_v18 = vsel %vm12406_vm2, 0, %v16528_v0  ;;  %vm2598_vm7 = vweird.f32 %v16531_v63  ;;  %v16534_v63 = vld [vmem:[#allocation89_spill] sm:$0xff]  ;;  %vm16537_vm2 = vmmov %vm16522_vm0 }
 0x3d7   :  { %16524 = vst [vmem:[#allocation34_spill] sm:$0xff] %v13315_v40  ;;  %8697 = vmatmul.mubr.msk.bf16.gmra.mxu1 %vm16530_vm12, %v13315_v40  ;;  %v2608_v11 = vsel %vm2601_vm13, %v2604_v8, %v2607_v2  ;;  %vm2706_vm9 = vcmp.eq.s32.totalorder %v2704_v27, 0  ;;  %vm2709_vm3 = vcmp.eq.s32.totalorder %v2704_v27, 2  ;;  %vm2705_vm14 = vcmp.lt.s32.totalorder %v2704_v27, 2  ;;  %v16535_v8 = vld [vmem:[#allocation98_spill] sm:$0xff]  ;;  %vm16543_vm0 = vmmov %vm16530_vm12 }
 0x3d8   :  { %v2609_v6 = vsel %vm2598_vm7, nan, %v2608_v11  ;;  %v2708_v1 = vsel %vm2706_vm9, %v16527_v43, %v2707_v57  ;;  %v2711_v4 = vsel %vm2709_vm3, %v2710_v9, %v16526_v5  ;;  %vm2702_vm15 = vweird.f32 %v16532_v59  ;;  %v9214_v27 = vld [vmem:[%s15986_s6 + $0xa8] ss:$20 sps:$4 sm:$0xff]   ;;  %v9216_v11 = vld [vmem:[%s15986_s6 + $0xac] ss:$20 sps:$4 sm:$0xff]  }
 0x3d9   :  { %v2712_v58 = vsel %vm2705_vm14, %v2708_v1, %v2711_v4  ;;  %v2807_v44 = vadd.s32 3, %v2803_v18  ;;  %v2811_v30 = vxor.u32 2147483648, %v12594_v32  ;;  %v2814_v40 = vxor.u32 2147483648, %v16533_v12  ;;  %v16539_v57 = vld [vmem:[#allocation75_spill] sm:$0xff]  ;;  %v16540_v9 = vld [vmem:[#allocation97_spill] sm:$0xff]  ;;  %v16541_v1 = vld [vmem:[#allocation72_spill] sm:$0xff]  ;;  %4779 = vmatprep.subr.bf16.mxu0 %v9216_v11 }
 0x3da   :  { %v2713_v0 = vsel %vm2702_vm15, nan, %v2712_v58  ;;  %v2912_v16 = vand.u32 3, %v16534_v63  ;;  %v2915_v2 = vxor.u32 2147483648, %v16535_v8  ;;  %vm2806_vm8 = vweird.f32 %v16539_v57  ;;  %v16542_v4 = vld [vmem:[#allocation101_spill] sm:$0xff]  ;;  %4780 = vmatpush1.bf16.msra.mxu0 %v9214_v27  ;;  %v9217_v63 = vld [vmem:[%s15986_s6 + $0x80] ss:$20 sps:$4 sm:$0xff]   ;;  %vm16545_vm15 = vmmov %vm16543_vm0 }
 0x3db   :  { %8743 = vmatmul.mubr.msk.bf16.gmra.mxu0 %vm16537_vm2, %v16536_v47  ;;  %v13341_v5 = vpack.c.bf16 %v2713_v0, %v2609_v6  ;;  %v2808_v43 = vand.u32 3, %v2807_v44  ;;  %v2918_v18 = vxor.u32 2147483648, %v16540_v9  ;;  %vm2910_vm10 = vweird.f32 %v16541_v1  ;;  %v16544_v27 = vld [vmem:[#allocation99_spill] sm:$0xff] }
 0x3dc   :  { %vm2913_vm1 = vcmp.lt.s32.totalorder %v2912_v16, 2  ;;  %vm2914_vm13 = vcmp.eq.s32.totalorder %v2912_v16, 0  ;;  %v3016_v59 = vand.u32 3, %v16542_v4  ;;  %vm2917_vm12 = vcmp.eq.s32.totalorder %v2912_v16, 2  ;;  %v9219_v4 = vld [vmem:[%s15986_s6 + $0x84] ss:$20 sps:$4 sm:$0xff]  }
 0x3dd   :  { %16538 = vst [vmem:[#allocation33_spill] sm:$0xff] %v13341_v5  ;;  %8700 = vmatprep.mubr.msk.bf16.mxu1 %vm16543_vm0, %v13341_v5  ;;  %vm2810_vm6 = vcmp.eq.s32.totalorder %v2808_v43, 0  ;;  %vm2813_vm5 = vcmp.eq.s32.totalorder %v2808_v43, 2  ;;  %v2916_v6 = vsel %vm2914_vm13, %v16540_v9, %v2915_v2  ;;  %vm2809_vm7 = vcmp.lt.s32.totalorder %v2808_v43, 2  ;;  %4781 = vmatprep.subr.bf16.mxu0 %v9219_v4 }
 0x3de   :  { %v2812_v58 = vsel %vm2810_vm6, %v16533_v12, %v2811_v30  ;;  %v2815_v44 = vsel %vm2813_vm5, %v2814_v40, %v12594_v32  ;;  %v2919_v0 = vsel %vm2917_vm12, %v2918_v18, %v16535_v8  ;;  %vm3017_vm9 = vcmp.lt.s32.totalorder %v3016_v59, 2  ;;  %v9220_v12 = vld [vmem:[%s15986_s6 + $0x28] ss:$20 sps:$4 sm:$0xff]   ;;  %4782 = vmatpush1.bf16.msra.mxu0 %v9217_v63  ;;  %vm16553_vm12 = vmmov %vm16545_vm15 }
 0x3df   :  { %v2816_v5 = vsel %vm2809_vm7, %v2812_v58, %v2815_v44  ;;  %v2920_v2 = vsel %vm2913_vm1, %v2916_v6, %v2919_v0  ;;  %v3019_v43 = vxor.u32 2147483648, %v12708_v25  ;;  %vm3018_vm3 = vcmp.eq.s32.totalorder %v3016_v59, 0 }
 0x3e0   :  { %v2817_v32 = vsel %vm2806_vm8, nan, %v2816_v5  ;;  %v2921_v40 = vsel %vm2910_vm10, nan, %v2920_v2  ;;  %v3022_v30 = vxor.u32 2147483648, %v12684_v21  ;;  %vm3021_vm14 = vcmp.eq.s32.totalorder %v3016_v59, 2  ;;  %v9222_v5 = vld [vmem:[%s15986_s6 + $0x2c] ss:$20 sps:$4 sm:$0xff]  }
 0x3e1   :  { %v13372_v8 = vpack.c.bf16 %v2921_v40, %v2817_v32  ;;  %v3020_v16 = vsel %vm3018_vm3, %v12684_v21, %v3019_v43  ;;  %v3120_v9 = vand.u32 3, %v16544_v27  ;;  %v3123_v18 = vxor.u32 2147483648, %v12680_v42  ;;  %v16546_v21 = vld [vmem:[#allocation85_spill] sm:$0xff]  ;;  %4592 = vmatprep.subr.bf16.mxu1 %v9222_v5  ;;  %v16548_v2 = vld [vmem:[#allocation102_spill] sm:$0xff] }
 0x3e2   :  { %v3023_v57 = vsel %vm3021_vm14, %v3022_v30, %v12708_v25  ;;  %v3126_v11 = vxor.u32 2147483648, %v12601_v41  ;;  %v3219_v1 = vsel %vm12697_vm4, 0, %v12651_v37  ;;  %vm3014_vm2 = vweird.f32 %v16546_v21  ;;  %4593 = vmatpush1.bf16.msra.mxu1 %v9220_v12  ;;  %v16549_v32 = vld [vmem:[#allocation105_spill] sm:$0xff]  ;;  %v16552_v27 = vld [vmem:[#allocation86_spill] sm:$0xff] }
 0x3e3   :  { %8701 = vmatmul.mubr.msk.bf16.gmra.mxu1 %vm16545_vm15, %v13372_v8  ;;  %v3024_v6 = vsel %vm3017_vm9, %v3020_v16, %v3023_v57  ;;  %vm3122_vm8 = vcmp.eq.s32.totalorder %v3120_v9, 0  ;;  %vm3125_vm10 = vcmp.eq.s32.totalorder %v3120_v9, 2  ;;  %vm3121_vm1 = vcmp.lt.s32.totalorder %v3120_v9, 2  ;;  %v16550_v16 = vld [vmem:[#allocation93_spill] sm:$0xff] }
 0x3e4   :  { %v3025_v25 = vsel %vm3014_vm2, nan, %v3024_v6  ;;  %v3124_v58 = vsel %vm3122_vm8, %v12601_v41, %v3123_v18  ;;  %v3127_v44 = vsel %vm3125_vm10, %v3126_v11, %v12680_v42  ;;  %vm3118_vm4 = vweird.f32 %v16547_v51  ;;  %v16551_v42 = vld [vmem:[#allocation104_spill] sm:$0xff]  ;;  %vm16555_vm10 = vmmov %vm16553_vm12 }
 0x3e5   :  { %v3128_v37 = vsel %vm3121_vm1, %v3124_v58, %v3127_v44  ;;  %v3223_v0 = vadd.s32 3, %v3219_v1  ;;  %v3227_v63 = vxor.u32 2147483648, %v12874_v23  ;;  %v3230_v59 = vxor.u32 2147483648, %v12805_v26 }
 0x3e6   :  { %v3129_v4 = vsel %vm3118_vm4, nan, %v3128_v37  ;;  %v3328_v43 = vand.u32 3, %v16548_v2  ;;  %v3331_v40 = vxor.u32 2147483648, %v16549_v32  ;;  %vm3222_vm13 = vweird.f32 %v16550_v16 }
 0x3e7   :  { %v13396_v30 = vpack.c.bf16 %v3129_v4, %v3025_v25  ;;  %v3224_v41 = vand.u32 3, %v3223_v0  ;;  %v3334_v12 = vxor.u32 2147483648, %v16551_v42  ;;  %vm3326_vm0 = vweird.f32 %v16552_v27 }
 0x3e8   :  { %vm3329_vm6 = vcmp.lt.s32.totalorder %v3328_v43, 2  ;;  %vm3330_vm5 = vcmp.eq.s32.totalorder %v3328_v43, 0  ;;  %v3432_v9 = vand.u32 3, %v12999_v48  ;;  %vm3333_vm3 = vcmp.eq.s32.totalorder %v3328_v43, 2 }
 0x3e9   :  { %8704 = vmatprep.mubr.msk.bf16.mxu1 %vm16553_vm12, %v13396_v30  ;;  %vm3226_vm7 = vcmp.eq.s32.totalorder %v3224_v41, 0  ;;  %vm3229_vm9 = vcmp.eq.s32.totalorder %v3224_v41, 2  ;;  %v3332_v5 = vsel %vm3330_vm5, %v16551_v42, %v3331_v40  ;;  %vm3225_vm14 = vcmp.lt.s32.totalorder %v3224_v41, 2  ;;  %vm16556_vm12 = vmmov %vm16555_vm10 }
 0x3ea   :  { %v3228_v57 = vsel %vm3226_vm7, %v12805_v26, %v3227_v63  ;;  %v3231_v18 = vsel %vm3229_vm9, %v3230_v59, %v12874_v23  ;;  %v3335_v11 = vsel %vm3333_vm3, %v3334_v12, %v16549_v32  ;;  %vm3433_vm15 = vcmp.lt.s32.totalorder %v3432_v9, 2  ;;  %v16554_v23 = vld [vmem:[#allocation103_spill] sm:$0xff] }
 0x3eb   :  { %v3232_v1 = vsel %vm3225_vm14, %v3228_v57, %v3231_v18  ;;  %v3336_v21 = vsel %vm3329_vm6, %v3332_v5, %v3335_v11  ;;  %v3435_v48 = vxor.u32 2147483648, %v13099_v28  ;;  %vm3434_vm2 = vcmp.eq.s32.totalorder %v3432_v9, 0  ;;  %v9232_v11 = vld [vmem:[%s15986_s6 + $0x8] ss:$20 sps:$4 sm:$0xff]  }
 0x3ec   :  { %v3233_v6 = vsel %vm3222_vm13, nan, %v3232_v1  ;;  %v3337_v25 = vsel %vm3326_vm0, nan, %v3336_v21  ;;  %v3438_v58 = vxor.u32 2147483648, %v13089_v29  ;;  %vm3437_vm8 = vcmp.eq.s32.totalorder %v3432_v9, 2  ;;  %v9234_v1 = vld [vmem:[%s15986_s6 + $0xc] ss:$20 sps:$4 sm:$0xff]  }
 0x3ed   :  { %v13414_v44 = vpack.c.bf16 %v3337_v25, %v3233_v6  ;;  %v3436_v26 = vsel %vm3434_vm2, %v13089_v29, %v3435_v48  ;;  %v3536_v51 = vand.u32 3, %v16554_v23  ;;  %v3539_v0 = vxor.u32 2147483648, %v13077_v49  ;;  %v9235_v21 = vld [vmem:[%s15986_s6 + $0x128] ss:$20 sps:$4 sm:$0xff]  }
 0x3ee   :  { %v3439_v37 = vsel %vm3437_vm8, %v3438_v58, %v13099_v28  ;;  %v3542_v63 = vxor.u32 2147483648, %v12899_v61  ;;  %v3635_v4 = vsel %vm13118_vm11, 0, %v13052_v52  ;;  %vm3430_vm1 = vweird.f32 %v12560_v50  ;;  %vm16557_vm8 = vmmov %vm16555_vm10 }
 0x3ef   :  { %8705 = vmatmul.mubr.msk.bf16.gmra.mxu1 %vm16555_vm10, %v13414_v44  ;;  %v3440_v29 = vsel %vm3433_vm15, %v3436_v26, %v3439_v37  ;;  %vm3538_vm4 = vcmp.eq.s32.totalorder %v3536_v51, 0  ;;  %vm3541_vm13 = vcmp.eq.s32.totalorder %v3536_v51, 2  ;;  %vm3537_vm0 = vcmp.lt.s32.totalorder %v3536_v51, 2 }
 0x3f0   :  { %v3441_v59 = vsel %vm3430_vm1, nan, %v3440_v29  ;;  %v3540_v28 = vsel %vm3538_vm4, %v12899_v61, %v3539_v0  ;;  %v3543_v2 = vsel %vm3541_vm13, %v3542_v63, %v13077_v49  ;;  %vm3534_vm6 = vweird.f32 %v12475_v3  ;;  %v9223_v3 = vld [vmem:[%s15986_s6 + $0x58] ss:$20 sps:$4 sm:$0xff]   ;;  %v9225_v49 = vld [vmem:[%s15986_s6 + $0x5c] ss:$20 sps:$4 sm:$0xff]  }
 0x3f1   :  { %v3544_v43 = vsel %vm3537_vm0, %v3540_v28, %v3543_v2  ;;  %v3639_v38 = vadd.s32 3, %v3635_v4  ;;  %v3643_v52 = vxor.u32 2147483648, %v13282_v56  ;;  %v3646_v40 = vxor.u32 2147483648, %v13262_v34  ;;  %4783 = vmatprep.subr.bf16.mxu0 %v9225_v49  ;;  %v13485_v29 = vld [vmem:[%s15988_s5] ss:$0 sm:$0xff]  ;;  %s9789_s5 = smov 64  }
 0x3f2   :  { %v3545_v32 = vsel %vm3534_vm6, nan, %v3544_v43  ;;  %v3744_v50 = vand.u32 3, %v13011_v22  ;;  %v3747_v16 = vxor.u32 2147483648, %v13212_v46  ;;  %v3750_v61 = vxor.u32 2147483648, %v13129_v53  ;;  %4784 = vmatpush1.bf16.msra.mxu0 %v9223_v3  ;;  %v6088_v28 = vld [vmem:[%s15989_s9] sm:$0xf] }
 0x3f3   :  { %v13435_v41 = vpack.c.bf16 %v3545_v32, %v3441_v59  ;;  %v3640_v42 = vand.u32 3, %v3639_v38  ;;  %vm3638_vm15 = vweird.f32 %v12749_v24  ;;  %vm3742_vm2 = vweird.f32 %v12657_v13  ;;  %v9231_v13 = vld [vmem:[%s15986_s6 + $0x34] ss:$20 sps:$4 sm:$0xff]   ;;  %v9237_v3 = vld [vmem:[%s15986_s6 + $0xd8] ss:$20 sps:$4 sm:$0xff]  }
 0x3f4   :  { %vm3745_vm11 = vcmp.lt.s32.totalorder %v3744_v50, 2  ;;  %vm3746_vm5 = vcmp.eq.s32.totalorder %v3744_v50, 0  ;;  %vm3749_vm3 = vcmp.eq.s32.totalorder %v3744_v50, 2  ;;  %4785 = vmatprep.subr.bf16.mxu0 %v9231_v13  ;;  %v16150_v48 = vmov 0  }
 0x3f5   :  { %8708 = vmatprep.mubr.msk.bf16.mxu1 %vm16556_vm12, %v13435_v41  ;;  %vm3642_vm7 = vcmp.eq.s32.totalorder %v3640_v42, 0  ;;  %vm3645_vm9 = vcmp.eq.s32.totalorder %v3640_v42, 2  ;;  %v3748_v22 = vsel %vm3746_vm5, %v13129_v53, %v3747_v16  ;;  %vm3641_vm14 = vcmp.lt.s32.totalorder %v3640_v42, 2  ;;  %v9226_v53 = vld [vmem:[%s15986_s6] ss:$20 sps:$4 sm:$0xff]   ;;  %4805 = vmatprep.mubr.bf16.mxu0 %v16150_v48 }
 0x3f6   :  { %v3644_v12 = vsel %vm3642_vm7, %v13262_v34, %v3643_v52  ;;  %v3647_v27 = vsel %vm3645_vm9, %v3646_v40, %v13282_v56  ;;  %v3751_v9 = vsel %vm3749_vm3, %v3750_v61, %v13212_v46  ;;  %v9228_v34 = vld [vmem:[%s15986_s6 + $0x4] ss:$20 sps:$4 sm:$0xff]   ;;  %9118 = vset.pattern.permute.xlu1 %v16150_v48  ;;  %9122 = vset.pattern.permute.xlu0 %v16150_v48  ;;  %vm16558_vm10 = vcmask 1043456   ;;  %v9236_v40 = vld [vmem:[%s15986_s6 + $0x100] ss:$20 sps:$4 sm:$0xff]  }
 0x3f7   :  { %v3648_v5 = vsel %vm3641_vm14, %v3644_v12, %v3647_v27  ;;  %v3752_v57 = vsel %vm3745_vm11, %v3748_v22, %v3751_v9  ;;  %v9229_v46 = vld [vmem:[%s15986_s6 + $0x30] ss:$20 sps:$4 sm:$0xff]   ;;  %4594 = vmatprep.subr.bf16.mxu1 %v9228_v34  ;;  %vm16559_vm1 = vmmov %vm16558_vm10  ;;  %vm16560_vm4 = vcmask 1041408   ;;  %vm16561_vm13 = vcmask 64512  }
 0x3f8   :  { %v3649_v56 = vsel %vm3638_vm15, nan, %v3648_v5  ;;  %v3753_v18 = vsel %vm3742_vm2, nan, %v3752_v57  ;;  %4595 = vmatpush1.bf16.msra.mxu1 %v9226_v53  ;;  %4786 = vmatpush1.bf16.msra.mxu0 %v9229_v46  ;;  %v6090_v42 = vsel %vm16559_vm1, %v6088_v28, 0  ;;  %v9238_v5 = vld [vmem:[%s15986_s6 + $0xb0] ss:$20 sps:$4 sm:$0xff]   ;;  %vm16562_vm0 = vmmov %vm16560_vm4 }
 0x3f9   :  { %v13465_v24 = vpack.c.bf16 %v3753_v18, %v3649_v56  ;;  %4787 = vmatprep.subr.bf16.mxu0 %v9234_v1  ;;  %8746 = vmatprep.subr.bf16.mxu1 %v9235_v21  ;;  %v9239_v18 = vld [vmem:[%s15986_s6 + $0x88] ss:$20 sps:$4 sm:$0xff]   ;;  %vm16563_vm6 = vmmov %vm16561_vm13 }
 0x3fa   :  { %vm16564_vm11 = vmmov %vm16563_vm6 }
 0x3fb   :  { %8709 = vmatmul.mubr.msk.bf16.gmra.mxu1 %vm16557_vm8, %v13465_v24  ;;  %vm16565_vm5 = vmmov %vm16563_vm6 }
 0x3fc   :  { %4788 = vmatpush1.bf16.msra.mxu0 %v9232_v11  ;;  %4612 = vmatprep.mubr.bf16.mxu1 %v16150_v48  ;;  %vm16566_vm12 = vmmov %vm16565_vm5 }
 0x3fd   :  { %8975 = vmatprep.subr.msk.bf16.mxu0 %vm16558_vm10, %v6088_v28  ;;  %vm16567_vm7 = vmmov %vm16565_vm5 }
 0x3fe   :  { %vm16568_vm9 = vmmov %vm16565_vm5 }
 0x3ff   :  { %vm16569_vm3 = vmmov %vm16565_vm5 }
 0x400   :  { %vm16570_vm14 = vmmov %vm16569_vm3 }
 0x401   :  { %vm16571_vm15 = vmmov %vm16569_vm3 }
 0x402   :  { %vm16572_vm2 = vmmov %vm16569_vm3 }
 0x403   :  { %vm16573_vm8 = vmmov %vm16572_vm2 }
 0x404   :  { %vm16574_vm10 = vmmov %vm16572_vm2 }
 0x405   :  { %vm16575_vm1 = vmmov %vm16572_vm2 }
 0x456   :  { %v8682_v6 = vpop.f32.mrf.mxu0 }
 0x458   :  { %v3902_v25 = vpop.f32.mrf.mxu0 }
 0x45a   :  { %v8683_v58 = vpop.f32.mrf.mxu0 }
 0x45c   :  { %v3905_v26 = vpop.f32.mrf.mxu0 }
 0x45e   :  { %v8716_v23 = vpop.f32.mrf.mxu0 }
 0x45f   :  { %v4124_v50 = vadd.f32 %v8716_v23, %v8682_v6 }
 0x460   :  { %v4115_v51 = vpop.f32.mrf.mxu0 }
 0x461   :  { %v4116_v0 = vadd.f32 %v4115_v51, %v3902_v25  ;;  %v4251_v22 = vadd.f32 %v13485_v29, %v4124_v50 }
 0x462   :  { %v8717_v37 = vpop.f32.mrf.mxu0 }
 0x463   :  { %v4249_v2 = vadd.f32 %v13485_v29, %v4116_v0  ;;  %v4127_v52 = vadd.f32 %v8717_v37, %v8683_v58 }
 0x464   :  { %v4118_v63 = vpop.f32.mrf.mxu0 }
 0x465   :  { %v4119_v4 = vadd.f32 %v4118_v63, %v3905_v26  ;;  %v4252_v61 = vadd.f32 %v13485_v29, %v4127_v52  ;;  %v9240_v26 = vld [vmem:[%s15986_s6 + $0x60] ss:$20 sps:$4 sm:$0xff]   ;;  %v9242_v52 = vld [vmem:[%s15986_s6 + $0x10] ss:$20 sps:$4 sm:$0xff]  }
 0x467   :  { %v4250_v43 = vadd.f32 %v13485_v29, %v4119_v4  ;;  %v13508_v9 = vpack.c.bf16 %v4252_v61, %v4251_v22  ;;  %v9241_v4 = vld [vmem:[%s15986_s6 + $0x38] ss:$20 sps:$4 sm:$0xff]  }
 0x469   :  { %v8720_v59 = vpop.f32.mrf.mxu0  ;;  %v13493_v32 = vpack.c.bf16 %v4250_v43, %v4249_v2 }
 0x46b   :  { %v4131_v38 = vpop.f32.mrf.mxu0  ;;  %4613 = vmatmul.mubr.bf16.vlgmr.msra.gmra.mxu1 %v13493_v32  ;;  %4806 = vmatmul.mubr.bf16.vlgmr.msra.gmra.mxu0 %v13493_v32 }
 0x46c   :  { %8747 = vmatpush3.bf16.msra.mxu1 %v9235_v21  ;;  %4622 = vmatprep.mubr.bf16.mxu1 %v16150_v48 }
 0x46d   :  { %v8721_v16 = vpop.f32.mrf.mxu0  ;;  %4815 = vmatprep.mubr.bf16.mxu0 %v16150_v48  ;;  %8748 = vmatprep.subr.bf16.mxu1 %v9236_v40 }
 0x46e   :  { %8795 = vmatpush3.bf16.msra.mxu0 %v6090_v42 }
 0x46f   :  { %v4134_v12 = vpop.f32.mrf.mxu0 }
 0x470   :  { %8749 = vmatpush3.bf16.msra.mxu1 %v9236_v40 }
 0x471   :  { %8750 = vmatprep.subr.bf16.mxu1 %v9237_v3  ;;  %v8724_v53 = vpop.f32.mrf.mxu0 }
 0x473   :  { %v8686_v49 = vpop.f32.mrf.mxu1  ;;  %4623 = vmatmul.mubr.bf16.gmra.mxu1 %v13508_v9  ;;  %4816 = vmatmul.mubr.bf16.gmra.mxu0 %v13508_v9  ;;  %v4147_v13 = vpop.f32.mrf.mxu0 }
 0x474   :  { %4632 = vmatprep.mubr.bf16.mxu1 %v16150_v48  ;;  %4825 = vmatprep.mubr.bf16.mxu0 %v16150_v48  ;;  %v4140_v23 = vadd.f32 %v8720_v59, %v8686_v49 }
 0x475   :  { %v3918_v27 = vpop.f32.mrf.mxu1  ;;  %8751 = vmatpush3.bf16.msra.mxu1 %v9237_v3  ;;  %v8725_v58 = vpop.f32.mrf.mxu0 }
 0x476   :  { %v4132_v34 = vadd.f32 %v4131_v38, %v3918_v27  ;;  %8752 = vmatprep.subr.bf16.mxu1 %v9238_v5  ;;  %v4255_v59 = vadd.f32 %v13485_v29, %v4140_v23 }
 0x477   :  { %v8687_v57 = vpop.f32.mrf.mxu1  ;;  %v4150_v63 = vpop.f32.mrf.mxu0 }
 0x478   :  { %v4253_v11 = vadd.f32 %v13485_v29, %v4132_v34  ;;  %v4143_v21 = vadd.f32 %v8721_v16, %v8687_v57 }
 0x479   :  { %v3921_v46 = vpop.f32.mrf.mxu1  ;;  %8753 = vmatpush3.bf16.msra.mxu1 %v9238_v5  ;;  %v8728_v38 = vpop.f32.mrf.mxu0 }
 0x47a   :  { %v4135_v56 = vadd.f32 %v4134_v12, %v3921_v46  ;;  %8754 = vmatprep.subr.bf16.mxu1 %v9239_v18  ;;  %v4256_v37 = vadd.f32 %v13485_v29, %v4143_v21  ;;  %v13564_v21 = vld [vmem:[%s15990_s10 + $0x28] ss:$0 sps:$4 sm:$0x33]  }
 0x47b   :  { %v4163_v16 = vpop.f32.mrf.mxu0  ;;  %8976 = vmatprep.subr.msk.bf16.mxu0 %vm16560_vm4, %v13564_v21  ;;  %vm16576_vm4 = vmmov %vm16575_vm1 }
 0x47c   :  { %v4254_v1 = vadd.f32 %v13485_v29, %v4135_v56  ;;  %v13536_v43 = vpack.c.bf16 %v4256_v37, %v4255_v59 }
 0x47d   :  { %8755 = vmatpush3.bf16.msra.mxu1 %v9239_v18  ;;  %v8729_v12 = vpop.f32.mrf.mxu0 }
 0x47e   :  { %v13522_v6 = vpack.c.bf16 %v4254_v1, %v4253_v11  ;;  %v8690_v25 = vpop.f32.mrf.mxu1  ;;  %8756 = vmatprep.subr.bf16.mxu1 %v9240_v26 }
 0x47f   :  { %v4156_v27 = vadd.f32 %v8724_v53, %v8690_v25  ;;  %v4166_v34 = vpop.f32.mrf.mxu0 }
 0x480   :  { %4633 = vmatmul.mubr.bf16.gmra.mxu1 %v13522_v6  ;;  %4826 = vmatmul.mubr.bf16.gmra.mxu0 %v13522_v6  ;;  %v3934_v51 = vpop.f32.mrf.mxu1 }
 0x481   :  { %4642 = vmatprep.mubr.bf16.mxu1 %v16150_v48  ;;  %4835 = vmatprep.mubr.bf16.mxu0 %v16150_v48  ;;  %v4148_v40 = vadd.f32 %v4147_v13, %v3934_v51  ;;  %v4259_v46 = vadd.f32 %v13485_v29, %v4156_v27  ;;  %v8732_v11 = vpop.f32.mrf.mxu0 }
 0x482   :  { %v8691_v0 = vpop.f32.mrf.mxu1  ;;  %8757 = vmatpush3.bf16.msra.mxu1 %v9240_v26 }
 0x483   :  { %8758 = vmatprep.subr.bf16.mxu1 %v9241_v4  ;;  %v4257_v61 = vadd.f32 %v13485_v29, %v4148_v40  ;;  %v4159_v49 = vadd.f32 %v8725_v58, %v8691_v0  ;;  %v4179_v58 = vpop.f32.mrf.mxu0 }
 0x484   :  { %v3937_v28 = vpop.f32.mrf.mxu1 }
 0x485   :  { %v4151_v2 = vadd.f32 %v4150_v63, %v3937_v28  ;;  %v4260_v57 = vadd.f32 %v13485_v29, %v4159_v49  ;;  %v8733_v0 = vpop.f32.mrf.mxu0 }
 0x486   :  { %8759 = vmatpush3.bf16.msra.mxu1 %v9241_v4 }
 0x487   :  { %v4258_v50 = vadd.f32 %v13485_v29, %v4151_v2  ;;  %8760 = vmatprep.subr.bf16.mxu1 %v9242_v52  ;;  %v13555_v13 = vpack.c.bf16 %v4260_v57, %v4259_v46  ;;  %v4182_v28 = vpop.f32.mrf.mxu0 }
 0x488   :  { %4643 = vmatmul.mubr.bf16.gmra.mxu1 %v13536_v43  ;;  %4836 = vmatmul.mubr.bf16.gmra.mxu0 %v13536_v43 }
 0x489   :  { %4652 = vmatprep.mubr.bf16.mxu1 %v16150_v48  ;;  %4845 = vmatprep.mubr.bf16.mxu0 %v16150_v48  ;;  %v13547_v22 = vpack.c.bf16 %v4258_v50, %v4257_v61 }
 0x48a   :  { %8761 = vmatpush3.bf16.msra.mxu1 %v9242_v52 }
 0x48c   :  { %v8694_v42 = vpop.f32.mrf.mxu1 }
 0x48d   :  { %v4172_v63 = vadd.f32 %v8728_v38, %v8694_v42 }
 0x48e   :  { %v3950_v3 = vpop.f32.mrf.mxu1 }
 0x48f   :  { %v4164_v53 = vadd.f32 %v4163_v16, %v3950_v3  ;;  %v4263_v2 = vadd.f32 %v13485_v29, %v4172_v63  ;;  %v8736_v16 = vpop.f32.mrf.mxu0 }
 0x490   :  { %4653 = vmatmul.mubr.bf16.gmra.mxu1 %v13547_v22  ;;  %4846 = vmatmul.mubr.bf16.gmra.mxu0 %v13547_v22  ;;  %v8695_v5 = vpop.f32.mrf.mxu1 }
 0x491   :  { %4662 = vmatprep.mubr.bf16.mxu1 %v16150_v48  ;;  %4855 = vmatprep.mubr.bf16.mxu0 %v16150_v48  ;;  %v4261_v26 = vadd.f32 %v13485_v29, %v4164_v53  ;;  %v4175_v51 = vadd.f32 %v8729_v12, %v8695_v5  ;;  %v4195_v3 = vpop.f32.mrf.mxu0 }
 0x492   :  { %v3953_v56 = vpop.f32.mrf.mxu1 }
 0x493   :  { %v4167_v18 = vadd.f32 %v4166_v34, %v3953_v56  ;;  %v4264_v59 = vadd.f32 %v13485_v29, %v4175_v51  ;;  %v8737_v57 = vpop.f32.mrf.mxu0 }
 0x495   :  { %v4262_v25 = vadd.f32 %v13485_v29, %v4167_v18  ;;  %v13578_v50 = vpack.c.bf16 %v4264_v59, %v4263_v2  ;;  %v4198_v18 = vpop.f32.mrf.mxu0 }
 0x497   :  { %v8698_v1 = vpop.f32.mrf.mxu1  ;;  %v13570_v37 = vpack.c.bf16 %v4262_v25, %v4261_v26 }
 0x498   :  { %4663 = vmatmul.mubr.bf16.gmra.mxu1 %v13555_v13  ;;  %4856 = vmatmul.mubr.bf16.gmra.mxu0 %v13555_v13  ;;  %v4188_v34 = vadd.f32 %v8732_v11, %v8698_v1 }
 0x499   :  { %4672 = vmatprep.mubr.bf16.mxu1 %v16150_v48  ;;  %4865 = vmatprep.mubr.bf16.mxu0 %v16150_v48  ;;  %v3966_v23 = vpop.f32.mrf.mxu1 }
 0x49a   :  { %v4180_v38 = vadd.f32 %v4179_v58, %v3966_v23  ;;  %v4267_v53 = vadd.f32 %v13485_v29, %v4188_v34  ;;  %v8740_v23 = vpop.f32.mrf.mxu0 }
 0x49b   :  { %v8699_v4 = vpop.f32.mrf.mxu1 }
 0x49c   :  { %v4265_v49 = vadd.f32 %v13485_v29, %v4180_v38  ;;  %v4191_v27 = vadd.f32 %v8733_v0, %v8699_v4  ;;  %v4211_v0 = vpop.f32.mrf.mxu0 }
 0x49d   :  { %v3969_v52 = vpop.f32.mrf.mxu1 }
 0x49e   :  { %v4183_v40 = vadd.f32 %v4182_v28, %v3969_v52  ;;  %v4268_v56 = vadd.f32 %v13485_v29, %v4191_v27  ;;  %v8741_v2 = vpop.f32.mrf.mxu0 }
 0x4a0   :  { %4673 = vmatmul.mubr.bf16.gmra.mxu1 %v13570_v37  ;;  %4866 = vmatmul.mubr.bf16.gmra.mxu0 %v13570_v37  ;;  %v4266_v61 = vadd.f32 %v13485_v29, %v4183_v40  ;;  %v13594_v26 = vpack.c.bf16 %v4268_v56, %v4267_v53 }
 0x4a1   :  { %4682 = vmatprep.mubr.bf16.mxu1 %v16150_v48  ;;  %4875 = vmatprep.mubr.bf16.mxu0 %v16150_v48 }
 0x4a2   :  { %v13586_v5 = vpack.c.bf16 %v4266_v61, %v4265_v49  ;;  %v4214_v61 = vpop.f32.mrf.mxu0 }
 0x4a3   :  { %v8702_v42 = vpop.f32.mrf.mxu1 }
 0x4a4   :  { %v4204_v52 = vadd.f32 %v8736_v16, %v8702_v42 }
 0x4a5   :  { %v3982_v12 = vpop.f32.mrf.mxu1 }
 0x4a6   :  { %v4196_v11 = vadd.f32 %v4195_v3, %v3982_v12  ;;  %v4271_v3 = vadd.f32 %v13485_v29, %v4204_v52 }
 0x4a7   :  { %v8703_v46 = vpop.f32.mrf.mxu1 }
 0x4a8   :  { %4683 = vmatmul.mubr.bf16.gmra.mxu1 %v13578_v50  ;;  %4876 = vmatmul.mubr.bf16.gmra.mxu0 %v13578_v50  ;;  %v4269_v63 = vadd.f32 %v13485_v29, %v4196_v11  ;;  %v4207_v59 = vadd.f32 %v8737_v57, %v8703_v46  ;;  %v8744_v57 = vpop.f32.mrf.mxu0 }
 0x4a9   :  { %4692 = vmatprep.mubr.bf16.mxu1 %v16150_v48  ;;  %4885 = vmatprep.mubr.bf16.mxu0 %v16150_v48  ;;  %v3985_v25 = vpop.f32.mrf.mxu1 }
 0x4aa   :  { %v4199_v58 = vadd.f32 %v4198_v18, %v3985_v25  ;;  %v4272_v38 = vadd.f32 %v13485_v29, %v4207_v59  ;;  %v4227_v46 = vpop.f32.mrf.mxu0 }
 0x4ac   :  { %v4270_v51 = vadd.f32 %v13485_v29, %v4199_v58  ;;  %v13610_v27 = vpack.c.bf16 %v4272_v38, %v4271_v3  ;;  %v8745_v58 = vpop.f32.mrf.mxu0 }
 0x4ae   :  { %v13602_v28 = vpack.c.bf16 %v4270_v51, %v4269_v63  ;;  %v4230_v63 = vpop.f32.mrf.mxu0 }
 0x4af   :  { %v8706_v1 = vpop.f32.mrf.mxu1 }
 0x4b0   :  { %4693 = vmatmul.mubr.bf16.gmra.mxu1 %v13586_v5  ;;  %4886 = vmatmul.mubr.bf16.gmra.mxu0 %v13586_v5  ;;  %v4220_v11 = vadd.f32 %v8740_v23, %v8706_v1 }
 0x4b1   :  { %4702 = vmatprep.mubr.bf16.mxu1 %v16150_v48  ;;  %4895 = vmatprep.mubr.bf16.mxu0 %v16150_v48  ;;  %v3998_v4 = vpop.f32.mrf.mxu1 }
 0x4b2   :  { %v4212_v16 = vadd.f32 %v4211_v0, %v3998_v4  ;;  %v4275_v4 = vadd.f32 %v13485_v29, %v4220_v11 }
 0x4b3   :  { %v8707_v40 = vpop.f32.mrf.mxu1 }
 0x4b4   :  { %v4273_v56 = vadd.f32 %v13485_v29, %v4212_v16  ;;  %v4223_v53 = vadd.f32 %v8741_v2, %v8707_v40 }
 0x4b5   :  { %v4001_v49 = vpop.f32.mrf.mxu1 }
 0x4b6   :  { %v4215_v12 = vadd.f32 %v4214_v61, %v4001_v49  ;;  %v4276_v0 = vadd.f32 %v13485_v29, %v4223_v53 }
 0x4b8   :  { %4703 = vmatmul.mubr.bf16.gmra.mxu1 %v13594_v26  ;;  %4896 = vmatmul.mubr.bf16.gmra.mxu0 %v13594_v26  ;;  %v4274_v34 = vadd.f32 %v13485_v29, %v4215_v12  ;;  %v13626_v52 = vpack.c.bf16 %v4276_v0, %v4275_v4 }
 0x4b9   :  { %4712 = vmatprep.mubr.bf16.mxu1 %v16150_v48  ;;  %4905 = vmatprep.mubr.bf16.mxu0 %v16150_v48 }
 0x4ba   :  { %v13618_v25 = vpack.c.bf16 %v4274_v34, %v4273_v56 }
 0x4bb   :  { %v8710_v42 = vpop.f32.mrf.mxu1 }
 0x4bc   :  { %v4236_v3 = vadd.f32 %v8744_v57, %v8710_v42  ;;  %v6507_v57 = vsel %vm16562_vm0, %v13564_v21, 0  ;;  %v9244_v42 = vld [vmem:[%s15990_s10 + $0x20] sm:$0xff]   ;;  %vm16578_vm0 = vcmask 687104  }
 0x4bd   :  { %v4014_v18 = vpop.f32.mrf.mxu1 }
 0x4be   :  { %v4228_v40 = vadd.f32 %v4227_v46, %v4014_v18  ;;  %v4279_v12 = vadd.f32 %v13485_v29, %v4236_v3 }
 0x4bf   :  { %v8711_v51 = vpop.f32.mrf.mxu1 }
 0x4c0   :  { %4713 = vmatmul.mubr.bf16.gmra.mxu1 %v13602_v28  ;;  %4906 = vmatmul.mubr.bf16.gmra.mxu0 %v13602_v28  ;;  %v4277_v1 = vadd.f32 %v13485_v29, %v4228_v40  ;;  %v4239_v38 = vadd.f32 %v8745_v58, %v8711_v51  ;;  %v16584_v58 = vld [vmem:[#allocation21_spill] sm:$0xff] }
 0x4c1   :  { %4722 = vmatprep.mubr.bf16.mxu1 %v16150_v48  ;;  %4915 = vmatprep.mubr.bf16.mxu0 %v16150_v48  ;;  %v4017_v59 = vpop.f32.mrf.mxu1  ;;  %v16586_v51 = vld [vmem:[#allocation25_spill] sm:$0xff] }
 0x4c2   :  { %v4231_v2 = vadd.f32 %v4230_v63, %v4017_v59  ;;  %v4280_v49 = vadd.f32 %v13485_v29, %v4239_v38 }
 0x4c4   :  { %v4278_v23 = vadd.f32 %v13485_v29, %v4231_v2  ;;  %v4296_v16 = vpack.c.bf16 %v4280_v49, %v4279_v12  ;;  %v9246_v29 = vld [vmem:[%s15990_s10 + $0x10] sm:$0xff]  }
 0x4c6   :  { %v4295_v61 = vpack.c.bf16 %v4278_v23, %v4277_v1 }
 0x4c8   :  { %4723 = vmatmul.mubr.bf16.gmra.mxu1 %v13610_v27  ;;  %4916 = vmatmul.mubr.bf16.gmra.mxu0 %v13610_v27 }
 0x4c9   :  { %4732 = vmatprep.mubr.bf16.mxu1 %v16150_v48  ;;  %4925 = vmatprep.mubr.bf16.mxu0 %v16150_v48 }
 0x4d0   :  { %4733 = vmatmul.mubr.bf16.gmra.mxu1 %v13618_v25  ;;  %4926 = vmatmul.mubr.bf16.gmra.mxu0 %v13618_v25 }
 0x4d1   :  { %4742 = vmatprep.mubr.bf16.mxu1 %v16150_v48  ;;  %4935 = vmatprep.mubr.bf16.mxu0 %v16150_v48 }
 0x4d8   :  { %4743 = vmatmul.mubr.bf16.gmra.mxu1 %v13626_v52  ;;  %4936 = vmatmul.mubr.bf16.gmra.mxu0 %v13626_v52 }
 0x4d9   :  { %4752 = vmatprep.mubr.bf16.mxu1 %v16150_v48  ;;  %4945 = vmatprep.mubr.bf16.mxu0 %v16150_v48 }
 0x4e0   :  { %4753 = vmatmul.mubr.bf16.gmra.mxu1 %v4295_v61  ;;  %4946 = vmatmul.mubr.bf16.gmra.mxu0 %v4295_v61 }
 0x4e1   :  { %4762 = vmatprep.mubr.bf16.mxu1 %v16150_v48  ;;  %4955 = vmatprep.mubr.bf16.mxu0 %v16150_v48 }
 0x4e8   :  { %4763 = vmatmul.mubr.bf16.gmra.mxu1 %v4296_v16  ;;  %4956 = vmatmul.mubr.bf16.gmra.mxu0 %v4296_v16 }
 0x4e9   :  { %8762 = vmatprep.mubr.bf16.mxu1 %v13493_v32  ;;  %8796 = vmatprep.mubr.msk.bf16.mxu0 %vm16561_vm13, %v16415_v19  ;;  %v9245_v19 = vld [vmem:[%s15990_s10 + $0x18] sm:$0xff]   ;;  %vm16577_vm13 = vmmov %vm16575_vm1 }
 0x4f0   :  { %8763 = vmatmul.mubr.bf16.vlgmr.msra.gmra.mxu1 %v13508_v9  ;;  %8797 = vmatmul.mubr.msk.bf16.vlgmr.msra.gmra.mxu0 %vm16563_vm6, %v16425_v10  ;;  %v9247_v10 = vld [vmem:[%s15990_s10 + $0x8] sm:$0xff]   ;;  %vm16580_vm6 = vmmov %vm16578_vm0 }
 0x4f1   :  { %8766 = vmatprep.mubr.bf16.mxu1 %v13522_v6  ;;  %8800 = vmatprep.mubr.msk.bf16.mxu0 %vm16564_vm11, %v16428_v35  ;;  %v9248_v35 = vld [vmem:[%s15990_s10] sm:$0xff]   ;;  %vm16583_vm11 = vmmov %vm16578_vm0 }
 0x4f2   :  { %8877 = vmatpush3.bf16.msra.mxu0 %v6507_v57 }
 0x4f3   :  { %8878 = vmatprep.subr.bf16.mxu0 %v9244_v42 }
 0x4f6   :  { %8879 = vmatpush3.bf16.msra.mxu0 %v9244_v42 }
 0x4f7   :  { %8880 = vmatprep.subr.bf16.mxu0 %v9245_v19 }
 0x4f8   :  { %8767 = vmatmul.mubr.bf16.gmra.mxu1 %v13536_v43  ;;  %8801 = vmatmul.mubr.msk.bf16.gmra.mxu0 %vm16565_vm5, %v16434_v17  ;;  %v4347_v17 = vlaneseq  ;;  %vm16585_vm5 = vmmov %vm16578_vm0 }
 0x4f9   :  { %8770 = vmatprep.mubr.bf16.mxu1 %v13547_v22  ;;  %8804 = vmatprep.mubr.msk.bf16.mxu0 %vm16566_vm12, %v16438_v60  ;;  %vm16587_vm12 = vmmov %vm16578_vm0 }
 0x4fa   :  { %8881 = vmatpush3.bf16.msra.mxu0 %v9245_v19  ;;  %v13699_v60 = vshrl.u32 %v4347_v17, 7 }
 0x4fb   :  { %8882 = vmatprep.subr.bf16.mxu0 %v9246_v29 }
 0x4fe   :  { %8883 = vmatpush3.bf16.msra.mxu0 %v9246_v29 }
 0x4ff   :  { %8884 = vmatprep.subr.bf16.mxu0 %v9247_v10 }
 0x500   :  { %8771 = vmatmul.mubr.bf16.gmra.mxu1 %v13555_v13  ;;  %8805 = vmatmul.mubr.msk.bf16.gmra.mxu0 %vm16567_vm7, %v16454_v20  ;;  %v4349_v20 = vsub.s32 0, %v13699_v60  ;;  %vm16589_vm7 = vmmov %vm16578_vm0 }
 0x501   :  { %8774 = vmatprep.mubr.bf16.mxu1 %v13570_v37  ;;  %8808 = vmatprep.mubr.msk.bf16.mxu0 %vm16568_vm9, %v16458_v39  ;;  %v13709_v39 = vld [vmem:[%s15991_s7] sm:$0x1f]  ;;  %vm16591_vm9 = vmmov %vm16578_vm0 }
 0x502   :  { %8885 = vmatpush3.bf16.msra.mxu0 %v9247_v10 }
 0x503   :  { %8886 = vmatprep.subr.bf16.mxu0 %v9248_v35 }
 0x506   :  { %8887 = vmatpush3.bf16.msra.mxu0 %v9248_v35 }
 0x508   :  { %8775 = vmatmul.mubr.bf16.gmra.mxu1 %v13578_v50  ;;  %8809 = vmatmul.mubr.msk.bf16.gmra.mxu0 %vm16569_vm3, %v16470_v54  ;;  %v4357_v54 = vsub.s32 2, %v13699_v60  ;;  %vm16594_vm3 = vmmov %vm16578_vm0 }
 0x509   :  { %8778 = vmatprep.mubr.bf16.mxu1 %v13586_v5  ;;  %8812 = vmatprep.mubr.msk.bf16.mxu0 %vm16570_vm14, %v16474_v14  ;;  %v4361_v14 = vsub.s32 3, %v13699_v60  ;;  %vm16598_vm14 = vmmov %vm16578_vm0 }
 0x510   :  { %8779 = vmatmul.mubr.bf16.gmra.mxu1 %v13594_v26  ;;  %8813 = vmatmul.mubr.msk.bf16.gmra.mxu0 %vm16571_vm15, %v16486_v15  ;;  %v13714_v15 = vrot.slane %v13709_v39, %v4349_v20  ;;  %v16588_v20 = vld [vmem:[#allocation23_spill] sm:$0xff]  ;;  %vm16601_vm15 = vmmov %vm16578_vm0 }
 0x511   :  { %8782 = vmatprep.mubr.bf16.mxu1 %v13602_v28  ;;  %8816 = vmatprep.mubr.msk.bf16.mxu0 %vm16572_vm2, %v16490_v45  ;;  %v13717_v45 = vrot.slane %v13709_v39, %v4357_v54  ;;  %v16590_v54 = vld [vmem:[#allocation24_spill] sm:$0xff]  ;;  %vm16604_vm2 = vmmov %vm16578_vm0 }
 0x513   :  { %16579 = vst [vmem:[#allocation39_spill] sm:$0xff] %v13717_v45 }
 0x518   :  { %8783 = vmatmul.mubr.bf16.gmra.mxu1 %v13610_v27  ;;  %8817 = vmatmul.mubr.msk.bf16.gmra.mxu0 %vm16573_vm8, %v16502_v7  ;;  %vm16608_vm8 = vmmov %vm16578_vm0 }
 0x519   :  { %8786 = vmatprep.mubr.bf16.mxu1 %v13618_v25  ;;  %8820 = vmatprep.mubr.msk.bf16.mxu0 %vm16574_vm10, %v16505_v55  ;;  %v16582_v55 = vld [vmem:[#allocation18_spill] sm:$0xff]  ;;  %vm16610_vm10 = vmmov %vm16578_vm0 }
 0x520   :  { %8787 = vmatmul.mubr.bf16.gmra.mxu1 %v13626_v52  ;;  %8821 = vmatmul.mubr.msk.bf16.gmra.mxu0 %vm16575_vm1, %v16519_v36  ;;  %vm16613_vm1 = vmmov %vm16578_vm0 }
 0x521   :  { %8790 = vmatprep.mubr.bf16.mxu1 %v4295_v61  ;;  %8824 = vmatprep.mubr.msk.bf16.mxu0 %vm16576_vm4, %v16521_v62  ;;  %vm16615_vm4 = vmmov %vm16578_vm0 }
 0x528   :  { %8791 = vmatmul.mubr.bf16.gmra.mxu1 %v4296_v16  ;;  %8825 = vmatmul.mubr.msk.bf16.gmra.mxu0 %vm16577_vm13, %v16536_v47  ;;  %vm16618_vm13 = vmmov %vm16578_vm0 }
 0x529   :  { %8888 = vmatprep.mubr.msk.bf16.mxu0 %vm16578_vm0, %v12973_v31  ;;  %v13722_v31 = vrot.slane %v13709_v39, %v4361_v14  ;;  %vm5319_vm0 = vcmask 31744  }
 0x52b   :  { %v4614_v47 = vpop.f32.mrf.mxu1  ;;  %v4807_v62 = vpop.f32.mrf.mxu0  ;;  %16581 = vst [vmem:[#allocation38_spill] sm:$0xff] %v13722_v31 }
 0x52c   :  { %v4615_v7 = vadd.f32 %v4614_v47, %v13714_v15  ;;  %v4808_v9 = vadd.f32 %v4807_v62, %v13717_v45 }
 0x52d   :  { %v13727_v36 = vpop.f32.mrf.mxu1  ;;  %v4809_v32 = vpop.f32.mrf.mxu0 }
 0x52e   :  { %v4810_v22 = vadd.f32 %v4809_v32, %v13722_v31  ;;  %v5127_v21 = vmax.f32 %v4615_v7, 0.0  ;;  %v5129_v5 = vmax.f32 %v4808_v9, 0.0 }
 0x52f   :  { %v4618_v6 = vpop.f32.mrf.mxu1  ;;  %v4811_v43 = vpop.f32.mrf.mxu0 }
 0x530   :  { %8889 = vmatmul.mubr.msk.bf16.vlgmr.msra.gmra.mxu0 %vm16580_vm6, %v10840_v33  ;;  %v4619_v13 = vadd.f32 %v4618_v6, %v13714_v15  ;;  %v4812_v33 = vadd.f32 %v4811_v43, %v13717_v45  ;;  %v5130_v56 = vmax.f32 %v4810_v22, 0.0  ;;  %vm7276_vm6 = vcmask 523264  }
 0x531   :  { %8892 = vmatprep.mubr.msk.bf16.mxu0 %vm16583_vm11, %v16582_v55  ;;  %v13733_v37 = vpop.f32.mrf.mxu1  ;;  %v4813_v50 = vpop.f32.mrf.mxu0 }
 0x532   :  { %v5131_v26 = vmax.f32 %v4619_v13, 0.0  ;;  %v5133_v28 = vmax.f32 %v4812_v33, 0.0  ;;  %v4814_v27 = vadd.f32 %v4813_v50, %v13722_v31 }
 0x533   :  { %v4624_v34 = vpop.f32.mrf.mxu1  ;;  %v4817_v46 = vpop.f32.mrf.mxu0 }
 0x534   :  { %v13736_v18 = vpack.c.bf16 %v5131_v26, %v5127_v21  ;;  %v13738_v53 = vpack.c.bf16 %v5133_v28, %v5129_v5  ;;  %v5134_v25 = vmax.f32 %v4814_v27, 0.0  ;;  %v4625_v11 = vadd.f32 %v4624_v34, %v13714_v15 }
 0x535   :  { %v13745_v0 = vpop.f32.mrf.mxu1  ;;  %v4819_v63 = vpop.f32.mrf.mxu0  ;;  %v4818_v4 = vadd.f32 %v4817_v46, %v13717_v45  ;;  %v16593_v46 = vld [vmem:[#allocation20_spill] sm:$0xff] }
 0x536   :  { %v13748_v59 = vpack.c.bf16 %v5134_v25, %v5130_v56  ;;  %v4820_v40 = vadd.f32 %v4819_v63, %v13722_v31  ;;  %v5135_v38 = vmax.f32 %v4625_v11, 0.0 }
 0x537   :  { %v4628_v2 = vpop.f32.mrf.mxu1  ;;  %v4821_v52 = vpop.f32.mrf.mxu0  ;;  %v5137_v49 = vmax.f32 %v4818_v4, 0.0 }
 0x538   :  { %8893 = vmatmul.mubr.msk.bf16.gmra.mxu0 %vm16585_vm5, %v16584_v58  ;;  %v4629_v23 = vadd.f32 %v4628_v2, %v13714_v15  ;;  %v4822_v1 = vadd.f32 %v4821_v52, %v13717_v45  ;;  %v5138_v42 = vmax.f32 %v4820_v40, 0.0 }
 0x539   :  { %8896 = vmatprep.mubr.msk.bf16.mxu0 %vm16587_vm12, %v16586_v51  ;;  %v13753_v61 = vpop.f32.mrf.mxu1  ;;  %v4823_v3 = vpop.f32.mrf.mxu0  ;;  %v16597_v51 = vld [vmem:[#allocation2_spill] sm:$0xff] }
 0x53a   :  { %v5139_v12 = vmax.f32 %v4629_v23, 0.0  ;;  %v5141_v16 = vmax.f32 %v4822_v1, 0.0  ;;  %v4824_v57 = vadd.f32 %v4823_v3, %v13722_v31 }
 0x53c   :  { %v13756_v19 = vpack.c.bf16 %v5139_v12, %v5135_v38  ;;  %v13758_v29 = vpack.c.bf16 %v5141_v16, %v5137_v49  ;;  %v5142_v10 = vmax.f32 %v4824_v57, 0.0 }
 0x53e   :  { %v13767_v7 = vpack.c.bf16 %v5142_v10, %v5138_v42 }
 0x540   :  { %v4634_v35 = vpop.f32.mrf.mxu1  ;;  %v4827_v17 = vpop.f32.mrf.mxu0  ;;  %8897 = vmatmul.mubr.msk.bf16.gmra.mxu0 %vm16589_vm7, %v16588_v20 }
 0x541   :  { %8900 = vmatprep.mubr.msk.bf16.mxu0 %vm16591_vm9, %v16590_v54  ;;  %v4635_v14 = vadd.f32 %v4634_v35, %v13714_v15  ;;  %v4828_v55 = vadd.f32 %v4827_v17, %v13717_v45  ;;  %v16600_v54 = vld [vmem:[#allocation34_spill] sm:$0xff] }
 0x542   :  { %v13765_v47 = vpop.f32.mrf.mxu1  ;;  %v4829_v62 = vpop.f32.mrf.mxu0 }
 0x543   :  { %16592 = vst [vmem:[#allocation30_spill] sm:$0xff] %v13765_v47  ;;  %v4830_v6 = vadd.f32 %v4829_v62, %v13722_v31  ;;  %v5143_v13 = vmax.f32 %v4635_v14, 0.0  ;;  %v5145_v50 = vmax.f32 %v4828_v55, 0.0 }
 0x544   :  { %v4638_v32 = vpop.f32.mrf.mxu1  ;;  %v4831_v9 = vpop.f32.mrf.mxu0 }
 0x545   :  { %v4639_v43 = vadd.f32 %v4638_v32, %v13714_v15  ;;  %v4832_v22 = vadd.f32 %v4831_v9, %v13717_v45  ;;  %v5146_v56 = vmax.f32 %v4830_v6, 0.0  ;;  %v16603_v9 = vld [vmem:[#allocation33_spill] sm:$0xff] }
 0x546   :  { %v13773_v33 = vpop.f32.mrf.mxu1  ;;  %v4833_v21 = vpop.f32.mrf.mxu0 }
 0x547   :  { %v5147_v5 = vmax.f32 %v4639_v43, 0.0  ;;  %v5149_v26 = vmax.f32 %v4832_v22, 0.0  ;;  %v4834_v28 = vadd.f32 %v4833_v21, %v13722_v31 }
 0x548   :  { %v4644_v27 = vpop.f32.mrf.mxu1  ;;  %v4837_v34 = vpop.f32.mrf.mxu0  ;;  %8901 = vmatmul.mubr.msk.bf16.gmra.mxu0 %vm16594_vm3, %v16593_v46 }
 0x549   :  { %v13778_v25 = vpack.c.bf16 %v5147_v5, %v5143_v13  ;;  %v13780_v58 = vpack.c.bf16 %v5149_v26, %v5145_v50  ;;  %v5150_v11 = vmax.f32 %v4834_v28, 0.0  ;;  %8904 = vmatprep.mubr.msk.bf16.mxu0 %vm16598_vm14, %v16597_v51  ;;  %v4645_v63 = vadd.f32 %v4644_v27, %v13714_v15 }
 0x54a   :  { %v13785_v4 = vpop.f32.mrf.mxu1  ;;  %v4839_v2 = vpop.f32.mrf.mxu0  ;;  %v4838_v52 = vadd.f32 %v4837_v34, %v13717_v45 }
 0x54b   :  { %16595 = vst [vmem:[#allocation22_spill] sm:$0xff] %v13778_v25  ;;  %16596 = vst [vmem:[#allocation36_spill] sm:$0xff] %v13780_v58  ;;  %v13788_v40 = vpack.c.bf16 %v5150_v11, %v5146_v56  ;;  %v4840_v38 = vadd.f32 %v4839_v2, %v13722_v31  ;;  %v5151_v12 = vmax.f32 %v4645_v63, 0.0 }
 0x54c   :  { %v4648_v23 = vpop.f32.mrf.mxu1  ;;  %v4841_v1 = vpop.f32.mrf.mxu0  ;;  %v5153_v42 = vmax.f32 %v4838_v52, 0.0 }
 0x54d   :  { %16599 = vst [vmem:[#allocation3_spill] sm:$0xff] %v13788_v40  ;;  %v4649_v3 = vadd.f32 %v4648_v23, %v13714_v15  ;;  %v4842_v49 = vadd.f32 %v4841_v1, %v13717_v45  ;;  %v5154_v14 = vmax.f32 %v4840_v38, 0.0 }
 0x54e   :  { %v13793_v16 = vpop.f32.mrf.mxu1  ;;  %v4843_v57 = vpop.f32.mrf.mxu0 }
 0x54f   :  { %v5155_v10 = vmax.f32 %v4649_v3, 0.0  ;;  %v5157_v35 = vmax.f32 %v4842_v49, 0.0  ;;  %v4844_v17 = vadd.f32 %v4843_v57, %v13722_v31 }
 0x550   :  { %v4654_v20 = vpop.f32.mrf.mxu1  ;;  %8905 = vmatmul.mubr.msk.bf16.gmra.mxu0 %vm16601_vm15, %v16600_v54 }
 0x551   :  { %v13798_v62 = vpack.c.bf16 %v5155_v10, %v5151_v12  ;;  %v13800_v55 = vpack.c.bf16 %v5157_v35, %v5153_v42  ;;  %v5158_v32 = vmax.f32 %v4844_v17, 0.0  ;;  %8908 = vmatprep.mubr.msk.bf16.mxu0 %vm16604_vm2, %v16603_v9  ;;  %v4655_v43 = vadd.f32 %v4654_v20, %v13714_v15 }
 0x552   :  { %v13804_v6 = vpop.f32.mrf.mxu1 }
 0x553   :  { %16602 = vst [vmem:[#allocation19_spill] sm:$0xff] %v13800_v55  ;;  %16605 = vst [vmem:[#allocation4_spill] sm:$0xff] %v13804_v6  ;;  %v13807_v22 = vpack.c.bf16 %v5158_v32, %v5154_v14  ;;  %v5159_v5 = vmax.f32 %v4655_v43, 0.0  ;;  %v16653_v55 = vmov 3  }
 0x554   :  { %v4658_v13 = vpop.f32.mrf.mxu1 }
 0x555   :  { %16606 = vst [vmem:[#allocation32_spill] sm:$0xff] %v13807_v22  ;;  %v4659_v21 = vadd.f32 %v4658_v13, %v13714_v15 }
 0x556   :  { %v13810_v50 = vpop.f32.mrf.mxu1 }
 0x557   :  { %16607 = vst [vmem:[#allocation27_spill] sm:$0xff] %v13810_v50  ;;  %v5163_v26 = vmax.f32 %v4659_v21, 0.0 }
 0x558   :  { %v4664_v28 = vpop.f32.mrf.mxu1  ;;  %8909 = vmatmul.mubr.msk.bf16.gmra.mxu0 %vm16608_vm8, %v13372_v8 }
 0x559   :  { %v13814_v27 = vpack.c.bf16 %v5163_v26, %v5159_v5  ;;  %8912 = vmatprep.mubr.msk.bf16.mxu0 %vm16610_vm10, %v13396_v30  ;;  %v4665_v46 = vadd.f32 %v4664_v28, %v13714_v15 }
 0x55a   :  { %v13818_v34 = vpop.f32.mrf.mxu1 }
 0x55b   :  { %16609 = vst [vmem:[#allocation42_spill] sm:$0xff] %v13814_v27  ;;  %16611 = vst [vmem:[#allocation46_spill] sm:$0xff] %v13818_v34  ;;  %v5167_v63 = vmax.f32 %v4665_v46, 0.0 }
 0x55c   :  { %v4668_v56 = vpop.f32.mrf.mxu1 }
 0x55d   :  { %v4669_v11 = vadd.f32 %v4668_v56, %v13714_v15 }
 0x55e   :  { %v13822_v51 = vpop.f32.mrf.mxu1 }
 0x55f   :  { %16612 = vst [vmem:[#allocation5_spill] sm:$0xff] %v13822_v51  ;;  %v5171_v2 = vmax.f32 %v4669_v11, 0.0 }
 0x560   :  { %v4674_v52 = vpop.f32.mrf.mxu1  ;;  %8913 = vmatmul.mubr.msk.bf16.gmra.mxu0 %vm16613_vm1, %v13414_v44 }
 0x561   :  { %v13826_v8 = vpack.c.bf16 %v5171_v2, %v5167_v63  ;;  %8916 = vmatprep.mubr.msk.bf16.mxu0 %vm16615_vm4, %v13435_v41  ;;  %v4675_v23 = vadd.f32 %v4674_v52, %v13714_v15 }
 0x562   :  { %v13830_v30 = vpop.f32.mrf.mxu1 }
 0x563   :  { %16614 = vst [vmem:[#allocation6_spill] sm:$0xff] %v13826_v8  ;;  %16616 = vst [vmem:[#allocation45_spill] sm:$0xff] %v13830_v30  ;;  %v5175_v49 = vmax.f32 %v4675_v23, 0.0 }
 0x564   :  { %v4678_v1 = vpop.f32.mrf.mxu1 }
 0x565   :  { %v4679_v38 = vadd.f32 %v4678_v1, %v13714_v15 }
 0x566   :  { %v13834_v3 = vpop.f32.mrf.mxu1 }
 0x567   :  { %16617 = vst [vmem:[#allocation37_spill] sm:$0xff] %v13834_v3  ;;  %v5179_v12 = vmax.f32 %v4679_v38, 0.0 }
 0x568   :  { %v4684_v57 = vpop.f32.mrf.mxu1  ;;  %8917 = vmatmul.mubr.msk.bf16.gmra.mxu0 %vm16618_vm13, %v13465_v24 }
 0x569   :  { %v13838_v44 = vpack.c.bf16 %v5179_v12, %v5175_v49  ;;  %v4685_v41 = vadd.f32 %v4684_v57, %v13714_v15 }
 0x56a   :  { %v13840_v42 = vpop.f32.mrf.mxu1 }
 0x56b   :  { %16619 = vst [vmem:[#allocation44_spill] sm:$0xff] %v13838_v44  ;;  %16620 = vst [vmem:[#allocation26_spill] sm:$0xff] %v13840_v42  ;;  %v5183_v20 = vmax.f32 %v4685_v41, 0.0 }
 0x56c   :  { %v4688_v10 = vpop.f32.mrf.mxu1 }
 0x56d   :  { %v4689_v35 = vadd.f32 %v4688_v10, %v13714_v15 }
 0x56e   :  { %v13844_v17 = vpop.f32.mrf.mxu1 }
 0x56f   :  { %16621 = vst [vmem:[#allocation43_spill] sm:$0xff] %v13844_v17  ;;  %v5187_v54 = vmax.f32 %v4689_v35, 0.0 }
 0x570   :  { %v4694_v14 = vpop.f32.mrf.mxu1 }
 0x571   :  { %v13846_v32 = vpack.c.bf16 %v5187_v54, %v5183_v20  ;;  %v4695_v24 = vadd.f32 %v4694_v14, %v13714_v15 }
 0x572   :  { %v13848_v9 = vpop.f32.mrf.mxu1 }
 0x573   :  { %16622 = vst [vmem:[#allocation48_spill] sm:$0xff] %v13846_v32  ;;  %16623 = vst [vmem:[#allocation50_spill] sm:$0xff] %v13848_v9  ;;  %v5191_v5 = vmax.f32 %v4695_v24, 0.0 }
 0x574   :  { %v4698_v43 = vpop.f32.mrf.mxu1 }
 0x575   :  { %v4699_v13 = vadd.f32 %v4698_v43, %v13714_v15 }
 0x576   :  { %v13852_v21 = vpop.f32.mrf.mxu1 }
 0x577   :  { %16624 = vst [vmem:[#allocation7_spill] sm:$0xff] %v13852_v21  ;;  %v5195_v26 = vmax.f32 %v4699_v13, 0.0 }
 0x578   :  { %v4704_v28 = vpop.f32.mrf.mxu1 }
 0x579   :  { %v13854_v46 = vpack.c.bf16 %v5195_v26, %v5191_v5  ;;  %v4705_v11 = vadd.f32 %v4704_v28, %v13714_v15 }
 0x57a   :  { %v13856_v56 = vpop.f32.mrf.mxu1 }
 0x57b   :  { %16625 = vst [vmem:[#allocation56_spill] sm:$0xff] %v13854_v46  ;;  %16626 = vst [vmem:[#allocation8_spill] sm:$0xff] %v13856_v56  ;;  %v5199_v23 = vmax.f32 %v4705_v11, 0.0  ;;  %v4353_v11 = vsub.s32 1, %v13699_v60 }
 0x57c   :  { %v4708_v63 = vpop.f32.mrf.mxu1 }
 0x57d   :  { %v4709_v2 = vadd.f32 %v4708_v63, %v13714_v15 }
 0x57e   :  { %v13860_v52 = vpop.f32.mrf.mxu1 }
 0x57f   :  { %16627 = vst [vmem:[#allocation55_spill] sm:$0xff] %v13860_v52  ;;  %v5203_v1 = vmax.f32 %v4709_v2, 0.0 }
 0x580   :  { %v4714_v38 = vpop.f32.mrf.mxu1 }
 0x581   :  { %v13862_v49 = vpack.c.bf16 %v5203_v1, %v5199_v23  ;;  %v4715_v57 = vadd.f32 %v4714_v38, %v13714_v15 }
 0x582   :  { %v13864_v12 = vpop.f32.mrf.mxu1 }
 0x583   :  { %16628 = vst [vmem:[#allocation47_spill] sm:$0xff] %v13862_v49  ;;  %16629 = vst [vmem:[#allocation29_spill] sm:$0xff] %v13864_v12  ;;  %v5207_v20 = vmax.f32 %v4715_v57, 0.0  ;;  %v13882_v57 = vrot.slane %v13709_v39, %v4353_v11 }
 0x584   :  { %v4718_v41 = vpop.f32.mrf.mxu1 }
 0x585   :  { %v4719_v10 = vadd.f32 %v4718_v41, %v13714_v15 }
 0x586   :  { %v13868_v35 = vpop.f32.mrf.mxu1 }
 0x587   :  { %16630 = vst [vmem:[#allocation54_spill] sm:$0xff] %v13868_v35  ;;  %v5211_v54 = vmax.f32 %v4719_v10, 0.0 }
 0x588   :  { %v4724_v14 = vpop.f32.mrf.mxu1 }
 0x589   :  { %v13870_v24 = vpack.c.bf16 %v5211_v54, %v5207_v20  ;;  %v4725_v13 = vadd.f32 %v4724_v14, %v13714_v15 }
 0x58a   :  { %v13872_v43 = vpop.f32.mrf.mxu1 }
 0x58b   :  { %16631 = vst [vmem:[#allocation51_spill] sm:$0xff] %v13870_v24  ;;  %16632 = vst [vmem:[#allocation28_spill] sm:$0xff] %v13872_v43  ;;  %v5215_v63 = vmax.f32 %v4725_v13, 0.0 }
 0x58c   :  { %v4728_v5 = vpop.f32.mrf.mxu1 }
 0x58d   :  { %v4729_v26 = vadd.f32 %v4728_v5, %v13714_v15 }
 0x58e   :  { %v13876_v28 = vpop.f32.mrf.mxu1 }
 0x58f   :  { %16633 = vst [vmem:[#allocation60_spill] sm:$0xff] %v13876_v28  ;;  %v5219_v2 = vmax.f32 %v4729_v26, 0.0 }
 0x590   :  { %v4734_v23 = vpop.f32.mrf.mxu1 }
 0x591   :  { %v13879_v1 = vpack.c.bf16 %v5219_v2, %v5215_v63  ;;  %v4735_v41 = vadd.f32 %v4734_v23, %v13714_v15 }
 0x592   :  { %v4736_v38 = vpop.f32.mrf.mxu1 }
 0x593   :  { %16634 = vst [vmem:[#allocation9_spill] sm:$0xff] %v13879_v1  ;;  %v4737_v20 = vadd.f32 %v4736_v38, %v13882_v57  ;;  %v5223_v5 = vmax.f32 %v4735_v41, 0.0 }
 0x594   :  { %v4738_v10 = vpop.f32.mrf.mxu1 }
 0x595   :  { %v4739_v54 = vadd.f32 %v4738_v10, %v13714_v15  ;;  %v5224_v24 = vmax.f32 %v4737_v20, 0.0 }
 0x596   :  { %v4740_v14 = vpop.f32.mrf.mxu1 }
 0x597   :  { %v5227_v48 = vmax.f32 %v4739_v54, 0.0  ;;  %v4741_v13 = vadd.f32 %v4740_v14, %v13882_v57 }
 0x598   :  { %v4744_v26 = vpop.f32.mrf.mxu1 }
 0x599   :  { %v13888_v63 = vpack.c.bf16 %v5227_v48, %v5223_v5  ;;  %v5228_v2 = vmax.f32 %v4741_v13, 0.0  ;;  %v4745_v23 = vadd.f32 %v4744_v26, %v13714_v15 }
 0x59a   :  { %v4746_v12 = vpop.f32.mrf.mxu1 }
 0x59b   :  { %16635 = vst [vmem:[#allocation35_spill] sm:$0xff] %v13888_v63  ;;  %v13890_v11 = vpack.c.bf16 %v5228_v2, %v5224_v24  ;;  %v4747_v38 = vadd.f32 %v4746_v12, %v13882_v57  ;;  %v5231_v41 = vmax.f32 %v4745_v23, 0.0 }
 0x59c   :  { %v4748_v35 = vpop.f32.mrf.mxu1 }
 0x59d   :  { %16636 = vst [vmem:[#allocation66_spill] sm:$0xff] %v13890_v11  ;;  %v4749_v10 = vadd.f32 %v4748_v35, %v13714_v15  ;;  %v5232_v20 = vmax.f32 %v4747_v38, 0.0 }
 0x59e   :  { %v4750_v1 = vpop.f32.mrf.mxu1 }
 0x59f   :  { %v5235_v54 = vmax.f32 %v4749_v10, 0.0  ;;  %v4751_v14 = vadd.f32 %v4750_v1, %v13882_v57 }
 0x5a0   :  { %v4754_v43 = vpop.f32.mrf.mxu1 }
 0x5a1   :  { %v13896_v48 = vpack.c.bf16 %v5235_v54, %v5231_v41  ;;  %v5236_v5 = vmax.f32 %v4751_v14, 0.0  ;;  %v4755_v26 = vadd.f32 %v4754_v43, %v13714_v15 }
 0x5a2   :  { %v4756_v13 = vpop.f32.mrf.mxu1 }
 0x5a3   :  { %16637 = vst [vmem:[#allocation64_spill] sm:$0xff] %v13896_v48  ;;  %v13898_v24 = vpack.c.bf16 %v5236_v5, %v5232_v20  ;;  %v4757_v12 = vadd.f32 %v4756_v13, %v13882_v57  ;;  %v5239_v23 = vmax.f32 %v4755_v26, 0.0  ;;  %v4365_v20 = vsub.s32 4, %v13699_v60 }
 0x5a4   :  { %v4758_v2 = vpop.f32.mrf.mxu1 }
 0x5a5   :  { %16638 = vst [vmem:[#allocation10_spill] sm:$0xff] %v13898_v24  ;;  %v4759_v35 = vadd.f32 %v4758_v2, %v13714_v15  ;;  %v5240_v38 = vmax.f32 %v4757_v12, 0.0 }
 0x5a6   :  { %v4760_v11 = vpop.f32.mrf.mxu1 }
 0x5a7   :  { %v5243_v10 = vmax.f32 %v4759_v35, 0.0  ;;  %v4761_v1 = vadd.f32 %v4760_v11, %v13882_v57  ;;  %v13913_v11 = vrot.slane %v13709_v39, %v4365_v20 }
 0x5a8   :  { %v4764_v63 = vpop.f32.mrf.mxu1 }
 0x5a9   :  { %v13904_v41 = vpack.c.bf16 %v5243_v10, %v5239_v23  ;;  %v5244_v54 = vmax.f32 %v4761_v1, 0.0  ;;  %v4765_v43 = vadd.f32 %v4764_v63, %v13714_v15 }
 0x5aa   :  { %v4766_v14 = vpop.f32.mrf.mxu1 }
 0x5ab   :  { %16639 = vst [vmem:[#allocation53_spill] sm:$0xff] %v13904_v41  ;;  %v13907_v5 = vpack.c.bf16 %v5244_v54, %v5240_v38  ;;  %v4767_v2 = vadd.f32 %v4766_v14, %v13882_v57  ;;  %v5247_v12 = vmax.f32 %v4765_v43, 0.0 }
 0x5ac   :  { %v4768_v13 = vpop.f32.mrf.mxu1 }
 0x5ad   :  { %16640 = vst [vmem:[#allocation63_spill] sm:$0xff] %v13907_v5  ;;  %v4769_v26 = vadd.f32 %v4768_v13, %v13714_v15  ;;  %v5248_v41 = vmax.f32 %v4767_v2, 0.0 }
 0x5ae   :  { %v4770_v35 = vpop.f32.mrf.mxu1 }
 0x5af   :  { %v5251_v23 = vmax.f32 %v4769_v26, 0.0  ;;  %v4771_v10 = vadd.f32 %v4770_v35, %v13882_v57 }
 0x5b0   :  { %v8764_v1 = vpop.f32.mrf.mxu1 }
 0x5b1   :  { %v13916_v60 = vpack.c.bf16 %v5251_v23, %v5247_v12  ;;  %v5252_v38 = vmax.f32 %v4771_v10, 0.0  ;;  %v13919_v63 = vadd.f32 %v8764_v1, %v13913_v11 }
 0x5b2   :  { %v5000_v54 = vpop.f32.mrf.mxu1 }
 0x5b3   :  { %16641 = vst [vmem:[#allocation58_spill] sm:$0xff] %v13916_v60  ;;  %v13921_v14 = vpack.c.bf16 %v5252_v38, %v5248_v41  ;;  %v13924_v15 = vadd.f32 %v5000_v54, %v13913_v11  ;;  %v5326_v39 = vsel %vm5319_vm0, %v13919_v63, -inf }
 0x5b4   :  { %v8765_v20 = vpop.f32.mrf.mxu1  ;;  %5327 = vmax.xlane.f32.xlu1 %v5326_v39 }
 0x5b5   :  { %16642 = vst [vmem:[#allocation31_spill] sm:$0xff] %v13921_v14  ;;  %v13929_v43 = vadd.f32 %v8765_v20, %v13913_v11  ;;  %v5320_v13 = vsel %vm5319_vm0, %v13924_v15, -inf }
 0x5b6   :  { %v5003_v2 = vpop.f32.mrf.mxu1  ;;  %5321 = vmax.xlane.f32.xlu0 %v5320_v13 }
 0x5b7   :  { %v13934_v26 = vadd.f32 %v5003_v2, %v13913_v11  ;;  %v5329_v41 = vsel %vm5319_vm0, %v13929_v43, -inf }
 0x5b8   :  { %v8768_v35 = vpop.f32.mrf.mxu1  ;;  %5330 = vmax.xlane.f32.xlu1 %v5329_v41 }
 0x5b9   :  { %v13939_v12 = vadd.f32 %v8768_v35, %v13913_v11  ;;  %v5323_v23 = vsel %vm5319_vm0, %v13934_v26, -inf }
 0x5ba   :  { %v5016_v10 = vpop.f32.mrf.mxu1  ;;  %5324 = vmax.xlane.f32.xlu0 %v5323_v23 }
 0x5bb   :  { %v13944_v38 = vadd.f32 %v5016_v10, %v13913_v11  ;;  %v5338_v39 = vsel %vm5319_vm0, %v13939_v12, -inf }
 0x5bc   :  { %v8769_v1 = vpop.f32.mrf.mxu1 }
 0x5bd   :  { %v13947_v54 = vadd.f32 %v8769_v1, %v13913_v11  ;;  %v5332_v23 = vsel %vm5319_vm0, %v13944_v38, -inf }
 0x5be   :  { %v5019_v20 = vpop.f32.mrf.mxu1  ;;  %5339 = vmax.xlane.f32.xlu0 %v5338_v39 }
 0x5bf   :  { %v13952_v13 = vadd.f32 %v5019_v20, %v13913_v11  ;;  %v5341_v2 = vsel %vm5319_vm0, %v13947_v54, -inf }
 0x5c0   :  { %5342 = vmax.xlane.f32.xlu1 %v5341_v2  ;;  %v8772_v41 = vpop.f32.mrf.mxu1 }
 0x5c1   :  { %v13957_v35 = vadd.f32 %v8772_v41, %v13913_v11  ;;  %v5335_v1 = vsel %vm5319_vm0, %v13952_v13, -inf }
 0x5c2   :  { %v5032_v10 = vpop.f32.mrf.mxu1  ;;  %5333 = vmax.xlane.f32.xlu0 %v5332_v23 }
 0x5c3   :  { %v13964_v20 = vadd.f32 %v5032_v10, %v13913_v11  ;;  %v5350_v2 = vsel %vm5319_vm0, %v13957_v35, -inf }
 0x5c4   :  { %v8773_v39 = vpop.f32.mrf.mxu1  ;;  %5336 = vmax.xlane.f32.xlu1 %v5335_v1 }
 0x5c5   :  { %v13967_v5 = vadd.f32 %v8773_v39, %v13913_v11  ;;  %v5344_v10 = vsel %vm5319_vm0, %v13964_v20, -inf }
 0x5c6   :  { %v5035_v41 = vpop.f32.mrf.mxu1  ;;  %5351 = vmax.xlane.f32.xlu0 %v5350_v2 }
 0x5c7   :  { %v13972_v14 = vadd.f32 %v5035_v41, %v13913_v11  ;;  %v5353_v23 = vsel %vm5319_vm0, %v13967_v5, -inf }
 0x5c8   :  { %v8776_v60 = vpop.f32.mrf.mxu1  ;;  %5354 = vmax.xlane.f32.xlu1 %v5353_v23 }
 0x5c9   :  { %v13977_v1 = vadd.f32 %v8776_v60, %v13913_v11  ;;  %v5347_v48 = vsel %vm5319_vm0, %v13972_v14, -inf }
 0x5ca   :  { %v5048_v39 = vpop.f32.mrf.mxu1  ;;  %5345 = vmax.xlane.f32.xlu0 %v5344_v10 }
 0x5cb   :  { %v13984_v41 = vadd.f32 %v5048_v39, %v13913_v11  ;;  %v5362_v60 = vsel %vm5319_vm0, %v13977_v1, -inf }
 0x5cc   :  { %v8777_v2 = vpop.f32.mrf.mxu1  ;;  %5348 = vmax.xlane.f32.xlu1 %v5347_v48 }
 0x5cd   :  { %v13987_v24 = vadd.f32 %v8777_v2, %v13913_v11  ;;  %v5356_v39 = vsel %vm5319_vm0, %v13984_v41, -inf }
 0x5ce   :  { %v5051_v23 = vpop.f32.mrf.mxu1  ;;  %5363 = vmax.xlane.f32.xlu0 %v5362_v60 }
 0x5cf   :  { %v13992_v46 = vadd.f32 %v5051_v23, %v13913_v11  ;;  %v5365_v10 = vsel %vm5319_vm0, %v13987_v24, -inf }
 0x5d0   :  { %v8780_v28 = vpop.f32.mrf.mxu1  ;;  %5366 = vmax.xlane.f32.xlu1 %v5365_v10 }
 0x5d1   :  { %v13997_v48 = vadd.f32 %v8780_v28, %v13913_v11  ;;  %v5359_v9 = vsel %vm5319_vm0, %v13992_v46, -inf }
 0x5d2   :  { %v5064_v2 = vpop.f32.mrf.mxu1  ;;  %5357 = vmax.xlane.f32.xlu0 %v5356_v39 }
 0x5d3   :  { %v14004_v23 = vadd.f32 %v5064_v2, %v13913_v11  ;;  %v5374_v28 = vsel %vm5319_vm0, %v13997_v48, -inf }
 0x5d4   :  { %v8781_v60 = vpop.f32.mrf.mxu1  ;;  %5360 = vmax.xlane.f32.xlu1 %v5359_v9 }
 0x5d5   :  { %v14007_v49 = vadd.f32 %v8781_v60, %v13913_v11  ;;  %v5368_v2 = vsel %vm5319_vm0, %v14004_v23, -inf }
 0x5d6   :  { %v5067_v10 = vpop.f32.mrf.mxu1  ;;  %5375 = vmax.xlane.f32.xlu0 %v5374_v28 }
 0x5d7   :  { %v14012_v21 = vadd.f32 %v5067_v10, %v13913_v11  ;;  %v5377_v39 = vsel %vm5319_vm0, %v14007_v49, -inf }
 0x5d8   :  { %v8784_v56 = vpop.f32.mrf.mxu1  ;;  %5378 = vmax.xlane.f32.xlu1 %v5377_v39 }
 0x5d9   :  { %v14017_v9 = vadd.f32 %v8784_v56, %v13913_v11  ;;  %v5371_v52 = vsel %vm5319_vm0, %v14012_v21, -inf }
 0x5da   :  { %v5080_v60 = vpop.f32.mrf.mxu1  ;;  %5369 = vmax.xlane.f32.xlu0 %v5368_v2 }
 0x5db   :  { %v14024_v10 = vadd.f32 %v5080_v60, %v13913_v11  ;;  %v5386_v56 = vsel %vm5319_vm0, %v14017_v9, -inf }
 0x5dc   :  { %v8785_v28 = vpop.f32.mrf.mxu1  ;;  %5372 = vmax.xlane.f32.xlu1 %v5371_v52 }
 0x5dd   :  { %v14027_v44 = vadd.f32 %v8785_v28, %v13913_v11  ;;  %v5380_v60 = vsel %vm5319_vm0, %v14024_v10, -inf }
 0x5de   :  { %v5083_v39 = vpop.f32.mrf.mxu1  ;;  %5387 = vmax.xlane.f32.xlu0 %v5386_v56 }
 0x5df   :  { %v14032_v30 = vadd.f32 %v5083_v39, %v13913_v11  ;;  %v5389_v2 = vsel %vm5319_vm0, %v14027_v44, -inf }
 0x5e0   :  { %v8788_v3 = vpop.f32.mrf.mxu1  ;;  %5390 = vmax.xlane.f32.xlu1 %v5389_v2 }
 0x5e1   :  { %v14037_v52 = vadd.f32 %v8788_v3, %v13913_v11  ;;  %v5383_v32 = vsel %vm5319_vm0, %v14032_v30, -inf }
 0x5e2   :  { %v5096_v28 = vpop.f32.mrf.mxu1  ;;  %5381 = vmax.xlane.f32.xlu0 %v5380_v60 }
 0x5e3   :  { %v14044_v39 = vadd.f32 %v5096_v28, %v13913_v11  ;;  %v5398_v3 = vsel %vm5319_vm0, %v14037_v52, -inf }
 0x5e4   :  { %v8789_v56 = vpop.f32.mrf.mxu1  ;;  %5384 = vmax.xlane.f32.xlu1 %v5383_v32 }
 0x5e5   :  { %v14047_v42 = vadd.f32 %v8789_v56, %v13913_v11  ;;  %v5392_v28 = vsel %vm5319_vm0, %v14044_v39, -inf }
 0x5e6   :  { %v5099_v2 = vpop.f32.mrf.mxu1  ;;  %5399 = vmax.xlane.f32.xlu0 %v5398_v3 }
 0x5e7   :  { %v14052_v17 = vadd.f32 %v5099_v2, %v13913_v11  ;;  %v5401_v60 = vsel %vm5319_vm0, %v14047_v42, -inf }
 0x5e8   :  { %v8792_v27 = vpop.f32.mrf.mxu1  ;;  %5402 = vmax.xlane.f32.xlu1 %v5401_v60 }
 0x5e9   :  { %v14057_v32 = vadd.f32 %v8792_v27, %v13913_v11  ;;  %v5395_v31 = vsel %vm5319_vm0, %v14052_v17, -inf }
 0x5ea   :  { %v5112_v56 = vpop.f32.mrf.mxu1  ;;  %5393 = vmax.xlane.f32.xlu0 %v5392_v28 }
 0x5eb   :  { %v14064_v2 = vadd.f32 %v5112_v56, %v13913_v11  ;;  %v5410_v27 = vsel %vm5319_vm0, %v14057_v32, -inf }
 0x5ec   :  { %v8793_v3 = vpop.f32.mrf.mxu1  ;;  %5396 = vmax.xlane.f32.xlu1 %v5395_v31 }
 0x5ed   :  { %v14067_v45 = vadd.f32 %v8793_v3, %v13913_v11  ;;  %v5404_v31 = vsel %vm5319_vm0, %v14064_v2, -inf }
 0x5ee   :  { %v5115_v60 = vpop.f32.mrf.mxu1  ;;  %5411 = vmax.xlane.f32.xlu0 %v5410_v27 }
 0x5ef   :  { %v14072_v6 = vadd.f32 %v5115_v60, %v13913_v11  ;;  %v5413_v28 = vsel %vm5319_vm0, %v14067_v45, -inf }
 0x5f0   :  { %5414 = vmax.xlane.f32.xlu1 %v5413_v28 }
 0x5f1   :  { %v5407_v56 = vsel %vm5319_vm0, %v14072_v6, -inf }
 0x5f2   :  { %5405 = vmax.xlane.f32.xlu0 %v5404_v31 }
 0x5f4   :  { %5408 = vmax.xlane.f32.xlu1 %v5407_v56 }
 0x63d   :  { %v5328_v3 = vpop.xlane.xlu1 %5327 }
 0x63e   :  { %v5418_v50 = vsub.f32 %v13919_v63, %v5328_v3 }
 0x63f   :  { %v5322_v8 = vpop.xlane.xlu0 %5321 }
 0x640   :  { %v5416_v27 = vsub.f32 %v13924_v15, %v5322_v8  ;;  %v5452_v11 = vmul.f32 1.442695, %v5418_v50 }
 0x641   :  { %v5331_v40 = vpop.xlane.xlu1 %5330 }
 0x642   :  { %v5448_v60 = vmul.f32 1.442695, %v5416_v27  ;;  %9389 = vpow2.f32 %v5452_v11  ;;  %v5419_v28 = vsub.f32 %v13929_v43, %v5331_v40 }
 0x643   :  { %v5325_v58 = vpop.xlane.xlu0 %5324 }
 0x644   :  { %v5417_v34 = vsub.f32 %v13934_v26, %v5325_v58  ;;  %9391 = vpow2.f32 %v5448_v60  ;;  %v5454_v31 = vmul.f32 1.442695, %v5419_v28 }
 0x646   :  { %v5450_v25 = vmul.f32 1.442695, %v5417_v34  ;;  %9393 = vpow2.f32 %v5454_v31 }
 0x647   :  { %v5340_v56 = vpop.xlane.xlu0 %5339 }
 0x648   :  { %v5422_v51 = vsub.f32 %v13939_v12, %v5340_v56  ;;  %9395 = vpow2.f32 %v5450_v25 }
 0x649   :  { %v5343_v63 = vpop.xlane.xlu1 %5342 }
 0x64a   :  { %v5460_v3 = vmul.f32 1.442695, %v5422_v51  ;;  %v5423_v50 = vsub.f32 %v13947_v54, %v5343_v63 }
 0x64b   :  { %v5334_v8 = vpop.xlane.xlu0 %5333 }
 0x64c   :  { %9397 = vpow2.f32 %v5460_v3  ;;  %v5462_v15 = vmul.f32 1.442695, %v5423_v50  ;;  %v5420_v40 = vsub.f32 %v13944_v38, %v5334_v8 }
 0x64d   :  { %v5337_v43 = vpop.xlane.xlu1 %5336 }
 0x64e   :  { %9399 = vpow2.f32 %v5462_v15  ;;  %v5456_v58 = vmul.f32 1.442695, %v5420_v40  ;;  %v5421_v26 = vsub.f32 %v13952_v13, %v5337_v43 }
 0x64f   :  { %v5352_v34 = vpop.xlane.xlu0 %5351  ;;  %v14088_v27 = vpop.eup %9389 }
 0x650   :  { %9401 = vpow2.f32 %v5456_v58  ;;  %v5458_v12 = vmul.f32 1.442695, %v5421_v26  ;;  %v5426_v25 = vsub.f32 %v13957_v35, %v5352_v34  ;;  %v5518_v54 = vsel %vm5319_vm0, %v14088_v27, 0.0 }
 0x651   :  { %v5355_v51 = vpop.xlane.xlu1 %5354  ;;  %v14093_v11 = vpop.eup %9391  ;;  %5519 = vadd.xlane.f32.xlu0 %v5518_v54 }
 0x652   :  { %9403 = vpow2.f32 %v5458_v12  ;;  %v5468_v38 = vmul.f32 1.442695, %v5426_v25  ;;  %v5427_v60 = vsub.f32 %v13967_v5, %v5355_v51  ;;  %v5512_v3 = vsel %vm5319_vm0, %v14093_v11, 0.0 }
 0x653   :  { %v5346_v28 = vpop.xlane.xlu0 %5345  ;;  %v14096_v13 = vpop.eup %9393 }
 0x654   :  { %9405 = vpow2.f32 %v5468_v38  ;;  %v5470_v31 = vmul.f32 1.442695, %v5427_v60  ;;  %v5424_v56 = vsub.f32 %v13964_v20, %v5346_v28  ;;  %v5521_v35 = vsel %vm5319_vm0, %v14096_v13, 0.0 }
 0x655   :  { %v5349_v63 = vpop.xlane.xlu1 %5348  ;;  %v14103_v50 = vpop.eup %9395  ;;  %5522 = vadd.xlane.f32.xlu1 %v5521_v35  ;;  %5513 = vadd.xlane.f32.xlu0 %v5512_v3 }
 0x656   :  { %9407 = vpow2.f32 %v5470_v31  ;;  %v5464_v8 = vmul.f32 1.442695, %v5424_v56  ;;  %v5425_v5 = vsub.f32 %v13972_v14, %v5349_v63  ;;  %v5515_v26 = vsel %vm5319_vm0, %v14103_v50, 0.0 }
 0x657   :  { %v5364_v15 = vpop.xlane.xlu0 %5363 }
 0x658   :  { %9409 = vpow2.f32 %v5464_v8  ;;  %v5466_v40 = vmul.f32 1.442695, %v5425_v5  ;;  %v5430_v20 = vsub.f32 %v13977_v1, %v5364_v15 }
 0x659   :  { %v14107_v43 = vpop.eup %9397  ;;  %v5367_v58 = vpop.xlane.xlu1 %5366  ;;  %5516 = vadd.xlane.f32.xlu1 %v5515_v26 }
 0x65a   :  { %9411 = vpow2.f32 %v5466_v40  ;;  %v5476_v34 = vmul.f32 1.442695, %v5430_v20  ;;  %v5431_v12 = vsub.f32 %v13987_v24, %v5367_v58  ;;  %v5530_v14 = vsel %vm5319_vm0, %v14107_v43, 0.0 }
 0x65b   :  { %v14114_v25 = vpop.eup %9399  ;;  %5531 = vadd.xlane.f32.xlu0 %v5530_v14  ;;  %v5358_v51 = vpop.xlane.xlu0 %5357 }
 0x65c   :  { %9413 = vpow2.f32 %v5476_v34  ;;  %v5478_v1 = vmul.f32 1.442695, %v5431_v12  ;;  %v5428_v54 = vsub.f32 %v13984_v41, %v5358_v51  ;;  %v5533_v38 = vsel %vm5319_vm0, %v14114_v25, 0.0 }
 0x65d   :  { %v14119_v60 = vpop.eup %9401  ;;  %v5361_v28 = vpop.xlane.xlu1 %5360  ;;  %5534 = vadd.xlane.f32.xlu1 %v5533_v38 }
 0x65e   :  { %9415 = vpow2.f32 %v5478_v1  ;;  %v5472_v24 = vmul.f32 1.442695, %v5428_v54  ;;  %v5429_v31 = vsub.f32 %v13992_v46, %v5361_v28  ;;  %v5524_v56 = vsel %vm5319_vm0, %v14119_v60, 0.0 }
 0x65f   :  { %v14124_v35 = vpop.eup %9403  ;;  %5525 = vadd.xlane.f32.xlu0 %v5524_v56  ;;  %v5376_v63 = vpop.xlane.xlu0 %5375 }
 0x660   :  { %9417 = vpow2.f32 %v5472_v24  ;;  %v5474_v41 = vmul.f32 1.442695, %v5429_v31  ;;  %v5434_v3 = vsub.f32 %v13997_v48, %v5376_v63  ;;  %v5527_v8 = vsel %vm5319_vm0, %v14124_v35, 0.0 }
 0x661   :  { %v14129_v5 = vpop.eup %9405  ;;  %v5379_v15 = vpop.xlane.xlu1 %5378  ;;  %5528 = vadd.xlane.f32.xlu1 %v5527_v8 }
 0x662   :  { %9419 = vpow2.f32 %v5474_v41  ;;  %v5484_v46 = vmul.f32 1.442695, %v5434_v3  ;;  %v5435_v40 = vsub.f32 %v14007_v49, %v5379_v15  ;;  %v5542_v20 = vsel %vm5319_vm0, %v14129_v5, 0.0 }
 0x663   :  { %v14134_v58 = vpop.eup %9407  ;;  %5543 = vadd.xlane.f32.xlu0 %v5542_v20  ;;  %v5370_v26 = vpop.xlane.xlu0 %5369 }
 0x664   :  { %9421 = vpow2.f32 %v5484_v46  ;;  %v5486_v48 = vmul.f32 1.442695, %v5435_v40  ;;  %v5432_v34 = vsub.f32 %v14004_v23, %v5370_v26  ;;  %v5545_v12 = vsel %vm5319_vm0, %v14134_v58, 0.0 }
 0x665   :  { %v14139_v14 = vpop.eup %9409  ;;  %v5373_v51 = vpop.xlane.xlu1 %5372  ;;  %5546 = vadd.xlane.f32.xlu1 %v5545_v12 }
 0x666   :  { %9423 = vpow2.f32 %v5486_v48  ;;  %v5480_v49 = vmul.f32 1.442695, %v5432_v34  ;;  %v5433_v1 = vsub.f32 %v14012_v21, %v5373_v51  ;;  %v5536_v54 = vsel %vm5319_vm0, %v14139_v14, 0.0 }
 0x667   :  { %v14144_v38 = vpop.eup %9411  ;;  %5537 = vadd.xlane.f32.xlu0 %v5536_v54  ;;  %v5388_v28 = vpop.xlane.xlu0 %5387 }
 0x668   :  { %9425 = vpow2.f32 %v5480_v49  ;;  %v5482_v23 = vmul.f32 1.442695, %v5433_v1  ;;  %v5438_v24 = vsub.f32 %v14017_v9, %v5388_v28  ;;  %v5539_v31 = vsel %vm5319_vm0, %v14144_v38, 0.0 }
 0x669   :  { %v14149_v56 = vpop.eup %9413  ;;  %v5391_v63 = vpop.xlane.xlu1 %5390  ;;  %5540 = vadd.xlane.f32.xlu1 %v5539_v31 }
 0x66a   :  { %9427 = vpow2.f32 %v5482_v23  ;;  %v5492_v21 = vmul.f32 1.442695, %v5438_v24  ;;  %v5439_v41 = vsub.f32 %v14027_v44, %v5391_v63  ;;  %v5554_v3 = vsel %vm5319_vm0, %v14149_v56, 0.0 }
 0x66b   :  { %v14154_v8 = vpop.eup %9415  ;;  %5555 = vadd.xlane.f32.xlu0 %v5554_v3  ;;  %v5382_v15 = vpop.xlane.xlu0 %5381 }
 0x66c   :  { %9429 = vpow2.f32 %v5492_v21  ;;  %v5494_v9 = vmul.f32 1.442695, %v5439_v41  ;;  %v5436_v46 = vsub.f32 %v14024_v10, %v5382_v15  ;;  %v5557_v40 = vsel %vm5319_vm0, %v14154_v8, 0.0 }
 0x66d   :  { %v14159_v20 = vpop.eup %9417  ;;  %v5385_v26 = vpop.xlane.xlu1 %5384  ;;  %5558 = vadd.xlane.f32.xlu1 %v5557_v40 }
 0x66e   :  { %9431 = vpow2.f32 %v5494_v9  ;;  %v5488_v44 = vmul.f32 1.442695, %v5436_v46  ;;  %v5437_v48 = vsub.f32 %v14032_v30, %v5385_v26  ;;  %v5548_v34 = vsel %vm5319_vm0, %v14159_v20, 0.0 }
 0x66f   :  { %v14164_v12 = vpop.eup %9419  ;;  %5549 = vadd.xlane.f32.xlu0 %v5548_v34  ;;  %v5400_v51 = vpop.xlane.xlu0 %5399 }
 0x670   :  { %9433 = vpow2.f32 %v5488_v44  ;;  %v5490_v10 = vmul.f32 1.442695, %v5437_v48  ;;  %v5442_v49 = vsub.f32 %v14037_v52, %v5400_v51  ;;  %v5551_v1 = vsel %vm5319_vm0, %v14164_v12, 0.0 }
 0x671   :  { %v14169_v54 = vpop.eup %9421  ;;  %v5403_v28 = vpop.xlane.xlu1 %5402  ;;  %5552 = vadd.xlane.f32.xlu1 %v5551_v1 }
 0x672   :  { %9435 = vpow2.f32 %v5490_v10  ;;  %v5500_v30 = vmul.f32 1.442695, %v5442_v49  ;;  %v5443_v23 = vsub.f32 %v14047_v42, %v5403_v28  ;;  %v5566_v24 = vsel %vm5319_vm0, %v14169_v54, 0.0 }
 0x673   :  { %v14174_v31 = vpop.eup %9423  ;;  %5567 = vadd.xlane.f32.xlu0 %v5566_v24  ;;  %v5394_v63 = vpop.xlane.xlu0 %5393 }
 0x674   :  { %9437 = vpow2.f32 %v5500_v30  ;;  %v5502_v52 = vmul.f32 1.442695, %v5443_v23  ;;  %v5440_v21 = vsub.f32 %v14044_v39, %v5394_v63  ;;  %v5569_v41 = vsel %vm5319_vm0, %v14174_v31, 0.0 }
 0x675   :  { %v14179_v3 = vpop.eup %9425  ;;  %v5397_v15 = vpop.xlane.xlu1 %5396  ;;  %5570 = vadd.xlane.f32.xlu1 %v5569_v41 }
 0x676   :  { %9439 = vpow2.f32 %v5502_v52  ;;  %v5496_v42 = vmul.f32 1.442695, %v5440_v21  ;;  %v5441_v9 = vsub.f32 %v14052_v17, %v5397_v15  ;;  %v5560_v46 = vsel %vm5319_vm0, %v14179_v3, 0.0 }
 0x677   :  { %v14184_v40 = vpop.eup %9427  ;;  %5561 = vadd.xlane.f32.xlu0 %v5560_v46  ;;  %v5412_v26 = vpop.xlane.xlu0 %5411 }
 0x678   :  { %9441 = vpow2.f32 %v5496_v42  ;;  %v5498_v39 = vmul.f32 1.442695, %v5441_v9  ;;  %v5446_v44 = vsub.f32 %v14057_v32, %v5412_v26  ;;  %v5563_v48 = vsel %vm5319_vm0, %v14184_v40, 0.0 }
 0x679   :  { %v14189_v34 = vpop.eup %9429  ;;  %v5415_v51 = vpop.xlane.xlu1 %5414  ;;  %5564 = vadd.xlane.f32.xlu1 %v5563_v48 }
 0x67a   :  { %9443 = vpow2.f32 %v5498_v39  ;;  %v5508_v17 = vmul.f32 1.442695, %v5446_v44  ;;  %v5447_v10 = vsub.f32 %v14067_v45, %v5415_v51  ;;  %v5578_v49 = vsel %vm5319_vm0, %v14189_v34, 0.0 }
 0x67b   :  { %v14194_v1 = vpop.eup %9431  ;;  %5579 = vadd.xlane.f32.xlu0 %v5578_v49  ;;  %v5406_v28 = vpop.xlane.xlu0 %5405 }
 0x67c   :  { %9445 = vpow2.f32 %v5508_v17  ;;  %v5510_v32 = vmul.f32 1.442695, %v5447_v10  ;;  %v5444_v30 = vsub.f32 %v14064_v2, %v5406_v28  ;;  %v5581_v23 = vsel %vm5319_vm0, %v14194_v1, 0.0 }
 0x67d   :  { %v14199_v24 = vpop.eup %9433  ;;  %v5409_v63 = vpop.xlane.xlu1 %5408  ;;  %5582 = vadd.xlane.f32.xlu1 %v5581_v23 }
 0x67e   :  { %9447 = vpow2.f32 %v5510_v32  ;;  %v5504_v45 = vmul.f32 1.442695, %v5444_v30  ;;  %v5445_v52 = vsub.f32 %v14072_v6, %v5409_v63  ;;  %v5572_v21 = vsel %vm5319_vm0, %v14199_v24, 0.0 }
 0x67f   :  { %v14204_v41 = vpop.eup %9435  ;;  %5573 = vadd.xlane.f32.xlu0 %v5572_v21 }
 0x680   :  { %9449 = vpow2.f32 %v5504_v45  ;;  %v5506_v15 = vmul.f32 1.442695, %v5445_v52  ;;  %v5575_v2 = vsel %vm5319_vm0, %v14204_v41, 0.0 }
 0x681   :  { %v14208_v42 = vpop.eup %9437  ;;  %5576 = vadd.xlane.f32.xlu1 %v5575_v2 }
 0x682   :  { %9451 = vpow2.f32 %v5506_v15  ;;  %v5590_v9 = vsel %vm5319_vm0, %v14208_v42, 0.0 }
 0x683   :  { %v14212_v6 = vpop.eup %9439  ;;  %5591 = vadd.xlane.f32.xlu0 %v5590_v9 }
 0x684   :  { %v5593_v46 = vsel %vm5319_vm0, %v14212_v6, 0.0 }
 0x685   :  { %v14216_v26 = vpop.eup %9441  ;;  %5594 = vadd.xlane.f32.xlu1 %v5593_v46 }
 0x686   :  { %v5584_v39 = vsel %vm5319_vm0, %v14216_v26, 0.0 }
 0x687   :  { %v14220_v44 = vpop.eup %9443  ;;  %5585 = vadd.xlane.f32.xlu0 %v5584_v39 }
 0x688   :  { %v5587_v48 = vsel %vm5319_vm0, %v14220_v44, 0.0 }
 0x689   :  { %v14224_v51 = vpop.eup %9445  ;;  %5588 = vadd.xlane.f32.xlu1 %v5587_v48 }
 0x68a   :  { %v5602_v17 = vsel %vm5319_vm0, %v14224_v51, 0.0 }
 0x68b   :  { %v14228_v10 = vpop.eup %9447  ;;  %5603 = vadd.xlane.f32.xlu0 %v5602_v17 }
 0x68c   :  { %v5605_v49 = vsel %vm5319_vm0, %v14228_v10, 0.0 }
 0x68d   :  { %v14232_v28 = vpop.eup %9449  ;;  %5606 = vadd.xlane.f32.xlu1 %v5605_v49 }
 0x68e   :  { %v5596_v32 = vsel %vm5319_vm0, %v14232_v28, 0.0 }
 0x68f   :  { %v14236_v30 = vpop.eup %9451  ;;  %5597 = vadd.xlane.f32.xlu0 %v5596_v32 }
 0x690   :  { %v5599_v23 = vsel %vm5319_vm0, %v14236_v30, 0.0 }
 0x691   :  { %5600 = vadd.xlane.f32.xlu1 %v5599_v23 }
 0x6da   :  { %v5520_v63 = vpop.xlane.xlu0 %5519 }
 0x6db   :  { %9453 = vrcp.f32 %v5520_v63 }
 0x6de   :  { %v5523_v45 = vpop.xlane.xlu1 %5522  ;;  %v5514_v52 = vpop.xlane.xlu0 %5513 }
 0x6df   :  { %9455 = vrcp.f32 %v5523_v45 }
 0x6e0   :  { %9457 = vrcp.f32 %v5514_v52 }
 0x6e2   :  { %v5517_v21 = vpop.xlane.xlu1 %5516 }
 0x6e3   :  { %9459 = vrcp.f32 %v5517_v21  ;;  %v9249_v21 = vld [vmem:[%s15992_s8 + $0x38] sm:$0xff]  }
 0x6e4   :  { %v5532_v15 = vpop.xlane.xlu0 %5531  ;;  %8828 = vmatprep.subr.bf16.mxu1 %v9249_v21 }
 0x6e5   :  { %9461 = vrcp.f32 %v5532_v15  ;;  %8829 = vmatpush3.bf16.msra.mxu1 %v9249_v21 }
 0x6e6   :  { %v5535_v2 = vpop.xlane.xlu1 %5534 }
 0x6e7   :  { %9463 = vrcp.f32 %v5535_v2 }
 0x6e8   :  { %v5526_v9 = vpop.xlane.xlu0 %5525  ;;  %v9454_v46 = vpop.eup %9453 }
 0x6e9   :  { %9465 = vrcp.f32 %v5526_v9  ;;  %v14241_v17 = vmul.f32 %v9454_v46, %v14088_v27 }
 0x6ea   :  { %v5529_v39 = vpop.xlane.xlu1 %5528 }
 0x6eb   :  { %9467 = vrcp.f32 %v5529_v39  ;;  %v9250_v39 = vld [vmem:[%s15992_s8 + $0x30] sm:$0xff]  }
 0x6ec   :  { %v9456_v48 = vpop.eup %9455  ;;  %v5544_v63 = vpop.xlane.xlu0 %5543  ;;  %8830 = vmatprep.subr.bf16.mxu1 %v9250_v39 }
 0x6ed   :  { %v14244_v49 = vmul.f32 %v9456_v48, %v14096_v13  ;;  %v9458_v32 = vpop.eup %9457  ;;  %8831 = vmatpush3.bf16.msra.mxu1 %v9250_v39  ;;  %v16647_v39 = vmov 1  }
 0x6ee   :  { %v5547_v23 = vpop.xlane.xlu1 %5546  ;;  %v14252_v15 = vmul.f32 %v9458_v32, %v14093_v11 }
 0x6ef   :  { %16643 = vst [vmem:[#allocation62_spill] sm:$0xff] %v14244_v49  ;;  %v5673_v45 = vpack.c.bf16 %v14244_v49, %v14241_v17  ;;  %9469 = vrcp.f32 %v5547_v23  ;;  %v16162_v49 = vmov 3  }
 0x6f0   :  { %v9460_v52 = vpop.eup %9459  ;;  %9471 = vrcp.f32 %v5544_v63  ;;  %v14266_v11 = vpop.xlane.xlu0 %5537 }
 0x6f1   :  { %5695 = vperm.xlu1 %9118, %v5673_v45   ;;  %v14255_v27 = vmul.f32 %v9460_v52, %v14103_v50  ;;  %v16157_v50 = vmov 1  }
 0x6f2   :  { %v9462_v13 = vpop.eup %9461  ;;  %v14257_v2 = vpop.xlane.xlu1 %5540 }
 0x6f3   :  { %16644 = vst [vmem:[#allocation65_spill] sm:$0xff] %v14255_v27  ;;  %v14261_v9 = vpack.c.bf16 %v14255_v27, %v14252_v15  ;;  %v14271_v48 = vmul.f32 %v9462_v13, %v14107_v43  ;;  %v9251_v43 = vld [vmem:[%s15992_s8 + $0x28] sm:$0xff]   ;;  %v9256_v27 = vld [vmem:[%s15992_s8] sm:$0xff]  }
 0x6f4   :  { %v9464_v46 = vpop.eup %9463  ;;  %v5556_v13 = vpop.xlane.xlu0 %5555  ;;  %8832 = vmatprep.subr.bf16.mxu1 %v9251_v43 }
 0x6f5   :  { %9119 = vset.pattern.permute.xlu1 %v16157_v50  ;;  %5690 = vperm.xlu0 %9122, %v14261_v9   ;;  %v14274_v32 = vmul.f32 %v9464_v46, %v14114_v25  ;;  %v16159_v25 = vmov 2  }
 0x6f6   :  { %5789 = vperm.xlu1 %9119, %v5673_v45   ;;  %v9466_v23 = vpop.eup %9465  ;;  %v5559_v21 = vpop.xlane.xlu1 %5558  ;;  %8833 = vmatpush3.bf16.msra.mxu1 %v9251_v43 }
 0x6f7   :  { %16645 = vst [vmem:[#allocation61_spill] sm:$0xff] %v14274_v32  ;;  %v14278_v52 = vpack.c.bf16 %v14274_v32, %v14271_v48  ;;  %v14290_v46 = vmul.f32 %v9466_v23, %v14119_v60  ;;  %9473 = vrcp.f32 %v5559_v21  ;;  %v9253_v23 = vld [vmem:[%s15992_s8 + $0x18] sm:$0xff]   ;;  %v16648_v32 = vmov 2  }
 0x6f8   :  { %v9468_v63 = vpop.eup %9467  ;;  %9475 = vrcp.f32 %v5556_v13  ;;  %v5550_v21 = vpop.xlane.xlu0 %5549 }
 0x6f9   :  { %9129 = vset.pattern.permute.xlu0 %v16162_v49  ;;  %v14282_v50 = vmul.f32 %v9468_v63, %v14124_v35  ;;  %v9252_v63 = vld [vmem:[%s15992_s8 + $0x20] sm:$0xff]  }
 0x6fa   :  { %9120 = vset.pattern.permute.xlu1 %v16159_v25  ;;  %5989 = vperm.xlu0 %9129, %v14278_v52   ;;  %v5553_v25 = vpop.xlane.xlu1 %5552 }
 0x6fb   :  { %16646 = vst [vmem:[#allocation69_spill] sm:$0xff] %v14282_v50  ;;  %5885 = vperm.xlu1 %9120, %v5673_v45   ;;  %v14294_v35 = vpack.c.bf16 %v14282_v50, %v14290_v46  ;;  %8834 = vmatprep.subr.bf16.mxu1 %v9252_v63  ;;  %9477 = vrcp.f32 %v5553_v25 }
 0x6fc   :  { %v9470_v60 = vpop.eup %9469  ;;  %8835 = vmatpush3.bf16.msra.mxu1 %v9252_v63  ;;  %9479 = vrcp.f32 %v5550_v21  ;;  %v5568_v63 = vpop.xlane.xlu0 %5567  ;;  %v9255_v21 = vld [vmem:[%s15992_s8 + $0x8] sm:$0xff]  }
 0x6fd   :  { %v9472_v43 = vpop.eup %9471  ;;  %8836 = vmatprep.subr.bf16.mxu1 %v9253_v23  ;;  %v14307_v13 = vmul.f32 %v9470_v60, %v14134_v58  ;;  %v16650_v60 = vmov 0  }
 0x6fe   :  { %9131 = vset.pattern.permute.xlu0 %v16647_v39  ;;  %v5571_v25 = vpop.xlane.xlu1 %5570 }
 0x6ff   :  { %9121 = vset.pattern.permute.xlu1 %v16162_v49  ;;  %5793 = vperm.xlu0 %9131, %v14294_v35   ;;  %16649 = vst [vmem:[#allocation11_spill] sm:$0xff] %v14307_v13  ;;  %v9254_v49 = vld [vmem:[%s15992_s8 + $0x10] sm:$0xff]   ;;  %9481 = vrcp.f32 %v5571_v25  ;;  %s9788_s8 = smov 4  }
 0x700   :  { %5981 = vperm.xlu1 %9121, %v5673_v45   ;;  %v14316_v45 = vmul.f32 %v9472_v43, %v14129_v5  ;;  %8837 = vmatpush3.bf16.msra.mxu1 %v9253_v23  ;;  %9483 = vrcp.f32 %v5568_v63  ;;  %v5562_v22 = vpop.xlane.xlu0 %5561 }
 0x701   :  { %8838 = vmatprep.subr.bf16.mxu1 %v9254_v49 }
 0x702   :  { %v14320_v58 = vpack.c.bf16 %v14307_v13, %v14316_v45  ;;  %v5565_v43 = vpop.xlane.xlu1 %5564  ;;  %v14329_v13 = vpop.f32.mrf.mxu0 }
 0x703   :  { %9132 = vset.pattern.permute.xlu0 %v16648_v32  ;;  %16651 = vst [vmem:[#allocation41_spill] sm:$0xff] %v14329_v13  ;;  %9485 = vrcp.f32 %v5565_v43 }
 0x704   :  { %9123 = vset.pattern.permute.xlu1 %v16647_v39  ;;  %5889 = vperm.xlu0 %9132, %v14294_v35   ;;  %v9474_v5 = vpop.eup %9473  ;;  %v14344_v63 = vpop.f32.mrf.mxu0  ;;  %9487 = vrcp.f32 %v5562_v22 }
 0x705   :  { %5785 = vperm.xlu1 %9123, %v14261_v9   ;;  %8839 = vmatpush3.bf16.msra.mxu1 %v9254_v49  ;;  %v9476_v23 = vpop.eup %9475  ;;  %v14333_v50 = vmul.f32 %v9474_v5, %v14154_v8  ;;  %16654 = vst [vmem:[#allocation12_spill] sm:$0xff] %v14344_v63 }
 0x706   :  { %8840 = vmatprep.subr.bf16.mxu1 %v9255_v21  ;;  %v14342_v25 = vmul.f32 %v9476_v23, %v14149_v56  ;;  %v5583_v13 = vpop.xlane.xlu1 %5582  ;;  %v5580_v56 = vpop.xlane.xlu0 %5579 }
 0x707   :  { %16652 = vst [vmem:[#allocation67_spill] sm:$0xff] %v14333_v50  ;;  %9489 = vrcp.f32 %v5583_v13 }
 0x708   :  { %9134 = vset.pattern.permute.xlu0 %v16650_v60  ;;  %v9478_v49 = vpop.eup %9477  ;;  %v14348_v5 = vpack.c.bf16 %v14333_v50, %v14342_v25  ;;  %9491 = vrcp.f32 %v5580_v56 }
 0x709   :  { %9124 = vset.pattern.permute.xlu1 %v16648_v32  ;;  %5715 = vperm.xlu0 %9134, %v14320_v58   ;;  %v9480_v8 = vpop.eup %9479  ;;  %v14352_v47 = vmul.f32 %v9478_v49, %v14164_v12  ;;  %9493 = vrcp.f32 %v14257_v2 }
 0x70a   :  { %5881 = vperm.xlu1 %9124, %v14261_v9   ;;  %8841 = vmatpush3.bf16.msra.mxu1 %v9255_v21  ;;  %v14360_v21 = vpop.f32.mrf.mxu0  ;;  %v14367_v23 = vpop.xlane.xlu1 %5576  ;;  %9495 = vrcp.f32 %v14266_v11 }
 0x70b   :  { %8842 = vmatprep.subr.bf16.mxu1 %v9256_v27  ;;  %16655 = vst [vmem:[#allocation40_spill] sm:$0xff] %v14352_v47 }
 0x70c   :  { %v9482_v12 = vpop.eup %9481  ;;  %v14371_v43 = vpop.f32.mrf.mxu0 }
 0x70d   :  { %9136 = vset.pattern.permute.xlu0 %v16648_v32  ;;  %16656 = vst [vmem:[#allocation79_spill] sm:$0xff] %v14371_v43  ;;  %v14377_v49 = vmul.f32 %v9482_v12, %v14174_v31 }
 0x70e   :  { %9125 = vset.pattern.permute.xlu1 %v16653_v55  ;;  %5901 = vperm.xlu0 %9136, %v14320_v58   ;;  %v14380_v50 = vpop.f32.mrf.mxu0  ;;  %v5595_v63 = vpop.xlane.xlu1 %5594 }
 0x70f   :  { %5977 = vperm.xlu1 %9125, %v14261_v9   ;;  %v14358_v9 = vmul.f32 %v9480_v8, %v14159_v20  ;;  %8843 = vmatpush3.bf16.msra.mxu1 %v9256_v27  ;;  %v9484_v20 = vpop.eup %9483  ;;  %v14374_v27 = vpop.xlane.xlu0 %5573  ;;  %16657 = vst [vmem:[#allocation71_spill] sm:$0xff] %v14377_v49  ;;  %16658 = vst [vmem:[#allocation74_spill] sm:$0xff] %v14380_v50  ;;  %9497 = vrcp.f32 %v5595_v63 }
 0x710   :  { %v9486_v8 = vpop.eup %9485  ;;  %v14395_v43 = vpop.f32.mrf.mxu0 }
 0x711   :  { %v14364_v22 = vpack.c.bf16 %v14352_v47, %v14358_v9  ;;  %v14385_v47 = vmul.f32 %v9484_v20, %v14169_v54  ;;  %v9488_v13 = vpop.eup %9487  ;;  %v14393_v12 = vmul.f32 %v9486_v8, %v14184_v40  ;;  %16660 = vst [vmem:[#allocation77_spill] sm:$0xff] %v14395_v43 }
 0x712   :  { %9143 = vset.pattern.permute.xlu0 %v16647_v39  ;;  %v14401_v54 = vmul.f32 %v9488_v13, %v14179_v3  ;;  %v14409_v20 = vpop.f32.mrf.mxu0 }
 0x713   :  { %9126 = vset.pattern.permute.xlu1 %v16650_v60  ;;  %5813 = vperm.xlu0 %9143, %v14348_v5   ;;  %v14390_v31 = vpack.c.bf16 %v14377_v49, %v14385_v47  ;;  %v5592_v56 = vpop.xlane.xlu0 %5591  ;;  %16659 = vst [vmem:[#allocation73_spill] sm:$0xff] %v14393_v12 }
 0x714   :  { %5705 = vperm.xlu1 %9126, %v14278_v52   ;;  %v14407_v40 = vpack.c.bf16 %v14393_v12, %v14401_v54  ;;  %9499 = vrcp.f32 %v5592_v56  ;;  %v9490_v3 = vpop.eup %9489  ;;  %v14415_v63 = vpop.f32.mrf.mxu0 }
 0x715   :  { %v9492_v11 = vpop.eup %9491  ;;  %16661 = vst [vmem:[#allocation78_spill] sm:$0xff] %v14415_v63  ;;  %v14419_v13 = vmul.f32 %v9490_v3, %v14194_v1 }
 0x716   :  { %v14424_v49 = vmul.f32 %v9492_v11, %v14189_v34 }
 0x717   :  { %9146 = vset.pattern.permute.xlu0 %v16650_v60  ;;  %v5586_v2 = vpop.xlane.xlu0 %5585  ;;  %16662 = vst [vmem:[#allocation13_spill] sm:$0xff] %v14419_v13 }
 0x718   :  { %9127 = vset.pattern.permute.xlu1 %v16647_v39  ;;  %5720 = vperm.xlu0 %9146, %v14364_v22   ;;  %v14431_v12 = vpack.c.bf16 %v14419_v13, %v14424_v49 }
 0x719   :  { %5797 = vperm.xlu1 %9127, %v14278_v52  }
 0x71b   :  { %v5604_v56 = vpop.xlane.xlu0 %5603 }
 0x71c   :  { %9149 = vset.pattern.permute.xlu0 %v16653_v55 }
 0x71d   :  { %9128 = vset.pattern.permute.xlu1 %v16648_v32  ;;  %6001 = vperm.xlu0 %9149, %v14364_v22  }
 0x71e   :  { %5893 = vperm.xlu1 %9128, %v14278_v52   ;;  %v5589_v52 = vpop.xlane.xlu1 %5588 }
 0x71f   :  { %9501 = vrcp.f32 %v5589_v52  ;;  %v9494_v52 = vpop.eup %9493  ;;  %v5598_v11 = vpop.xlane.xlu0 %5597 }
 0x720   :  { %9503 = vrcp.f32 %v5586_v2  ;;  %v9496_v1 = vpop.eup %9495  ;;  %v14439_v34 = vmul.f32 %v9494_v52, %v14144_v38 }
 0x721   :  { %6013 = vperm.xlu0 %9149, %v14390_v31   ;;  %v9498_v3 = vpop.eup %9497  ;;  %v14443_v13 = vmul.f32 %v9496_v1, %v14139_v14 }
 0x722   :  { %9130 = vset.pattern.permute.xlu1 %v16650_v60  ;;  %v5607_v8 = vpop.xlane.xlu1 %5606  ;;  %v14447_v63 = vmul.f32 %v9498_v3, %v14212_v6 }
 0x723   :  { %5700 = vperm.xlu1 %9130, %v14294_v35   ;;  %v5676_v38 = vpack.c.bf16 %v14439_v34, %v14443_v13 }
 0x724   :  { %16664 = vst [vmem:[#allocation14_spill] sm:$0xff] %v14447_v63 }
 0x725   :  { %9154 = vset.pattern.permute.xlu0 %v16647_v39 }
 0x726   :  { %5817 = vperm.xlu0 %9154, %v14407_v40   ;;  %v5601_v2 = vpop.xlane.xlu1 %5600 }
 0x727   :  { %9133 = vset.pattern.permute.xlu1 %v16653_v55  ;;  %9505 = vrcp.f32 %v5601_v2 }
 0x728   :  { %5985 = vperm.xlu1 %9133, %v14294_v35   ;;  %v14426_v35 = vpop.f32.mrf.mxu0  ;;  %9507 = vrcp.f32 %v5598_v11 }
 0x729   :  { %16663 = vst [vmem:[#allocation52_spill] sm:$0xff] %v14426_v35  ;;  %v9500_v35 = vpop.eup %9499  ;;  %9509 = vrcp.f32 %v5607_v8 }
 0x72a   :  { %9155 = vset.pattern.permute.xlu0 %v16648_v32  ;;  %v14435_v43 = vpop.f32.mrf.mxu0  ;;  %9511 = vrcp.f32 %v5604_v56 }
 0x72b   :  { %5913 = vperm.xlu0 %9155, %v14407_v40   ;;  %9513 = vrcp.f32 %v14374_v27 }
 0x72c   :  { %9135 = vset.pattern.permute.xlu1 %v16647_v39  ;;  %v14449_v50 = vpop.f32.mrf.mxu0  ;;  %v9502_v52 = vpop.eup %9501  ;;  %9515 = vrcp.f32 %v14367_v23 }
 0x72d   :  { %5805 = vperm.xlu1 %9135, %v14320_v58   ;;  %v9504_v14 = vpop.eup %9503  ;;  %v14466_v2 = vmul.f32 %v9502_v52, %v14220_v44 }
 0x72e   :  { %v14462_v1 = vpop.f32.mrf.mxu0 }
 0x72f   :  { %9157 = vset.pattern.permute.xlu0 %v16650_v60  ;;  %16665 = vst [vmem:[#allocation49_spill] sm:$0xff] %v14466_v2 }
 0x730   :  { %5745 = vperm.xlu0 %9157, %v14431_v12  }
 0x731   :  { %9137 = vset.pattern.permute.xlu1 %v16653_v55 }
 0x732   :  { %5997 = vperm.xlu1 %9137, %v14320_v58   ;;  %v14456_v58 = vmul.f32 %v9500_v35, %v14208_v42  ;;  %v14471_v42 = vmul.f32 %v9504_v14, %v14216_v26  ;;  %v14473_v35 = vpop.f32.mrf.mxu0 }
 0x734   :  { %9159 = vset.pattern.permute.xlu0 %v16648_v32  ;;  %v14460_v6 = vpack.c.bf16 %v14447_v63, %v14456_v58  ;;  %v14477_v3 = vpack.c.bf16 %v14466_v2, %v14471_v42  ;;  %v9506_v44 = vpop.eup %9505  ;;  %v14482_v11 = vpop.f32.mrf.mxu0 }
 0x735   :  { %5925 = vperm.xlu0 %9159, %v14431_v12   ;;  %v9508_v26 = vpop.eup %9507  ;;  %v14486_v8 = vmul.f32 %v9506_v44, %v14236_v30 }
 0x736   :  { %9138 = vset.pattern.permute.xlu1 %v16650_v60  ;;  %v14489_v52 = vpop.f32.mrf.mxu0  ;;  %v14493_v56 = vmul.f32 %v9508_v26, %v14232_v28  ;;  %v9510_v30 = vpop.eup %9509 }
 0x737   :  { %5710 = vperm.xlu1 %9138, %v5676_v38   ;;  %16666 = vst [vmem:[#allocation87_spill] sm:$0xff] %v14486_v8  ;;  %v9512_v44 = vpop.eup %9511  ;;  %v14509_v28 = vmul.f32 %v9510_v30, %v14228_v10 }
 0x738   :  { %v14497_v14 = vpack.c.bf16 %v14486_v8, %v14493_v56  ;;  %v14500_v63 = vpop.f32.mrf.mxu0 }
 0x739   :  { %9166 = vset.pattern.permute.xlu0 %v16647_v39  ;;  %16667 = vst [vmem:[#allocation84_spill] sm:$0xff] %v14509_v28 }
 0x73a   :  { %5837 = vperm.xlu0 %9166, %v14460_v6   ;;  %v14505_v2 = vpop.f32.mrf.mxu0 }
 0x73b   :  { %9139 = vset.pattern.permute.xlu1 %v16647_v39 }
 0x73c   :  { %5801 = vperm.xlu1 %9139, %v5676_v38   ;;  %v14517_v26 = vpop.f32.mrf.mxu0 }
 0x73e   :  { %9169 = vset.pattern.permute.xlu0 %v16650_v60  ;;  %v14526_v10 = vpop.f32.mrf.mxu0 }
 0x73f   :  { %5750 = vperm.xlu0 %9169, %v14477_v3  }
 0x740   :  { %9140 = vset.pattern.permute.xlu1 %v16648_v32 }
 0x741   :  { %5897 = vperm.xlu1 %9140, %v5676_v38  }
 0x743   :  { %9172 = vset.pattern.permute.xlu0 %v16653_v55 }
 0x744   :  { %6025 = vperm.xlu0 %9172, %v14477_v3  }
 0x745   :  { %9141 = vset.pattern.permute.xlu1 %v16653_v55 }
 0x746   :  { %5993 = vperm.xlu1 %9141, %v5676_v38   ;;  %v14514_v38 = vmul.f32 %v9512_v44, %v14224_v51  ;;  %v14531_v51 = vpop.f32.mrf.mxu0 }
 0x748   :  { %9177 = vset.pattern.permute.xlu0 %v16647_v39  ;;  %16668 = vst [vmem:[#allocation76_spill] sm:$0xff] %v14514_v38  ;;  %v14521_v8 = vpack.c.bf16 %v14509_v28, %v14514_v38  ;;  %v14537_v30 = vpop.f32.mrf.mxu0 }
 0x749   :  { %5841 = vperm.xlu0 %9177, %v14497_v14  }
 0x74a   :  { %9142 = vset.pattern.permute.xlu1 %v16650_v60 }
 0x74b   :  { %5725 = vperm.xlu1 %9142, %v14348_v5  }
 0x74d   :  { %9178 = vset.pattern.permute.xlu0 %v16648_v32 }
 0x74e   :  { %5937 = vperm.xlu0 %9178, %v14497_v14  }
 0x74f   :  { %9144 = vset.pattern.permute.xlu1 %v16648_v32 }
 0x750   :  { %5909 = vperm.xlu1 %9144, %v14348_v5  }
 0x752   :  { %9180 = vset.pattern.permute.xlu0 %v16653_v55 }
 0x753   :  { %6037 = vperm.xlu0 %9180, %v14521_v8  }
 0x754   :  { %9145 = vset.pattern.permute.xlu1 %v16653_v55 }
 0x755   :  { %6005 = vperm.xlu1 %9145, %v14348_v5   ;;  %v14543_v5 = vpop.f32.mrf.mxu0 }
 0x757   :  { %7934 = vrot.lane.b32.xlu0 %v14252_v15, %s9788_s8  ;;  %v14549_v15 = vpop.f32.mrf.mxu0 }
 0x759   :  { %9147 = vset.pattern.permute.xlu1 %v16647_v39 }
 0x75a   :  { %5809 = vperm.xlu1 %9147, %v14364_v22  }
 0x75b   :  { %7938 = vrot.lane.b32.xlu0 %v14241_v17, %s9788_s8  ;;  %v4631_v17 = vadd.f32 %v13753_v61, %v13882_v57 }
 0x75e   :  { %9148 = vset.pattern.permute.xlu1 %v16648_v32 }
 0x75f   :  { %5905 = vperm.xlu1 %9148, %v14364_v22   ;;  %7942 = vrot.lane.b32.xlu0 %v14290_v46, %s9788_s8  ;;  %v14556_v46 = vpop.f32.mrf.mxu0  ;;  %v4627_v22 = vadd.f32 %v13745_v0, %v13882_v57 }
 0x761   :  { %v14563_v28 = vpop.f32.mrf.mxu0  ;;  %v5136_v61 = vmax.f32 %v4627_v22, 0.0  ;;  %v4621_v22 = vadd.f32 %v13733_v37, %v13882_v57 }
 0x763   :  { %9150 = vset.pattern.permute.xlu1 %v16650_v60  ;;  %7946 = vrot.lane.b32.xlu0 %v14271_v48, %s9788_s8  ;;  %v5140_v48 = vmax.f32 %v4631_v17, 0.0  ;;  %v14570_v38 = vpop.f32.mrf.mxu0 }
 0x764   :  { %5735 = vperm.xlu1 %9150, %v14390_v31  }
 0x767   :  { %7950 = vrot.lane.b32.xlu0 %v14443_v13, %s9788_s8  ;;  %v5260_v13 = vpack.c.bf16 %v5140_v48, %v5136_v61  ;;  %v5132_v61 = vmax.f32 %v4621_v22, 0.0 }
 0x768   :  { %9151 = vset.pattern.permute.xlu1 %v16647_v39 }
 0x769   :  { %5821 = vperm.xlu1 %9151, %v14390_v31  }
 0x76b   :  { %7954 = vrot.lane.b32.xlu0 %v14316_v45, %s9788_s8 }
 0x76c   :  { %v5696_v44 = vpop.permute.xlu1 %5695 }
 0x76d   :  { %9152 = vset.pattern.permute.xlu1 %v16648_v32  ;;  %v5769_v45 = vmul.bf16 %v5696_v44, %v13756_v19  ;;  %v4617_v19 = vadd.f32 %v13727_v36, %v13882_v57  ;;  %v9514_v44 = vpop.eup %9513 }
 0x76e   :  { %5917 = vperm.xlu1 %9152, %v14390_v31   ;;  %v14578_v31 = vpop.f32.mrf.mxu0  ;;  %v5649_v36 = vmul.f32 %v9514_v44, %v14199_v24 }
 0x76f   :  { %7958 = vrot.lane.b32.xlu0 %v14358_v9, %s9788_s8 }
 0x771   :  { %v5790_v0 = vpop.permute.xlu1 %5789 }
 0x772   :  { %v5849_v17 = vmul.bf16 %v5790_v0, %v5260_v13  ;;  %9153 = vset.pattern.permute.xlu1 %v16650_v60  ;;  %v5691_v0 = vpop.permute.xlu0 %5690 }
 0x773   :  { %5730 = vperm.xlu1 %9153, %v14407_v40   ;;  %7962 = vrot.lane.b32.xlu0 %v14342_v25, %s9788_s8  ;;  %v14589_v25 = vpop.f32.mrf.mxu0 }
 0x774   :  { %v5865_v27 = vadd.bf16 %v5849_v17, %v5769_v45 }
 0x776   :  { %v5886_v9 = vpop.permute.xlu1 %5885 }
 0x777   :  { %v5945_v23 = vmul.bf16 %v5886_v9, %v13758_v29  ;;  %9156 = vset.pattern.permute.xlu1 %v16653_v55  ;;  %7966 = vrot.lane.b32.xlu0 %v14401_v54, %s9788_s8  ;;  %v5128_v29 = vmax.f32 %v4617_v19, 0.0  ;;  %v14595_v54 = vpop.f32.mrf.mxu0 }
 0x778   :  { %6009 = vperm.xlu1 %9156, %v14407_v40   ;;  %v9516_v40 = vpop.eup %9515 }
 0x779   :  { %v5961_v48 = vadd.bf16 %v5945_v23, %v5865_v27  ;;  %v5256_v17 = vpack.c.bf16 %v5132_v61, %v5128_v29  ;;  %v14600_v9 = vpop.f32.mrf.mxu0  ;;  %v14605_v22 = vmul.f32 %v9516_v40, %v14204_v41 }
 0x77b   :  { %v5982_v13 = vpop.permute.xlu1 %5981  ;;  %7970 = vrot.lane.b32.xlu0 %v14385_v47, %s9788_s8  ;;  %v5768_v47 = vmul.bf16 %v5691_v0, %v13736_v18  ;;  %v14610_v23 = vpop.f32.mrf.mxu0 }
 0x77c   :  { %v6041_v37 = vmul.bf16 %v5982_v13, %v13767_v7  ;;  %9158 = vset.pattern.permute.xlu1 %v16647_v39 }
 0x77d   :  { %5829 = vperm.xlu1 %9158, %v14431_v12   ;;  %v14617_v41 = vpop.f32.mrf.mxu0 }
 0x77e   :  { %v6057_v45 = vadd.bf16 %v6041_v37, %v5961_v48  ;;  %v5682_v48 = vpack.c.bf16 %v14605_v22, %v5649_v36 }
 0x77f   :  { %7974 = vrot.lane.b32.xlu0 %v5649_v36, %s9788_s8  ;;  %v14627_v13 = vpop.f32.mrf.mxu0 }
 0x780   :  { %v5786_v27 = vpop.permute.xlu1 %5785  ;;  %16669 = vst [vmem:[#allocation83_spill] sm:$0xff] %v14627_v13 }
 0x781   :  { %v5848_v7 = vmul.bf16 %v5786_v27, %v5256_v17  ;;  %9160 = vset.pattern.permute.xlu1 %v16653_v55 }
 0x782   :  { %6021 = vperm.xlu1 %9160, %v14431_v12  }
 0x783   :  { %v5864_v24 = vadd.bf16 %v5848_v7, %v5768_v47  ;;  %7978 = vrot.lane.b32.xlu0 %v14424_v49, %s9788_s8  ;;  %v4651_v49 = vadd.f32 %v13793_v16, %v13882_v57  ;;  %v14632_v16 = vpop.f32.mrf.mxu0 }
 0x784   :  { %16670 = vst [vmem:[#allocation59_spill] sm:$0xff] %v14632_v16 }
 0x785   :  { %v5882_v19 = vpop.permute.xlu1 %5881  ;;  %v5156_v37 = vmax.f32 %v4651_v49, 0.0  ;;  %v14636_v0 = vpop.f32.mrf.mxu0 }
 0x786   :  { %v5944_v44 = vmul.bf16 %v5882_v19, %v13738_v53  ;;  %9161 = vset.pattern.permute.xlu1 %v16650_v60  ;;  %v4647_v53 = vadd.f32 %v13785_v4, %v13882_v57  ;;  %v4641_v4 = vadd.f32 %v13773_v33, %v13882_v57 }
 0x787   :  { %5740 = vperm.xlu1 %9161, %v5682_v48   ;;  %7982 = vrot.lane.b32.xlu0 %v14471_v42, %s9788_s8  ;;  %v14642_v19 = vpop.f32.mrf.mxu0 }
 0x788   :  { %v5960_v18 = vadd.bf16 %v5944_v44, %v5864_v24  ;;  %v5148_v24 = vmax.f32 %v4641_v4, 0.0  ;;  %16672 = vst [vmem:[#allocation80_spill] sm:$0xff] %v14642_v19  ;;  %v16676_v4 = vld [vmem:[#allocation22_spill] sm:$0xff] }
 0x78a   :  { %v5978_v12 = vpop.permute.xlu1 %5977 }
 0x78b   :  { %v6040_v61 = vmul.bf16 %v5978_v12, %v13748_v59  ;;  %9162 = vset.pattern.permute.xlu1 %v16647_v39  ;;  %7986 = vrot.lane.b32.xlu0 %v14456_v58, %s9788_s8  ;;  %v5152_v59 = vmax.f32 %v4647_v53, 0.0  ;;  %v5990_v58 = vpop.permute.xlu0 %5989 }
 0x78c   :  { %5825 = vperm.xlu1 %9162, %v5682_v48  }
 0x78d   :  { %v6056_v42 = vadd.bf16 %v6040_v61, %v5960_v18  ;;  %v5268_v36 = vpack.c.bf16 %v5156_v37, %v5152_v59  ;;  %v16673_v18 = vld [vmem:[#allocation19_spill] sm:$0xff]  ;;  %v16675_v59 = vld [vmem:[#allocation5_spill] sm:$0xff] }
 0x78f   :  { %v5706_v29 = vpop.permute.xlu1 %5705  ;;  %7990 = vrot.lane.b32.xlu0 %v14493_v56, %s9788_s8  ;;  %8844 = vmatprep.mubr.bf16.mxu1 %v6056_v42  ;;  %v16671_v56 = vld [vmem:[#allocation30_spill] sm:$0xff]  ;;  %v5794_v7 = vpop.permute.xlu0 %5793 }
 0x790   :  { %9163 = vset.pattern.permute.xlu1 %v16648_v32  ;;  %8845 = vmatmul.mubr.bf16.vlgmr.msra.gmra.mxu1 %v6057_v45  ;;  %v5771_v17 = vmul.bf16 %v5706_v29, %v13798_v62  ;;  %v4637_v45 = vadd.f32 %v16671_v56, %v13882_v57  ;;  %v16674_v62 = vld [vmem:[#allocation32_spill] sm:$0xff] }
 0x791   :  { %5921 = vperm.xlu1 %9163, %v5682_v48   ;;  %v6043_v49 = vmul.bf16 %v5990_v58, %v16674_v62 }
 0x792   :  { %v5144_v33 = vmax.f32 %v4637_v45, 0.0  ;;  %v16679_v45 = vld [vmem:[#allocation36_spill] sm:$0xff] }
 0x793   :  { %v5890_v42 = vpop.permute.xlu0 %5889 }
 0x794   :  { %v5798_v40 = vpop.permute.xlu1 %5797  ;;  %v5264_v53 = vpack.c.bf16 %v5148_v24, %v5144_v33  ;;  %v16680_v33 = vld [vmem:[#allocation3_spill] sm:$0xff] }
 0x795   :  { %v5851_v27 = vmul.bf16 %v5798_v40, %v5268_v36  ;;  %9164 = vset.pattern.permute.xlu1 %v16653_v55  ;;  %v4671_v36 = vadd.f32 %v16675_v59, %v13882_v57 }
 0x796   :  { %6017 = vperm.xlu1 %9164, %v5682_v48   ;;  %v14648_v48 = vpop.f32.mrf.mxu0  ;;  %v5850_v40 = vmul.bf16 %v5794_v7, %v5264_v53 }
 0x797   :  { %v5867_v47 = vadd.bf16 %v5851_v27, %v5771_v17  ;;  %v16677_v27 = vld [vmem:[#allocation46_spill] sm:$0xff] }
 0x798   :  { %v4667_v58 = vadd.f32 %v16677_v27, %v13882_v57  ;;  %v14657_v56 = vpop.f32.mrf.mxu0 }
 0x799   :  { %v5894_v44 = vpop.permute.xlu1 %5893  ;;  %16678 = vst [vmem:[#allocation57_spill] sm:$0xff] %v14657_v56 }
 0x79a   :  { %v5947_v12 = vmul.bf16 %v5894_v44, %v16673_v18  ;;  %9165 = vset.pattern.permute.xlu1 %v16650_v60  ;;  %v5172_v44 = vmax.f32 %v4671_v36, 0.0  ;;  %v5168_v7 = vmax.f32 %v4667_v58, 0.0 }
 0x79b   :  { %5755 = vperm.xlu1 %9165, %v14460_v6  }
 0x79c   :  { %v5963_v61 = vadd.bf16 %v5947_v12, %v5867_v47  ;;  %v5946_v47 = vmul.bf16 %v5890_v42, %v16679_v45  ;;  %v16681_v42 = vld [vmem:[#allocation6_spill] sm:$0xff] }
 0x79e   :  { %v6059_v37 = vadd.bf16 %v6043_v49, %v5963_v61  ;;  %v5701_v29 = vpop.permute.xlu1 %5700  ;;  %v14662_v49 = vpop.f32.mrf.mxu0 }
 0x79f   :  { %v5770_v17 = vmul.bf16 %v5701_v29, %v16676_v4  ;;  %9167 = vset.pattern.permute.xlu1 %v16648_v32  ;;  %v5716_v61 = vpop.permute.xlu0 %5715  ;;  %v5276_v29 = vpack.c.bf16 %v5172_v44, %v5168_v7 }
 0x7a0   :  { %5933 = vperm.xlu1 %9167, %v14460_v6   ;;  %v14665_v4 = vpop.f32.mrf.mxu0  ;;  %v5773_v36 = vmul.bf16 %v5716_v61, %v16681_v42 }
 0x7a1   :  { %v5866_v24 = vadd.bf16 %v5850_v40, %v5770_v17 }
 0x7a2   :  { %v14670_v27 = vpop.f32.mrf.mxu0 }
 0x7a3   :  { %v5986_v18 = vpop.permute.xlu1 %5985  ;;  %v5962_v12 = vadd.bf16 %v5946_v47, %v5866_v24  ;;  %16682 = vst [vmem:[#allocation88_spill] sm:$0xff] %v14670_v27  ;;  %v16684_v47 = vld [vmem:[#allocation4_spill] sm:$0xff] }
 0x7a4   :  { %v6042_v62 = vmul.bf16 %v5986_v18, %v16680_v33  ;;  %9168 = vset.pattern.permute.xlu1 %v16653_v55  ;;  %v4657_v24 = vadd.f32 %v16684_v47, %v13882_v57  ;;  %v14680_v44 = vpop.f32.mrf.mxu0  ;;  %v16686_v33 = vld [vmem:[#allocation39_spill] sm:$0xff] }
 0x7a5   :  { %6029 = vperm.xlu1 %9168, %v14460_v6   ;;  %v16683_v6 = vld [vmem:[#allocation27_spill] sm:$0xff]  ;;  %16685 = vst [vmem:[#allocation15_spill] sm:$0xff] %v14680_v44  ;;  %v4862_v7 = vadd.f32 %v14409_v20, %v16686_v33  ;;  %v16693_v44 = vld [vmem:[#allocation42_spill] sm:$0xff] }
 0x7a6   :  { %v6058_v53 = vadd.bf16 %v6042_v62, %v5962_v12  ;;  %v4661_v45 = vadd.f32 %v16683_v6, %v13882_v57  ;;  %v5160_v12 = vmax.f32 %v4657_v24, 0.0  ;;  %v4852_v62 = vadd.f32 %v14360_v21, %v16686_v33  ;;  %v14688_v61 = vpop.f32.mrf.mxu0  ;;  %v16692_v21 = vld [vmem:[#allocation79_spill] sm:$0xff] }
 0x7a7   :  { %16687 = vst [vmem:[#allocation96_spill] sm:$0xff] %v14688_v61  ;;  %v16694_v61 = vld [vmem:[#allocation77_spill] sm:$0xff] }
 0x7a8   :  { %v5806_v59 = vpop.permute.xlu1 %5805  ;;  %8848 = vmatprep.mubr.bf16.mxu1 %v6058_v53  ;;  %v5165_v47 = vmax.f32 %v4852_v62, 0.0 }
 0x7a9   :  { %v5853_v40 = vmul.bf16 %v5806_v59, %v5276_v29  ;;  %9170 = vset.pattern.permute.xlu1 %v16647_v39  ;;  %8849 = vmatmul.mubr.bf16.gmra.mxu1 %v6059_v37  ;;  %v5164_v37 = vmax.f32 %v4661_v45, 0.0  ;;  %v16689_v59 = vld [vmem:[#allocation74_spill] sm:$0xff] }
 0x7aa   :  { %5833 = vperm.xlu1 %9170, %v14477_v3   ;;  %v4858_v42 = vadd.f32 %v16689_v59, %v16686_v33 }
 0x7ab   :  { %v5869_v17 = vadd.bf16 %v5853_v40, %v5773_v36  ;;  %v5272_v29 = vpack.c.bf16 %v5164_v37, %v5160_v12  ;;  %v16690_v36 = vld [vmem:[#allocation38_spill] sm:$0xff]  ;;  %v5173_v37 = vmax.f32 %v4862_v7, 0.0  ;;  %v14702_v12 = vpop.f32.mrf.mxu0 }
 0x7ac   :  { %v16691_v40 = vld [vmem:[#allocation78_spill] sm:$0xff]  ;;  %v4854_v24 = vadd.f32 %v16692_v21, %v16690_v36  ;;  %16695 = vst [vmem:[#allocation16_spill] sm:$0xff] %v14702_v12  ;;  %v5169_v56 = vmax.f32 %v4858_v42, 0.0 }
 0x7ad   :  { %v14672_v58 = vpop.permute.xlu1 %5997  ;;  %v4864_v6 = vadd.f32 %v16691_v40, %v16690_v36  ;;  %v16696_v40 = vld [vmem:[#allocation12_spill] sm:$0xff]  ;;  %v14709_v13 = vpop.f32.mrf.mxu0  ;;  %v16698_v42 = vld [vmem:[#allocation26_spill] sm:$0xff] }
 0x7ae   :  { %9171 = vset.pattern.permute.xlu1 %v16648_v32  ;;  %v4850_v62 = vadd.f32 %v16696_v40, %v16690_v36 }
 0x7af   :  { %5929 = vperm.xlu1 %9171, %v14477_v3   ;;  %v16688_v3 = vld [vmem:[#allocation41_spill] sm:$0xff]  ;;  %v5174_v21 = vmax.f32 %v4864_v6, 0.0  ;;  %v4687_v6 = vadd.f32 %v16698_v42, %v13882_v57 }
 0x7b0   :  { %v4848_v53 = vadd.f32 %v16688_v3, %v16686_v33  ;;  %v4860_v3 = vadd.f32 %v16694_v61, %v16690_v36  ;;  %v16697_v61 = vld [vmem:[#allocation43_spill] sm:$0xff] }
 0x7b1   :  { %v4691_v7 = vadd.f32 %v16697_v61, %v13882_v57 }
 0x7b2   :  { %v5711_v18 = vpop.permute.xlu1 %5710  ;;  %v5161_v59 = vmax.f32 %v4848_v53, 0.0  ;;  %v5162_v53 = vmax.f32 %v4850_v62, 0.0 }
 0x7b3   :  { %9173 = vset.pattern.permute.xlu1 %v16650_v60  ;;  %v5772_v27 = vmul.bf16 %v5711_v18, %v16693_v44  ;;  %v5166_v44 = vmax.f32 %v4854_v24, 0.0  ;;  %v5902_v18 = vpop.permute.xlu0 %5901 }
 0x7b4   :  { %5765 = vperm.xlu1 %9173, %v14521_v8   ;;  %v5273_v19 = vpack.c.bf16 %v5165_v47, %v5161_v59 }
 0x7b5   :  { %v5274_v24 = vpack.c.bf16 %v5166_v44, %v5162_v53 }
 0x7b7   :  { %v5802_v45 = vpop.permute.xlu1 %5801 }
 0x7b8   :  { %v5852_v20 = vmul.bf16 %v5802_v45, %v5272_v29  ;;  %9174 = vset.pattern.permute.xlu1 %v16647_v39  ;;  %v5170_v39 = vmax.f32 %v4860_v3, 0.0  ;;  %v5277_v45 = vpack.c.bf16 %v5173_v37, %v5169_v56  ;;  %v14715_v3 = vpop.f32.mrf.mxu0 }
 0x7b9   :  { %5845 = vperm.xlu1 %9174, %v14521_v8  }
 0x7ba   :  { %v5868_v16 = vadd.bf16 %v5852_v20, %v5772_v27  ;;  %v5278_v27 = vpack.c.bf16 %v5174_v21, %v5170_v39  ;;  %v5949_v47 = vmul.bf16 %v5902_v18, %v5277_v45  ;;  %v5188_v20 = vmax.f32 %v4691_v7, 0.0  ;;  %v14720_v62 = vpop.f32.mrf.mxu0  ;;  %v16701_v7 = vld [vmem:[#allocation65_spill] sm:$0xff] }
 0x7bc   :  { %v5898_v29 = vpop.permute.xlu1 %5897  ;;  %v5965_v56 = vadd.bf16 %v5949_v47, %v5869_v17  ;;  %v6045_v37 = vmul.bf16 %v14672_v58, %v5278_v27  ;;  %v16699_v17 = vld [vmem:[#allocation48_spill] sm:$0xff]  ;;  %v16702_v27 = vld [vmem:[#allocation45_spill] sm:$0xff]  ;;  %v16703_v47 = vld [vmem:[#allocation62_spill] sm:$0xff] }
 0x7bd   :  { %9175 = vset.pattern.permute.xlu1 %v16648_v32  ;;  %v5948_v12 = vmul.bf16 %v5898_v29, %v5273_v19  ;;  %v5184_v32 = vmax.f32 %v4687_v6, 0.0  ;;  %v4677_v42 = vadd.f32 %v16702_v27, %v13882_v57 }
 0x7be   :  { %5941 = vperm.xlu1 %9175, %v14521_v8   ;;  %v5814_v8 = vpop.permute.xlu0 %5813  ;;  %v6061_v44 = vadd.bf16 %v6045_v37, %v5965_v56  ;;  %v4878_v37 = vadd.f32 %v14473_v35, %v16686_v33  ;;  %v4870_v35 = vadd.f32 %v14435_v43, %v16690_v36 }
 0x7bf   :  { %v5964_v40 = vadd.bf16 %v5948_v12, %v5868_v16  ;;  %v5284_v21 = vpack.c.bf16 %v5188_v20, %v5184_v32  ;;  %v16700_v12 = vld [vmem:[#allocation37_spill] sm:$0xff]  ;;  %v5176_v56 = vmax.f32 %v4677_v42, 0.0 }
 0x7c0   :  { %v4681_v45 = vadd.f32 %v16700_v12, %v13882_v57 }
 0x7c1   :  { %v5994_v59 = vpop.permute.xlu1 %5993  ;;  %v5855_v29 = vmul.bf16 %v5814_v8, %v5284_v21  ;;  %v4880_v8 = vadd.f32 %v14482_v11, %v16690_v36 }
 0x7c2   :  { %v6044_v61 = vmul.bf16 %v5994_v59, %v5274_v24  ;;  %9176 = vset.pattern.permute.xlu1 %v16650_v60  ;;  %v14725_v60 = vpop.f32.mrf.mxu0  ;;  %v5180_v6 = vmax.f32 %v4681_v45, 0.0  ;;  %v4872_v24 = vadd.f32 %v14449_v50, %v16686_v33  ;;  %v4884_v59 = vadd.f32 %v14500_v63, %v16690_v36  ;;  %v5721_v32 = vpop.permute.xlu0 %5720 }
 0x7c3   :  { %5760 = vperm.xlu1 %9176, %v14497_v14   ;;  %v5186_v11 = vmax.f32 %v4880_v8, 0.0 }
 0x7c4   :  { %v6060_v19 = vadd.bf16 %v6044_v61, %v5964_v40  ;;  %v14731_v53 = vpop.f32.mrf.mxu0  ;;  %v16704_v40 = vld [vmem:[#allocation52_spill] sm:$0xff]  ;;  %v5280_v21 = vpack.c.bf16 %v5180_v6, %v5176_v56  ;;  %v5178_v6 = vmax.f32 %v4870_v35, 0.0 }
 0x7c5   :  { %v4868_v61 = vadd.f32 %v16704_v40, %v16686_v33 }
 0x7c6   :  { %v5726_v18 = vpop.permute.xlu1 %5725  ;;  %8852 = vmatprep.mubr.bf16.mxu1 %v6060_v19  ;;  %v14741_v20 = vpop.f32.mrf.mxu0  ;;  %v16705_v19 = vld [vmem:[#allocation69_spill] sm:$0xff] }
 0x7c7   :  { %v5775_v39 = vmul.bf16 %v5726_v18, %v16699_v17  ;;  %9179 = vset.pattern.permute.xlu1 %v16653_v55  ;;  %8853 = vmatmul.mubr.bf16.gmra.mxu1 %v6061_v44  ;;  %v4882_v55 = vadd.f32 %v14489_v52, %v16686_v33  ;;  %v4874_v52 = vadd.f32 %v14462_v1, %v16690_v36  ;;  %v5181_v44 = vmax.f32 %v4872_v24, 0.0  ;;  %v6002_v56 = vpop.permute.xlu0 %6001 }
 0x7c8   :  { %6033 = vperm.xlu1 %9179, %v14497_v14   ;;  %v14757_v63 = vpop.f32.mrf.mxu0  ;;  %v5190_v17 = vmax.f32 %v4884_v59, 0.0  ;;  %v5177_v45 = vmax.f32 %v4868_v61, 0.0 }
 0x7c9   :  { %v5871_v16 = vadd.bf16 %v5855_v29, %v5775_v39  ;;  %v5189_v50 = vmax.f32 %v4882_v55, 0.0  ;;  %v5185_v29 = vmax.f32 %v4878_v37, 0.0  ;;  %v16706_v39 = vld [vmem:[#allocation44_spill] sm:$0xff]  ;;  %v16707_v55 = vld [vmem:[#allocation61_spill] sm:$0xff] }
 0x7ca   :  { %v5774_v1 = vmul.bf16 %v5721_v32, %v16706_v39  ;;  %v14762_v43 = vpop.f32.mrf.mxu0  ;;  %v5286_v24 = vpack.c.bf16 %v5190_v17, %v5186_v11  ;;  %v16708_v32 = vld [vmem:[#allocation55_spill] sm:$0xff]  ;;  %v16711_v11 = vld [vmem:[#allocation40_spill] sm:$0xff] }
 0x7cb   :  { %v5910_v58 = vpop.permute.xlu1 %5909  ;;  %v5285_v27 = vpack.c.bf16 %v5189_v50, %v5185_v29 }
 0x7cc   :  { %7936 = vrot.lane.b32.xlu1 %v16701_v7, %s9788_s8  ;;  %v5182_v7 = vmax.f32 %v4874_v52, 0.0  ;;  %v16709_v52 = vld [vmem:[#allocation8_spill] sm:$0xff] }
 0x7cd   :  { %v5951_v40 = vmul.bf16 %v5910_v58, %v5285_v27  ;;  %v4707_v8 = vadd.f32 %v16709_v52, %v13882_v57  ;;  %v9258_v27 = vld [vmem:[%s15993_s12 + $0x10] sm:$0xff]  }
 0x7ce   :  { %v5282_v59 = vpack.c.bf16 %v5182_v7, %v5178_v6 }
 0x7cf   :  { %v5200_v39 = vmax.f32 %v4707_v8, 0.0 }
 0x7d0   :  { %v6006_v14 = vpop.permute.xlu1 %6005  ;;  %7940 = vrot.lane.b32.xlu1 %v16703_v47, %s9788_s8  ;;  %v5281_v47 = vpack.c.bf16 %v5181_v44, %v5177_v45  ;;  %v6046_v35 = vmul.bf16 %v6002_v56, %v5282_v59  ;;  %v16713_v56 = vld [vmem:[#allocation47_spill] sm:$0xff]  ;;  %v4892_v59 = vadd.f32 %v14526_v10, %v16686_v33  ;;  %v9260_v10 = vld [vmem:[%s15993_s12] sm:$0xff]  }
 0x7d1   :  { %v6047_v50 = vmul.bf16 %v6006_v14, %v5286_v24  ;;  %v9257_v14 = vld [vmem:[%s15993_s12 + $0x18] sm:$0xff]  }
 0x7d2   :  { %8920 = vmatprep.subr.bf16.mxu1 %v9257_v14 }
 0x7d3   :  { %8921 = vmatpush3.bf16.msra.mxu1 %v9257_v14  ;;  %v16716_v14 = vld [vmem:[#allocation73_spill] sm:$0xff] }
 0x7d4   :  { %7944 = vrot.lane.b32.xlu1 %v16705_v19, %s9788_s8  ;;  %v4711_v19 = vadd.f32 %v16708_v32, %v13882_v57  ;;  %8922 = vmatprep.subr.bf16.mxu1 %v9258_v27  ;;  %v16714_v32 = vld [vmem:[#allocation50_spill] sm:$0xff] }
 0x7d5   :  { %v5810_v18 = vpop.permute.xlu1 %5809 }
 0x7d6   :  { %v5854_v12 = vmul.bf16 %v5810_v18, %v5280_v21  ;;  %v14770_v21 = vpop.f32.mrf.mxu0  ;;  %v5967_v18 = vadd.bf16 %v5951_v40, %v5871_v16  ;;  %v5204_v29 = vmax.f32 %v4711_v19, 0.0  ;;  %v4697_v19 = vadd.f32 %v16714_v32, %v13882_v57 }
 0x7d7   :  { %8923 = vmatpush3.bf16.msra.mxu1 %v9258_v27 }
 0x7d8   :  { %v5870_v42 = vadd.bf16 %v5854_v12, %v5774_v1  ;;  %7948 = vrot.lane.b32.xlu1 %v16707_v55, %s9788_s8  ;;  %v6063_v1 = vadd.bf16 %v6047_v50, %v5967_v18  ;;  %v16710_v12 = vld [vmem:[#allocation11_spill] sm:$0xff]  ;;  %v14777_v45 = vpop.f32.mrf.mxu0  ;;  %v5292_v16 = vpack.c.bf16 %v5204_v29, %v5200_v39 }
 0x7d9   :  { %v16712_v55 = vld [vmem:[#allocation7_spill] sm:$0xff] }
 0x7da   :  { %v5906_v37 = vpop.permute.xlu1 %5905  ;;  %v4701_v6 = vadd.f32 %v16712_v55, %v13882_v57  ;;  %v14793_v24 = vpop.f32.mrf.mxu0  ;;  %v16715_v50 = vld [vmem:[#allocation67_spill] sm:$0xff] }
 0x7db   :  { %v5950_v61 = vmul.bf16 %v5906_v37, %v5281_v47  ;;  %v4902_v47 = vadd.f32 %v14549_v15, %v16686_v33  ;;  %v4888_v15 = vadd.f32 %v14505_v2, %v16686_v33  ;;  %v4904_v2 = vadd.f32 %v14556_v46, %v16690_v36 }
 0x7dc   :  { %7952 = vrot.lane.b32.xlu1 %v14439_v34, %s9788_s8  ;;  %v14779_v34 = vpop.permute.xlu0 %6013  ;;  %v14809_v18 = vpop.f32.mrf.mxu0 }
 0x7dd   :  { %v5966_v44 = vadd.bf16 %v5950_v61, %v5870_v42  ;;  %v9259_v42 = vld [vmem:[%s15993_s12 + $0x8] sm:$0xff]   ;;  %v4898_v61 = vadd.f32 %v14537_v30, %v16686_v33  ;;  %v5197_v30 = vmax.f32 %v4892_v59, 0.0  ;;  %v5206_v55 = vmax.f32 %v4904_v2, 0.0 }
 0x7de   :  { %8924 = vmatprep.subr.bf16.mxu1 %v9259_v42 }
 0x7df   :  { %v5736_v58 = vpop.permute.xlu1 %5735  ;;  %v6062_v17 = vadd.bf16 %v6046_v35, %v5966_v44  ;;  %v5196_v35 = vmax.f32 %v4701_v6, 0.0  ;;  %v5205_v44 = vmax.f32 %v4902_v47, 0.0  ;;  %v5201_v39 = vmax.f32 %v4898_v61, 0.0  ;;  %8925 = vmatpush3.bf16.msra.mxu1 %v9259_v42  ;;  %v16717_v47 = vld [vmem:[#allocation60_spill] sm:$0xff] }
 0x7e0   :  { %7956 = vrot.lane.b32.xlu1 %v16710_v12, %s9788_s8  ;;  %v5777_v40 = vmul.bf16 %v5736_v58, %v16713_v56  ;;  %v5818_v8 = vpop.permute.xlu0 %5817  ;;  %v4894_v58 = vadd.f32 %v14531_v51, %v16690_v36  ;;  %v4890_v12 = vadd.f32 %v14517_v26, %v16690_v36  ;;  %8926 = vmatprep.subr.bf16.mxu1 %v9260_v10  ;;  %v16720_v61 = vld [vmem:[#allocation28_spill] sm:$0xff] }
 0x7e1   :  { %8856 = vmatprep.mubr.bf16.mxu1 %v6062_v17  ;;  %v5192_v17 = vmax.f32 %v4697_v19, 0.0  ;;  %v4731_v56 = vadd.f32 %v16717_v47, %v13882_v57  ;;  %v16723_v47 = vld [vmem:[#allocation49_spill] sm:$0xff] }
 0x7e2   :  { %8857 = vmatmul.mubr.bf16.gmra.mxu1 %v6063_v1  ;;  %v5193_v1 = vmax.f32 %v4888_v15, 0.0  ;;  %v5198_v46 = vmax.f32 %v4894_v58, 0.0  ;;  %v5194_v32 = vmax.f32 %v4890_v12, 0.0  ;;  %v4727_v15 = vadd.f32 %v16720_v61, %v13882_v57 }
 0x7e3   :  { %v5288_v51 = vpack.c.bf16 %v5196_v35, %v5192_v17  ;;  %8927 = vmatpush3.bf16.msra.mxu1 %v9260_v10  ;;  %v5220_v2 = vmax.f32 %v4731_v56, 0.0 }
 0x7e4   :  { %v5822_v7 = vpop.permute.xlu1 %5821  ;;  %7960 = vrot.lane.b32.xlu1 %v16711_v11, %s9788_s8  ;;  %v14821_v11 = vpop.f32.mrf.mxu0  ;;  %v5289_v27 = vpack.c.bf16 %v5197_v30, %v5193_v1  ;;  %v5290_v30 = vpack.c.bf16 %v5198_v46, %v5194_v32  ;;  %v5216_v10 = vmax.f32 %v4727_v15, 0.0  ;;  %v16721_v46 = vld [vmem:[#allocation13_spill] sm:$0xff]  ;;  %v16726_v32 = vld [vmem:[#allocation14_spill] sm:$0xff] }
 0x7e5   :  { %v5857_v37 = vmul.bf16 %v5822_v7, %v5292_v16  ;;  %v4900_v16 = vadd.f32 %v14543_v5, %v16690_v36  ;;  %v5293_v7 = vpack.c.bf16 %v5205_v44, %v5201_v39  ;;  %v5914_v6 = vpop.permute.xlu0 %5913  ;;  %v5856_v26 = vmul.bf16 %v5818_v8, %v5288_v51  ;;  %v16719_v5 = vld [vmem:[#allocation71_spill] sm:$0xff] }
 0x7e6   :  { %v5952_v35 = vmul.bf16 %v5914_v6, %v5289_v27  ;;  %v5300_v51 = vpack.c.bf16 %v5220_v2, %v5216_v10  ;;  %v16728_v10 = vld [vmem:[#allocation51_spill] sm:$0xff] }
 0x7e7   :  { %v5873_v52 = vadd.bf16 %v5857_v37, %v5777_v40  ;;  %v16718_v37 = vld [vmem:[#allocation56_spill] sm:$0xff]  ;;  %v5202_v19 = vmax.f32 %v4900_v16, 0.0 }
 0x7e8   :  { %7964 = vrot.lane.b32.xlu1 %v16715_v50, %s9788_s8  ;;  %v14830_v50 = vpop.f32.mrf.mxu0 }
 0x7e9   :  { %v5918_v29 = vpop.permute.xlu1 %5917  ;;  %v5294_v58 = vpack.c.bf16 %v5206_v55, %v5202_v19  ;;  %v16722_v55 = vld [vmem:[#allocation9_spill] sm:$0xff] }
 0x7ea   :  { %v5953_v40 = vmul.bf16 %v5918_v29, %v5293_v7  ;;  %v14834_v1 = vpop.f32.mrf.mxu0 }
 0x7eb   :  { %v6049_v12 = vmul.bf16 %v14779_v34, %v5294_v58 }
 0x7ec   :  { %7968 = vrot.lane.b32.xlu1 %v16716_v14, %s9788_s8  ;;  %v5969_v8 = vadd.bf16 %v5953_v40, %v5873_v52  ;;  %v5746_v14 = vpop.permute.xlu0 %5745  ;;  %v14839_v52 = vpop.f32.mrf.mxu0 }
 0x7ed   :  { %v5779_v6 = vmul.bf16 %v5746_v14, %v16722_v55  ;;  %v4920_v14 = vadd.f32 %v14600_v9, %v16690_v36 }
 0x7ee   :  { %v5731_v42 = vpop.permute.xlu1 %5730  ;;  %v6065_v7 = vadd.bf16 %v6049_v12, %v5969_v8  ;;  %v14844_v34 = vpop.f32.mrf.mxu0  ;;  %v4918_v8 = vadd.f32 %v14595_v54, %v16686_v33  ;;  %v4910_v54 = vadd.f32 %v14570_v38, %v16690_v36 }
 0x7ef   :  { %v5776_v59 = vmul.bf16 %v5731_v42, %v16718_v37  ;;  %v16725_v37 = vld [vmem:[#allocation29_spill] sm:$0xff] }
 0x7f0   :  { %7972 = vrot.lane.b32.xlu1 %v16719_v5, %s9788_s8  ;;  %v14852_v5 = vpop.f32.mrf.mxu0 }
 0x7f1   :  { %v5872_v44 = vadd.bf16 %v5856_v26, %v5776_v59  ;;  %v16724_v26 = vld [vmem:[#allocation54_spill] sm:$0xff]  ;;  %v4717_v59 = vadd.f32 %v16725_v37, %v13882_v57 }
 0x7f2   :  { %v4721_v40 = vadd.f32 %v16724_v26, %v13882_v57  ;;  %v14860_v58 = vpop.f32.mrf.mxu0  ;;  %v4908_v57 = vadd.f32 %v14563_v28, %v16686_v33 }
 0x7f3   :  { %v6010_v29 = vpop.permute.xlu1 %6009  ;;  %v5968_v17 = vadd.bf16 %v5952_v35, %v5872_v44  ;;  %v5208_v15 = vmax.f32 %v4717_v59, 0.0  ;;  %v4912_v35 = vadd.f32 %v14578_v31, %v16686_v33  ;;  %v16727_v44 = vld [vmem:[#allocation87_spill] sm:$0xff] }
 0x7f4   :  { %v6048_v39 = vmul.bf16 %v6010_v29, %v5290_v30  ;;  %7976 = vrot.lane.b32.xlu1 %v14605_v22, %s9788_s8  ;;  %v5212_v19 = vmax.f32 %v4721_v40, 0.0  ;;  %v4922_v30 = vadd.f32 %v14610_v23, %v16686_v33  ;;  %v4924_v29 = vadd.f32 %v14617_v41, %v16690_v36  ;;  %v14873_v28 = vpop.f32.mrf.mxu0 }
 0x7f5   :  { %v5213_v31 = vmax.f32 %v4912_v35, 0.0  ;;  %v5217_v41 = vmax.f32 %v4918_v8, 0.0  ;;  %v5210_v40 = vmax.f32 %v4910_v54, 0.0 }
 0x7f6   :  { %v6064_v16 = vadd.bf16 %v6048_v39, %v5968_v17  ;;  %v5296_v2 = vpack.c.bf16 %v5212_v19, %v5208_v15  ;;  %v4914_v39 = vadd.f32 %v14589_v25, %v16690_v36  ;;  %v14877_v26 = vpop.f32.mrf.mxu0 }
 0x7f8   :  { %v5830_v27 = vpop.permute.xlu1 %5829  ;;  %7980 = vrot.lane.b32.xlu1 %v16721_v46, %s9788_s8  ;;  %8860 = vmatprep.mubr.bf16.mxu1 %v6064_v16  ;;  %v5221_v16 = vmax.f32 %v4922_v30, 0.0  ;;  %v5214_v55 = vmax.f32 %v4914_v39, 0.0  ;;  %v14879_v19 = vpop.f32.mrf.mxu0  ;;  %v16730_v39 = vld [vmem:[#allocation64_spill] sm:$0xff] }
 0x7f9   :  { %v5859_v42 = vmul.bf16 %v5830_v27, %v5300_v51  ;;  %8861 = vmatmul.mubr.bf16.gmra.mxu1 %v6065_v7  ;;  %v5209_v7 = vmax.f32 %v4908_v57, 0.0  ;;  %v5222_v27 = vmax.f32 %v4924_v29, 0.0 }
 0x7fb   :  { %v5875_v22 = vadd.bf16 %v5859_v42, %v5779_v6  ;;  %v5297_v46 = vpack.c.bf16 %v5213_v31, %v5209_v7  ;;  %v5926_v6 = vpop.permute.xlu0 %5925  ;;  %v5218_v42 = vmax.f32 %v4920_v14, 0.0  ;;  %v4942_v14 = vadd.f32 %v14662_v49, %v16686_v33  ;;  %v16733_v49 = vld [vmem:[#allocation57_spill] sm:$0xff] }
 0x7fc   :  { %7984 = vrot.lane.b32.xlu1 %v16723_v47, %s9788_s8  ;;  %v5301_v47 = vpack.c.bf16 %v5221_v16, %v5217_v41  ;;  %v4932_v7 = vadd.f32 %v14636_v0, %v16686_v33  ;;  %v4944_v41 = vadd.f32 %v14665_v4, %v16690_v36  ;;  %v16734_v0 = vld [vmem:[#allocation59_spill] sm:$0xff] }
 0x7fd   :  { %v6022_v56 = vpop.permute.xlu1 %6021  ;;  %v5302_v37 = vpack.c.bf16 %v5222_v27, %v5218_v42  ;;  %v16731_v27 = vld [vmem:[#allocation83_spill] sm:$0xff]  ;;  %v4940_v42 = vadd.f32 %v16733_v49, %v16690_v36 }
 0x7fe   :  { %v5955_v59 = vmul.bf16 %v5926_v6, %v5301_v47  ;;  %v5237_v47 = vmax.f32 %v4942_v14, 0.0  ;;  %v5238_v4 = vmax.f32 %v4944_v41, 0.0 }
 0x7ff   :  { %v6051_v38 = vmul.bf16 %v6022_v56, %v5302_v37  ;;  %v5838_v30 = vpop.permute.xlu0 %5837 }
 0x800   :  { %7988 = vrot.lane.b32.xlu1 %v16726_v32, %s9788_s8  ;;  %v5298_v32 = vpack.c.bf16 %v5214_v55, %v5210_v40  ;;  %v16732_v55 = vld [vmem:[#allocation80_spill] sm:$0xff]  ;;  %v4930_v40 = vadd.f32 %v16734_v0, %v16690_v36 }
 0x801   :  { %v4934_v6 = vadd.f32 %v16732_v55, %v16690_v36 }
 0x802   :  { %v5741_v61 = vpop.permute.xlu1 %5740 }
 0x803   :  { %v5778_v12 = vmul.bf16 %v5741_v61, %v16728_v10  ;;  %v5971_v61 = vadd.bf16 %v5955_v59, %v5875_v22 }
 0x804   :  { %7992 = vrot.lane.b32.xlu1 %v16727_v44, %s9788_s8 }
 0x805   :  { %v6067_v8 = vadd.bf16 %v6051_v38, %v5971_v61  ;;  %v16736_v38 = vld [vmem:[#allocation66_spill] sm:$0xff] }
 0x807   :  { %v5826_v17 = vpop.permute.xlu1 %5825 }
 0x808   :  { %v5858_v23 = vmul.bf16 %v5826_v17, %v5296_v2  ;;  %v14881_v2 = vpop.f32.mrf.mxu0  ;;  %v16729_v17 = vld [vmem:[#allocation10_spill] sm:$0xff] }
 0x809   :  { %v5861_v31 = vmul.bf16 %v5838_v30, %v16729_v17  ;;  %v5234_v30 = vmax.f32 %v4940_v42, 0.0 }
 0x80a   :  { %v5874_v51 = vadd.bf16 %v5858_v23, %v5778_v12  ;;  %v14885_v12 = vpop.f32.mrf.mxu0 }
 0x80c   :  { %v5922_v25 = vpop.permute.xlu1 %5921  ;;  %v14887_v56 = vpop.f32.mrf.mxu0 }
 0x80d   :  { %v5954_v9 = vmul.bf16 %v5922_v25, %v5297_v46  ;;  %v4928_v46 = vadd.f32 %v16731_v27, %v16686_v33  ;;  %v5751_v25 = vpop.permute.xlu0 %5750 }
 0x80e   :  { %v14893_v54 = vpop.f32.mrf.mxu0 }
 0x80f   :  { %v5970_v35 = vadd.bf16 %v5954_v9, %v5874_v51  ;;  %v4938_v51 = vadd.f32 %v14648_v48, %v16686_v33  ;;  %v5229_v9 = vmax.f32 %v4932_v7, 0.0 }
 0x810   :  { %v14907_v37 = vpop.f32.mrf.mxu0 }
 0x811   :  { %v6018_v15 = vpop.permute.xlu1 %6017  ;;  %v5233_v59 = vmax.f32 %v4938_v51, 0.0 }
 0x812   :  { %v6050_v44 = vmul.bf16 %v6018_v15, %v5298_v32  ;;  %v16735_v32 = vld [vmem:[#allocation35_spill] sm:$0xff] }
 0x813   :  { %v5780_v61 = vmul.bf16 %v5751_v25, %v16735_v32  ;;  %v16739_v32 = vld [vmem:[#allocation96_spill] sm:$0xff] }
 0x814   :  { %v6066_v57 = vadd.bf16 %v6050_v44, %v5970_v35  ;;  %v5225_v35 = vmax.f32 %v4928_v46, 0.0  ;;  %v5230_v44 = vmax.f32 %v4934_v6, 0.0 }
 0x816   :  { %v5756_v29 = vpop.permute.xlu1 %5755  ;;  %8864 = vmatprep.mubr.bf16.mxu1 %v6066_v57  ;;  %v5309_v57 = vpack.c.bf16 %v5237_v47, %v5233_v59  ;;  %v5305_v17 = vpack.c.bf16 %v5229_v9, %v5225_v35  ;;  %v16738_v59 = vld [vmem:[#allocation31_spill] sm:$0xff]  ;;  %v16740_v35 = vld [vmem:[#allocation88_spill] sm:$0xff] }
 0x817   :  { %v5781_v10 = vmul.bf16 %v5756_v29, %v16730_v39  ;;  %8865 = vmatmul.mubr.bf16.gmra.mxu1 %v6067_v8  ;;  %v5226_v29 = vmax.f32 %v4930_v40, 0.0  ;;  %v5310_v39 = vpack.c.bf16 %v5238_v4, %v5234_v30 }
 0x819   :  { %v5877_v23 = vadd.bf16 %v5861_v31, %v5781_v10  ;;  %v14911_v31 = vpop.f32.mrf.mxu0  ;;  %v6026_v10 = vpop.permute.xlu0 %6025  ;;  %v5306_v27 = vpack.c.bf16 %v5230_v44, %v5226_v29  ;;  %v4948_v44 = vadd.f32 %v16740_v35, %v16686_v33  ;;  %v16741_v29 = vld [vmem:[#allocation16_spill] sm:$0xff] }
 0x81b   :  { %v5934_v22 = vpop.permute.xlu1 %5933  ;;  %v14913_v55 = vpop.f32.mrf.mxu0  ;;  %v6052_v25 = vmul.bf16 %v6026_v10, %v5306_v27  ;;  %v4964_v10 = vadd.f32 %v14725_v60, %v16690_v36 }
 0x81c   :  { %v5957_v14 = vmul.bf16 %v5934_v22, %v5309_v57  ;;  %v4962_v22 = vadd.f32 %v14720_v62, %v16686_v33 }
 0x81d   :  { %v14915_v0 = vpop.f32.mrf.mxu0 }
 0x81e   :  { %v5973_v46 = vadd.bf16 %v5957_v14, %v5877_v23  ;;  %v4952_v23 = vadd.f32 %v16739_v32, %v16686_v33  ;;  %v5253_v30 = vmax.f32 %v4962_v22, 0.0  ;;  %v5241_v14 = vmax.f32 %v4948_v44, 0.0  ;;  %v16744_v22 = vld [vmem:[#allocation53_spill] sm:$0xff] }
 0x81f   :  { %v14919_v9 = vpop.f32.mrf.mxu0 }
 0x820   :  { %v6030_v16 = vpop.permute.xlu1 %6029 }
 0x821   :  { %v6053_v41 = vmul.bf16 %v6030_v16, %v5310_v39  ;;  %v14929_v57 = vpop.f32.mrf.mxu0 }
 0x823   :  { %v6069_v47 = vadd.bf16 %v6053_v41, %v5973_v46  ;;  %v14939_v41 = vpop.f32.mrf.mxu0 }
 0x825   :  { %v5834_v48 = vpop.permute.xlu1 %5833 }
 0x826   :  { %v5860_v15 = vmul.bf16 %v5834_v48, %v16736_v38  ;;  %v16737_v48 = vld [vmem:[#allocation58_spill] sm:$0xff]  ;;  %v4958_v38 = vadd.f32 %v14709_v13, %v16686_v33  ;;  %v4960_v33 = vadd.f32 %v14715_v3, %v16690_v36 }
 0x828   :  { %v5876_v8 = vadd.bf16 %v5860_v15, %v5780_v61  ;;  %v5842_v61 = vpop.permute.xlu0 %5841  ;;  %v5249_v39 = vmax.f32 %v4958_v38, 0.0 }
 0x82a   :  { %v5930_v7 = vpop.permute.xlu1 %5929 }
 0x82b   :  { %v5956_v51 = vmul.bf16 %v5930_v7, %v5305_v17  ;;  %v4954_v17 = vadd.f32 %v16741_v29, %v16690_v36  ;;  %v16742_v7 = vld [vmem:[#allocation15_spill] sm:$0xff] }
 0x82c   :  { %v4950_v13 = vadd.f32 %v16742_v7, %v16690_v36  ;;  %v5938_v27 = vpop.permute.xlu0 %5937 }
 0x82d   :  { %v5972_v49 = vadd.bf16 %v5956_v51, %v5876_v8  ;;  %v5245_v8 = vmax.f32 %v4952_v23, 0.0  ;;  %v5317_v51 = vpack.c.bf16 %v5253_v30, %v5249_v39 }
 0x82f   :  { %v5766_v6 = vpop.permute.xlu1 %5765  ;;  %v6068_v42 = vadd.bf16 %v6052_v25, %v5972_v49  ;;  %v5246_v25 = vmax.f32 %v4954_v17, 0.0  ;;  %v5313_v49 = vpack.c.bf16 %v5245_v8, %v5241_v14 }
 0x830   :  { %v5783_v16 = vmul.bf16 %v5766_v6, %v16737_v48  ;;  %v5254_v6 = vmax.f32 %v4964_v10, 0.0  ;;  %v5242_v48 = vmax.f32 %v4950_v13, 0.0  ;;  %v6038_v36 = vpop.permute.xlu0 %6037 }
 0x831   :  { %8868 = vmatprep.mubr.bf16.mxu1 %v6068_v42  ;;  %v16743_v42 = vld [vmem:[#allocation63_spill] sm:$0xff] }
 0x832   :  { %8869 = vmatmul.mubr.bf16.gmra.mxu1 %v6069_v47  ;;  %v5862_v47 = vmul.bf16 %v5842_v61, %v16743_v42  ;;  %v5314_v23 = vpack.c.bf16 %v5246_v25, %v5242_v48 }
 0x834   :  { %v5846_v40 = vpop.permute.xlu1 %5845 }
 0x835   :  { %v5863_v4 = vmul.bf16 %v5846_v40, %v16738_v59  ;;  %v14943_v59 = vpop.f32.mrf.mxu0 }
 0x837   :  { %v5879_v15 = vadd.bf16 %v5863_v4, %v5783_v16  ;;  %v5250_v16 = vmax.f32 %v4960_v33, 0.0  ;;  %v5958_v4 = vmul.bf16 %v5938_v27, %v5313_v49  ;;  %v14945_v8 = vpop.f32.mrf.mxu0 }
 0x839   :  { %v5942_v62 = vpop.permute.xlu1 %5941  ;;  %v5318_v3 = vpack.c.bf16 %v5254_v6, %v5250_v16  ;;  %v14947_v17 = vpop.f32.mrf.mxu0 }
 0x83a   :  { %v5959_v40 = vmul.bf16 %v5942_v62, %v5317_v51 }
 0x83b   :  { %v6055_v29 = vmul.bf16 %v6038_v36, %v5318_v3  ;;  %v8890_v39 = vpop.f32.mrf.mxu0 }
 0x83c   :  { %v5975_v38 = vadd.bf16 %v5959_v40, %v5879_v15  ;;  %v14953_v15 = vld [vmem:[%s15994_s11] ss:$0 sm:$0xff] }
 0x83d   :  { %v6543_v14 = vpop.f32.mrf.mxu0 }
 0x83e   :  { %v5761_v46 = vpop.permute.xlu1 %5760  ;;  %v6071_v62 = vadd.bf16 %v6055_v29, %v5975_v38 }
 0x83f   :  { %v5782_v60 = vmul.bf16 %v5761_v46, %v16744_v22  ;;  %v8891_v25 = vpop.f32.mrf.mxu0 }
 0x841   :  { %v5878_v32 = vadd.bf16 %v5862_v47, %v5782_v60  ;;  %v6546_v60 = vpop.f32.mrf.mxu0 }
 0x843   :  { %v6034_v35 = vpop.permute.xlu1 %6033  ;;  %v5974_v44 = vadd.bf16 %v5958_v4, %v5878_v32 }
 0x844   :  { %v6054_v30 = vmul.bf16 %v6034_v35, %v5314_v23 }
 0x846   :  { %v6070_v61 = vadd.bf16 %v6054_v30, %v5974_v44 }
 0x848   :  { %8872 = vmatprep.mubr.bf16.mxu1 %v6070_v61 }
 0x849   :  { %8873 = vmatmul.mubr.bf16.gmra.mxu1 %v6071_v62 }
 0x850   :  { %v8846_v10 = vpop.f32.mrf.mxu1 }
 0x851   :  { %v6344_v7 = vadd.f32 %v8846_v10, %v14731_v53 }
 0x852   :  { %v6335_v13 = vpop.f32.mrf.mxu1 }
 0x853   :  { %v6672_v27 = vadd.f32 %v8890_v39, %v6344_v7  ;;  %v6336_v33 = vadd.f32 %v6335_v13, %v14741_v20  ;;  %v8894_v7 = vpop.f32.mrf.mxu0 }
 0x854   :  { %v8847_v51 = vpop.f32.mrf.mxu1 }
 0x855   :  { %v14957_v49 = vadd.f32 %v14953_v15, %v6672_v27  ;;  %v6670_v46 = vadd.f32 %v6543_v14, %v6336_v33  ;;  %v6347_v6 = vadd.f32 %v8847_v51, %v14757_v63  ;;  %v6559_v33 = vpop.f32.mrf.mxu0 }
 0x856   :  { %v6338_v42 = vpop.f32.mrf.mxu1 }
 0x857   :  { %v6743_v53 = vand.u32 2147483647, %v14957_v49  ;;  %v14962_v47 = vadd.f32 %v14953_v15, %v6670_v46  ;;  %v6673_v40 = vadd.f32 %v8891_v25, %v6347_v6  ;;  %v6339_v22 = vadd.f32 %v6338_v42, %v14762_v43 }
 0x858   :  { %v7159_v29 = vmax.f32 %v14957_v49, 0.0 }
 0x859   :  { %v6775_v48 = vsub.f32 0.0, %v6743_v53  ;;  %v6741_v20 = vand.u32 2147483647, %v14962_v47  ;;  %v14967_v16 = vadd.f32 %v14953_v15, %v6673_v40  ;;  %v6671_v4 = vadd.f32 %v6546_v60, %v6339_v22 }
 0x85a   :  { %v7157_v35 = vmax.f32 %v14962_v47, 0.0 }
 0x85b   :  { %v6809_v32 = vmul.f32 1.442695, %v6775_v48  ;;  %v6773_v23 = vsub.f32 0.0, %v6741_v20  ;;  %v6744_v63 = vand.u32 2147483647, %v14967_v16  ;;  %v14971_v36 = vadd.f32 %v14953_v15, %v6671_v4  ;;  %v8895_v48 = vpop.f32.mrf.mxu0 }
 0x85c   :  { %v7160_v43 = vmax.f32 %v14967_v16, 0.0 }
 0x85d   :  { %9517 = vpow2.f32 %v6809_v32  ;;  %v6805_v3 = vmul.f32 1.442695, %v6773_v23  ;;  %v6776_v38 = vsub.f32 0.0, %v6744_v63  ;;  %v6742_v44 = vand.u32 2147483647, %v14971_v36 }
 0x85e   :  { %v7158_v30 = vmax.f32 %v14971_v36, 0.0  ;;  %v7222_v10 = vpack.c.bf16 %v7160_v43, %v7159_v29 }
 0x85f   :  { %9519 = vpow2.f32 %v6805_v3  ;;  %v6811_v61 = vmul.f32 1.442695, %v6776_v38  ;;  %v6774_v62 = vsub.f32 0.0, %v6742_v44 }
 0x860   :  { %v7221_v39 = vpack.c.bf16 %v7158_v30, %v7157_v35 }
 0x861   :  { %9521 = vpow2.f32 %v6811_v61  ;;  %v6807_v14 = vmul.f32 1.442695, %v6774_v62  ;;  %v6562_v62 = vpop.f32.mrf.mxu0 }
 0x862   :  { %8928 = vmatprep.mubr.msk.bf16.mxu1 %vm7276_vm6, %v7221_v39 }
 0x863   :  { %8929 = vmatmul.mubr.msk.bf16.vlgmr.msra.gmra.mxu1 %vm7276_vm6, %v7222_v10  ;;  %9523 = vpow2.f32 %v6807_v14 }
 0x869   :  { %v8850_v13 = vpop.f32.mrf.mxu1 }
 0x86a   :  { %v14988_v27 = vpop.eup %9517  ;;  %v6360_v51 = vadd.f32 %v8850_v13, %v14770_v21 }
 0x86b   :  { %v6351_v25 = vpop.f32.mrf.mxu1  ;;  %v6887_v46 = vadd.f32 1.0, %v14988_v27  ;;  %v6890_v44 = vmul.f32 -0.5, %v14988_v27 }
 0x86c   :  { %v14992_v6 = vpop.eup %9519  ;;  %v6676_v42 = vadd.f32 %v8894_v7, %v6360_v51  ;;  %v6352_v53 = vadd.f32 %v6351_v25, %v14777_v45  ;;  %v6893_v7 = vand.u32 2147483647, %v14988_v27 }
 0x86d   :  { %v8851_v40 = vpop.f32.mrf.mxu1  ;;  %9525 = vlog2.f32 %v6887_v46  ;;  %v6869_v22 = vadd.f32 1.0, %v14992_v6 }
 0x86e   :  { %v14996_v60 = vpop.eup %9521  ;;  %v14999_v20 = vadd.f32 %v14953_v15, %v6676_v42  ;;  %v6674_v4 = vadd.f32 %v6559_v33, %v6352_v53  ;;  %v6363_v21 = vadd.f32 %v8851_v40, %v14793_v24  ;;  %v6891_v42 = vadd.f32 1.0, %v6890_v44 }
 0x86f   :  { %v6354_v32 = vpop.f32.mrf.mxu1  ;;  %9527 = vlog2.f32 %v6869_v22  ;;  %v6896_v23 = vadd.f32 1.0, %v14996_v60  ;;  %vm6894_vm11 = vcmp.lt.f32.partialorder %v6893_v7, 0.0004427343 }
 0x870   :  { %v6747_v63 = vand.u32 2147483647, %v14999_v20  ;;  %v15005_v45 = vadd.f32 %v14953_v15, %v6674_v4  ;;  %v6677_v3 = vadd.f32 %v8895_v48, %v6363_v21  ;;  %v6355_v38 = vadd.f32 %v6354_v32, %v14809_v18  ;;  %v15009_v61 = vpop.eup %9523 }
 0x871   :  { %9529 = vlog2.f32 %v6896_v23  ;;  %v6872_v18 = vmul.f32 -0.5, %v14992_v6  ;;  %v6878_v53 = vadd.f32 1.0, %v15009_v61  ;;  %v6899_v32 = vmul.f32 -0.5, %v14996_v60 }
 0x872   :  { %v6779_v39 = vsub.f32 0.0, %v6747_v63  ;;  %v6745_v24 = vand.u32 2147483647, %v15005_v45  ;;  %v15013_v10 = vadd.f32 %v14953_v15, %v6677_v3  ;;  %v6675_v14 = vadd.f32 %v6562_v62, %v6355_v38 }
 0x873   :  { %v7161_v25 = vmax.f32 %v15005_v45, 0.0  ;;  %v7163_v23 = vmax.f32 %v14999_v20, 0.0  ;;  %v6873_v3 = vadd.f32 1.0, %v6872_v18 }
 0x874   :  { %v6817_v13 = vmul.f32 1.442695, %v6779_v39  ;;  %v6777_v33 = vsub.f32 0.0, %v6745_v24  ;;  %v6748_v51 = vand.u32 2147483647, %v15013_v10  ;;  %v15020_v46 = vadd.f32 %v14953_v15, %v6675_v14 }
 0x875   :  { %v7164_v48 = vmax.f32 %v15013_v10, 0.0  ;;  %v6875_v24 = vand.u32 2147483647, %v14992_v6 }
 0x876   :  { %9531 = vpow2.f32 %v6817_v13  ;;  %v6813_v40 = vmul.f32 1.442695, %v6777_v33  ;;  %v6780_v22 = vsub.f32 0.0, %v6748_v51  ;;  %v6746_v4 = vand.u32 2147483647, %v15020_v46 }
 0x877   :  { %v7162_v21 = vmax.f32 %v15020_v46, 0.0  ;;  %9533 = vlog2.f32 %v6878_v53  ;;  %v7224_v39 = vpack.c.bf16 %v7164_v48, %v7163_v23  ;;  %v6892_v33 = vmul.f32 %v14988_v27, %v6891_v42 }
 0x878   :  { %9535 = vpow2.f32 %v6813_v40  ;;  %v6819_v63 = vmul.f32 1.442695, %v6780_v22  ;;  %v6778_v38 = vsub.f32 0.0, %v6746_v4  ;;  %v6900_v51 = vadd.f32 1.0, %v6899_v32 }
 0x879   :  { %v7223_v44 = vpack.c.bf16 %v7162_v21, %v7161_v25  ;;  %v6874_v53 = vmul.f32 %v14992_v6, %v6873_v3  ;;  %v6902_v40 = vand.u32 2147483647, %v14996_v60  ;;  %vm6876_vm5 = vcmp.lt.f32.partialorder %v6875_v24, 0.0004427343 }
 0x87a   :  { %v9526_v62 = vpop.eup %9525  ;;  %9537 = vpow2.f32 %v6819_v63  ;;  %v6815_v14 = vmul.f32 1.442695, %v6778_v38  ;;  %v6881_v63 = vmul.f32 -0.5, %v15009_v61  ;;  %v6901_v32 = vmul.f32 %v14996_v60, %v6900_v51 }
 0x87b   :  { %8932 = vmatprep.mubr.msk.bf16.mxu1 %vm7276_vm6, %v7223_v44  ;;  %v6889_v13 = vmul.f32 0.6931472, %v9526_v62  ;;  %vm6903_vm12 = vcmp.lt.f32.partialorder %v6902_v40, 0.0004427343  ;;  %v6884_v62 = vand.u32 2147483647, %v15009_v61 }
 0x87c   :  { %v9528_v18 = vpop.eup %9527  ;;  %8933 = vmatmul.mubr.msk.bf16.gmra.mxu1 %vm7276_vm6, %v7224_v39  ;;  %9539 = vpow2.f32 %v6815_v14  ;;  %v6882_v3 = vadd.f32 1.0, %v6881_v63  ;;  %v8898_v39 = vpop.f32.mrf.mxu0 }
 0x87d   :  { %v6895_v22 = vsel %vm6894_vm11, %v6892_v33, %v6889_v13  ;;  %v6871_v4 = vmul.f32 0.6931472, %v9528_v18  ;;  %vm6885_vm7 = vcmp.lt.f32.partialorder %v6884_v62, 0.0004427343 }
 0x87e   :  { %v9530_v38 = vpop.eup %9529  ;;  %v7191_v44 = vadd.f32 %v7159_v29, %v6895_v22  ;;  %v6883_v33 = vmul.f32 %v15009_v61, %v6882_v3 }
 0x87f   :  { %v6877_v27 = vsel %vm6876_vm5, %v6874_v53, %v6871_v4  ;;  %v6898_v42 = vmul.f32 0.6931472, %v9530_v38  ;;  %v6575_v53 = vpop.f32.mrf.mxu0 }
 0x880   :  { %7682 = vrot.lane.b32.xlu0 %v7191_v44, %s9789_s5  ;;  %v7189_v6 = vadd.f32 %v7157_v35, %v6877_v27 }
 0x881   :  { %v6904_v7 = vsel %vm6903_vm12, %v6901_v32, %v6898_v42  ;;  %v8899_v42 = vpop.f32.mrf.mxu0 }
 0x882   :  { %7678 = vrot.lane.b32.xlu1 %v7189_v6, %s9789_s5  ;;  %v7192_v24 = vadd.f32 %v7160_v43, %v6904_v7 }
 0x883   :  { %v9532_v49 = vpop.eup %9531 }
 0x884   :  { %v9534_v29 = vpop.eup %9533  ;;  %v6923_v60 = vadd.f32 1.0, %v9532_v49  ;;  %v6926_v38 = vmul.f32 -0.5, %v9532_v49  ;;  %v6929_v7 = vand.u32 2147483647, %v9532_v49 }
 0x885   :  { %v9536_v14 = vpop.eup %9535  ;;  %v6880_v13 = vmul.f32 0.6931472, %v9534_v29 }
 0x886   :  { %7684 = vrot.lane.b32.xlu1 %v7192_v24, %s9789_s5  ;;  %9541 = vlog2.f32 %v6923_v60  ;;  %v6905_v47 = vadd.f32 1.0, %v9536_v14  ;;  %v6908_v27 = vmul.f32 -0.5, %v9536_v14  ;;  %v6911_v3 = vand.u32 2147483647, %v9536_v14 }
 0x887   :  { %v15055_v35 = vpop.eup %9537  ;;  %v8854_v51 = vpop.f32.mrf.mxu1  ;;  %v6886_v18 = vsel %vm6885_vm7, %v6883_v33, %v6880_v13  ;;  %vm15080_vm9 = vcmp.lt.f32.partialorder %v6929_v7, 0.0004427343 }
 0x888   :  { %v6376_v40 = vadd.f32 %v8854_v51, %v14821_v11  ;;  %v7190_v16 = vadd.f32 %v7158_v30, %v6886_v18  ;;  %9543 = vlog2.f32 %v6905_v47  ;;  %v6932_v22 = vadd.f32 1.0, %v15055_v35  ;;  %v6578_v33 = vpop.f32.mrf.mxu0 }
 0x889   :  { %v6367_v43 = vpop.f32.mrf.mxu1  ;;  %v15061_v61 = vpop.eup %9539  ;;  %v6909_v60 = vadd.f32 1.0, %v6908_v27  ;;  %v6935_v13 = vmul.f32 -0.5, %v15055_v35  ;;  %vm15084_vm3 = vcmp.lt.f32.partialorder %v6911_v3, 0.0004427343 }
 0x88a   :  { %v6680_v4 = vadd.f32 %v8898_v39, %v6376_v40  ;;  %v6368_v63 = vadd.f32 %v6367_v43, %v14830_v50  ;;  %7680 = vrot.lane.b32.xlu1 %v7190_v16, %s9789_s5  ;;  %9545 = vlog2.f32 %v6932_v22  ;;  %v6914_v11 = vadd.f32 1.0, %v15061_v61 }
 0x88b   :  { %v8855_v44 = vpop.f32.mrf.mxu1  ;;  %v6927_v39 = vadd.f32 1.0, %v6926_v38  ;;  %v6936_v27 = vadd.f32 1.0, %v6935_v13 }
 0x88c   :  { %v15067_v36 = vadd.f32 %v14953_v15, %v6680_v4  ;;  %v6678_v30 = vadd.f32 %v6575_v53, %v6368_v63  ;;  %v6379_v32 = vadd.f32 %v8855_v44, %v14834_v1  ;;  %9547 = vlog2.f32 %v6914_v11 }
 0x88d   :  { %v6370_v6 = vpop.f32.mrf.mxu1  ;;  %v6928_v4 = vmul.f32 %v9532_v49, %v6927_v39  ;;  %v6910_v44 = vmul.f32 %v9536_v14, %v6909_v60  ;;  %v6917_v11 = vmul.f32 -0.5, %v15061_v61 }
 0x88e   :  { %v6751_v50 = vand.u32 2147483647, %v15067_v36  ;;  %v15072_v62 = vadd.f32 %v14953_v15, %v6678_v30  ;;  %v6681_v29 = vadd.f32 %v8899_v42, %v6379_v32  ;;  %v6371_v24 = vadd.f32 %v6370_v6, %v14839_v52 }
 0x88f   :  { %v6938_v52 = vand.u32 2147483647, %v15055_v35 }
 0x890   :  { %v6783_v47 = vsub.f32 0.0, %v6751_v50  ;;  %v6749_v1 = vand.u32 2147483647, %v15072_v62  ;;  %v15078_v51 = vadd.f32 %v14953_v15, %v6681_v29  ;;  %v6679_v18 = vadd.f32 %v6578_v33, %v6371_v24 }
 0x891   :  { %v7165_v7 = vmax.f32 %v15072_v62, 0.0  ;;  %v7167_v29 = vmax.f32 %v15067_v36, 0.0  ;;  %v6918_v33 = vadd.f32 1.0, %v6917_v11  ;;  %vm6939_vm14 = vcmp.lt.f32.partialorder %v6938_v52, 0.0004427343 }
 0x892   :  { %v6825_v16 = vmul.f32 1.442695, %v6783_v47  ;;  %v6781_v43 = vsub.f32 0.0, %v6749_v1  ;;  %v6752_v22 = vand.u32 2147483647, %v15078_v51  ;;  %v15091_v38 = vadd.f32 %v14953_v15, %v6679_v18 }
 0x893   :  { %v9542_v63 = vpop.eup %9541  ;;  %v7168_v32 = vmax.f32 %v15078_v51, 0.0 }
 0x894   :  { %9549 = vpow2.f32 %v6825_v16  ;;  %v6821_v42 = vmul.f32 1.442695, %v6781_v43  ;;  %v6784_v30 = vsub.f32 0.0, %v6752_v22  ;;  %v6750_v3 = vand.u32 2147483647, %v15091_v38 }
 0x895   :  { %v9544_v6 = vpop.eup %9543  ;;  %v7166_v49 = vmax.f32 %v15091_v38, 0.0  ;;  %v6925_v50 = vmul.f32 0.6931472, %v9542_v63  ;;  %v7226_v1 = vpack.c.bf16 %v7168_v32, %v7167_v29  ;;  %v6920_v16 = vand.u32 2147483647, %v15061_v61 }
 0x896   :  { %9551 = vpow2.f32 %v6821_v42  ;;  %v6827_v14 = vmul.f32 1.442695, %v6784_v30  ;;  %v6907_v39 = vmul.f32 0.6931472, %v9544_v6  ;;  %v6782_v24 = vsub.f32 0.0, %v6750_v3 }
 0x897   :  { %v7225_v60 = vpack.c.bf16 %v7166_v49, %v7165_v7  ;;  %v6931_v13 = vsel %vm15080_vm9, %v6928_v4, %v6925_v50  ;;  %v9546_v47 = vpop.eup %9545  ;;  %v6937_v4 = vmul.f32 %v15055_v35, %v6936_v27  ;;  %vm6921_vm15 = vcmp.lt.f32.partialorder %v6920_v16, 0.0004427343  ;;  %v8902_v35 = vpop.f32.mrf.mxu0 }
 0x898   :  { %9553 = vpow2.f32 %v6827_v14  ;;  %v7195_v18 = vadd.f32 %v7163_v23, %v6931_v13  ;;  %v6823_v43 = vmul.f32 1.442695, %v6782_v24  ;;  %v6913_v53 = vsel %vm15084_vm3, %v6910_v44, %v6907_v39 }
 0x899   :  { %8936 = vmatprep.mubr.msk.bf16.mxu1 %vm7276_vm6, %v7225_v60  ;;  %v6934_v22 = vmul.f32 0.6931472, %v9546_v47  ;;  %v9548_v63 = vpop.eup %9547  ;;  %v6919_v23 = vmul.f32 %v15061_v61, %v6918_v33  ;;  %v7193_v42 = vadd.f32 %v7161_v25, %v6913_v53  ;;  %v6591_v10 = vpop.f32.mrf.mxu0 }
 0x89a   :  { %7690 = vrot.lane.b32.xlu0 %v7195_v18, %s9789_s5  ;;  %8937 = vmatmul.mubr.msk.bf16.gmra.mxu1 %vm7276_vm6, %v7226_v1  ;;  %v6916_v20 = vmul.f32 0.6931472, %v9548_v63  ;;  %9555 = vpow2.f32 %v6823_v43 }
 0x89b   :  { %v6940_v11 = vsel %vm6939_vm14, %v6937_v4, %v6934_v22  ;;  %v8903_v39 = vpop.f32.mrf.mxu0 }
 0x89c   :  { %v7196_v40 = vadd.f32 %v7164_v48, %v6940_v11  ;;  %v6922_v44 = vsel %vm6921_vm15, %v6919_v23, %v6916_v20 }
 0x89d   :  { %v7194_v52 = vadd.f32 %v7162_v21, %v6922_v44  ;;  %v6594_v53 = vpop.f32.mrf.mxu0 }
 0x89e   :  { %7686 = vrot.lane.b32.xlu0 %v7193_v42, %s9789_s5  ;;  %7692 = vrot.lane.b32.xlu1 %v7196_v40, %s9789_s5 }
 0x8a1   :  { %v15127_v27 = vpop.eup %9549 }
 0x8a2   :  { %7688 = vrot.lane.b32.xlu1 %v7194_v52, %s9789_s5  ;;  %v8858_v61 = vpop.f32.mrf.mxu1  ;;  %v6959_v45 = vadd.f32 1.0, %v15127_v27  ;;  %v6962_v18 = vmul.f32 -0.5, %v15127_v27  ;;  %v6965_v11 = vand.u32 2147483647, %v15127_v27 }
 0x8a3   :  { %v15131_v25 = vpop.eup %9551  ;;  %v6392_v48 = vadd.f32 %v8858_v61, %v14844_v34 }
 0x8a4   :  { %v6383_v30 = vpop.f32.mrf.mxu1  ;;  %9557 = vlog2.f32 %v6959_v45  ;;  %v6941_v6 = vadd.f32 1.0, %v15131_v25  ;;  %v6944_v43 = vmul.f32 -0.5, %v15131_v25  ;;  %v6963_v44 = vadd.f32 1.0, %v6962_v18 }
 0x8a5   :  { %v15135_v3 = vpop.eup %9553  ;;  %v6684_v46 = vadd.f32 %v8902_v35, %v6392_v48  ;;  %v6384_v21 = vadd.f32 %v6383_v30, %v14852_v5  ;;  %vm6966_vm2 = vcmp.lt.f32.partialorder %v6965_v11, 0.0004427343  ;;  %v8906_v11 = vpop.f32.mrf.mxu0 }
 0x8a6   :  { %v8859_v50 = vpop.f32.mrf.mxu1  ;;  %9559 = vlog2.f32 %v6941_v6  ;;  %v6968_v14 = vadd.f32 1.0, %v15135_v3  ;;  %v6945_v35 = vadd.f32 1.0, %v6944_v43  ;;  %v6971_v52 = vmul.f32 -0.5, %v15135_v3 }
 0x8a7   :  { %v15140_v24 = vadd.f32 %v14953_v15, %v6684_v46  ;;  %v6682_v60 = vadd.f32 %v6591_v10, %v6384_v21  ;;  %v6395_v34 = vadd.f32 %v8859_v50, %v14860_v58  ;;  %v15143_v33 = vpop.eup %9555  ;;  %v6947_v46 = vand.u32 2147483647, %v15131_v25 }
 0x8a8   :  { %v6386_v13 = vpop.f32.mrf.mxu1  ;;  %9561 = vlog2.f32 %v6968_v14  ;;  %v6950_v20 = vadd.f32 1.0, %v15143_v33  ;;  %v6974_v43 = vand.u32 2147483647, %v15135_v3 }
 0x8a9   :  { %v6755_v47 = vand.u32 2147483647, %v15140_v24  ;;  %v15147_v1 = vadd.f32 %v14953_v15, %v6682_v60  ;;  %v6685_v5 = vadd.f32 %v8903_v39, %v6395_v34  ;;  %v6387_v16 = vadd.f32 %v6386_v13, %v14873_v28 }
 0x8aa   :  { %9563 = vlog2.f32 %v6950_v20  ;;  %v7171_v50 = vmax.f32 %v15140_v24, 0.0  ;;  %v6964_v39 = vmul.f32 %v15127_v27, %v6963_v44  ;;  %vm6948_vm8 = vcmp.lt.f32.partialorder %v6947_v46, 0.0004427343 }
 0x8ab   :  { %v6787_v22 = vsub.f32 0.0, %v6755_v47  ;;  %v6753_v58 = vand.u32 2147483647, %v15147_v1  ;;  %v15154_v4 = vadd.f32 %v14953_v15, %v6685_v5  ;;  %v6683_v63 = vadd.f32 %v6594_v53, %v6387_v16 }
 0x8ac   :  { %v7169_v48 = vmax.f32 %v15147_v1, 0.0  ;;  %v6972_v47 = vadd.f32 1.0, %v6971_v52  ;;  %v6946_v16 = vmul.f32 %v15131_v25, %v6945_v35  ;;  %vm6975_vm10 = vcmp.lt.f32.partialorder %v6974_v43, 0.0004427343 }
 0x8ad   :  { %v6833_v23 = vmul.f32 1.442695, %v6787_v22  ;;  %v6785_v42 = vsub.f32 0.0, %v6753_v58  ;;  %v6756_v40 = vand.u32 2147483647, %v15154_v4  ;;  %v15160_v28 = vadd.f32 %v14953_v15, %v6683_v63 }
 0x8ae   :  { %v7172_v10 = vmax.f32 %v15154_v4, 0.0  ;;  %v6953_v58 = vmul.f32 -0.5, %v15143_v33 }
 0x8af   :  { %9565 = vpow2.f32 %v6833_v23  ;;  %v6829_v61 = vmul.f32 1.442695, %v6785_v42  ;;  %v6788_v45 = vsub.f32 0.0, %v6756_v40  ;;  %v6754_v30 = vand.u32 2147483647, %v15160_v28 }
 0x8b0   :  { %v7170_v6 = vmax.f32 %v15160_v28, 0.0  ;;  %v7228_v18 = vpack.c.bf16 %v7172_v10, %v7171_v50  ;;  %v6973_v42 = vmul.f32 %v15135_v3, %v6972_v47  ;;  %v6954_v44 = vadd.f32 1.0, %v6953_v58 }
 0x8b1   :  { %v9558_v21 = vpop.eup %9557  ;;  %9567 = vpow2.f32 %v6829_v61  ;;  %v6835_v14 = vmul.f32 1.442695, %v6788_v45  ;;  %v6786_v60 = vsub.f32 0.0, %v6754_v30  ;;  %v6607_v61 = vpop.f32.mrf.mxu0 }
 0x8b2   :  { %v7227_v34 = vpack.c.bf16 %v7170_v6, %v7169_v48  ;;  %v6961_v13 = vmul.f32 0.6931472, %v9558_v21  ;;  %v6955_v51 = vmul.f32 %v15143_v33, %v6954_v44 }
 0x8b3   :  { %v9560_v5 = vpop.eup %9559  ;;  %v6831_v27 = vmul.f32 1.442695, %v6786_v60  ;;  %9569 = vpow2.f32 %v6835_v14 }
 0x8b4   :  { %8940 = vmatprep.mubr.msk.bf16.mxu1 %vm7276_vm6, %v7227_v34  ;;  %v6967_v53 = vsel %vm6966_vm2, %v6964_v39, %v6961_v13  ;;  %v6943_v22 = vmul.f32 0.6931472, %v9560_v5 }
 0x8b5   :  { %v9562_v63 = vpop.eup %9561  ;;  %8941 = vmatmul.mubr.msk.bf16.gmra.mxu1 %vm7276_vm6, %v7228_v18  ;;  %v7199_v20 = vadd.f32 %v7167_v29, %v6967_v53  ;;  %9571 = vpow2.f32 %v6831_v27  ;;  %v6956_v29 = vand.u32 2147483647, %v15143_v33 }
 0x8b6   :  { %v6949_v23 = vsel %vm6948_vm8, %v6946_v16, %v6943_v22  ;;  %v6970_v25 = vmul.f32 0.6931472, %v9562_v63 }
 0x8b7   :  { %7698 = vrot.lane.b32.xlu0 %v7199_v20, %s9789_s5  ;;  %v7197_v52 = vadd.f32 %v7165_v7, %v6949_v23  ;;  %v9564_v30 = vpop.eup %9563  ;;  %vm6957_vm1 = vcmp.lt.f32.partialorder %v6956_v29, 0.0004427343 }
 0x8b8   :  { %v6976_v40 = vsel %vm6975_vm10, %v6973_v42, %v6970_v25  ;;  %v6952_v7 = vmul.f32 0.6931472, %v9564_v30 }
 0x8b9   :  { %v8862_v35 = vpop.f32.mrf.mxu1  ;;  %v7200_v36 = vadd.f32 %v7168_v32, %v6976_v40 }
 0x8ba   :  { %v6408_v45 = vadd.f32 %v8862_v35, %v14877_v26  ;;  %v8907_v26 = vpop.f32.mrf.mxu0  ;;  %v6958_v47 = vsel %vm6957_vm1, %v6955_v51, %v6952_v7 }
 0x8bb   :  { %v6399_v3 = vpop.f32.mrf.mxu1  ;;  %7694 = vrot.lane.b32.xlu0 %v7197_v52, %s9789_s5  ;;  %7700 = vrot.lane.b32.xlu1 %v7200_v36, %s9789_s5 }
 0x8bc   :  { %v15195_v46 = vpop.eup %9565  ;;  %v6688_v21 = vadd.f32 %v8906_v11, %v6408_v45  ;;  %v6400_v62 = vadd.f32 %v6399_v3, %v14879_v19  ;;  %v7198_v19 = vadd.f32 %v7166_v49, %v6958_v47  ;;  %v6610_v22 = vpop.f32.mrf.mxu0 }
 0x8bd   :  { %v8863_v32 = vpop.f32.mrf.mxu1  ;;  %v6995_v14 = vadd.f32 1.0, %v15195_v46  ;;  %v6998_v27 = vmul.f32 -0.5, %v15195_v46 }
 0x8be   :  { %v15200_v39 = vpop.eup %9567  ;;  %v15203_v60 = vadd.f32 %v14953_v15, %v6688_v21  ;;  %v6686_v34 = vadd.f32 %v6607_v61, %v6400_v62  ;;  %v6411_v13 = vadd.f32 %v8863_v32, %v14881_v2  ;;  %v7001_v32 = vand.u32 2147483647, %v15195_v46 }
 0x8bf   :  { %v6402_v5 = vpop.f32.mrf.mxu1  ;;  %9573 = vlog2.f32 %v6995_v14  ;;  %7696 = vrot.lane.b32.xlu1 %v7198_v19, %s9789_s5  ;;  %v6977_v2 = vadd.f32 1.0, %v15200_v39  ;;  %v6999_v42 = vadd.f32 1.0, %v6998_v27  ;;  %v6980_v7 = vmul.f32 -0.5, %v15200_v39 }
 0x8c0   :  { %v6759_v33 = vand.u32 2147483647, %v15203_v60  ;;  %v15210_v18 = vadd.f32 %v14953_v15, %v6686_v34  ;;  %v6689_v16 = vadd.f32 %v8907_v26, %v6411_v13  ;;  %v6403_v43 = vadd.f32 %v6402_v5, %v14885_v12  ;;  %v15216_v53 = vpop.eup %9569 }
 0x8c1   :  { %9575 = vlog2.f32 %v6977_v2  ;;  %v7004_v40 = vadd.f32 1.0, %v15216_v53  ;;  %v7175_v45 = vmax.f32 %v15203_v60, 0.0  ;;  %v7000_v34 = vmul.f32 %v15195_v46, %v6999_v42 }
 0x8c2   :  { %v6791_v38 = vsub.f32 0.0, %v6759_v33  ;;  %v6757_v49 = vand.u32 2147483647, %v15210_v18  ;;  %v15220_v58 = vadd.f32 %v14953_v15, %v6689_v16  ;;  %v6687_v63 = vadd.f32 %v6610_v22, %v6403_v43  ;;  %v15223_v23 = vpop.eup %9571 }
 0x8c3   :  { %v7173_v36 = vmax.f32 %v15210_v18, 0.0  ;;  %v6986_v3 = vadd.f32 1.0, %v15223_v23  ;;  %v6981_v47 = vadd.f32 1.0, %v6980_v7  ;;  %v7007_v5 = vmul.f32 -0.5, %v15216_v53 }
 0x8c4   :  { %v6841_v20 = vmul.f32 1.442695, %v6791_v38  ;;  %v6789_v11 = vsub.f32 0.0, %v6757_v49  ;;  %v6760_v12 = vand.u32 2147483647, %v15220_v58  ;;  %v15226_v25 = vadd.f32 %v14953_v15, %v6687_v63 }
 0x8c5   :  { %v7176_v52 = vmax.f32 %v15220_v58, 0.0  ;;  %vm7002_vm4 = vcmp.lt.f32.partialorder %v7001_v32, 0.0004427343  ;;  %v6983_v19 = vand.u32 2147483647, %v15200_v39  ;;  %v6982_v2 = vmul.f32 %v15200_v39, %v6981_v47 }
 0x8c6   :  { %9577 = vpow2.f32 %v6841_v20  ;;  %v6837_v44 = vmul.f32 1.442695, %v6789_v11  ;;  %v6792_v35 = vsub.f32 0.0, %v6760_v12  ;;  %v6758_v29 = vand.u32 2147483647, %v15226_v25  ;;  %v8910_v11 = vpop.f32.mrf.mxu0 }
 0x8c7   :  { %v7174_v61 = vmax.f32 %v15226_v25, 0.0  ;;  %9579 = vlog2.f32 %v7004_v40  ;;  %v7230_v51 = vpack.c.bf16 %v7176_v52, %v7175_v45  ;;  %v7008_v22 = vadd.f32 1.0, %v7007_v5 }
 0x8c8   :  { %9581 = vpow2.f32 %v6837_v44  ;;  %v6843_v30 = vmul.f32 1.442695, %v6792_v35  ;;  %v6790_v21 = vsub.f32 0.0, %v6758_v29  ;;  %v6989_v38 = vmul.f32 -0.5, %v15223_v23 }
 0x8c9   :  { %v7229_v62 = vpack.c.bf16 %v7174_v61, %v7173_v36  ;;  %vm6984_vm13 = vcmp.lt.f32.partialorder %v6983_v19, 0.0004427343  ;;  %v7010_v46 = vand.u32 2147483647, %v15216_v53  ;;  %v7009_v42 = vmul.f32 %v15216_v53, %v7008_v22 }
 0x8ca   :  { %9583 = vpow2.f32 %v6843_v30  ;;  %v6839_v14 = vmul.f32 1.442695, %v6790_v21  ;;  %v6990_v40 = vadd.f32 1.0, %v6989_v38  ;;  %v6992_v44 = vand.u32 2147483647, %v15223_v23 }
 0x8cb   :  { %8944 = vmatprep.mubr.msk.bf16.mxu1 %vm7276_vm6, %v7229_v62  ;;  %9585 = vlog2.f32 %v6986_v3  ;;  %vm7011_vm11 = vcmp.lt.f32.partialorder %v7010_v46, 0.0004427343  ;;  %v6623_v3 = vpop.f32.mrf.mxu0 }
 0x8cc   :  { %v9574_v26 = vpop.eup %9573  ;;  %8945 = vmatmul.mubr.msk.bf16.gmra.mxu1 %vm7276_vm6, %v7230_v51  ;;  %9587 = vpow2.f32 %v6839_v14  ;;  %v6991_v51 = vmul.f32 %v15223_v23, %v6990_v40  ;;  %vm6993_vm5 = vcmp.lt.f32.partialorder %v6992_v44, 0.0004427343 }
 0x8cd   :  { %v6997_v13 = vmul.f32 0.6931472, %v9574_v26  ;;  %v8911_v23 = vpop.f32.mrf.mxu0 }
 0x8ce   :  { %v9576_v16 = vpop.eup %9575 }
 0x8cf   :  { %v7003_v33 = vsel %vm7002_vm4, %v7000_v34, %v6997_v13  ;;  %v6979_v27 = vmul.f32 0.6931472, %v9576_v16 }
 0x8d0   :  { %v7203_v43 = vadd.f32 %v7171_v50, %v7003_v33 }
 0x8d1   :  { %v6985_v63 = vsel %vm6984_vm13, %v6982_v2, %v6979_v27 }
 0x8d2   :  { %7706 = vrot.lane.b32.xlu0 %v7203_v43, %s9789_s5  ;;  %v7201_v24 = vadd.f32 %v7169_v48, %v6985_v63  ;;  %v6626_v63 = vpop.f32.mrf.mxu0 }
 0x8d3   :  { %v15256_v49 = vpop.eup %9577 }
 0x8d4   :  { %v9580_v20 = vpop.eup %9579  ;;  %v7031_v50 = vadd.f32 1.0, %v15256_v49  ;;  %v7034_v4 = vmul.f32 -0.5, %v15256_v49  ;;  %v7037_v43 = vand.u32 2147483647, %v15256_v49 }
 0x8d5   :  { %v15261_v12 = vpop.eup %9581  ;;  %v7006_v39 = vmul.f32 0.6931472, %v9580_v20 }
 0x8d6   :  { %7702 = vrot.lane.b32.xlu0 %v7201_v24, %s9789_s5  ;;  %9589 = vlog2.f32 %v7031_v50  ;;  %v7013_v35 = vadd.f32 1.0, %v15261_v12  ;;  %v7019_v27 = vand.u32 2147483647, %v15261_v12  ;;  %v7035_v46 = vadd.f32 1.0, %v7034_v4 }
 0x8d7   :  { %v15267_v29 = vpop.eup %9583  ;;  %v7012_v1 = vsel %vm7011_vm11, %v7009_v42, %v7006_v39  ;;  %v8866_v48 = vpop.f32.mrf.mxu1  ;;  %vm15300_vm12 = vcmp.lt.f32.partialorder %v7037_v43, 0.0004427343 }
 0x8d8   :  { %v9586_v30 = vpop.eup %9585  ;;  %v7204_v21 = vadd.f32 %v7172_v10, %v7012_v1  ;;  %v6424_v53 = vadd.f32 %v8866_v48, %v14887_v56  ;;  %9591 = vlog2.f32 %v7013_v35  ;;  %v7040_v32 = vadd.f32 1.0, %v15267_v29 }
 0x8d9   :  { %v6415_v62 = vpop.f32.mrf.mxu1  ;;  %v6988_v7 = vmul.f32 0.6931472, %v9586_v30  ;;  %v15274_v14 = vpop.eup %9587  ;;  %v7016_v56 = vmul.f32 -0.5, %v15261_v12  ;;  %vm15304_vm7 = vcmp.lt.f32.partialorder %v7019_v27, 0.0004427343  ;;  %v7036_v1 = vmul.f32 %v15256_v49, %v7035_v46 }
 0x8da   :  { %7708 = vrot.lane.b32.xlu1 %v7204_v21, %s9789_s5  ;;  %v6692_v26 = vadd.f32 %v8910_v11, %v6424_v53  ;;  %v6416_v34 = vadd.f32 %v6415_v62, %v14893_v54  ;;  %9593 = vlog2.f32 %v7040_v32  ;;  %v7022_v47 = vadd.f32 1.0, %v15274_v14 }
 0x8db   :  { %v6994_v10 = vsel %vm6993_vm5, %v6991_v51, %v6988_v7  ;;  %v8867_v13 = vpop.f32.mrf.mxu1  ;;  %v7025_v53 = vmul.f32 -0.5, %v15274_v14 }
 0x8dc   :  { %v15282_v5 = vadd.f32 %v14953_v15, %v6692_v26  ;;  %v6690_v19 = vadd.f32 %v6623_v3, %v6416_v34  ;;  %v7202_v33 = vadd.f32 %v7170_v6, %v6994_v10  ;;  %v6427_v54 = vadd.f32 %v8867_v13, %v14907_v37 }
 0x8dd   :  { %v6418_v16 = vpop.f32.mrf.mxu1  ;;  %9595 = vlog2.f32 %v7022_v47  ;;  %v7017_v6 = vadd.f32 1.0, %v7016_v56  ;;  %v7043_v37 = vmul.f32 -0.5, %v15267_v29 }
 0x8de   :  { %v6763_v2 = vand.u32 2147483647, %v15282_v5  ;;  %v15291_v22 = vadd.f32 %v14953_v15, %v6690_v19  ;;  %7704 = vrot.lane.b32.xlu1 %v7202_v33, %s9789_s5  ;;  %v6693_v38 = vadd.f32 %v8911_v23, %v6427_v54  ;;  %v6419_v28 = vadd.f32 %v6418_v16, %v14911_v31 }
 0x8df   :  { %v7046_v31 = vand.u32 2147483647, %v15267_v29  ;;  %v7018_v3 = vmul.f32 %v15261_v12, %v7017_v6  ;;  %v7044_v21 = vadd.f32 1.0, %v7043_v37  ;;  %v7026_v23 = vadd.f32 1.0, %v7025_v53 }
 0x8e0   :  { %v6795_v20 = vsub.f32 0.0, %v6763_v2  ;;  %v6761_v11 = vand.u32 2147483647, %v15291_v22  ;;  %v15298_v24 = vadd.f32 %v14953_v15, %v6693_v38  ;;  %v6691_v50 = vadd.f32 %v6626_v63, %v6419_v28 }
 0x8e1   :  { %v7177_v26 = vmax.f32 %v15291_v22, 0.0  ;;  %v7028_v16 = vand.u32 2147483647, %v15274_v14  ;;  %v7045_v38 = vmul.f32 %v15267_v29, %v7044_v21  ;;  %vm7047_vm9 = vcmp.lt.f32.partialorder %v7046_v31, 0.0004427343  ;;  %v8914_v29 = vpop.f32.mrf.mxu0 }
 0x8e2   :  { %v6849_v40 = vmul.f32 1.442695, %v6795_v20  ;;  %v6793_v44 = vsub.f32 0.0, %v6761_v11  ;;  %v6764_v35 = vand.u32 2147483647, %v15298_v24  ;;  %v15312_v30 = vadd.f32 %v14953_v15, %v6691_v50 }
 0x8e3   :  { %v9590_v48 = vpop.eup %9589  ;;  %v7180_v51 = vmax.f32 %v15298_v24, 0.0  ;;  %v7179_v15 = vmax.f32 %v15282_v5, 0.0  ;;  %vm7029_vm3 = vcmp.lt.f32.partialorder %v7028_v16, 0.0004427343  ;;  %v6639_v58 = vpop.f32.mrf.mxu0 }
 0x8e4   :  { %9597 = vpow2.f32 %v6849_v40  ;;  %v6845_v62 = vmul.f32 1.442695, %v6793_v44  ;;  %v6796_v7 = vsub.f32 0.0, %v6764_v35  ;;  %v6762_v34 = vand.u32 2147483647, %v15312_v30 }
 0x8e5   :  { %v9592_v32 = vpop.eup %9591  ;;  %v7178_v49 = vmax.f32 %v15312_v30, 0.0  ;;  %v7033_v4 = vmul.f32 0.6931472, %v9590_v48  ;;  %v7232_v33 = vpack.c.bf16 %v7180_v51, %v7179_v15  ;;  %v8915_v44 = vpop.f32.mrf.mxu0  ;;  %v15364_v35 = vld [vmem:[%s15994_s11] ss:$0 sm:$0xff] }
 0x8e6   :  { %9599 = vpow2.f32 %v6845_v62  ;;  %v6851_v12 = vmul.f32 1.442695, %v6796_v7  ;;  %v7015_v10 = vmul.f32 0.6931472, %v9592_v32  ;;  %v6794_v13 = vsub.f32 0.0, %v6762_v34 }
 0x8e7   :  { %v7231_v56 = vpack.c.bf16 %v7178_v49, %v7177_v26  ;;  %v7039_v47 = vsel %vm15300_vm12, %v7036_v1, %v7033_v4  ;;  %v9594_v19 = vpop.eup %9593  ;;  %v6642_v4 = vpop.f32.mrf.mxu0 }
 0x8e8   :  { %9601 = vpow2.f32 %v6851_v12  ;;  %v7207_v54 = vadd.f32 %v7175_v45, %v7039_v47  ;;  %v6847_v43 = vmul.f32 1.442695, %v6794_v13  ;;  %v7021_v27 = vsel %vm15304_vm7, %v7018_v3, %v7015_v10 }
 0x8e9   :  { %8948 = vmatprep.mubr.msk.bf16.mxu1 %vm7276_vm6, %v7231_v56  ;;  %v7042_v2 = vmul.f32 0.6931472, %v9594_v19  ;;  %v7027_v45 = vmul.f32 %v15274_v14, %v7026_v23  ;;  %v7205_v6 = vadd.f32 %v7173_v36, %v7021_v27  ;;  %vm8030_vm7 = vcmask 7168  }
 0x8ea   :  { %v9596_v46 = vpop.eup %9595  ;;  %7714 = vrot.lane.b32.xlu0 %v7207_v54, %s9789_s5  ;;  %8949 = vmatmul.mubr.msk.bf16.gmra.mxu1 %vm7276_vm6, %v7232_v33  ;;  %9603 = vpow2.f32 %v6847_v43 }
 0x8eb   :  { %v7048_v28 = vsel %vm7047_vm9, %v7045_v38, %v7042_v2  ;;  %v7024_v60 = vmul.f32 0.6931472, %v9596_v46  ;;  %vm16764_vm9 = vcmask 64512  }
 0x8ec   :  { %v7208_v37 = vadd.f32 %v7176_v52, %v7048_v28 }
 0x8ed   :  { %v7030_v63 = vsel %vm7029_vm3, %v7027_v45, %v7024_v60  ;;  %vm16765_vm3 = vmmov %vm16764_vm9 }
 0x8ee   :  { %7710 = vrot.lane.b32.xlu0 %v7205_v6, %s9789_s5  ;;  %7716 = vrot.lane.b32.xlu1 %v7208_v37, %s9789_s5  ;;  %v7206_v20 = vadd.f32 %v7174_v61, %v7030_v63 }
 0x8f1   :  { %v15349_v11 = vpop.eup %9597 }
 0x8f2   :  { %7712 = vrot.lane.b32.xlu1 %v7206_v20, %s9789_s5  ;;  %v8870_v14 = vpop.f32.mrf.mxu1  ;;  %v7067_v18 = vadd.f32 1.0, %v15349_v11  ;;  %v7070_v7 = vmul.f32 -0.5, %v15349_v11  ;;  %v7073_v56 = vand.u32 2147483647, %v15349_v11 }
 0x8f3   :  { %v15353_v36 = vpop.eup %9599  ;;  %v6440_v52 = vadd.f32 %v8870_v14, %v14913_v55 }
 0x8f4   :  { %v6431_v50 = vpop.f32.mrf.mxu1  ;;  %9605 = vlog2.f32 %v7067_v18  ;;  %v7049_v39 = vadd.f32 1.0, %v15353_v36  ;;  %v7052_v34 = vmul.f32 -0.5, %v15353_v36  ;;  %v7071_v54 = vadd.f32 1.0, %v7070_v7 }
 0x8f5   :  { %v15357_v42 = vpop.eup %9601  ;;  %v6696_v25 = vadd.f32 %v8914_v29, %v6440_v52  ;;  %v6432_v61 = vadd.f32 %v6431_v50, %v14915_v0  ;;  %v7055_v45 = vand.u32 2147483647, %v15353_v36  ;;  %vm7074_vm14 = vcmp.lt.f32.partialorder %v7073_v56, 0.0004427343 }
 0x8f6   :  { %v8871_v31 = vpop.f32.mrf.mxu1  ;;  %9607 = vlog2.f32 %v7049_v39  ;;  %v7076_v40 = vadd.f32 1.0, %v15357_v42  ;;  %v7053_v16 = vadd.f32 1.0, %v7052_v34  ;;  %v7079_v43 = vmul.f32 -0.5, %v15357_v42 }
 0x8f7   :  { %v15367_v55 = vadd.f32 %v15364_v35, %v6696_v25  ;;  %v6694_v1 = vadd.f32 %v6639_v58, %v6432_v61  ;;  %v6443_v48 = vadd.f32 %v8871_v31, %v14919_v9  ;;  %v15370_v21 = vpop.eup %9603  ;;  %v7072_v29 = vmul.f32 %v15349_v11, %v7071_v54 }
 0x8f8   :  { %v6434_v3 = vpop.f32.mrf.mxu1  ;;  %9609 = vlog2.f32 %v7076_v40  ;;  %v7058_v47 = vadd.f32 1.0, %v15370_v21  ;;  %v7080_v58 = vadd.f32 1.0, %v7079_v43  ;;  %v7054_v39 = vmul.f32 %v15353_v36, %v7053_v16  ;;  %v15433_v43 = vpop.permute.xlu1 %7936 }
 0x8f9   :  { %v6767_v0 = vand.u32 2147483647, %v15367_v55  ;;  %v15374_v53 = vadd.f32 %v15364_v35, %v6694_v1  ;;  %v6697_v62 = vadd.f32 %v8915_v44, %v6443_v48  ;;  %v6435_v32 = vadd.f32 %v6434_v3, %v14929_v57  ;;  %v8918_v48 = vpop.f32.mrf.mxu0 }
 0x8fa   :  { %9611 = vlog2.f32 %v7058_v47  ;;  %v7183_v37 = vmax.f32 %v15367_v55, 0.0  ;;  %v7082_v25 = vand.u32 2147483647, %v15357_v42  ;;  %v7061_v40 = vmul.f32 -0.5, %v15370_v21 }
 0x8fb   :  { %v6799_v12 = vsub.f32 0.0, %v6767_v0  ;;  %v6765_v9 = vand.u32 2147483647, %v15374_v53  ;;  %v15381_v10 = vadd.f32 %v15364_v35, %v6697_v62  ;;  %v6695_v13 = vadd.f32 %v6642_v4, %v6435_v32  ;;  %v6655_v4 = vpop.f32.mrf.mxu0 }
 0x8fc   :  { %v7181_v46 = vmax.f32 %v15374_v53, 0.0  ;;  %vm7056_vm15 = vcmp.lt.f32.partialorder %v7055_v45, 0.0004427343  ;;  %v7081_v0 = vmul.f32 %v15357_v42, %v7080_v58  ;;  %vm7083_vm2 = vcmp.lt.f32.partialorder %v7082_v25, 0.0004427343 }
 0x8fd   :  { %v6857_v23 = vmul.f32 1.442695, %v6799_v12  ;;  %v6797_v19 = vsub.f32 0.0, %v6765_v9  ;;  %v6768_v33 = vand.u32 2147483647, %v15381_v10  ;;  %v15387_v57 = vadd.f32 %v15364_v35, %v6695_v13 }
 0x8fe   :  { %v7184_v38 = vmax.f32 %v15381_v10, 0.0  ;;  %v7062_v7 = vadd.f32 1.0, %v7061_v40 }
 0x8ff   :  { %9613 = vpow2.f32 %v6857_v23  ;;  %v6853_v27 = vmul.f32 1.442695, %v6797_v19  ;;  %v6800_v2 = vsub.f32 0.0, %v6768_v33  ;;  %v6766_v28 = vand.u32 2147483647, %v15387_v57 }
 0x900   :  { %v7182_v60 = vmax.f32 %v15387_v57, 0.0  ;;  %v7234_v50 = vpack.c.bf16 %v7184_v38, %v7183_v37  ;;  %v7063_v24 = vmul.f32 %v15370_v21, %v7062_v7 }
 0x901   :  { %v9606_v6 = vpop.eup %9605  ;;  %9615 = vpow2.f32 %v6853_v27  ;;  %v6859_v63 = vmul.f32 1.442695, %v6800_v2  ;;  %v6798_v20 = vsub.f32 0.0, %v6766_v28 }
 0x902   :  { %v7233_v14 = vpack.c.bf16 %v7182_v60, %v7181_v46  ;;  %v7069_v18 = vmul.f32 0.6931472, %v9606_v6 }
 0x903   :  { %v9608_v52 = vpop.eup %9607  ;;  %v6855_v11 = vmul.f32 1.442695, %v6798_v20  ;;  %9617 = vpow2.f32 %v6859_v63 }
 0x904   :  { %8952 = vmatprep.mubr.msk.bf16.mxu1 %vm7276_vm6, %v7233_v14  ;;  %v7075_v61 = vsel %vm7074_vm14, %v7072_v29, %v7069_v18  ;;  %v7051_v31 = vmul.f32 0.6931472, %v9608_v52  ;;  %v15453_v52 = vpop.permute.xlu1 %7940  ;;  %vm16766_vm14 = vmmov %vm16765_vm3 }
 0x905   :  { %v9610_v44 = vpop.eup %9609  ;;  %8953 = vmatmul.mubr.msk.bf16.gmra.mxu1 %vm7276_vm6, %v7234_v50  ;;  %v7211_v1 = vadd.f32 %v7179_v15, %v7075_v61  ;;  %9619 = vpow2.f32 %v6855_v11  ;;  %v7064_v15 = vand.u32 2147483647, %v15370_v21 }
 0x906   :  { %v7057_v3 = vsel %vm7056_vm15, %v7054_v39, %v7051_v31  ;;  %v7078_v36 = vmul.f32 0.6931472, %v9610_v44  ;;  %vm16767_vm15 = vmmov %vm16765_vm3 }
 0x907   :  { %7722 = vrot.lane.b32.xlu0 %v7211_v1, %s9789_s5  ;;  %v7209_v34 = vadd.f32 %v7177_v26, %v7057_v3  ;;  %v9612_v9 = vpop.eup %9611  ;;  %vm7065_vm8 = vcmp.lt.f32.partialorder %v7064_v15, 0.0004427343 }
 0x908   :  { %v7084_v62 = vsel %vm7083_vm2, %v7081_v0, %v7078_v36  ;;  %v7060_v26 = vmul.f32 0.6931472, %v9612_v9  ;;  %v15478_v15 = vpop.permute.xlu1 %7944  ;;  %vm16768_vm2 = vmmov %vm16765_vm3 }
 0x909   :  { %v8874_v32 = vpop.f32.mrf.mxu1  ;;  %v7212_v5 = vadd.f32 %v7180_v51, %v7084_v62 }
 0x90a   :  { %v6456_v12 = vadd.f32 %v8874_v32, %v14939_v41  ;;  %v8919_v41 = vpop.f32.mrf.mxu0  ;;  %v7066_v16 = vsel %vm7065_vm8, %v7063_v24, %v7060_v26  ;;  %vm16769_vm8 = vmmov %vm16768_vm2 }
 0x90b   :  { %v6447_v42 = vpop.f32.mrf.mxu1  ;;  %7718 = vrot.lane.b32.xlu0 %v7209_v34, %s9789_s5  ;;  %7724 = vrot.lane.b32.xlu1 %v7212_v5, %s9789_s5  ;;  %v7210_v21 = vadd.f32 %v7178_v49, %v7066_v16 }
 0x90c   :  { %v15422_v13 = vpop.eup %9613  ;;  %v6700_v56 = vadd.f32 %v8918_v48, %v6456_v12  ;;  %v6448_v22 = vadd.f32 %v6447_v42, %v14943_v59  ;;  %v6658_v63 = vpop.f32.mrf.mxu0 }
 0x90d   :  { %v8875_v51 = vpop.f32.mrf.mxu1  ;;  %v7103_v47 = vadd.f32 1.0, %v15422_v13  ;;  %v7106_v39 = vmul.f32 -0.5, %v15422_v13  ;;  %v15464_v48 = vpop.permute.xlu0 %7934  ;;  %v7109_v5 = vand.u32 2147483647, %v15422_v13 }
 0x90e   :  { %v15427_v23 = vpop.eup %9615  ;;  %v15430_v19 = vadd.f32 %v15364_v35, %v6700_v56  ;;  %v6698_v33 = vadd.f32 %v6655_v4, %v6448_v22  ;;  %v6459_v54 = vadd.f32 %v8875_v51, %v14945_v8 }
 0x90f   :  { %v6450_v59 = vpop.f32.mrf.mxu1  ;;  %9621 = vlog2.f32 %v7103_v47  ;;  %7720 = vrot.lane.b32.xlu1 %v7210_v21, %s9789_s5  ;;  %v7085_v8 = vadd.f32 1.0, %v15427_v23  ;;  %v7107_v7 = vadd.f32 1.0, %v7106_v39  ;;  %v7088_v32 = vmul.f32 -0.5, %v15427_v23 }
 0x910   :  { %v6771_v27 = vand.u32 2147483647, %v15430_v19  ;;  %v15439_v2 = vadd.f32 %v15364_v35, %v6698_v33  ;;  %v6701_v28 = vadd.f32 %v8919_v41, %v6459_v54  ;;  %v6451_v45 = vadd.f32 %v6450_v59, %v14947_v17  ;;  %v15444_v6 = vpop.eup %9617  ;;  %v15489_v33 = vpop.permute.xlu1 %7948 }
 0x911   :  { %9623 = vlog2.f32 %v7085_v8  ;;  %v7112_v25 = vadd.f32 1.0, %v15444_v6  ;;  %v7108_v42 = vmul.f32 %v15422_v13, %v7107_v7  ;;  %v7089_v56 = vadd.f32 1.0, %v7088_v32  ;;  %v15484_v26 = vpop.permute.xlu0 %7938  ;;  %v15494_v13 = vld [vmem:[%s15995_s13] ss:$0 sm:$0xff]  ;;  %s9790_s13 = smov 1  }
 0x912   :  { %v6803_v29 = vsub.f32 0.0, %v6771_v27  ;;  %v6769_v30 = vand.u32 2147483647, %v15439_v2  ;;  %v15448_v49 = vadd.f32 %v15364_v35, %v6701_v28  ;;  %v6699_v20 = vadd.f32 %v6658_v63, %v6451_v45  ;;  %v15451_v17 = vpop.eup %9619 }
 0x913   :  { %v7185_v40 = vmax.f32 %v15439_v2, 0.0  ;;  %v7094_v36 = vadd.f32 1.0, %v15451_v17  ;;  %v7115_v22 = vmul.f32 -0.5, %v15444_v6  ;;  %vm7110_vm10 = vcmp.lt.f32.partialorder %v7109_v5, 0.0004427343 }
 0x914   :  { %v6865_v14 = vmul.f32 1.442695, %v6803_v29  ;;  %v6801_v18 = vsub.f32 0.0, %v6769_v30  ;;  %v6772_v58 = vand.u32 2147483647, %v15448_v49  ;;  %v15456_v50 = vadd.f32 %v15364_v35, %v6699_v20 }
 0x915   :  { %v7188_v31 = vmax.f32 %v15448_v49, 0.0  ;;  %v7187_v35 = vmax.f32 %v15430_v19, 0.0  ;;  %v7091_v24 = vand.u32 2147483647, %v15427_v23  ;;  %v7090_v16 = vmul.f32 %v15427_v23, %v7089_v56  ;;  %v15502_v8 = vpop.permute.xlu0 %7942 }
 0x916   :  { %9625 = vpow2.f32 %v6865_v14  ;;  %v6861_v11 = vmul.f32 1.442695, %v6801_v18  ;;  %v6804_v61 = vsub.f32 0.0, %v6772_v58  ;;  %v6770_v44 = vand.u32 2147483647, %v15456_v50 }
 0x917   :  { %v7186_v1 = vmax.f32 %v15456_v50, 0.0  ;;  %9627 = vlog2.f32 %v7112_v25  ;;  %v7236_v34 = vpack.c.bf16 %v7188_v31, %v7187_v35  ;;  %v7116_v59 = vadd.f32 1.0, %v7115_v22 }
 0x918   :  { %9629 = vpow2.f32 %v6861_v11  ;;  %v6867_v3 = vmul.f32 1.442695, %v6804_v61  ;;  %v6802_v0 = vsub.f32 0.0, %v6770_v44  ;;  %v7097_v21 = vmul.f32 -0.5, %v15451_v17 }
 0x919   :  { %v7235_v62 = vpack.c.bf16 %v7186_v1, %v7185_v40  ;;  %v7118_v27 = vand.u32 2147483647, %v15444_v6  ;;  %v7117_v18 = vmul.f32 %v15444_v6, %v7116_v59  ;;  %v7100_v39 = vand.u32 2147483647, %v15451_v17 }
 0x91a   :  { %9631 = vpow2.f32 %v6867_v3  ;;  %v6863_v4 = vmul.f32 1.442695, %v6802_v0  ;;  %v7098_v58 = vadd.f32 1.0, %v7097_v21 }
 0x91b   :  { %8956 = vmatprep.mubr.msk.bf16.mxu1 %vm7276_vm6, %v7235_v62  ;;  %9633 = vlog2.f32 %v7094_v36  ;;  %vm7119_vm1 = vcmp.lt.f32.partialorder %v7118_v27, 0.0004427343  ;;  %vm7101_vm4 = vcmp.lt.f32.partialorder %v7100_v39, 0.0004427343 }
 0x91c   :  { %v9622_v12 = vpop.eup %9621  ;;  %8957 = vmatmul.mubr.msk.bf16.gmra.mxu1 %vm7276_vm6, %v7236_v34  ;;  %9635 = vpow2.f32 %v6863_v4  ;;  %vm7092_vm6 = vcmp.lt.f32.partialorder %v7091_v24, 0.0004427343  ;;  %v7099_v5 = vmul.f32 %v15451_v17, %v7098_v58  ;;  %v15523_v4 = vpop.permute.xlu0 %7946 }
 0x91d   :  { %v7105_v9 = vmul.f32 0.6931472, %v9622_v12 }
 0x91e   :  { %v9624_v47 = vpop.eup %9623 }
 0x91f   :  { %v7111_v51 = vsel %vm7110_vm10, %v7108_v42, %v7105_v9  ;;  %v7087_v54 = vmul.f32 0.6931472, %v9624_v47  ;;  %vm16770_vm10 = vmmov %vm16768_vm2 }
 0x920   :  { %v7215_v41 = vadd.f32 %v7183_v37, %v7111_v51  ;;  %v15538_v59 = vpop.permute.xlu0 %7950 }
 0x921   :  { %v7093_v28 = vsel %vm7092_vm6, %v7090_v16, %v7087_v54  ;;  %vm16771_vm6 = vmmov %vm16768_vm2 }
 0x922   :  { %7730 = vrot.lane.b32.xlu0 %v7215_v41, %s9789_s5  ;;  %v7213_v23 = vadd.f32 %v7181_v46, %v7093_v28  ;;  %v15516_v46 = vpop.permute.xlu1 %7952 }
 0x923   :  { %v15500_v55 = vpop.eup %9625  ;;  %v8930_v37 = vpop.f32.mrf.mxu1 }
 0x924   :  { %v9628_v45 = vpop.eup %9627  ;;  %v7368_v63 = vadd.f32 %v8930_v37, %v15494_v13  ;;  %v7139_v29 = vadd.f32 1.0, %v15500_v55  ;;  %v7142_v10 = vmul.f32 -0.5, %v15500_v55  ;;  %v7145_v27 = vand.u32 2147483647, %v15500_v55 }
 0x925   :  { %v15508_v30 = vpop.eup %9629  ;;  %v7359_v20 = vpop.f32.mrf.mxu1  ;;  %v7114_v14 = vmul.f32 0.6931472, %v9628_v45 }
 0x926   :  { %v7488_v25 = vsub.f32 0.0, %v7368_v63  ;;  %v7360_v11 = vadd.f32 %v15494_v13, %v7359_v20  ;;  %7726 = vrot.lane.b32.xlu0 %v7213_v23, %s9789_s5  ;;  %9637 = vlog2.f32 %v7139_v29  ;;  %v7121_v3 = vadd.f32 1.0, %v15508_v30  ;;  %v15533_v47 = vpop.permute.xlu1 %7956  ;;  %v15546_v20 = vpop.permute.xlu0 %7954 }
 0x927   :  { %v15514_v53 = vpop.eup %9631  ;;  %v8931_v61 = vpop.f32.mrf.mxu1  ;;  %v7120_v44 = vsel %vm7119_vm1, %v7117_v18, %v7114_v14  ;;  %v7124_v54 = vmul.f32 -0.5, %v15508_v30  ;;  %v7143_v21 = vadd.f32 1.0, %v7142_v10  ;;  %v7127_v23 = vand.u32 2147483647, %v15508_v30  ;;  %vm16772_vm1 = vmmov %vm16768_vm2 }
 0x928   :  { %v9634_v36 = vpop.eup %9633  ;;  %v7522_v6 = vmul.f32 1.442695, %v7488_v25  ;;  %v7486_v0 = vsub.f32 0.0, %v7360_v11  ;;  %v7371_v62 = vadd.f32 %v8931_v61, %v15494_v13  ;;  %v7216_v7 = vadd.f32 %v7184_v38, %v7120_v44 }
 0x929   :  { %v7362_v32 = vpop.f32.mrf.mxu1  ;;  %v7096_v34 = vmul.f32 0.6931472, %v9634_v36  ;;  %9639 = vlog2.f32 %v7121_v3  ;;  %v15527_v56 = vpop.eup %9635  ;;  %v7148_v38 = vadd.f32 1.0, %v15514_v53  ;;  %v7125_v57 = vadd.f32 1.0, %v7124_v54 }
 0x92a   :  { %9641 = vpow2.f32 %v7522_v6  ;;  %v7518_v12 = vmul.f32 1.442695, %v7486_v0  ;;  %v7489_v9 = vsub.f32 0.0, %v7371_v62  ;;  %7732 = vrot.lane.b32.xlu1 %v7216_v7, %s9789_s5  ;;  %v7363_v42 = vadd.f32 %v15494_v13, %v7362_v32  ;;  %v15541_v37 = vpop.permute.xlu1 %7960 }
 0x92b   :  { %v7102_v22 = vsel %vm7101_vm4, %v7099_v5, %v7096_v34  ;;  %v7130_v16 = vadd.f32 1.0, %v15527_v56  ;;  %v7151_v28 = vmul.f32 -0.5, %v15514_v53  ;;  %v7144_v63 = vmul.f32 %v15500_v55, %v7143_v21  ;;  %v15559_v34 = vpop.permute.xlu0 %7958  ;;  %vm16773_vm4 = vmmov %vm16772_vm1 }
 0x92c   :  { %9643 = vpow2.f32 %v7518_v12  ;;  %v7524_v17 = vmul.f32 1.442695, %v7489_v9  ;;  %v7487_v24 = vsub.f32 0.0, %v7363_v42  ;;  %v7214_v51 = vadd.f32 %v7182_v60, %v7102_v22 }
 0x92d   :  { %9645 = vlog2.f32 %v7148_v38  ;;  %vm7146_vm13 = vcmp.lt.f32.partialorder %v7145_v27, 0.0004427343  ;;  %v7126_v18 = vmul.f32 %v15508_v30, %v7125_v57  ;;  %v7152_v11 = vadd.f32 1.0, %v7151_v28 }
 0x92e   :  { %9647 = vpow2.f32 %v7524_v17  ;;  %v7520_v41 = vmul.f32 1.442695, %v7487_v24  ;;  %7728 = vrot.lane.b32.xlu1 %v7214_v51, %s9789_s5  ;;  %v7133_v61 = vmul.f32 -0.5, %v15527_v56  ;;  %vm7128_vm11 = vcmp.lt.f32.partialorder %v7127_v23, 0.0004427343  ;;  %v15553_v36 = vpop.permute.xlu1 %7964 }
 0x92f   :  { %v7154_v55 = vand.u32 2147483647, %v15514_v53  ;;  %v7153_v7 = vmul.f32 %v15514_v53, %v7152_v11  ;;  %v7136_v9 = vand.u32 2147483647, %v15527_v56  ;;  %v15572_v28 = vpop.permute.xlu0 %7962 }
 0x930   :  { %9649 = vpow2.f32 %v7520_v41  ;;  %v7134_v32 = vadd.f32 1.0, %v7133_v61 }
 0x931   :  { %9651 = vlog2.f32 %v7130_v16  ;;  %vm7155_vm5 = vcmp.lt.f32.partialorder %v7154_v55, 0.0004427343  ;;  %vm7137_vm12 = vcmp.lt.f32.partialorder %v7136_v9, 0.0004427343 }
 0x932   :  { %v15566_v17 = vpop.permute.xlu1 %7968  ;;  %v7135_v54 = vmul.f32 %v15527_v56, %v7134_v32 }
 0x933   :  { %v9638_v60 = vpop.eup %9637 }
 0x934   :  { %v7141_v45 = vmul.f32 0.6931472, %v9638_v60 }
 0x936   :  { %v9640_v29 = vpop.eup %9639  ;;  %v7147_v14 = vsel %vm7146_vm13, %v7144_v63, %v7141_v45  ;;  %v15578_v23 = vpop.permute.xlu1 %7972  ;;  %vm16774_vm13 = vmmov %vm16772_vm1 }
 0x937   :  { %v9642_v58 = vpop.eup %9641  ;;  %v7219_v39 = vadd.f32 %v7187_v35, %v7147_v14  ;;  %v7123_v25 = vmul.f32 0.6931472, %v9640_v29 }
 0x938   :  { %v7584_v44 = vadd.f32 1.0, %v9642_v58 }
 0x939   :  { %v9644_v3 = vpop.eup %9643  ;;  %7738 = vrot.lane.b32.xlu0 %v7219_v39, %s9789_s5  ;;  %v7129_v6 = vsel %vm7128_vm11, %v7126_v18, %v7123_v25  ;;  %v15580_v39 = vpop.permute.xlu0 %7966  ;;  %vm16775_vm11 = vmmov %vm16772_vm1 }
 0x93a   :  { %v9646_v0 = vpop.eup %9645  ;;  %9653 = vrcp.f32 %v7584_v44  ;;  %v7582_v30 = vadd.f32 1.0, %v9644_v3  ;;  %v7217_v19 = vadd.f32 %v7185_v40, %v7129_v6  ;;  %v15583_v25 = vpop.permute.xlu1 %7976 }
 0x93b   :  { %v9648_v62 = vpop.eup %9647  ;;  %v7150_v35 = vmul.f32 0.6931472, %v9646_v0  ;;  %16753 = vst [vmem:[#allocation92_spill] sm:$0xff] %v15583_v25 }
 0x93c   :  { %v7585_v5 = vadd.f32 1.0, %v9648_v62  ;;  %v8934_v12 = vpop.f32.mrf.mxu1  ;;  %9655 = vrcp.f32 %v7582_v30 }
 0x93d   :  { %v9650_v42 = vpop.eup %9649  ;;  %v7384_v22 = vadd.f32 %v8934_v12, %v15494_v13  ;;  %7734 = vrot.lane.b32.xlu0 %v7217_v19, %s9789_s5  ;;  %v7156_v10 = vsel %vm7155_vm5, %v7153_v7, %v7150_v35  ;;  %v15587_v11 = vpop.permute.xlu0 %7970  ;;  %vm16778_vm5 = vmmov %vm16772_vm1 }
 0x93e   :  { %v9652_v2 = vpop.eup %9651  ;;  %9657 = vrcp.f32 %v7585_v5  ;;  %v7583_v40 = vadd.f32 1.0, %v9650_v42  ;;  %v7375_v38 = vpop.f32.mrf.mxu1  ;;  %v7220_v53 = vadd.f32 %v7188_v31, %v7156_v10 }
 0x93f   :  { %v7492_v24 = vsub.f32 0.0, %v7384_v22  ;;  %v7376_v51 = vadd.f32 %v15494_v13, %v7375_v38  ;;  %v7132_v41 = vmul.f32 0.6931472, %v9652_v2  ;;  %v15590_v55 = vpop.permute.xlu1 %7980 }
 0x940   :  { %7740 = vrot.lane.b32.xlu1 %v7220_v53, %s9789_s5  ;;  %v8935_v16 = vpop.f32.mrf.mxu1  ;;  %9659 = vrcp.f32 %v7583_v40 }
 0x941   :  { %v7530_v21 = vmul.f32 1.442695, %v7492_v24  ;;  %v7490_v27 = vsub.f32 0.0, %v7376_v51  ;;  %v7387_v57 = vadd.f32 %v8935_v16, %v15494_v13  ;;  %v7138_v60 = vsel %vm7137_vm12, %v7135_v54, %v7132_v41  ;;  %v15592_v62 = vpop.permute.xlu0 %7974  ;;  %vm16779_vm12 = vmmov %vm16772_vm1 }
 0x942   :  { %v7378_v49 = vpop.f32.mrf.mxu1  ;;  %v7218_v31 = vadd.f32 %v7186_v1, %v7138_v60 }
 0x943   :  { %9661 = vpow2.f32 %v7530_v21  ;;  %v7526_v45 = vmul.f32 1.442695, %v7490_v27  ;;  %v7493_v63 = vsub.f32 0.0, %v7387_v57  ;;  %v7379_v56 = vadd.f32 %v15494_v13, %v7378_v49  ;;  %v15594_v7 = vpop.permute.xlu1 %7984 }
 0x944   :  { %7736 = vrot.lane.b32.xlu1 %v7218_v31, %s9789_s5  ;;  %16754 = vst [vmem:[#allocation81_spill] sm:$0xff] %v15594_v7 }
 0x945   :  { %9663 = vpow2.f32 %v7526_v45  ;;  %v7532_v29 = vmul.f32 1.442695, %v7493_v63  ;;  %v7491_v14 = vsub.f32 0.0, %v7379_v56  ;;  %v15596_v5 = vpop.permute.xlu0 %7978 }
 0x947   :  { %v9654_v18 = vpop.eup %9653  ;;  %9665 = vpow2.f32 %v7532_v29  ;;  %v7528_v58 = vmul.f32 1.442695, %v7491_v14  ;;  %v15599_v22 = vpop.permute.xlu1 %7988 }
 0x948   :  { %7810 = vrot.lane.b32.xlu0 %v9654_v18, %s9790_s13  ;;  %16755 = vst [vmem:[#allocation91_spill] sm:$0xff] %v15599_v22 }
 0x949   :  { %9667 = vpow2.f32 %v7528_v58  ;;  %v9656_v50 = vpop.eup %9655  ;;  %v15603_v41 = vpop.permute.xlu0 %7982 }
 0x94a   :  { %16756 = vst [vmem:[#allocation90_spill] sm:$0xff] %v15603_v41 }
 0x94b   :  { %v9658_v1 = vpop.eup %9657  ;;  %v15607_v60 = vpop.permute.xlu1 %7992 }
 0x94c   :  { %7806 = vrot.lane.b32.xlu0 %v9656_v50, %s9790_s13  ;;  %7812 = vrot.lane.b32.xlu1 %v9658_v1, %s9790_s13  ;;  %16757 = vst [vmem:[#allocation94_spill] sm:$0xff] %v15607_v60 }
 0x94d   :  { %v9660_v61 = vpop.eup %9659  ;;  %v15611_v56 = vpop.permute.xlu0 %7986 }
 0x94e   :  { %16758 = vst [vmem:[#allocation95_spill] sm:$0xff] %v15611_v56 }
 0x94f   :  { %v15613_v29 = vpop.permute.xlu1 %7678 }
 0x950   :  { %v9662_v44 = vpop.eup %9661  ;;  %7808 = vrot.lane.b32.xlu1 %v9660_v61, %s9790_s13 }
 0x951   :  { %v7588_v3 = vadd.f32 1.0, %v9662_v44  ;;  %v15616_v18 = vpop.permute.xlu0 %7990 }
 0x952   :  { %v9664_v6 = vpop.eup %9663  ;;  %16759 = vst [vmem:[#allocation70_spill] sm:$0xff] %v15616_v18 }
 0x953   :  { %9669 = vrcp.f32 %v7588_v3  ;;  %v7586_v0 = vadd.f32 1.0, %v9664_v6  ;;  %v15618_v58 = vpop.permute.xlu1 %7684 }
 0x954   :  { %v9666_v30 = vpop.eup %9665 }
 0x955   :  { %v7589_v19 = vadd.f32 1.0, %v9666_v30  ;;  %9671 = vrcp.f32 %v7586_v0  ;;  %v15620_v44 = vpop.permute.xlu0 %7682 }
 0x956   :  { %v9668_v35 = vpop.eup %9667 }
 0x957   :  { %9673 = vrcp.f32 %v7589_v19  ;;  %v7587_v32 = vadd.f32 1.0, %v9668_v35  ;;  %v15622_v0 = vpop.permute.xlu1 %7680 }
 0x959   :  { %9675 = vrcp.f32 %v7587_v32  ;;  %v15624_v35 = vpop.permute.xlu0 %7690 }
 0x95a   :  { %v8938_v12 = vpop.f32.mrf.mxu1 }
 0x95b   :  { %v7400_v9 = vadd.f32 %v8938_v12, %v15494_v13 }
 0x95c   :  { %v7391_v42 = vpop.f32.mrf.mxu1 }
 0x95d   :  { %v7496_v10 = vsub.f32 0.0, %v7400_v9  ;;  %v7392_v2 = vadd.f32 %v15494_v13, %v7391_v42  ;;  %v15627_v42 = vpop.permute.xlu1 %7692 }
 0x95e   :  { %v8939_v40 = vpop.f32.mrf.mxu1 }
 0x95f   :  { %v7538_v38 = vmul.f32 1.442695, %v7496_v10  ;;  %v7494_v53 = vsub.f32 0.0, %v7392_v2  ;;  %v7403_v24 = vadd.f32 %v8939_v40, %v15494_v13 }
 0x960   :  { %v9670_v51 = vpop.eup %9669  ;;  %v7394_v54 = vpop.f32.mrf.mxu1 }
 0x961   :  { %9677 = vpow2.f32 %v7538_v38  ;;  %v7534_v16 = vmul.f32 1.442695, %v7494_v53  ;;  %v7497_v21 = vsub.f32 0.0, %v7403_v24  ;;  %v7395_v27 = vadd.f32 %v15494_v13, %v7394_v54  ;;  %7818 = vrot.lane.b32.xlu0 %v9670_v51, %s9790_s13  ;;  %v15630_v53 = vpop.permute.xlu0 %7686 }
 0x962   :  { %v9672_v57 = vpop.eup %9671 }
 0x963   :  { %9679 = vpow2.f32 %v7534_v16  ;;  %v7540_v49 = vmul.f32 1.442695, %v7497_v21  ;;  %v7495_v31 = vsub.f32 0.0, %v7395_v27 }
 0x964   :  { %v9674_v45 = vpop.eup %9673 }
 0x965   :  { %9681 = vpow2.f32 %v7540_v49  ;;  %v7536_v63 = vmul.f32 1.442695, %v7495_v31  ;;  %7814 = vrot.lane.b32.xlu0 %v9672_v57, %s9790_s13  ;;  %7820 = vrot.lane.b32.xlu1 %v9674_v45, %s9790_s13  ;;  %v15634_v49 = vpop.permute.xlu1 %7688  ;;  %v15636_v45 = vpop.permute.xlu0 %7698 }
 0x966   :  { %v9676_v14 = vpop.eup %9675 }
 0x967   :  { %9683 = vpow2.f32 %v7536_v63 }
 0x969   :  { %7816 = vrot.lane.b32.xlu1 %v9676_v14, %s9790_s13 }
 0x96e   :  { %v9678_v50 = vpop.eup %9677 }
 0x96f   :  { %v7592_v1 = vadd.f32 1.0, %v9678_v50 }
 0x970   :  { %v9680_v61 = vpop.eup %9679 }
 0x971   :  { %9685 = vrcp.f32 %v7592_v1  ;;  %v7590_v3 = vadd.f32 1.0, %v9680_v61  ;;  %v15639_v61 = vpop.permute.xlu1 %7700 }
 0x972   :  { %v9682_v6 = vpop.eup %9681 }
 0x973   :  { %v7593_v30 = vadd.f32 1.0, %v9682_v6  ;;  %9687 = vrcp.f32 %v7590_v3  ;;  %v15643_v6 = vpop.permute.xlu0 %7694 }
 0x974   :  { %v9684_v19 = vpop.eup %9683 }
 0x975   :  { %9689 = vrcp.f32 %v7593_v30  ;;  %v7591_v32 = vadd.f32 1.0, %v9684_v19  ;;  %v8942_v12 = vpop.f32.mrf.mxu1  ;;  %v15645_v19 = vpop.permute.xlu1 %7696 }
 0x976   :  { %v7416_v9 = vadd.f32 %v8942_v12, %v15494_v13 }
 0x977   :  { %v7407_v10 = vpop.f32.mrf.mxu1  ;;  %9691 = vrcp.f32 %v7591_v32  ;;  %v15648_v32 = vpop.permute.xlu0 %7706 }
 0x978   :  { %v7500_v2 = vsub.f32 0.0, %v7416_v9  ;;  %v7408_v40 = vadd.f32 %v15494_v13, %v7407_v10 }
 0x979   :  { %v8943_v38 = vpop.f32.mrf.mxu1 }
 0x97a   :  { %v7546_v24 = vmul.f32 1.442695, %v7500_v2  ;;  %v7498_v51 = vsub.f32 0.0, %v7408_v40  ;;  %v7419_v54 = vadd.f32 %v8943_v38, %v15494_v13  ;;  %v15650_v2 = vpop.permute.xlu1 %7708 }
 0x97b   :  { %v7410_v16 = vpop.f32.mrf.mxu1 }
 0x97c   :  { %9693 = vpow2.f32 %v7546_v24  ;;  %v7542_v21 = vmul.f32 1.442695, %v7498_v51  ;;  %v7501_v27 = vsub.f32 0.0, %v7419_v54  ;;  %v7411_v57 = vadd.f32 %v15494_v13, %v7410_v16  ;;  %v15653_v54 = vpop.permute.xlu0 %7702 }
 0x97e   :  { %v9686_v31 = vpop.eup %9685  ;;  %9695 = vpow2.f32 %v7542_v21  ;;  %v7548_v63 = vmul.f32 1.442695, %v7501_v27  ;;  %v7499_v14 = vsub.f32 0.0, %v7411_v57 }
 0x97f   :  { %7826 = vrot.lane.b32.xlu0 %v9686_v31, %s9790_s13 }
 0x980   :  { %9697 = vpow2.f32 %v7548_v63  ;;  %v7544_v50 = vmul.f32 1.442695, %v7499_v14  ;;  %v9688_v1 = vpop.eup %9687 }
 0x982   :  { %v9690_v3 = vpop.eup %9689  ;;  %9699 = vpow2.f32 %v7544_v50  ;;  %v15656_v50 = vpop.permute.xlu1 %7704 }
 0x983   :  { %7822 = vrot.lane.b32.xlu0 %v9688_v1, %s9790_s13  ;;  %7828 = vrot.lane.b32.xlu1 %v9690_v3, %s9790_s13 }
 0x984   :  { %v9692_v30 = vpop.eup %9691 }
 0x987   :  { %7824 = vrot.lane.b32.xlu1 %v9692_v30, %s9790_s13 }
 0x989   :  { %v9694_v12 = vpop.eup %9693 }
 0x98a   :  { %v7596_v9 = vadd.f32 1.0, %v9694_v12  ;;  %v15659_v12 = vpop.permute.xlu0 %7714 }
 0x98b   :  { %v9696_v10 = vpop.eup %9695 }
 0x98c   :  { %9701 = vrcp.f32 %v7596_v9  ;;  %v7594_v40 = vadd.f32 1.0, %v9696_v10  ;;  %v8946_v38 = vpop.f32.mrf.mxu1 }
 0x98d   :  { %v9698_v24 = vpop.eup %9697  ;;  %v7432_v51 = vadd.f32 %v8946_v38, %v15494_v13 }
 0x98e   :  { %v7597_v16 = vadd.f32 1.0, %v9698_v24  ;;  %v7423_v21 = vpop.f32.mrf.mxu1  ;;  %9703 = vrcp.f32 %v7594_v40  ;;  %v15662_v24 = vpop.permute.xlu1 %7716 }
 0x98f   :  { %v9700_v27 = vpop.eup %9699  ;;  %v7504_v57 = vsub.f32 0.0, %v7432_v51  ;;  %v7424_v31 = vadd.f32 %v15494_v13, %v7423_v21 }
 0x990   :  { %9705 = vrcp.f32 %v7597_v16  ;;  %v7595_v63 = vadd.f32 1.0, %v9700_v27  ;;  %v8947_v14 = vpop.f32.mrf.mxu1  ;;  %v15664_v27 = vpop.permute.xlu0 %7710 }
 0x991   :  { %v7554_v1 = vmul.f32 1.442695, %v7504_v57  ;;  %v7502_v3 = vsub.f32 0.0, %v7424_v31  ;;  %v7435_v30 = vadd.f32 %v8947_v14, %v15494_v13 }
 0x992   :  { %v7426_v9 = vpop.f32.mrf.mxu1  ;;  %v15667_v31 = vpop.permute.xlu1 %7712 }
 0x993   :  { %9707 = vpow2.f32 %v7554_v1  ;;  %v7550_v10 = vmul.f32 1.442695, %v7502_v3  ;;  %v7505_v38 = vsub.f32 0.0, %v7435_v30  ;;  %v7427_v40 = vadd.f32 %v15494_v13, %v7426_v9 }
 0x994   :  { %9709 = vrcp.f32 %v7595_v63  ;;  %v15669_v1 = vpop.permute.xlu0 %7722 }
 0x995   :  { %9711 = vpow2.f32 %v7550_v10  ;;  %v7556_v51 = vmul.f32 1.442695, %v7505_v38  ;;  %v7503_v16 = vsub.f32 0.0, %v7427_v40 }
 0x996   :  { %v15673_v63 = vpop.permute.xlu1 %7724 }
 0x997   :  { %9713 = vpow2.f32 %v7556_v51  ;;  %v7552_v21 = vmul.f32 1.442695, %v7503_v16 }
 0x998   :  { %v15675_v40 = vpop.permute.xlu0 %7718 }
 0x999   :  { %v9702_v57 = vpop.eup %9701  ;;  %9715 = vpow2.f32 %v7552_v21 }
 0x99a   :  { %7834 = vrot.lane.b32.xlu0 %v9702_v57, %s9790_s13  ;;  %v15678_v21 = vpop.permute.xlu1 %7720 }
 0x99b   :  { %v9704_v14 = vpop.eup %9703 }
 0x99d   :  { %v9706_v3 = vpop.eup %9705 }
 0x99e   :  { %7830 = vrot.lane.b32.xlu0 %v9704_v14, %s9790_s13  ;;  %7836 = vrot.lane.b32.xlu1 %v9706_v3, %s9790_s13  ;;  %v15680_v14 = vpop.permute.xlu0 %7730  ;;  %v15682_v18 = vpop.permute.xlu1 %7732 }
 0x99f   :  { %16760 = vst [vmem:[#allocation68_spill] sm:$0xff] %v15680_v14  ;;  %16761 = vst [vmem:[#allocation100_spill] sm:$0xff] %v15682_v18 }
 0x9a0   :  { %v9708_v30 = vpop.eup %9707 }
 0x9a1   :  { %v9710_v9 = vpop.eup %9709  ;;  %v7600_v10 = vadd.f32 1.0, %v9708_v30 }
 0x9a2   :  { %v9712_v38 = vpop.eup %9711  ;;  %7832 = vrot.lane.b32.xlu1 %v9710_v9, %s9790_s13  ;;  %v15685_v22 = vpop.permute.xlu0 %7726 }
 0x9a3   :  { %9717 = vrcp.f32 %v7600_v10  ;;  %v7598_v51 = vadd.f32 1.0, %v9712_v38  ;;  %16762 = vst [vmem:[#allocation89_spill] sm:$0xff] %v15685_v22 }
 0x9a4   :  { %v9714_v16 = vpop.eup %9713 }
 0x9a5   :  { %v7601_v57 = vadd.f32 1.0, %v9714_v16  ;;  %9719 = vrcp.f32 %v7598_v51  ;;  %v15688_v16 = vpop.permute.xlu1 %7728 }
 0x9a6   :  { %v9716_v60 = vpop.eup %9715  ;;  %16763 = vst [vmem:[#allocation98_spill] sm:$0xff] %v15688_v16 }
 0x9a7   :  { %9721 = vrcp.f32 %v7601_v57  ;;  %v7599_v3 = vadd.f32 1.0, %v9716_v60 }
 0x9a9   :  { %9723 = vrcp.f32 %v7599_v3 }
 0x9aa   :  { %v8950_v30 = vpop.f32.mrf.mxu1 }
 0x9ab   :  { %v7448_v7 = vadd.f32 %v8950_v30, %v15494_v13  ;;  %v15691_v14 = vpop.permute.xlu0 %7738 }
 0x9ac   :  { %v7439_v9 = vpop.f32.mrf.mxu1 }
 0x9ad   :  { %v7508_v10 = vsub.f32 0.0, %v7448_v7  ;;  %v7440_v38 = vadd.f32 %v15494_v13, %v7439_v9 }
 0x9ae   :  { %v8951_v41 = vpop.f32.mrf.mxu1 }
 0x9af   :  { %v7562_v51 = vmul.f32 1.442695, %v7508_v10  ;;  %v7506_v56 = vsub.f32 0.0, %v7440_v38  ;;  %v7451_v57 = vadd.f32 %v8951_v41, %v15494_v13  ;;  %v15699_v38 = vpop.permute.xlu0 %7734 }
 0x9b0   :  { %v9718_v60 = vpop.eup %9717  ;;  %v7442_v18 = vpop.f32.mrf.mxu1 }
 0x9b1   :  { %9725 = vpow2.f32 %v7562_v51  ;;  %v7558_v3 = vmul.f32 1.442695, %v7506_v56  ;;  %v7509_v30 = vsub.f32 0.0, %v7451_v57  ;;  %v7443_v22 = vadd.f32 %v15494_v13, %v7442_v18  ;;  %7842 = vrot.lane.b32.xlu0 %v9718_v60, %s9790_s13 }
 0x9b2   :  { %v9720_v7 = vpop.eup %9719  ;;  %v15695_v10 = vpop.permute.xlu1 %7740 }
 0x9b3   :  { %9727 = vpow2.f32 %v7558_v3  ;;  %v7564_v9 = vmul.f32 1.442695, %v7509_v30  ;;  %v7507_v25 = vsub.f32 0.0, %v7443_v22 }
 0x9b4   :  { %v9722_v16 = vpop.eup %9721 }
 0x9b5   :  { %9729 = vpow2.f32 %v7564_v9  ;;  %v7560_v41 = vmul.f32 1.442695, %v7507_v25  ;;  %7838 = vrot.lane.b32.xlu0 %v9720_v7, %s9790_s13  ;;  %7844 = vrot.lane.b32.xlu1 %v9722_v16, %s9790_s13 }
 0x9b6   :  { %v9724_v56 = vpop.eup %9723  ;;  %v15702_v18 = vpop.permute.xlu1 %7736 }
 0x9b7   :  { %9731 = vpow2.f32 %v7560_v41 }
 0x9b9   :  { %7840 = vrot.lane.b32.xlu1 %v9724_v56, %s9790_s13 }
 0x9ba   :  { %v7811_v51 = vpop.permute.xlu0 %7810 }
 0x9bb   :  { %v8033_v22 = vsel %vm8030_vm7, %v15620_v44, %v7811_v51 }
 0x9bc   :  { %v8065_v25 = vsel %vm5319_vm0, %v8033_v22, %v15484_v26 }
 0x9bd   :  { %8097 = vst.msk [vmem:[%s15996_s14 + $0x10] sm:$0xff] %vm16764_vm9, %v8065_v25  ;;  %vm16780_vm9 = vmmov %vm16772_vm1 }
 0x9be   :  { %v9726_v16 = vpop.eup %9725  ;;  %v7807_v57 = vpop.permute.xlu0 %7806 }
 0x9bf   :  { %v7813_v60 = vpop.permute.xlu1 %7812  ;;  %v7604_v3 = vadd.f32 1.0, %v9726_v16  ;;  %v8031_v30 = vsel %vm8030_vm7, %v15613_v29, %v7807_v57 }
 0x9c0   :  { %v8034_v7 = vsel %vm8030_vm7, %v15618_v58, %v7813_v60  ;;  %v9728_v9 = vpop.eup %9727  ;;  %v8063_v44 = vsel %vm5319_vm0, %v8031_v30, %v15464_v48 }
 0x9c1   :  { %v8066_v26 = vsel %vm5319_vm0, %v8034_v7, %v15453_v52  ;;  %9733 = vrcp.f32 %v7604_v3  ;;  %v7602_v41 = vadd.f32 1.0, %v9728_v9  ;;  %8095 = vst.msk [vmem:[%s15996_s14] sm:$0xff] %vm16765_vm3, %v8063_v44  ;;  %vm16781_vm3 = vmmov %vm16772_vm1 }
 0x9c2   :  { %8098 = vst.msk [vmem:[%s15996_s14 + $0x18] sm:$0xff] %vm16766_vm14, %v8066_v26  ;;  %v9730_v29 = vpop.eup %9729  ;;  %vm16782_vm14 = vmmov %vm16772_vm1 }
 0x9c3   :  { %v7809_v58 = vpop.permute.xlu1 %7808  ;;  %v7605_v56 = vadd.f32 1.0, %v9730_v29  ;;  %9735 = vrcp.f32 %v7602_v41 }
 0x9c4   :  { %v8032_v48 = vsel %vm8030_vm7, %v15622_v0, %v7809_v58  ;;  %v9732_v51 = vpop.eup %9731 }
 0x9c5   :  { %v8064_v52 = vsel %vm5319_vm0, %v8032_v48, %v15433_v43  ;;  %9737 = vrcp.f32 %v7605_v56  ;;  %v7603_v22 = vadd.f32 1.0, %v9732_v51  ;;  %v8954_v25 = vpop.f32.mrf.mxu1 }
 0x9c6   :  { %8096 = vst.msk [vmem:[%s15996_s14 + $0x8] sm:$0xff] %vm16767_vm15, %v8064_v52  ;;  %v7464_v16 = vadd.f32 %v8954_v25, %v15494_v13  ;;  %vm16783_vm15 = vmmov %vm16772_vm1 }
 0x9c7   :  { %v7455_v57 = vpop.f32.mrf.mxu1  ;;  %9739 = vrcp.f32 %v7603_v22 }
 0x9c8   :  { %v7512_v60 = vsub.f32 0.0, %v7464_v16  ;;  %v7456_v3 = vadd.f32 %v15494_v13, %v7455_v57 }
 0x9c9   :  { %v8955_v0 = vpop.f32.mrf.mxu1 }
 0x9ca   :  { %v7570_v30 = vmul.f32 1.442695, %v7512_v60  ;;  %v7510_v7 = vsub.f32 0.0, %v7456_v3  ;;  %v7467_v43 = vadd.f32 %v8955_v0, %v15494_v13 }
 0x9cb   :  { %v7458_v9 = vpop.f32.mrf.mxu1 }
 0x9cc   :  { %9741 = vpow2.f32 %v7570_v30  ;;  %v7566_v44 = vmul.f32 1.442695, %v7510_v7  ;;  %v7513_v26 = vsub.f32 0.0, %v7467_v43  ;;  %v7459_v41 = vadd.f32 %v15494_v13, %v7458_v9 }
 0x9ce   :  { %v9734_v29 = vpop.eup %9733  ;;  %9743 = vpow2.f32 %v7566_v44  ;;  %v7572_v58 = vmul.f32 1.442695, %v7513_v26  ;;  %v7511_v56 = vsub.f32 0.0, %v7459_v41 }
 0x9cf   :  { %7850 = vrot.lane.b32.xlu0 %v9734_v29, %s9790_s13 }
 0x9d0   :  { %9745 = vpow2.f32 %v7572_v58  ;;  %v7568_v48 = vmul.f32 1.442695, %v7511_v56  ;;  %v9736_v51 = vpop.eup %9735 }
 0x9d2   :  { %v9738_v52 = vpop.eup %9737  ;;  %9747 = vpow2.f32 %v7568_v48 }
 0x9d3   :  { %7846 = vrot.lane.b32.xlu0 %v9736_v51, %s9790_s13  ;;  %v7819_v22 = vpop.permute.xlu0 %7818  ;;  %7852 = vrot.lane.b32.xlu1 %v9738_v52, %s9790_s13 }
 0x9d4   :  { %v8037_v25 = vsel %vm8030_vm7, %v15624_v35, %v7819_v22  ;;  %v9740_v57 = vpop.eup %9739 }
 0x9d5   :  { %v8069_v16 = vsel %vm5319_vm0, %v8037_v25, %v15523_v4 }
 0x9d6   :  { %8101 = vst.msk [vmem:[%s15996_s14 + $0x30] sm:$0xff] %vm16768_vm2, %v8069_v16  ;;  %vm16784_vm2 = vmmov %vm16772_vm1 }
 0x9d7   :  { %v7815_v60 = vpop.permute.xlu0 %7814  ;;  %7848 = vrot.lane.b32.xlu1 %v9740_v57, %s9790_s13  ;;  %v7821_v3 = vpop.permute.xlu1 %7820 }
 0x9d8   :  { %v8035_v0 = vsel %vm8030_vm7, %v15630_v53, %v7815_v60  ;;  %v8038_v30 = vsel %vm8030_vm7, %v15627_v42, %v7821_v3 }
 0x9d9   :  { %v9742_v35 = vpop.eup %9741  ;;  %v8067_v4 = vsel %vm5319_vm0, %v8035_v0, %v15502_v8  ;;  %v8070_v7 = vsel %vm5319_vm0, %v8038_v30, %v15489_v33 }
 0x9da   :  { %v7608_v43 = vadd.f32 1.0, %v9742_v35  ;;  %8099 = vst.msk [vmem:[%s15996_s14 + $0x20] sm:$0xff] %vm16769_vm8, %v8067_v4  ;;  %vm16785_vm8 = vmmov %vm16772_vm1 }
 0x9db   :  { %8102 = vst.msk [vmem:[%s15996_s14 + $0x38] sm:$0xff] %vm16770_vm10, %v8070_v7  ;;  %v9744_v53 = vpop.eup %9743  ;;  %v7817_v42 = vpop.permute.xlu1 %7816  ;;  %vm16786_vm10 = vmmov %vm16772_vm1 }
 0x9dc   :  { %9749 = vrcp.f32 %v7608_v43  ;;  %v7606_v9 = vadd.f32 1.0, %v9744_v53  ;;  %v8036_v8 = vsel %vm8030_vm7, %v15634_v49, %v7817_v42  ;;  %v8958_v44 = vpop.f32.mrf.mxu1 }
 0x9dd   :  { %v9746_v33 = vpop.eup %9745  ;;  %v8068_v26 = vsel %vm5319_vm0, %v8036_v8, %v15478_v15  ;;  %v7480_v41 = vadd.f32 %v8958_v44, %v15494_v13 }
 0x9de   :  { %v7609_v29 = vadd.f32 1.0, %v9746_v33  ;;  %8100 = vst.msk [vmem:[%s15996_s14 + $0x28] sm:$0xff] %vm16771_vm6, %v8068_v26  ;;  %v7471_v58 = vpop.f32.mrf.mxu1  ;;  %9751 = vrcp.f32 %v7606_v9  ;;  %vm16787_vm6 = vmmov %vm16772_vm1 }
 0x9df   :  { %v9748_v56 = vpop.eup %9747  ;;  %v7516_v48 = vsub.f32 0.0, %v7480_v41  ;;  %v7472_v51 = vadd.f32 %v15494_v13, %v7471_v58 }
 0x9e0   :  { %9753 = vrcp.f32 %v7609_v29  ;;  %v7607_v49 = vadd.f32 1.0, %v9748_v56  ;;  %v8959_v52 = vpop.f32.mrf.mxu1 }
 0x9e1   :  { %v7578_v22 = vmul.f32 1.442695, %v7516_v48  ;;  %v7514_v25 = vsub.f32 0.0, %v7472_v51  ;;  %v7483_v15 = vadd.f32 %v8959_v52, %v15494_v13 }
 0x9e2   :  { %v7474_v16 = vpop.f32.mrf.mxu1 }
 0x9e3   :  { %9755 = vpow2.f32 %v7578_v22  ;;  %v7574_v57 = vmul.f32 1.442695, %v7514_v25  ;;  %v7517_v60 = vsub.f32 0.0, %v7483_v15  ;;  %v7475_v3 = vadd.f32 %v15494_v13, %v7474_v16 }
 0x9e4   :  { %9757 = vrcp.f32 %v7607_v49 }
 0x9e5   :  { %9759 = vpow2.f32 %v7574_v57  ;;  %v7580_v0 = vmul.f32 1.442695, %v7517_v60  ;;  %v7515_v30 = vsub.f32 0.0, %v7475_v3  ;;  %v16777_v57 = vld [vmem:[#allocation84_spill] sm:$0xff] }
 0x9e7   :  { %9761 = vpow2.f32 %v7580_v0  ;;  %v7576_v35 = vmul.f32 1.442695, %v7515_v30 }
 0x9e9   :  { %v9750_v4 = vpop.eup %9749  ;;  %9763 = vpow2.f32 %v7576_v35 }
 0x9ea   :  { %7858 = vrot.lane.b32.xlu0 %v9750_v4, %s9790_s13 }
 0x9eb   :  { %v9752_v7 = vpop.eup %9751 }
 0x9ed   :  { %v9754_v43 = vpop.eup %9753 }
 0x9ee   :  { %7854 = vrot.lane.b32.xlu0 %v9752_v7, %s9790_s13  ;;  %7860 = vrot.lane.b32.xlu1 %v9754_v43, %s9790_s13 }
 0x9f0   :  { %v9756_v53 = vpop.eup %9755 }
 0x9f1   :  { %v9758_v42 = vpop.eup %9757  ;;  %v7612_v9 = vadd.f32 1.0, %v9756_v53  ;;  %v7827_v13 = vpop.permute.xlu0 %7826 }
 0x9f2   :  { %v9760_v8 = vpop.eup %9759  ;;  %v8041_v44 = vsel %vm8030_vm7, %v15636_v45, %v7827_v13  ;;  %7856 = vrot.lane.b32.xlu1 %v9758_v42, %s9790_s13 }
 0x9f3   :  { %9765 = vrcp.f32 %v7612_v9  ;;  %v7610_v33 = vadd.f32 1.0, %v9760_v8  ;;  %v8073_v26 = vsel %vm5319_vm0, %v8041_v44, %v15546_v20 }
 0x9f4   :  { %v9762_v41 = vpop.eup %9761  ;;  %8105 = vst.msk [vmem:[%s15996_s14 + $0x50] sm:$0xff] %vm16772_vm1, %v8073_v26 }
 0x9f5   :  { %v7613_v29 = vadd.f32 1.0, %v9762_v41  ;;  %v7823_v58 = vpop.permute.xlu0 %7822  ;;  %v7829_v56 = vpop.permute.xlu1 %7828  ;;  %9767 = vrcp.f32 %v7610_v33  ;;  %v16790_v33 = vld [vmem:[#allocation68_spill] sm:$0xff]  ;;  %v16791_v41 = vld [vmem:[#allocation95_spill] sm:$0xff] }
 0x9f6   :  { %v9764_v48 = vpop.eup %9763  ;;  %v8039_v45 = vsel %vm8030_vm7, %v15643_v6, %v7823_v58  ;;  %v8042_v51 = vsel %vm8030_vm7, %v15639_v61, %v7829_v56  ;;  %v16793_v56 = vld [vmem:[#allocation89_spill] sm:$0xff] }
 0x9f7   :  { %9769 = vrcp.f32 %v7613_v29  ;;  %v7611_v49 = vadd.f32 1.0, %v9764_v48  ;;  %v8071_v20 = vsel %vm5319_vm0, %v8039_v45, %v15538_v59  ;;  %v8074_v52 = vsel %vm5319_vm0, %v8042_v51, %v15533_v47  ;;  %v16794_v45 = vld [vmem:[#allocation100_spill] sm:$0xff] }
 0x9f8   :  { %8103 = vst.msk [vmem:[%s15996_s14 + $0x40] sm:$0xff] %vm16773_vm4, %v8071_v20  ;;  %vm16789_vm4 = vmmov %vm16772_vm1 }
 0x9f9   :  { %8106 = vst.msk [vmem:[%s15996_s14 + $0x58] sm:$0xff] %vm16774_vm13, %v8074_v52  ;;  %v7825_v6 = vpop.permute.xlu1 %7824  ;;  %9771 = vrcp.f32 %v7611_v49  ;;  %vm16792_vm13 = vmmov %vm16772_vm1  ;;  %v16795_v49 = vld [vmem:[#allocation90_spill] sm:$0xff]  ;;  %v16796_v52 = vld [vmem:[#allocation91_spill] sm:$0xff] }
 0x9fa   :  { %v8040_v61 = vsel %vm8030_vm7, %v15645_v19, %v7825_v6  ;;  %v16776_v19 = vld [vmem:[#allocation76_spill] sm:$0xff] }
 0x9fb   :  { %v8072_v59 = vsel %vm5319_vm0, %v8040_v61, %v15516_v46 }
 0x9fc   :  { %8104 = vst.msk [vmem:[%s15996_s14 + $0x48] sm:$0xff] %vm16775_vm11, %v8072_v59  ;;  %vm16797_vm11 = vmmov %vm16772_vm1  ;;  %v16799_v59 = vld [vmem:[#allocation98_spill] sm:$0xff] }
 0xa00   :  { %v9766_v47 = vpop.eup %9765 }
 0xa01   :  { %7866 = vrot.lane.b32.xlu0 %v9766_v47, %s9790_s13 }
 0xa02   :  { %v9768_v22 = vpop.eup %9767 }
 0xa04   :  { %v9770_v25 = vpop.eup %9769 }
 0xa05   :  { %7862 = vrot.lane.b32.xlu0 %v9768_v22, %s9790_s13  ;;  %7868 = vrot.lane.b32.xlu1 %v9770_v25, %s9790_s13  ;;  %v16800_v22 = vld [vmem:[#allocation81_spill] sm:$0xff] }
 0xa06   :  { %v9772_v15 = vpop.eup %9771 }
 0xa09   :  { %7994 = vrot.lane.b32.xlu0 %v16776_v19, %s9788_s8  ;;  %7864 = vrot.lane.b32.xlu1 %v9772_v15, %s9790_s13 }
 0xa0c   :  { %v7835_v46 = vpop.permute.xlu0 %7834 }
 0xa0d   :  { %v8045_v16 = vsel %vm8030_vm7, %v15648_v32, %v7835_v46  ;;  %7996 = vrot.lane.b32.xlu1 %v16777_v57, %s9788_s8  ;;  %v16802_v57 = vld [vmem:[#allocation70_spill] sm:$0xff] }
 0xa0e   :  { %v8077_v60 = vsel %vm5319_vm0, %v8045_v16, %v15572_v28 }
 0xa0f   :  { %8109 = vst.msk [vmem:[%s15996_s14 + $0x70] sm:$0xff] %vm16778_vm5, %v8077_v60  ;;  %vm16798_vm5 = vmmov %vm16772_vm1 }
 0xa10   :  { %v7831_v3 = vpop.permute.xlu0 %7830  ;;  %v7837_v0 = vpop.permute.xlu1 %7836 }
 0xa11   :  { %v8043_v30 = vsel %vm8030_vm7, %v15653_v54, %v7831_v3  ;;  %v8046_v35 = vsel %vm8030_vm7, %v15650_v2, %v7837_v0 }
 0xa12   :  { %v8075_v32 = vsel %vm5319_vm0, %v8043_v30, %v15559_v34  ;;  %v8078_v4 = vsel %vm5319_vm0, %v8046_v35, %v15553_v36 }
 0xa13   :  { %8107 = vst.msk [vmem:[%s15996_s14 + $0x60] sm:$0xff] %vm16779_vm12, %v8075_v32  ;;  %vm16801_vm12 = vmmov %vm16772_vm1 }
 0xa14   :  { %8110 = vst.msk [vmem:[%s15996_s14 + $0x78] sm:$0xff] %vm16780_vm9, %v8078_v4  ;;  %v7833_v28 = vpop.permute.xlu1 %7832  ;;  %vm16803_vm9 = vmmov %vm16772_vm1 }
 0xa15   :  { %v8044_v2 = vsel %vm8030_vm7, %v15656_v50, %v7833_v28 }
 0xa16   :  { %v8076_v34 = vsel %vm5319_vm0, %v8044_v2, %v15541_v37 }
 0xa17   :  { %8108 = vst.msk [vmem:[%s15996_s14 + $0x68] sm:$0xff] %vm16781_vm3, %v8076_v34  ;;  %vm16804_vm3 = vmmov %vm16772_vm1 }
 0xa23   :  { %v7843_v36 = vpop.permute.xlu0 %7842 }
 0xa24   :  { %v8049_v54 = vsel %vm8030_vm7, %v15659_v12, %v7843_v36 }
 0xa25   :  { %v8081_v7 = vsel %vm5319_vm0, %v8049_v54, %v15587_v11 }
 0xa26   :  { %8113 = vst.msk [vmem:[%s15996_s14 + $0x90] sm:$0xff] %vm16782_vm14, %v8081_v7  ;;  %vm16806_vm14 = vmmov %vm16772_vm1 }
 0xa27   :  { %v7839_v50 = vpop.permute.xlu0 %7838  ;;  %v7845_v43 = vpop.permute.xlu1 %7844 }
 0xa28   :  { %v8047_v37 = vsel %vm8030_vm7, %v15664_v27, %v7839_v50  ;;  %v8050_v53 = vsel %vm8030_vm7, %v15662_v24, %v7845_v43 }
 0xa29   :  { %v8079_v42 = vsel %vm5319_vm0, %v8047_v37, %v15580_v39  ;;  %v8082_v12 = vsel %vm5319_vm0, %v8050_v53, %v15578_v23 }
 0xa2a   :  { %8111 = vst.msk [vmem:[%s15996_s14 + $0x80] sm:$0xff] %vm16783_vm15, %v8079_v42  ;;  %vm16807_vm15 = vmmov %vm16772_vm1 }
 0xa2b   :  { %8114 = vst.msk [vmem:[%s15996_s14 + $0x98] sm:$0xff] %vm16784_vm2, %v8082_v12  ;;  %v7841_v11 = vpop.permute.xlu1 %7840 }
 0xa2c   :  { %v8048_v24 = vsel %vm8030_vm7, %v15667_v31, %v7841_v11 }
 0xa2d   :  { %v8080_v39 = vsel %vm5319_vm0, %v8048_v24, %v15566_v17 }
 0xa2e   :  { %8112 = vst.msk [vmem:[%s15996_s14 + $0x88] sm:$0xff] %vm16785_vm8, %v8080_v39 }
 0xa41   :  { %v7851_v23 = vpop.permute.xlu0 %7850 }
 0xa42   :  { %v8053_v27 = vsel %vm8030_vm7, %v15669_v1, %v7851_v23 }
 0xa43   :  { %v8085_v9 = vsel %vm5319_vm0, %v8053_v27, %v15596_v5 }
 0xa44   :  { %8117 = vst.msk [vmem:[%s15996_s14 + $0xb0] sm:$0xff] %vm16786_vm10, %v8085_v9 }
 0xa45   :  { %v7847_v31 = vpop.permute.xlu0 %7846  ;;  %v7853_v13 = vpop.permute.xlu1 %7852 }
 0xa46   :  { %v8051_v17 = vsel %vm8030_vm7, %v15675_v40, %v7847_v31  ;;  %v8054_v8 = vsel %vm8030_vm7, %v15673_v63, %v7853_v13  ;;  %v16788_v40 = vld [vmem:[#allocation92_spill] sm:$0xff] }
 0xa47   :  { %v8083_v44 = vsel %vm5319_vm0, %v8051_v17, %v15592_v62  ;;  %v8086_v1 = vsel %vm5319_vm0, %v8054_v8, %v15590_v55 }
 0xa48   :  { %8115 = vst.msk [vmem:[%s15996_s14 + $0xa0] sm:$0xff] %vm16787_vm6, %v8083_v44 }
 0xa49   :  { %8118 = vst.msk [vmem:[%s15996_s14 + $0xb8] sm:$0xff] %vm16772_vm1, %v8086_v1  ;;  %v7849_v5 = vpop.permute.xlu1 %7848 }
 0xa4a   :  { %v8052_v63 = vsel %vm8030_vm7, %v15678_v21, %v7849_v5 }
 0xa4b   :  { %v8084_v62 = vsel %vm5319_vm0, %v8052_v63, %v16788_v40 }
 0xa4c   :  { %8116 = vst.msk [vmem:[%s15996_s14 + $0xa8] sm:$0xff] %vm16789_vm4, %v8084_v62 }
 0xa5c   :  { %v7859_v55 = vpop.permute.xlu0 %7858 }
 0xa5d   :  { %v8057_v26 = vsel %vm8030_vm7, %v16790_v33, %v7859_v55 }
 0xa5e   :  { %v8089_v29 = vsel %vm5319_vm0, %v8057_v26, %v16791_v41 }
 0xa5f   :  { %8121 = vst.msk [vmem:[%s15996_s14 + $0xd0] sm:$0xff] %vm16792_vm13, %v8089_v29 }
 0xa60   :  { %v7855_v21 = vpop.permute.xlu0 %7854  ;;  %v7861_v58 = vpop.permute.xlu1 %7860 }
 0xa61   :  { %v8055_v48 = vsel %vm8030_vm7, %v16793_v56, %v7855_v21  ;;  %v8058_v51 = vsel %vm8030_vm7, %v16794_v45, %v7861_v58 }
 0xa62   :  { %v8087_v20 = vsel %vm5319_vm0, %v8055_v48, %v16795_v49  ;;  %v8090_v6 = vsel %vm5319_vm0, %v8058_v51, %v16796_v52 }
 0xa63   :  { %8119 = vst.msk [vmem:[%s15996_s14 + $0xc0] sm:$0xff] %vm16797_vm11, %v8087_v20 }
 0xa64   :  { %8122 = vst.msk [vmem:[%s15996_s14 + $0xd8] sm:$0xff] %vm16798_vm5, %v8090_v6  ;;  %v7857_v61 = vpop.permute.xlu1 %7856 }
 0xa65   :  { %v8056_v47 = vsel %vm8030_vm7, %v16799_v59, %v7857_v61 }
 0xa66   :  { %v8088_v25 = vsel %vm5319_vm0, %v8056_v47, %v16800_v22 }
 0xa67   :  { %8120 = vst.msk [vmem:[%s15996_s14 + $0xc8] sm:$0xff] %vm16801_vm12, %v8088_v25 }
 0xa73   :  { %v7867_v15 = vpop.permute.xlu0 %7866 }
 0xa74   :  { %v8061_v3 = vsel %vm8030_vm7, %v15691_v14, %v7867_v15 }
 0xa77   :  { %v7863_v19 = vpop.permute.xlu0 %7862  ;;  %v7869_v46 = vpop.permute.xlu1 %7868 }
 0xa78   :  { %v8059_v16 = vsel %vm8030_vm7, %v15699_v38, %v7863_v19  ;;  %v16805_v38 = vld [vmem:[#allocation94_spill] sm:$0xff]  ;;  %v8062_v14 = vsel %vm8030_vm7, %v15695_v10, %v7869_v46 }
 0xa79   :  { %v8091_v60 = vsel %vm5319_vm0, %v8059_v16, %v16802_v57 }
 0xa7a   :  { %8123 = vst.msk [vmem:[%s15996_s14 + $0xe0] sm:$0xff] %vm16803_vm9, %v8091_v60 }
 0xa7b   :  { %v7995_v0 = vpop.permute.xlu0 %7994  ;;  %v7865_v30 = vpop.permute.xlu1 %7864 }
 0xa7c   :  { %v8093_v35 = vsel %vm5319_vm0, %v8061_v3, %v7995_v0  ;;  %v8060_v32 = vsel %vm8030_vm7, %v15702_v18, %v7865_v30 }
 0xa7d   :  { %8125 = vst.msk [vmem:[%s15996_s14 + $0xf0] sm:$0xff] %vm16804_vm3, %v8093_v35  ;;  %v8092_v4 = vsel %vm5319_vm0, %v8060_v32, %v16805_v38 }
 0xa7e   :  { %8124 = vst.msk [vmem:[%s15996_s14 + $0xe8] sm:$0xff] %vm16806_vm14, %v8092_v4 }
 0xa7f   :  { %v7997_v28 = vpop.permute.xlu1 %7996 }
 0xa80   :  { %v8094_v2 = vsel %vm5319_vm0, %v8062_v14, %v7997_v28 }
 0xa81   :  { %8126 = vst.msk [vmem:[%s15996_s14 + $0xf8] sm:$0xff] %vm16807_vm15, %v8094_v2 }

</bundles_post_ra>
